<compile_context>
chip_gen: v7x
topology: tpu7x:2x2x1
jax: 0.10.0
libtpu: 0.0.40
codegen_flags: <defaults>
</compile_context>

<pallas_src>
import numpy as np
import jax
import jax.numpy as jnp
from jax import lax
from jax.experimental import pallas as pl
from jax.experimental.pallas import tpu as pltpu

# ---------------- problem sizes (small but consistent with the module) ----------------
B, N, C, H, W = 2, 5, 128, 8, 8      # N=5 and C=128 are forced by the module's forward
HW = H * W
L0, L1 = 64, 64                       # layer_channels[0], layer_channels[1]
C3 = 128                              # conv3 output channels (hard-coded in the module)
CIN_GM = N * C3                       # 640 input channels of conv3_channel_attention
SE_RED = 4
EPS = 1e-5


def _build_shift_mats():
    """S[t] (HW,HW): S[t] @ v == v shifted by 3x3-tap t with zero padding folded in."""
    s = np.zeros((9, HW, HW), np.float32)
    for kh in range(3):
        for kw in range(3):
            t = kh * 3 + kw
            for hh in range(H):
                for ww in range(W):
                    hs, ws = hh + kh - 1, ww + kw - 1
                    if 0 <= hs < H and 0 <= ws < W:
                        s[t, hh * W + ww, hs * W + ws] = 1.0
    return jnp.asarray(s, jnp.bfloat16)          # 0/1 entries: exact in bf16


SHIFT_MATS = _build_shift_mats()                 # (9, 64, 64)


# ===================== fused kernel: one grid step per batch element ===================
def relanet_kernel(x_ref,
                   w1, b1, w2, b2, w3, b3,
                   wa1, ba1, wa2, ba2, wa3t,
                   wcat, smat, bgm, wf1, wf2,
                   out_ref, spat_ref, gate_ref):
    f32, bf16 = jnp.float32, jnp.bfloat16

    xb = x_ref[0]                                                    # (N, HW, C) f32
    xb_bf = xb.astype(bf16)

    # ---- relation branch: conv1 hoisted above the pairwise diff (exact) ---------------
    p = jnp.dot(xb_bf.reshape(N * HW, C), w1[...],
                preferred_element_type=f32)                          # (320, 64)
    p4 = p.reshape(N, HW, L0)
    d1 = (p4[None, :, :, :] - p4[:, None, :, :]).reshape(N * N * HW, L0)   # [i,j]=p[j]-p[i]
    h = jnp.maximum(d1 + b1[...], 0.0).astype(bf16)                  # (1600, 64)
    h = jnp.maximum(jnp.dot(h, w2[...], preferred_element_type=f32) + b2[...],
                    0.0).astype(bf16)                                # (1600, 64)
    h = jnp.maximum(jnp.dot(h, w3[...], preferred_element_type=f32) + b3[...],
                    0.0)                                             # (1600, 128) f32
    mean_feat = jnp.mean(h.reshape(N, N, HW, C3), axis=1)            # (N, HW, 128) f32
    mf_bf = mean_feat.astype(bf16)

    # ---- spatial attention branch: 2x(1x1 conv+BN+ReLU) -> 1x1 conv -> tanh -----------
    a = jnp.maximum(jnp.dot(mf_bf.reshape(N * HW, C3), wa1[...],
                            preferred_element_type=f32) + ba1[...], 0.0).astype(bf16)
    a = jnp.maximum(jnp.dot(a, wa2[...], preferred_element_type=f32) + ba2[...], 0.0)
    s = jnp.tanh(jnp.sum(a * wa3t[...], axis=-1, keepdims=True))     # (320, 1) == a @ wa3
    spat = s.reshape(N, HW, 1)

    # ---- 3x3 conv (N*128 -> 128, pad=1) as matmuls: sum_t S_t @ (gm @ W_t) ------------
    gm = jnp.concatenate([mf_bf[n] for n in range(N)], axis=-1)      # (HW, 640), n-major
    tmp = jnp.dot(gm, wcat[...], preferred_element_type=f32)         # (HW, 9*128)
    acc = jnp.zeros((HW, C3), f32)
    for t in range(9):                                               # 9 tiny MXU matmuls
        tap = tmp[:, t * C3:(t + 1) * C3].astype(bf16)
        acc = acc + jnp.dot(smat[t], tap, preferred_element_type=f32)
    y = jnp.maximum(acc + bgm[...], 0.0)                             # (HW, 128), BN folded

    # ---- SE channel attention ----------------------------------------------------------
    pooled = jnp.mean(y, axis=0, keepdims=True).astype(bf16)         # (1, 128)
    se = jnp.maximum(jnp.dot(pooled, wf1[...], preferred_element_type=f32), 0.0).astype(bf16)
    g = jax.nn.sigmoid(jnp.dot(se, wf2[...], preferred_element_type=f32))   # (1,128) f32

    # ---- final modulation + stores ------------------------------------------------------
    out_ref[0] = (0.5 * spat + 1.5) * xb * (1.0 + g.reshape(1, 1, C3))
    spat_ref[0] = spat        # lane-1 store, never re-read by another kernel
    gate_ref[0] = g


def _full_spec(arr):
    nd = arr.ndim
    return pl.BlockSpec(arr.shape, lambda b, _nd=nd: (0,) * _nd)


# ===================== parameters (deterministic, in-script) ===========================
def init_params(key):
    ks = jax.random.split(key, 16)

    def conv_w(k, cin, cout):
        return jax.random.normal(k, (cin, cout), jnp.float32) / float(cin) ** 0.5

    def bn(k, c):
        k1, k2, k3, k4 = jax.random.split(k, 4)
        gamma = 1.0 + 0.1 * jax.random.normal(k1, (c,), jnp.float32)
        beta = 0.1 * jax.random.normal(k2, (c,), jnp.float32)
        mean = 0.1 * jax.random.normal(k3, (c,), jnp.float32)
        var = jax.random.uniform(k4, (c,), jnp.float32, minval=0.5, maxval=1.5)
        return gamma, beta, mean, var

    p = {}
    p["w1"], p["bn1"] = conv_w(ks[0], C, L0), bn(ks[1], L0)
    p["w2"], p["bn2"] = conv_w(ks[2], L0, L1), bn(ks[3], L1)
    p["w3"], p["bn3"] = conv_w(ks[4], L1, C3), bn(ks[5], C3)
    p["wa1"], p["bna1"] = conv_w(ks[6], C3, L0), bn(ks[7], L0)
    p["wa2"], p["bna2"] = conv_w(ks[8], L0, L1), bn(ks[9], L1)
    p["wa3"] = conv_w(ks[10], L1, 1)
    p["wgm"] = (jax.random.normal(ks[11], (3, 3, CIN_GM, C3), jnp.float32)
                / float(9 * CIN_GM) ** 0.5)                         # HWIO
    p["bngm"] = bn(ks[12], C3)
    p["wf1"] = conv_w(ks[13], C3, C3 // SE_RED)                     # SE fc1 (no bias)
    p["wf2"] = conv_w(ks[14], C3 // SE_RED, C3)                     # SE fc2 (no bias)
    return p


def fold_bn(w, bnp):
    gamma, beta, mean, var = bnp
    scale = gamma / jnp.sqrt(var + EPS)
    return w * scale[None, :], (beta - mean * scale).reshape(1, -1)


# ===================== forward (glue + fused kernel) ===================================
def relanet_forward(x, params):
    # x: (B, N, C, H, W) float32.  NCHW<->NHWC transposes stay here (module semantics);
    # in a channels-last model both disappear.
    x2 = jnp.transpose(x, (0, 1, 3, 4, 2)).reshape(B, N, HW, C)

    bf16 = jnp.bfloat16
    w1, b1 = fold_bn(params["w1"], params["bn1"])
    w2, b2 = fold_bn(params["w2"], params["bn2"])
    w3, b3 = fold_bn(params["w3"], params["bn3"])
    wa1, ba1 = fold_bn(params["wa1"], params["bna1"])
    wa2, ba2 = fold_bn(params["wa2"], params["bna2"])
    wa3t = params["wa3"].T                                           # (1, L1) f32
    wgm_f, bgm = fold_bn(params["wgm"], params["bngm"])              # (3,3,640,128),(1,128)
    # (kh,kw,i,o) -> (i, t*128+o): one K=640, N=1152 matmul covers all 9 taps.
    wcat = wgm_f.reshape(9, CIN_GM, C3).transpose(1, 0, 2).reshape(CIN_GM, 9 * C3)

    weights = (w1.astype(bf16), b1, w2.astype(bf16), b2, w3.astype(bf16), b3,
               wa1.astype(bf16), ba1, wa2.astype(bf16), ba2, wa3t,
               wcat.astype(bf16), SHIFT_MATS, bgm,
               params["wf1"].astype(bf16), params["wf2"].astype(bf16))

    out4, spat4, gate = pl.pallas_call(
        relanet_kernel,
        out_shape=(jax.ShapeDtypeStruct((B, N, HW, C), jnp.float32),
                   jax.ShapeDtypeStruct((B, N, HW, 1), jnp.float32),
                   jax.ShapeDtypeStruct((B, 1, C3), jnp.float32)),
        grid_spec=pltpu.PrefetchScalarGridSpec(
            num_scalar_prefetch=0,
            grid=(B,),                                               # 2 parallel steps
            in_specs=[pl.BlockSpec((1, N, HW, C), lambda b: (b, 0, 0, 0))]
                     + [_full_spec(wgt) for wgt in weights],
            out_specs=[
                pl.BlockSpec((1, N, HW, C), lambda b: (b, 0, 0, 0)),
                pl.BlockSpec((1, N, HW, 1), lambda b: (b, 0, 0, 0)),
                pl.BlockSpec((1, 1, C3), lambda b: (b, 0, 0)),
            ]),
        compiler_params=pltpu.CompilerParams(
            dimension_semantics=("parallel",),
            vmem_limit_bytes=32 * 1024 * 1024),
    )(x2, *weights)

    out = out4.reshape(B, N, H, W, C).transpose(0, 1, 4, 2, 3)           # (B, N, C, H, W)
    spatial_out = spat4.reshape(B, N, H, W, 1).transpose(0, 1, 4, 2, 3)  # (B, N, 1, H, W)
    channel_attention = gate.reshape(B, 1, C3, 1, 1)                     # (B, 1, 128, 1, 1)
    return out, spatial_out, channel_attention


relanet_forward = jax.jit(relanet_forward)


# ===================== pure-JAX reference (f32) ========================================
def relanet_reference(x, params):
    def bn_apply(y, bnp):
        gamma, beta, mean, var = bnp
        return gamma * (y - mean) / jnp.sqrt(var + EPS) + beta

    xcl = jnp.transpose(x, (0, 1, 3, 4, 2))                 # (B, N, H, W, C)
    diff = xcl[:, None] - xcl[:, :, None]                   # [b,i,j] = x[b,j]-x[b,i]
    h = jax.nn.relu(bn_apply(diff @ params["w1"], params["bn1"]))
    h = jax.nn.relu(bn_apply(h @ params["w2"], params["bn2"]))
    h = jax.nn.relu(bn_apply(h @ params["w3"], params["bn3"]))
    mean_feat = h.mean(axis=2)                              # (B, N, H, W, 128)

    a = jax.nn.relu(bn_apply(mean_feat @ params["wa1"], params["bna1"]))
    a = jax.nn.relu(bn_apply(a @ params["wa2"], params["bna2"]))
    spatial = jnp.tanh(a @ params["wa3"])                   # (B, N, H, W, 1)

    gm = mean_feat.transpose(0, 2, 3, 1, 4).reshape(B, H, W, CIN_GM)
    conv = lax.conv_general_dilated(gm, params["wgm"], window_strides=(1, 1),
                                    padding=((1, 1), (1, 1)),
                                    dimension_numbers=("NHWC", "HWIO", "NHWC"))
    y = jax.nn.relu(bn_apply(conv, params["bngm"]))
    pooled = y.mean(axis=(1, 2))                            # (B, 128)
    g = jax.nn.sigmoid(jax.nn.relu(pooled @ params["wf1"]) @ params["wf2"])

    out = (0.5 * spatial + 1.5) * xcl * (1 + g[:, None, None, None, :])
    return (out.transpose(0, 1, 4, 2, 3),
            spatial.transpose(0, 1, 4, 2, 3),
            g.reshape(B, 1, C3, 1, 1))


# ===================== main ============================================================
if __name__ == "__main__":
    key = jax.random.PRNGKey(0)
    kx, kp = jax.random.split(key)
    x = jax.random.normal(kx, (B, N, C, H, W), jnp.float32)
    label_1shot = jnp.zeros((B, N), jnp.int32)   # present for signature parity; unused
    params = init_params(kp)

    out, spatial, chan = jax.block_until_ready(relanet_forward(x, params))
    ref_out, ref_spatial, ref_chan = relanet_reference(x, params)

    # bf16 MXU operands vs. an f32 reference: ~2^-9 relative rounding per matmul layer,
    # compounded over ~5 layers feeding tanh -> worst-case ~1.5e-2; 2.5e-2 covers the tail.
    TOL = 2.5e-2
    np.testing.assert_allclose(np.asarray(out), np.asarray(ref_out), rtol=TOL, atol=TOL)
    np.testing.assert_allclose(np.asarray(spatial), np.asarray(ref_spatial), rtol=TOL, atol=TOL)
    np.testing.assert_allclose(np.asarray(chan), np.asarray(ref_chan), rtol=TOL, atol=TOL)
    print("KERNEL_OK")
</pallas_src>

<mosaic_0001>
module attributes {stable_mosaic.version = 11 : i64} {
  func.func @relanet_kernel(%arg0: i32, %arg1: memref<1x5x64x128xf32, #tpu.memory_space<vmem>>, %arg2: memref<128x64xbf16, #tpu.memory_space<vmem>>, %arg3: memref<1x64xf32, #tpu.memory_space<vmem>>, %arg4: memref<64x64xbf16, #tpu.memory_space<vmem>>, %arg5: memref<1x64xf32, #tpu.memory_space<vmem>>, %arg6: memref<64x128xbf16, #tpu.memory_space<vmem>>, %arg7: memref<1x128xf32, #tpu.memory_space<vmem>>, %arg8: memref<128x64xbf16, #tpu.memory_space<vmem>>, %arg9: memref<1x64xf32, #tpu.memory_space<vmem>>, %arg10: memref<64x64xbf16, #tpu.memory_space<vmem>>, %arg11: memref<1x64xf32, #tpu.memory_space<vmem>>, %arg12: memref<1x64xf32, #tpu.memory_space<vmem>>, %arg13: memref<640x1152xbf16, #tpu.memory_space<vmem>>, %arg14: memref<9x64x64xbf16, #tpu.memory_space<vmem>>, %arg15: memref<1x128xf32, #tpu.memory_space<vmem>>, %arg16: memref<128x32xbf16, #tpu.memory_space<vmem>>, %arg17: memref<32x128xbf16, #tpu.memory_space<vmem>>, %arg18: memref<1x5x64x128xf32, #tpu.memory_space<vmem>>, %arg19: memref<1x5x64x1xf32, #tpu.memory_space<vmem>>, %arg20: memref<1x1x128xf32, #tpu.memory_space<vmem>>) attributes {dimension_semantics = [#tpu.dimension_semantics<parallel>], iteration_bounds = array<i64: 2>, scalar_prefetch = 0 : i64, scratch_operands = 0 : i64, tpu.core_type = #tpu.core_type<tc>, window_params = [{transform_indices = @transform_0, window_bounds = array<i64: 1, 5, 64, 128>}, {pipeline_mode = #tpu.pipeline_mode<synchronous>, transform_indices = @transform_1, window_bounds = array<i64: 128, 64>}, {pipeline_mode = #tpu.pipeline_mode<synchronous>, transform_indices = @transform_2, window_bounds = array<i64: 1, 64>}, {pipeline_mode = #tpu.pipeline_mode<synchronous>, transform_indices = @transform_3, window_bounds = array<i64: 64, 64>}, {pipeline_mode = #tpu.pipeline_mode<synchronous>, transform_indices = @transform_4, window_bounds = array<i64: 1, 64>}, {pipeline_mode = #tpu.pipeline_mode<synchronous>, transform_indices = @transform_5, window_bounds = array<i64: 64, 128>}, {pipeline_mode = #tpu.pipeline_mode<synchronous>, transform_indices = @transform_6, window_bounds = array<i64: 1, 128>}, {pipeline_mode = #tpu.pipeline_mode<synchronous>, transform_indices = @transform_7, window_bounds = array<i64: 128, 64>}, {pipeline_mode = #tpu.pipeline_mode<synchronous>, transform_indices = @transform_8, window_bounds = array<i64: 1, 64>}, {pipeline_mode = #tpu.pipeline_mode<synchronous>, transform_indices = @transform_9, window_bounds = array<i64: 64, 64>}, {pipeline_mode = #tpu.pipeline_mode<synchronous>, transform_indices = @transform_10, window_bounds = array<i64: 1, 64>}, {pipeline_mode = #tpu.pipeline_mode<synchronous>, transform_indices = @transform_11, window_bounds = array<i64: 1, 64>}, {pipeline_mode = #tpu.pipeline_mode<synchronous>, transform_indices = @transform_12, window_bounds = array<i64: 640, 1152>}, {pipeline_mode = #tpu.pipeline_mode<synchronous>, transform_indices = @transform_13, window_bounds = array<i64: 9, 64, 64>}, {pipeline_mode = #tpu.pipeline_mode<synchronous>, transform_indices = @transform_14, window_bounds = array<i64: 1, 128>}, {pipeline_mode = #tpu.pipeline_mode<synchronous>, transform_indices = @transform_15, window_bounds = array<i64: 128, 32>}, {pipeline_mode = #tpu.pipeline_mode<synchronous>, transform_indices = @transform_16, window_bounds = array<i64: 32, 128>}, {transform_indices = @transform_17, window_bounds = array<i64: 1, 5, 64, 128>}, {transform_indices = @transform_18, window_bounds = array<i64: 1, 5, 64, 1>}, {transform_indices = @transform_19, window_bounds = array<i64: 1, 1, 128>}]} {
    %c0 = arith.constant 0 : index
    %c0_0 = arith.constant 0 : index
    %c0_1 = arith.constant 0 : index
    %c0_2 = arith.constant 0 : index
    %0 = vector.load %arg1[%c0, %c0_0, %c0_1, %c0_2] : memref<1x5x64x128xf32, #tpu.memory_space<vmem>>, vector<1x5x64x128xf32>
    %1 = vector.shape_cast %0 : vector<1x5x64x128xf32> to vector<5x64x128xf32>
    %2 = arith.truncf %1 : vector<5x64x128xf32> to vector<5x64x128xbf16>
    %3 = vector.shape_cast %2 : vector<5x64x128xbf16> to vector<320x128xbf16>
    %c0_3 = arith.constant 0 : index
    %c0_4 = arith.constant 0 : index
    %4 = vector.load %arg2[%c0_3, %c0_4] : memref<128x64xbf16, #tpu.memory_space<vmem>>, vector<128x64xbf16>
    %cst = arith.constant dense<0.000000e+00> : vector<320x64xf32>
    %5 = tpu.matmul %3, %4, %cst {dimension_numbers = #tpu.dot_dimension_numbers<[1], [0], [0], [1], [0, 0, 1, 1], [], []>} : vector<320x128xbf16>, vector<128x64xbf16>, vector<320x64xf32> -> vector<320x64xf32>
    %6 = vector.shape_cast %5 : vector<320x64xf32> to vector<5x64x64xf32>
    %7 = vector.shape_cast %6 : vector<5x64x64xf32> to vector<1x5x64x64xf32>
    %8 = vector.shape_cast %6 : vector<5x64x64xf32> to vector<5x1x64x64xf32>
    %9 = vector.broadcast %7 : vector<1x5x64x64xf32> to vector<5x5x64x64xf32>
    %10 = vector.broadcast %8 : vector<5x1x64x64xf32> to vector<5x5x64x64xf32>
    %11 = arith.subf %9, %10 : vector<5x5x64x64xf32>
    %12 = vector.shape_cast %11 : vector<5x5x64x64xf32> to vector<1600x64xf32>
    %c0_5 = arith.constant 0 : index
    %c0_6 = arith.constant 0 : index
    %13 = vector.load %arg3[%c0_5, %c0_6] : memref<1x64xf32, #tpu.memory_space<vmem>>, vector<1x64xf32>
    %14 = vector.broadcast %13 : vector<1x64xf32> to vector<1600x64xf32>
    %15 = arith.addf %12, %14 : vector<1600x64xf32>
    %cst_7 = arith.constant 0.000000e+00 : f32
    %16 = vector.broadcast %cst_7 : f32 to vector<1600x64xf32>
    %17 = arith.maximumf %15, %16 : vector<1600x64xf32>
    %18 = arith.truncf %17 : vector<1600x64xf32> to vector<1600x64xbf16>
    %c0_8 = arith.constant 0 : index
    %c0_9 = arith.constant 0 : index
    %19 = vector.load %arg4[%c0_8, %c0_9] : memref<64x64xbf16, #tpu.memory_space<vmem>>, vector<64x64xbf16>
    %cst_10 = arith.constant dense<0.000000e+00> : vector<1600x64xf32>
    %20 = tpu.matmul %18, %19, %cst_10 {dimension_numbers = #tpu.dot_dimension_numbers<[1], [0], [0], [1], [0, 0, 1, 1], [], []>} : vector<1600x64xbf16>, vector<64x64xbf16>, vector<1600x64xf32> -> vector<1600x64xf32>
    %c0_11 = arith.constant 0 : index
    %c0_12 = arith.constant 0 : index
    %21 = vector.load %arg5[%c0_11, %c0_12] : memref<1x64xf32, #tpu.memory_space<vmem>>, vector<1x64xf32>
    %22 = vector.broadcast %21 : vector<1x64xf32> to vector<1600x64xf32>
    %23 = arith.addf %20, %22 : vector<1600x64xf32>
    %cst_13 = arith.constant 0.000000e+00 : f32
    %24 = vector.broadcast %cst_13 : f32 to vector<1600x64xf32>
    %25 = arith.maximumf %23, %24 : vector<1600x64xf32>
    %26 = arith.truncf %25 : vector<1600x64xf32> to vector<1600x64xbf16>
    %c0_14 = arith.constant 0 : index
    %c0_15 = arith.constant 0 : index
    %27 = vector.load %arg6[%c0_14, %c0_15] : memref<64x128xbf16, #tpu.memory_space<vmem>>, vector<64x128xbf16>
    %cst_16 = arith.constant dense<0.000000e+00> : vector<1600x128xf32>
    %28 = tpu.matmul %26, %27, %cst_16 {dimension_numbers = #tpu.dot_dimension_numbers<[1], [0], [0], [1], [0, 0, 1, 1], [], []>} : vector<1600x64xbf16>, vector<64x128xbf16>, vector<1600x128xf32> -> vector<1600x128xf32>
    %c0_17 = arith.constant 0 : index
    %c0_18 = arith.constant 0 : index
    %29 = vector.load %arg7[%c0_17, %c0_18] : memref<1x128xf32, #tpu.memory_space<vmem>>, vector<1x128xf32>
    %30 = vector.broadcast %29 : vector<1x128xf32> to vector<1600x128xf32>
    %31 = arith.addf %28, %30 : vector<1600x128xf32>
    %cst_19 = arith.constant 0.000000e+00 : f32
    %32 = vector.broadcast %cst_19 : f32 to vector<1600x128xf32>
    %33 = arith.maximumf %31, %32 : vector<1600x128xf32>
    %34 = vector.shape_cast %33 : vector<1600x128xf32> to vector<5x5x64x128xf32>
    %cst_20 = arith.constant dense<0.000000e+00> : vector<5x64x128xf32>
    %35 = vector.multi_reduction <add>, %34, %cst_20 [1] : vector<5x5x64x128xf32> to vector<5x64x128xf32>
    %cst_21 = arith.constant 5.000000e+00 : f32
    %36 = vector.broadcast %cst_21 : f32 to vector<5x64x128xf32>
    %37 = arith.divf %35, %36 : vector<5x64x128xf32>
    %38 = arith.truncf %37 : vector<5x64x128xf32> to vector<5x64x128xbf16>
    %39 = vector.shape_cast %38 : vector<5x64x128xbf16> to vector<320x128xbf16>
    %c0_22 = arith.constant 0 : index
    %c0_23 = arith.constant 0 : index
    %40 = vector.load %arg8[%c0_22, %c0_23] : memref<128x64xbf16, #tpu.memory_space<vmem>>, vector<128x64xbf16>
    %cst_24 = arith.constant dense<0.000000e+00> : vector<320x64xf32>
    %41 = tpu.matmul %39, %40, %cst_24 {dimension_numbers = #tpu.dot_dimension_numbers<[1], [0], [0], [1], [0, 0, 1, 1], [], []>} : vector<320x128xbf16>, vector<128x64xbf16>, vector<320x64xf32> -> vector<320x64xf32>
    %c0_25 = arith.constant 0 : index
    %c0_26 = arith.constant 0 : index
    %42 = vector.load %arg9[%c0_25, %c0_26] : memref<1x64xf32, #tpu.memory_space<vmem>>, vector<1x64xf32>
    %43 = vector.broadcast %42 : vector<1x64xf32> to vector<320x64xf32>
    %44 = arith.addf %41, %43 : vector<320x64xf32>
    %cst_27 = arith.constant 0.000000e+00 : f32
    %45 = vector.broadcast %cst_27 : f32 to vector<320x64xf32>
    %46 = arith.maximumf %44, %45 : vector<320x64xf32>
    %47 = arith.truncf %46 : vector<320x64xf32> to vector<320x64xbf16>
    %c0_28 = arith.constant 0 : index
    %c0_29 = arith.constant 0 : index
    %48 = vector.load %arg10[%c0_28, %c0_29] : memref<64x64xbf16, #tpu.memory_space<vmem>>, vector<64x64xbf16>
    %cst_30 = arith.constant dense<0.000000e+00> : vector<320x64xf32>
    %49 = tpu.matmul %47, %48, %cst_30 {dimension_numbers = #tpu.dot_dimension_numbers<[1], [0], [0], [1], [0, 0, 1, 1], [], []>} : vector<320x64xbf16>, vector<64x64xbf16>, vector<320x64xf32> -> vector<320x64xf32>
    %c0_31 = arith.constant 0 : index
    %c0_32 = arith.constant 0 : index
    %50 = vector.load %arg11[%c0_31, %c0_32] : memref<1x64xf32, #tpu.memory_space<vmem>>, vector<1x64xf32>
    %51 = vector.broadcast %50 : vector<1x64xf32> to vector<320x64xf32>
    %52 = arith.addf %49, %51 : vector<320x64xf32>
    %cst_33 = arith.constant 0.000000e+00 : f32
    %53 = vector.broadcast %cst_33 : f32 to vector<320x64xf32>
    %54 = arith.maximumf %52, %53 : vector<320x64xf32>
    %c0_34 = arith.constant 0 : index
    %c0_35 = arith.constant 0 : index
    %55 = vector.load %arg12[%c0_34, %c0_35] : memref<1x64xf32, #tpu.memory_space<vmem>>, vector<1x64xf32>
    %56 = vector.broadcast %55 : vector<1x64xf32> to vector<320x64xf32>
    %57 = arith.mulf %54, %56 : vector<320x64xf32>
    %cst_36 = arith.constant dense<0.000000e+00> : vector<320xf32>
    %58 = vector.multi_reduction <add>, %57, %cst_36 [1] : vector<320x64xf32> to vector<320xf32>
    %59 = vector.shape_cast %58 : vector<320xf32> to vector<320x1xf32>
    %60 = math.tanh %59 : vector<320x1xf32>
    %61 = vector.shape_cast %60 : vector<320x1xf32> to vector<5x64x1xf32>
    %62 = vector.extract_strided_slice %38 {offsets = [0, 0, 0], sizes = [1, 64, 128], strides = [1, 1, 1]} : vector<5x64x128xbf16> to vector<1x64x128xbf16>
    %63 = vector.shape_cast %62 : vector<1x64x128xbf16> to vector<64x128xbf16>
    %64 = vector.extract_strided_slice %38 {offsets = [1, 0, 0], sizes = [1, 64, 128], strides = [1, 1, 1]} : vector<5x64x128xbf16> to vector<1x64x128xbf16>
    %65 = vector.shape_cast %64 : vector<1x64x128xbf16> to vector<64x128xbf16>
    %66 = vector.extract_strided_slice %38 {offsets = [2, 0, 0], sizes = [1, 64, 128], strides = [1, 1, 1]} : vector<5x64x128xbf16> to vector<1x64x128xbf16>
    %67 = vector.shape_cast %66 : vector<1x64x128xbf16> to vector<64x128xbf16>
    %68 = vector.extract_strided_slice %38 {offsets = [3, 0, 0], sizes = [1, 64, 128], strides = [1, 1, 1]} : vector<5x64x128xbf16> to vector<1x64x128xbf16>
    %69 = vector.shape_cast %68 : vector<1x64x128xbf16> to vector<64x128xbf16>
    %70 = vector.extract_strided_slice %38 {offsets = [4, 0, 0], sizes = [1, 64, 128], strides = [1, 1, 1]} : vector<5x64x128xbf16> to vector<1x64x128xbf16>
    %71 = vector.shape_cast %70 : vector<1x64x128xbf16> to vector<64x128xbf16>
    %72 = tpu.concatenate %63, %65, %67, %69, %71 in 1 : vector<64x128xbf16>, vector<64x128xbf16>, vector<64x128xbf16>, vector<64x128xbf16>, vector<64x128xbf16> -> vector<64x640xbf16>
    %c0_37 = arith.constant 0 : index
    %c0_38 = arith.constant 0 : index
    %73 = vector.load %arg13[%c0_37, %c0_38] : memref<640x1152xbf16, #tpu.memory_space<vmem>>, vector<640x1152xbf16>
    %cst_39 = arith.constant dense<0.000000e+00> : vector<64x1152xf32>
    %74 = tpu.matmul %72, %73, %cst_39 {dimension_numbers = #tpu.dot_dimension_numbers<[1], [0], [0], [1], [0, 0, 1, 1], [], []>} : vector<64x640xbf16>, vector<640x1152xbf16>, vector<64x1152xf32> -> vector<64x1152xf32>
    %cst_40 = arith.constant 0.000000e+00 : f32
    %75 = vector.broadcast %cst_40 : f32 to vector<64x128xf32>
    %76 = vector.extract_strided_slice %74 {offsets = [0, 0], sizes = [64, 128], strides = [1, 1]} : vector<64x1152xf32> to vector<64x128xf32>
    %77 = arith.truncf %76 : vector<64x128xf32> to vector<64x128xbf16>
    %c0_41 = arith.constant 0 : index
    %c0_42 = arith.constant 0 : index
    %c0_43 = arith.constant 0 : index
    %78 = vector.load %arg14[%c0_41, %c0_42, %c0_43] : memref<9x64x64xbf16, #tpu.memory_space<vmem>>, vector<1x64x64xbf16>
    %79 = vector.shape_cast %78 : vector<1x64x64xbf16> to vector<64x64xbf16>
    %cst_44 = arith.constant dense<0.000000e+00> : vector<64x128xf32>
    %80 = tpu.matmul %79, %77, %cst_44 {dimension_numbers = #tpu.dot_dimension_numbers<[1], [0], [0], [1], [0, 0, 1, 1], [], []>} : vector<64x64xbf16>, vector<64x128xbf16>, vector<64x128xf32> -> vector<64x128xf32>
    %81 = arith.addf %75, %80 : vector<64x128xf32>
    %82 = vector.extract_strided_slice %74 {offsets = [0, 128], sizes = [64, 128], strides = [1, 1]} : vector<64x1152xf32> to vector<64x128xf32>
    %83 = arith.truncf %82 : vector<64x128xf32> to vector<64x128xbf16>
    %c1 = arith.constant 1 : index
    %c0_45 = arith.constant 0 : index
    %c0_46 = arith.constant 0 : index
    %84 = vector.load %arg14[%c1, %c0_45, %c0_46] : memref<9x64x64xbf16, #tpu.memory_space<vmem>>, vector<1x64x64xbf16>
    %85 = vector.shape_cast %84 : vector<1x64x64xbf16> to vector<64x64xbf16>
    %cst_47 = arith.constant dense<0.000000e+00> : vector<64x128xf32>
    %86 = tpu.matmul %85, %83, %cst_47 {dimension_numbers = #tpu.dot_dimension_numbers<[1], [0], [0], [1], [0, 0, 1, 1], [], []>} : vector<64x64xbf16>, vector<64x128xbf16>, vector<64x128xf32> -> vector<64x128xf32>
    %87 = arith.addf %81, %86 : vector<64x128xf32>
    %88 = vector.extract_strided_slice %74 {offsets = [0, 256], sizes = [64, 128], strides = [1, 1]} : vector<64x1152xf32> to vector<64x128xf32>
    %89 = arith.truncf %88 : vector<64x128xf32> to vector<64x128xbf16>
    %c2 = arith.constant 2 : index
    %c0_48 = arith.constant 0 : index
    %c0_49 = arith.constant 0 : index
    %90 = vector.load %arg14[%c2, %c0_48, %c0_49] : memref<9x64x64xbf16, #tpu.memory_space<vmem>>, vector<1x64x64xbf16>
    %91 = vector.shape_cast %90 : vector<1x64x64xbf16> to vector<64x64xbf16>
    %cst_50 = arith.constant dense<0.000000e+00> : vector<64x128xf32>
    %92 = tpu.matmul %91, %89, %cst_50 {dimension_numbers = #tpu.dot_dimension_numbers<[1], [0], [0], [1], [0, 0, 1, 1], [], []>} : vector<64x64xbf16>, vector<64x128xbf16>, vector<64x128xf32> -> vector<64x128xf32>
    %93 = arith.addf %87, %92 : vector<64x128xf32>
    %94 = vector.extract_strided_slice %74 {offsets = [0, 384], sizes = [64, 128], strides = [1, 1]} : vector<64x1152xf32> to vector<64x128xf32>
    %95 = arith.truncf %94 : vector<64x128xf32> to vector<64x128xbf16>
    %c3 = arith.constant 3 : index
    %c0_51 = arith.constant 0 : index
    %c0_52 = arith.constant 0 : index
    %96 = vector.load %arg14[%c3, %c0_51, %c0_52] : memref<9x64x64xbf16, #tpu.memory_space<vmem>>, vector<1x64x64xbf16>
    %97 = vector.shape_cast %96 : vector<1x64x64xbf16> to vector<64x64xbf16>
    %cst_53 = arith.constant dense<0.000000e+00> : vector<64x128xf32>
    %98 = tpu.matmul %97, %95, %cst_53 {dimension_numbers = #tpu.dot_dimension_numbers<[1], [0], [0], [1], [0, 0, 1, 1], [], []>} : vector<64x64xbf16>, vector<64x128xbf16>, vector<64x128xf32> -> vector<64x128xf32>
    %99 = arith.addf %93, %98 : vector<64x128xf32>
    %100 = vector.extract_strided_slice %74 {offsets = [0, 512], sizes = [64, 128], strides = [1, 1]} : vector<64x1152xf32> to vector<64x128xf32>
    %101 = arith.truncf %100 : vector<64x128xf32> to vector<64x128xbf16>
    %c4 = arith.constant 4 : index
    %c0_54 = arith.constant 0 : index
    %c0_55 = arith.constant 0 : index
    %102 = vector.load %arg14[%c4, %c0_54, %c0_55] : memref<9x64x64xbf16, #tpu.memory_space<vmem>>, vector<1x64x64xbf16>
    %103 = vector.shape_cast %102 : vector<1x64x64xbf16> to vector<64x64xbf16>
    %cst_56 = arith.constant dense<0.000000e+00> : vector<64x128xf32>
    %104 = tpu.matmul %103, %101, %cst_56 {dimension_numbers = #tpu.dot_dimension_numbers<[1], [0], [0], [1], [0, 0, 1, 1], [], []>} : vector<64x64xbf16>, vector<64x128xbf16>, vector<64x128xf32> -> vector<64x128xf32>
    %105 = arith.addf %99, %104 : vector<64x128xf32>
    %106 = vector.extract_strided_slice %74 {offsets = [0, 640], sizes = [64, 128], strides = [1, 1]} : vector<64x1152xf32> to vector<64x128xf32>
    %107 = arith.truncf %106 : vector<64x128xf32> to vector<64x128xbf16>
    %c5 = arith.constant 5 : index
    %c0_57 = arith.constant 0 : index
    %c0_58 = arith.constant 0 : index
    %108 = vector.load %arg14[%c5, %c0_57, %c0_58] : memref<9x64x64xbf16, #tpu.memory_space<vmem>>, vector<1x64x64xbf16>
    %109 = vector.shape_cast %108 : vector<1x64x64xbf16> to vector<64x64xbf16>
    %cst_59 = arith.constant dense<0.000000e+00> : vector<64x128xf32>
    %110 = tpu.matmul %109, %107, %cst_59 {dimension_numbers = #tpu.dot_dimension_numbers<[1], [0], [0], [1], [0, 0, 1, 1], [], []>} : vector<64x64xbf16>, vector<64x128xbf16>, vector<64x128xf32> -> vector<64x128xf32>
    %111 = arith.addf %105, %110 : vector<64x128xf32>
    %112 = vector.extract_strided_slice %74 {offsets = [0, 768], sizes = [64, 128], strides = [1, 1]} : vector<64x1152xf32> to vector<64x128xf32>
    %113 = arith.truncf %112 : vector<64x128xf32> to vector<64x128xbf16>
    %c6 = arith.constant 6 : index
    %c0_60 = arith.constant 0 : index
    %c0_61 = arith.constant 0 : index
    %114 = vector.load %arg14[%c6, %c0_60, %c0_61] : memref<9x64x64xbf16, #tpu.memory_space<vmem>>, vector<1x64x64xbf16>
    %115 = vector.shape_cast %114 : vector<1x64x64xbf16> to vector<64x64xbf16>
    %cst_62 = arith.constant dense<0.000000e+00> : vector<64x128xf32>
    %116 = tpu.matmul %115, %113, %cst_62 {dimension_numbers = #tpu.dot_dimension_numbers<[1], [0], [0], [1], [0, 0, 1, 1], [], []>} : vector<64x64xbf16>, vector<64x128xbf16>, vector<64x128xf32> -> vector<64x128xf32>
    %117 = arith.addf %111, %116 : vector<64x128xf32>
    %118 = vector.extract_strided_slice %74 {offsets = [0, 896], sizes = [64, 128], strides = [1, 1]} : vector<64x1152xf32> to vector<64x128xf32>
    %119 = arith.truncf %118 : vector<64x128xf32> to vector<64x128xbf16>
    %c7 = arith.constant 7 : index
    %c0_63 = arith.constant 0 : index
    %c0_64 = arith.constant 0 : index
    %120 = vector.load %arg14[%c7, %c0_63, %c0_64] : memref<9x64x64xbf16, #tpu.memory_space<vmem>>, vector<1x64x64xbf16>
    %121 = vector.shape_cast %120 : vector<1x64x64xbf16> to vector<64x64xbf16>
    %cst_65 = arith.constant dense<0.000000e+00> : vector<64x128xf32>
    %122 = tpu.matmul %121, %119, %cst_65 {dimension_numbers = #tpu.dot_dimension_numbers<[1], [0], [0], [1], [0, 0, 1, 1], [], []>} : vector<64x64xbf16>, vector<64x128xbf16>, vector<64x128xf32> -> vector<64x128xf32>
    %123 = arith.addf %117, %122 : vector<64x128xf32>
    %124 = vector.extract_strided_slice %74 {offsets = [0, 1024], sizes = [64, 128], strides = [1, 1]} : vector<64x1152xf32> to vector<64x128xf32>
    %125 = arith.truncf %124 : vector<64x128xf32> to vector<64x128xbf16>
    %c8 = arith.constant 8 : index
    %c0_66 = arith.constant 0 : index
    %c0_67 = arith.constant 0 : index
    %126 = vector.load %arg14[%c8, %c0_66, %c0_67] : memref<9x64x64xbf16, #tpu.memory_space<vmem>>, vector<1x64x64xbf16>
    %127 = vector.shape_cast %126 : vector<1x64x64xbf16> to vector<64x64xbf16>
    %cst_68 = arith.constant dense<0.000000e+00> : vector<64x128xf32>
    %128 = tpu.matmul %127, %125, %cst_68 {dimension_numbers = #tpu.dot_dimension_numbers<[1], [0], [0], [1], [0, 0, 1, 1], [], []>} : vector<64x64xbf16>, vector<64x128xbf16>, vector<64x128xf32> -> vector<64x128xf32>
    %129 = arith.addf %123, %128 : vector<64x128xf32>
    %c0_69 = arith.constant 0 : index
    %c0_70 = arith.constant 0 : index
    %130 = vector.load %arg15[%c0_69, %c0_70] : memref<1x128xf32, #tpu.memory_space<vmem>>, vector<1x128xf32>
    %131 = vector.broadcast %130 : vector<1x128xf32> to vector<64x128xf32>
    %132 = arith.addf %129, %131 : vector<64x128xf32>
    %cst_71 = arith.constant 0.000000e+00 : f32
    %133 = vector.broadcast %cst_71 : f32 to vector<64x128xf32>
    %134 = arith.maximumf %132, %133 : vector<64x128xf32>
    %cst_72 = arith.constant dense<0.000000e+00> : vector<128xf32>
    %135 = vector.multi_reduction <add>, %134, %cst_72 [0] : vector<64x128xf32> to vector<128xf32>
    %136 = vector.shape_cast %135 : vector<128xf32> to vector<1x128xf32>
    %cst_73 = arith.constant 6.400000e+01 : f32
    %137 = vector.broadcast %cst_73 : f32 to vector<1x128xf32>
    %138 = arith.divf %136, %137 : vector<1x128xf32>
    %139 = arith.truncf %138 : vector<1x128xf32> to vector<1x128xbf16>
    %c0_74 = arith.constant 0 : index
    %c0_75 = arith.constant 0 : index
    %140 = vector.load %arg16[%c0_74, %c0_75] : memref<128x32xbf16, #tpu.memory_space<vmem>>, vector<128x32xbf16>
    %cst_76 = arith.constant dense<0.000000e+00> : vector<1x32xf32>
    %141 = tpu.matmul %139, %140, %cst_76 {dimension_numbers = #tpu.dot_dimension_numbers<[1], [0], [0], [1], [0, 0, 1, 1], [], []>} : vector<1x128xbf16>, vector<128x32xbf16>, vector<1x32xf32> -> vector<1x32xf32>
    %cst_77 = arith.constant 0.000000e+00 : f32
    %142 = vector.broadcast %cst_77 : f32 to vector<1x32xf32>
    %143 = arith.maximumf %141, %142 : vector<1x32xf32>
    %144 = arith.truncf %143 : vector<1x32xf32> to vector<1x32xbf16>
    %c0_78 = arith.constant 0 : index
    %c0_79 = arith.constant 0 : index
    %145 = vector.load %arg17[%c0_78, %c0_79] : memref<32x128xbf16, #tpu.memory_space<vmem>>, vector<32x128xbf16>
    %cst_80 = arith.constant dense<0.000000e+00> : vector<1x128xf32>
    %146 = tpu.matmul %144, %145, %cst_80 {dimension_numbers = #tpu.dot_dimension_numbers<[1], [0], [0], [1], [0, 0, 1, 1], [], []>} : vector<1x32xbf16>, vector<32x128xbf16>, vector<1x128xf32> -> vector<1x128xf32>
    %147 = arith.negf %146 : vector<1x128xf32>
    %148 = math.exp %147 : vector<1x128xf32>
    %cst_81 = arith.constant 1.000000e+00 : f32
    %149 = vector.broadcast %cst_81 : f32 to vector<1x128xf32>
    %150 = arith.addf %149, %148 : vector<1x128xf32>
    %151 = arith.divf %149, %150 : vector<1x128xf32>
    %cst_82 = arith.constant 5.000000e-01 : f32
    %152 = vector.broadcast %cst_82 : f32 to vector<5x64x1xf32>
    %153 = arith.mulf %152, %61 : vector<5x64x1xf32>
    %cst_83 = arith.constant 1.500000e+00 : f32
    %154 = vector.broadcast %cst_83 : f32 to vector<5x64x1xf32>
    %155 = arith.addf %153, %154 : vector<5x64x1xf32>
    %156 = vector.broadcast %155 : vector<5x64x1xf32> to vector<5x64x128xf32>
    %157 = arith.mulf %156, %1 : vector<5x64x128xf32>
    %158 = vector.shape_cast %151 : vector<1x128xf32> to vector<1x1x128xf32>
    %cst_84 = arith.constant 1.000000e+00 : f32
    %159 = vector.broadcast %cst_84 : f32 to vector<1x1x128xf32>
    %160 = arith.addf %159, %158 : vector<1x1x128xf32>
    %161 = vector.broadcast %160 : vector<1x1x128xf32> to vector<5x64x128xf32>
    %162 = arith.mulf %157, %161 : vector<5x64x128xf32>
    %c0_85 = arith.constant 0 : index
    %c0_86 = arith.constant 0 : index
    %c0_87 = arith.constant 0 : index
    %c0_88 = arith.constant 0 : index
    %163 = vector.load %arg18[%c0_85, %c0_86, %c0_87, %c0_88] : memref<1x5x64x128xf32, #tpu.memory_space<vmem>>, vector<1x5x64x128xf32>
    %164 = vector.shape_cast %163 : vector<1x5x64x128xf32> to vector<5x64x128xf32>
    %165 = vector.shape_cast %162 : vector<5x64x128xf32> to vector<1x5x64x128xf32>
    tpu.vector_store %arg18[%c0_85, %c0_86, %c0_87, %c0_88], %165 {strides = array<i32>} : memref<1x5x64x128xf32, #tpu.memory_space<vmem>>, vector<1x5x64x128xf32>,
    %c0_89 = arith.constant 0 : index
    %c0_90 = arith.constant 0 : index
    %c0_91 = arith.constant 0 : index
    %c0_92 = arith.constant 0 : index
    %166 = vector.load %arg19[%c0_89, %c0_90, %c0_91, %c0_92] : memref<1x5x64x1xf32, #tpu.memory_space<vmem>>, vector<1x5x64x1xf32>
    %167 = vector.shape_cast %166 : vector<1x5x64x1xf32> to vector<5x64x1xf32>
    %168 = vector.shape_cast %61 : vector<5x64x1xf32> to vector<1x5x64x1xf32>
    tpu.vector_store %arg19[%c0_89, %c0_90, %c0_91, %c0_92], %168 {strides = array<i32>} : memref<1x5x64x1xf32, #tpu.memory_space<vmem>>, vector<1x5x64x1xf32>,
    %c0_93 = arith.constant 0 : index
    %c0_94 = arith.constant 0 : index
    %c0_95 = arith.constant 0 : index
    %169 = vector.load %arg20[%c0_93, %c0_94, %c0_95] : memref<1x1x128xf32, #tpu.memory_space<vmem>>, vector<1x1x128xf32>
    %170 = vector.shape_cast %169 : vector<1x1x128xf32> to vector<1x128xf32>
    %171 = vector.shape_cast %151 : vector<1x128xf32> to vector<1x1x128xf32>
    tpu.vector_store %arg20[%c0_93, %c0_94, %c0_95], %171 {strides = array<i32>} : memref<1x1x128xf32, #tpu.memory_space<vmem>>, vector<1x1x128xf32>,
    return
  }
  func.func @transform_0(%arg0: i32) -> (i32, i32, i32, i32) {
    %c0_i32 = arith.constant 0 : i32
    %c0_i32_0 = arith.constant 0 : i32
    %c0_i32_1 = arith.constant 0 : i32
    %c0_i32_2 = arith.constant 0 : i32
    return %arg0, %c0_i32, %c0_i32_0, %c0_i32_1 : i32, i32, i32, i32
  }
  func.func @transform_1(%arg0: i32) -> (i32, i32) {
    %c0_i32 = arith.constant 0 : i32
    %c0_i32_0 = arith.constant 0 : i32
    %c0_i32_1 = arith.constant 0 : i32
    return %c0_i32, %c0_i32_0 : i32, i32
  }
  func.func @transform_2(%arg0: i32) -> (i32, i32) {
    %c0_i32 = arith.constant 0 : i32
    %c0_i32_0 = arith.constant 0 : i32
    %c0_i32_1 = arith.constant 0 : i32
    return %c0_i32, %c0_i32_0 : i32, i32
  }
  func.func @transform_3(%arg0: i32) -> (i32, i32) {
    %c0_i32 = arith.constant 0 : i32
    %c0_i32_0 = arith.constant 0 : i32
    %c0_i32_1 = arith.constant 0 : i32
    return %c0_i32, %c0_i32_0 : i32, i32
  }
  func.func @transform_4(%arg0: i32) -> (i32, i32) {
    %c0_i32 = arith.constant 0 : i32
    %c0_i32_0 = arith.constant 0 : i32
    %c0_i32_1 = arith.constant 0 : i32
    return %c0_i32, %c0_i32_0 : i32, i32
  }
  func.func @transform_5(%arg0: i32) -> (i32, i32) {
    %c0_i32 = arith.constant 0 : i32
    %c0_i32_0 = arith.constant 0 : i32
    %c0_i32_1 = arith.constant 0 : i32
    return %c0_i32, %c0_i32_0 : i32, i32
  }
  func.func @transform_6(%arg0: i32) -> (i32, i32) {
    %c0_i32 = arith.constant 0 : i32
    %c0_i32_0 = arith.constant 0 : i32
    %c0_i32_1 = arith.constant 0 : i32
    return %c0_i32, %c0_i32_0 : i32, i32
  }
  func.func @transform_7(%arg0: i32) -> (i32, i32) {
    %c0_i32 = arith.constant 0 : i32
    %c0_i32_0 = arith.constant 0 : i32
    %c0_i32_1 = arith.constant 0 : i32
    return %c0_i32, %c0_i32_0 : i32, i32
  }
  func.func @transform_8(%arg0: i32) -> (i32, i32) {
    %c0_i32 = arith.constant 0 : i32
    %c0_i32_0 = arith.constant 0 : i32
    %c0_i32_1 = arith.constant 0 : i32
    return %c0_i32, %c0_i32_0 : i32, i32
  }
  func.func @transform_9(%arg0: i32) -> (i32, i32) {
    %c0_i32 = arith.constant 0 : i32
    %c0_i32_0 = arith.constant 0 : i32
    %c0_i32_1 = arith.constant 0 : i32
    return %c0_i32, %c0_i32_0 : i32, i32
  }
  func.func @transform_10(%arg0: i32) -> (i32, i32) {
    %c0_i32 = arith.constant 0 : i32
    %c0_i32_0 = arith.constant 0 : i32
    %c0_i32_1 = arith.constant 0 : i32
    return %c0_i32, %c0_i32_0 : i32, i32
  }
  func.func @transform_11(%arg0: i32) -> (i32, i32) {
    %c0_i32 = arith.constant 0 : i32
    %c0_i32_0 = arith.constant 0 : i32
    %c0_i32_1 = arith.constant 0 : i32
    return %c0_i32, %c0_i32_0 : i32, i32
  }
  func.func @transform_12(%arg0: i32) -> (i32, i32) {
    %c0_i32 = arith.constant 0 : i32
    %c0_i32_0 = arith.constant 0 : i32
    %c0_i32_1 = arith.constant 0 : i32
    return %c0_i32, %c0_i32_0 : i32, i32
  }
  func.func @transform_13(%arg0: i32) -> (i32, i32, i32) {
    %c0_i32 = arith.constant 0 : i32
    %c0_i32_0 = arith.constant 0 : i32
    %c0_i32_1 = arith.constant 0 : i32
    %c0_i32_2 = arith.constant 0 : i32
    return %c0_i32, %c0_i32_0, %c0_i32_1 : i32, i32, i32
  }
  func.func @transform_14(%arg0: i32) -> (i32, i32) {
    %c0_i32 = arith.constant 0 : i32
    %c0_i32_0 = arith.constant 0 : i32
    %c0_i32_1 = arith.constant 0 : i32
    return %c0_i32, %c0_i32_0 : i32, i32
  }
  func.func @transform_15(%arg0: i32) -> (i32, i32) {
    %c0_i32 = arith.constant 0 : i32
    %c0_i32_0 = arith.constant 0 : i32
    %c0_i32_1 = arith.constant 0 : i32
    return %c0_i32, %c0_i32_0 : i32, i32
  }
  func.func @transform_16(%arg0: i32) -> (i32, i32) {
    %c0_i32 = arith.constant 0 : i32
    %c0_i32_0 = arith.constant 0 : i32
    %c0_i32_1 = arith.constant 0 : i32
    return %c0_i32, %c0_i32_0 : i32, i32
  }
  func.func @transform_17(%arg0: i32) -> (i32, i32, i32, i32) {
    %c0_i32 = arith.constant 0 : i32
    %c0_i32_0 = arith.constant 0 : i32
    %c0_i32_1 = arith.constant 0 : i32
    %c0_i32_2 = arith.constant 0 : i32
    return %arg0, %c0_i32, %c0_i32_0, %c0_i32_1 : i32, i32, i32, i32
  }
  func.func @transform_18(%arg0: i32) -> (i32, i32, i32, i32) {
    %c0_i32 = arith.constant 0 : i32
    %c0_i32_0 = arith.constant 0 : i32
    %c0_i32_1 = arith.constant 0 : i32
    %c0_i32_2 = arith.constant 0 : i32
    return %arg0, %c0_i32, %c0_i32_0, %c0_i32_1 : i32, i32, i32, i32
  }
  func.func @transform_19(%arg0: i32) -> (i32, i32, i32) {
    %c0_i32 = arith.constant 0 : i32
    %c0_i32_0 = arith.constant 0 : i32
    %c0_i32_1 = arith.constant 0 : i32
    return %arg0, %c0_i32, %c0_i32_0 : i32, i32, i32
  }
}

</mosaic_0001>

<bundles_post_ra>
// kernel: relanet_forward.1
= control target key start
LH: loop header
LB: loop body
LE: loop exit
PB: predicated region body
PF: predicated region fallthrough
CT: control target
= control target key end

     0   :  { %s18006_s0 = inlined_call_operand.vmem [shape: f32[2,5,64,128], index: 0, kind: input, shape index: {}]   ;;  %s18007_s1 = inlined_call_operand.vmem [shape: bf16[128,64], index: 1, kind: input, shape index: {}]   ;;  %s18008_s2 = inlined_call_operand.vmem [shape: f32[1,64], index: 2, kind: input, shape index: {}]   ;;  %s18009_s3 = inlined_call_operand.vmem [shape: bf16[64,64], index: 3, kind: input, shape index: {}]   ;;  %s18010_s4 = inlined_call_operand.vmem [shape: f32[1,64], index: 4, kind: input, shape index: {}]   ;;  %s18011_s5 = inlined_call_operand.vmem [shape: bf16[64,128], index: 5, kind: input, shape index: {}]   ;;  %s18012_s6 = inlined_call_operand.vmem [shape: f32[1,128], index: 6, kind: input, shape index: {}]   ;;  %s18013_s7 = inlined_call_operand.vmem [shape: bf16[128,64], index: 7, kind: input, shape index: {}]   ;;  %s18014_s8 = inlined_call_operand.vmem [shape: f32[1,64], index: 8, kind: input, shape index: {}]   ;;  %s18015_s9 = inlined_call_operand.vmem [shape: bf16[64,64], index: 9, kind: input, shape index: {}]   ;;  %s18016_s10 = inlined_call_operand.vmem [shape: f32[1,64], index: 10, kind: input, shape index: {}]   ;;  %s18017_s11 = inlined_call_operand.vmem [shape: f32[1,64], index: 11, kind: input, shape index: {}]   ;;  %s18018_s12 = inlined_call_operand.vmem [shape: bf16[640,1152], index: 12, kind: input, shape index: {}]   ;;  %s18019_s13 = inlined_call_operand.vmem [shape: bf16[9,64,64], index: 13, kind: input, shape index: {}]   ;;  %s18020_s14 = inlined_call_operand.vmem [shape: f32[1,128], index: 14, kind: input, shape index: {}]   ;;  %s18021_s15 = inlined_call_operand.vmem [shape: bf16[128,32], index: 15, kind: input, shape index: {}]   ;;  %s18022_s16 = inlined_call_operand.vmem [shape: bf16[32,128], index: 16, kind: input, shape index: {}]   ;;  %s18023_s17 = inlined_call_operand.hbm [shape: f32[2,5,64,128], index: 17, kind: output, shape index: {0}]   ;;  %s18024_s18 = inlined_call_operand.vmem [shape: f32[2,5,64,1], index: 18, kind: output, shape index: {1}]   ;;  %s18025_s19 = inlined_call_operand.hbm [shape: f32[2,1,128], index: 19, kind: output, shape index: {2}]  }
   0x1   :  { %18073 = sst [smem:[#allocation52_spill]] %s18006_s0 }
   0x2   :  { %18074 = sst [smem:[#allocation53_spill]] %s18007_s1 }
   0x3   :  { %18075 = sst [smem:[#allocation54_spill]] %s18008_s2 }
   0x4   :  { %18076 = sst [smem:[#allocation55_spill]] %s18009_s3 }
   0x5   :  { %18077 = sst [smem:[#allocation56_spill]] %s18010_s4 }
   0x6   :  { %18078 = sst [smem:[#allocation57_spill]] %s18011_s5 }
   0x7   :  { %18079 = sst [smem:[#allocation58_spill]] %s18012_s6 }
   0x8   :  { %18080 = sst [smem:[#allocation59_spill]] %s18023_s17 }
   0x9   :  { %18081 = sst [smem:[#allocation60_spill]] %s18025_s19 }
   0xa   :  { %25 = vsyncpa [#allocation3], 0 }
   0xb   :  { %27 = vsyncpa [#allocation3 + $0x1], 0 }
   0xc   :  { %28 = vsyncpa [#allocation5], 0 }
   0xd   :  { %30 = vsyncpa [#allocation5 + $0x1], 0  ;;  %s13735_s0 = smov 0   ;;  %s13737_s30 = smov 0  }
   0xe   :  { %s13739_s20 = smov 0   ;;  %s13741_s21 = smov 0  }
   0xf LB: > { %18082 = sst [smem:[#allocation8_spill]] %s13614_s0  ;;  %s13756_s1 = sadd.s32 4294967295, %s13626_s21   ;;  %s13626_s21 = sphi %s13741_s21, %s18246_s21   ;;  %s13622_s20 = sphi %s13739_s20, %s18248_s20   ;;  %s13618_s30 = sphi %s13737_s30, %s18250_s30   ;;  %s13614_s0 = sphi %s13735_s0, %s18249_s0  }
  0x10   : > { %18083 = sst [smem:[#allocation9_spill]] %s13622_s20  ;;  %s10545_s22 = sadd.s32 4294967294, %s13626_s21  }
  0x11   : > { %18084 = sst [smem:[#allocation10_spill]] %s13626_s21  ;;  %s13760_s2 = sadd.s32 1, %s13626_s21  }
  0x12   : > { %18085 = sst [smem:[#allocation11_spill]] %s13760_s2  ;;  %s405_s23 = sadd.s32 1, %s13622_s20 }
  0x13   : > { %s402_s24 = ssub.s32 %s13626_s21, %s13760_s2  ;;  %p415_p0 = scmp.ne.s32.totalorder %s13622_s20, %s13618_s30 }
  0x14   : > { %p403_p1 = scmp.eq.s32.totalorder %s402_s24, 0  ;;  %p416_p2 = scmp.eq.s32.totalorder %s13756_s1, 1 }
  0x15   : > { %p421_p3 = scmp.ne.s32.totalorder %s13618_s30, %s13614_s0  ;;  %p422_p4 = scmp.eq.s32.totalorder %s10545_s22, 1 }
  0x16   : > { %s13771_s25 = scalar_select %p403_p1, %s13622_s20, %s405_s23  }
  0x17   : > { %p13773_p5 = por %p416_p2, %p415_p0  ;;  %p13777_p6 = por %p422_p4, %p421_p3 }
  0x18   : > { %18086 = sst [smem:[#allocation12_spill]] %s13771_s25  ;;  %p10548_p7 = scmp.ge.s32.totalorder %s13626_s21, 1 }
  0x19   : > { %s18087_s3 = scalar_select %p13773_p5, 1, 0 }
  0x1a   : > { %s18089_s26 = scalar_select %p13777_p6, 1, 0 }
  0x1b   : > { %18088 = sst [smem:[#allocation13_spill]] %s18087_s3  ;;  %p548_p8 = scmp.lt.s32.totalorder %s13626_s21, 3 }
  0x1c   : > { %18090 = sst [smem:[#allocation14_spill]] %s18089_s26 }
  0x1d   : > { %p549_p9 = pnand %p10548_p7, %p548_p8 }
  0x1f   : > { %552 = sbr.rel (%p549_p9) target bundleno = 2667 (0xa6b), region = 88 }
  0x26   : > { %s18091_s29 = sld [smem:[#allocation53_spill]]  ;;  %p613_p10 = scmp.lt.s32.totalorder %s13756_s1, 1  ;;  %vm1687_vm0 = vcmask 523264   ;;  %vm10349_vm1 = vcmask 7168   ;;  %vm13630_vm2 = vmmov 0   ;;  %vm10094_vm3 = vcmask 261120  }
  0x27   : > { %s18092_s26 = sld [smem:[#allocation52_spill]]  ;;  %s18093_s21 = sld [smem:[#allocation55_spill]] }
  0x28   : > { %s13791_s24 = scalar_select %p613_p10, %s13756_s1, 1 }
  0x29   : > { %s18095_s28 = sld [smem:[#allocation54_spill]]  ;;  %s18103_s5 = sld [smem:[#allocation57_spill]] }
  0x2a   : > { %s18034_s27 = smul.u32 320, %s13791_s24  ;;  %s18180_s4 = sld [smem:[#allocation56_spill]] }
  0x2b   : > { %s18200_s6 = sld [smem:[#allocation58_spill]]  ;;  %s18201_s22 = smul.u32 320, %s13791_s24 }
  0x2c   : > { %v12806_v0 = vld [vmem:[%s18091_s29] sm:$0xff]   ;;  %v12807_v1 = vld [vmem:[%s18091_s29 + $0x8] sm:$0xff]   ;;  %v12808_v2 = vld [vmem:[%s18091_s29 + $0x10] sm:$0xff]   ;;  %s11315_s23 = sshll.u32 %s13756_s1, 4  ;;  %s18239_s24 = sld [smem:[#allocation60_spill]] }
  0x2d   : > { %11782 = vmatprep.subr.bf16.mxu0 %v12806_v0  ;;  %s13802_s0 = scalar_lea.vmem %s18092_s26, %s18034_s27  ;;  %v12809_v3 = vld [vmem:[%s18091_s29 + $0x18] sm:$0xff]   ;;  %v12810_v7 = vld [vmem:[%s18091_s29 + $0x20] sm:$0xff]   ;;  %v12811_v8 = vld [vmem:[%s18091_s29 + $0x28] sm:$0xff]   ;;  %s18094_s17 = smov %s18093_s21 }
  0x2e   : > { %11783 = vmatpush3.bf16.msra.mxu0 %v12806_v0  ;;  %v624_v4 = vld [vmem:[%s13802_s0] sm:$0xff]  ;;  %v625_v5 = vld [vmem:[%s13802_s0 + $0x8] sm:$0xff]  ;;  %v12812_v9 = vld [vmem:[%s18091_s29 + $0x30] sm:$0xff]   ;;  %s16938_s2 = scalar_lea.vmem %s18024_s18, %s18201_s22  ;;  %s17720_s22 = sand.u32 1, %s13618_s30  }
  0x2f   : > { %11784 = vmatprep.subr.bf16.mxu0 %v12807_v1  ;;  %v664_v6 = vpack.c.bf16 %v625_v5, %v624_v4  ;;  %v12814_v10 = vld [vmem:[%s18093_s21] sm:$0xff]   ;;  %v12813_v11 = vld [vmem:[%s18091_s29 + $0x38] sm:$0xff]   ;;  %v12815_v12 = vld [vmem:[%s18094_s17 + $0x8] sm:$0xff]   ;;  %s612_s20 = scalar_lea.vmem [#allocation4], %s17720_s22  ;;  %s10402_s26 = scalar_lea.sflag [#allocation5], %s17720_s22 }
  0x30   : > { %12554 = vmatprep.subr.bf16.mxu1 %v12814_v10  ;;  %v626_v13 = vld [vmem:[%s13802_s0 + $0x10] sm:$0xff]  ;;  %v627_v14 = vld [vmem:[%s13802_s0 + $0x18] sm:$0xff]  ;;  %v628_v15 = vld [vmem:[%s13802_s0 + $0x20] sm:$0xff] }
  0x31   : > { %11798 = vmatprep.mubr.bf16.mxu0 %v664_v6  ;;  %12558 = vmatpush3.bf16.msra.mxu1 %v12814_v10  ;;  %v629_v16 = vld [vmem:[%s13802_s0 + $0x28] sm:$0xff]  ;;  %v12816_v17 = vld [vmem:[%s18094_s17 + $0x10] sm:$0xff]   ;;  %v665_v18 = vpack.c.bf16 %v627_v14, %v626_v13  ;;  %v12817_v19 = vld [vmem:[%s18094_s17 + $0x18] sm:$0xff]  }
  0x32   : > { %11785 = vmatpush3.bf16.msra.mxu0 %v12807_v1  ;;  %12555 = vmatprep.subr.bf16.mxu1 %v12815_v12  ;;  %v666_v20 = vpack.c.bf16 %v629_v16, %v628_v15  ;;  %v630_v21 = vld [vmem:[%s13802_s0 + $0x30] sm:$0xff]  ;;  %v631_v22 = vld [vmem:[%s13802_s0 + $0x38] sm:$0xff]  ;;  %v632_v23 = vld [vmem:[%s13802_s0 + $0x40] sm:$0xff]  ;;  %s17759_s19 = scalar_lea.hbm %s18239_s24, %s11315_s23 }
  0x33   : > { %11786 = vmatprep.subr.bf16.mxu0 %v12808_v2  ;;  %v633_v24 = vld [vmem:[%s13802_s0 + $0x48] sm:$0xff]  ;;  %v667_v25 = vpack.c.bf16 %v631_v22, %v630_v21  ;;  %v634_v27 = vld [vmem:[%s13802_s0 + $0x50] sm:$0xff]  ;;  %v635_v28 = vld [vmem:[%s13802_s0 + $0x58] sm:$0xff] }
  0x34   : > { %v668_v26 = vpack.c.bf16 %v633_v24, %v632_v23  ;;  %v636_v29 = vld [vmem:[%s13802_s0 + $0x60] sm:$0xff]  ;;  %v637_v30 = vld [vmem:[%s13802_s0 + $0x68] sm:$0xff]  ;;  %v669_v31 = vpack.c.bf16 %v635_v28, %v634_v27  ;;  %v638_v33 = vld [vmem:[%s13802_s0 + $0x70] sm:$0xff] }
  0x35   : > { %12559 = vmatpush3.bf16.msra.mxu1 %v12815_v12  ;;  %v670_v32 = vpack.c.bf16 %v637_v30, %v636_v29  ;;  %v639_v34 = vld [vmem:[%s13802_s0 + $0x78] sm:$0xff]  ;;  %v640_v35 = vld [vmem:[%s13802_s0 + $0x80] sm:$0xff]  ;;  %v641_v36 = vld [vmem:[%s13802_s0 + $0x88] sm:$0xff] }
  0x36   : > { %11787 = vmatpush3.bf16.msra.mxu0 %v12808_v2  ;;  %12556 = vmatprep.subr.bf16.mxu1 %v12816_v17  ;;  %v671_v37 = vpack.c.bf16 %v639_v34, %v638_v33  ;;  %v672_v38 = vpack.c.bf16 %v641_v36, %v640_v35  ;;  %v642_v39 = vld [vmem:[%s13802_s0 + $0x90] sm:$0xff]  ;;  %v643_v40 = vld [vmem:[%s13802_s0 + $0x98] sm:$0xff]  ;;  %v644_v41 = vld [vmem:[%s13802_s0 + $0xa0] sm:$0xff] }
  0x37   : > { %11788 = vmatprep.subr.bf16.mxu0 %v12809_v3  ;;  %v645_v42 = vld [vmem:[%s13802_s0 + $0xa8] sm:$0xff]  ;;  %v673_v43 = vpack.c.bf16 %v643_v40, %v642_v39  ;;  %v646_v45 = vld [vmem:[%s13802_s0 + $0xb0] sm:$0xff]  ;;  %v647_v46 = vld [vmem:[%s13802_s0 + $0xb8] sm:$0xff] }
  0x38   : > { %v674_v44 = vpack.c.bf16 %v645_v42, %v644_v41  ;;  %v648_v47 = vld [vmem:[%s13802_s0 + $0xc0] sm:$0xff]  ;;  %v649_v48 = vld [vmem:[%s13802_s0 + $0xc8] sm:$0xff]  ;;  %v675_v49 = vpack.c.bf16 %v647_v46, %v646_v45  ;;  %v650_v51 = vld [vmem:[%s13802_s0 + $0xd0] sm:$0xff] }
  0x39   : > { %12560 = vmatpush3.bf16.msra.mxu1 %v12816_v17  ;;  %v676_v50 = vpack.c.bf16 %v649_v48, %v648_v47  ;;  %v651_v52 = vld [vmem:[%s13802_s0 + $0xd8] sm:$0xff]  ;;  %v652_v53 = vld [vmem:[%s13802_s0 + $0xe0] sm:$0xff]  ;;  %v653_v54 = vld [vmem:[%s13802_s0 + $0xe8] sm:$0xff] }
  0x3a   : > { %11789 = vmatpush3.bf16.msra.mxu0 %v12809_v3  ;;  %12557 = vmatprep.subr.bf16.mxu1 %v12817_v19  ;;  %v677_v55 = vpack.c.bf16 %v651_v52, %v650_v51  ;;  %v678_v56 = vpack.c.bf16 %v653_v54, %v652_v53  ;;  %v654_v57 = vld [vmem:[%s13802_s0 + $0xf0] sm:$0xff]  ;;  %v655_v58 = vld [vmem:[%s13802_s0 + $0xf8] sm:$0xff]  ;;  %v656_v59 = vld [vmem:[%s13802_s0 + $0x100] sm:$0xff] }
  0x3b   : > { %11790 = vmatprep.subr.bf16.mxu0 %v12810_v7  ;;  %v657_v60 = vld [vmem:[%s13802_s0 + $0x108] sm:$0xff]  ;;  %v679_v61 = vpack.c.bf16 %v655_v58, %v654_v57  ;;  %v658_v63 = vld [vmem:[%s13802_s0 + $0x110] sm:$0xff]  ;;  %v659_v0 = vld [vmem:[%s13802_s0 + $0x118] sm:$0xff] }
  0x3c   : > { %v680_v62 = vpack.c.bf16 %v657_v60, %v656_v59  ;;  %v660_v1 = vld [vmem:[%s13802_s0 + $0x120] sm:$0xff]  ;;  %v661_v2 = vld [vmem:[%s13802_s0 + $0x128] sm:$0xff]  ;;  %v681_v3 = vpack.c.bf16 %v659_v0, %v658_v63  ;;  %v662_v5 = vld [vmem:[%s13802_s0 + $0x130] sm:$0xff] }
  0x3d   : > { %12561 = vmatpush3.bf16.msra.mxu1 %v12817_v19  ;;  %v682_v4 = vpack.c.bf16 %v661_v2, %v660_v1  ;;  %v663_v6 = vld [vmem:[%s13802_s0 + $0x138] sm:$0xff] }
  0x3e   : > { %11791 = vmatpush3.bf16.msra.mxu0 %v12810_v7  ;;  %v683_v7 = vpack.c.bf16 %v663_v6, %v662_v5 }
  0x3f   : > { %11792 = vmatprep.subr.bf16.mxu0 %v12811_v8 }
  0x42   : > { %11793 = vmatpush3.bf16.msra.mxu0 %v12811_v8 }
  0x43   : > { %11794 = vmatprep.subr.bf16.mxu0 %v12812_v9 }
  0x46   : > { %11795 = vmatpush3.bf16.msra.mxu0 %v12812_v9  ;;  %v13876_v9 = vld [vmem:[%s18095_s28] ss:$0 sm:$0xff] }
  0x47   : > { %11796 = vmatprep.subr.bf16.mxu0 %v12813_v11 }
  0x4a   : > { %11797 = vmatpush3.bf16.msra.mxu0 %v12813_v11 }
  0x4b   : > { %11838 = vmatprep.subr.bf16.mxu0 %v12814_v10 }
  0x4d   : > { %11799 = vmatmul.mubr.bf16.vlgmr.msra.gmra.mrb[0].mxu0 %v665_v18 }
  0x4e   : > { %11802 = vmatprep.mubr.bf16.mxu0 %v666_v20  ;;  %11839 = vmatpush3.bf16.msra.mxu0 %v12814_v10 }
  0x4f   : > { %11840 = vmatprep.subr.bf16.mxu0 %v12815_v12 }
  0x52   : > { %11841 = vmatpush3.bf16.msra.mxu0 %v12815_v12 }
  0x53   : > { %11842 = vmatprep.subr.bf16.mxu0 %v12816_v17 }
  0x55   : > { %11803 = vmatmul.mubr.bf16.gmra.mrb[4].mxu0 %v667_v25 }
  0x56   : > { %11806 = vmatprep.mubr.bf16.mxu0 %v668_v26  ;;  %11843 = vmatpush3.bf16.msra.mxu0 %v12816_v17 }
  0x57   : > { %11844 = vmatprep.subr.bf16.mxu0 %v12817_v19 }
  0x5a   : > { %11845 = vmatpush3.bf16.msra.mxu0 %v12817_v19 }
  0x5d   : > { %11807 = vmatmul.mubr.bf16.gmra.mrb[8].mxu0 %v669_v31 }
  0x5e   : > { %11810 = vmatprep.mubr.bf16.mxu0 %v670_v32 }
  0x65   : > { %11811 = vmatmul.mubr.bf16.gmra.mrb[12].mxu0 %v671_v37 }
  0x66   : > { %11814 = vmatprep.mubr.bf16.mxu0 %v672_v38 }
  0x6d   : > { %11815 = vmatmul.mubr.bf16.gmra.mrb[16].mxu0 %v673_v43 }
  0x6e   : > { %11818 = vmatprep.mubr.bf16.mxu0 %v674_v44 }
  0x75   : > { %11819 = vmatmul.mubr.bf16.gmra.mrb[20].mxu0 %v675_v49 }
  0x76   : > { %11822 = vmatprep.mubr.bf16.mxu0 %v676_v50 }
  0x7d   : > { %11823 = vmatmul.mubr.bf16.gmra.mrb[24].mxu0 %v677_v55 }
  0x7e   : > { %11826 = vmatprep.mubr.bf16.mxu0 %v678_v56 }
  0x85   : > { %11827 = vmatmul.mubr.bf16.gmra.mrb[28].mxu0 %v679_v61 }
  0x86   : > { %11830 = vmatprep.mubr.bf16.mxu0 %v680_v62 }
  0x8d   : > { %11831 = vmatmul.mubr.bf16.gmra.mrb[32].mxu0 %v681_v3 }
  0x8e   : > { %11834 = vmatprep.mubr.bf16.mxu0 %v682_v4 }
  0x95   : > { %11835 = vmatmul.mubr.bf16.gmra.mrb[36].mxu0 %v683_v7 }
 0x120   : > { %v13871_v8 = vpop.f32.mrb[0].mxu0 }
 0x121   : > { %v13878_v10 = vpop.f32.mrb[1].mxu0  ;;  %v943_v11 = vsub.f32 %v13871_v8, %v13871_v8 }
 0x122   : > { %18096 = vst [vmem:[#allocation15_spill] sm:$0xff] %v13878_v10  ;;  %v13882_v12 = vpop.f32.mrb[2].mxu0  ;;  %v941_v13 = vsub.f32 %v13878_v10, %v13878_v10 }
 0x123   : > { %v13886_v14 = vpop.f32.mrb[3].mxu0  ;;  %v944_v15 = vsub.f32 %v13882_v12, %v13882_v12  ;;  %v1150_v16 = vadd.f32 %v13876_v9, %v943_v11 }
 0x124   : > { %18097 = vst [vmem:[#allocation16_spill] sm:$0xff] %v13886_v14  ;;  %v942_v17 = vsub.f32 %v13886_v14, %v13886_v14  ;;  %v1148_v18 = vadd.f32 %v13876_v9, %v941_v13 }
 0x125   : > { %v1151_v19 = vadd.f32 %v13876_v9, %v944_v15  ;;  %v1350_v21 = vmax.f32 %v1150_v16, 0.0 }
 0x126   : > { %v1149_v20 = vadd.f32 %v13876_v9, %v942_v17  ;;  %v1348_v24 = vmax.f32 %v1148_v18, 0.0 }
 0x127   : > { %v1351_v22 = vmax.f32 %v1151_v19, 0.0 }
 0x128   : > { %v13896_v23 = vpop.f32.mrb[4].mxu0  ;;  %v1349_v25 = vmax.f32 %v1149_v20, 0.0 }
 0x129   : > { %v13898_v26 = vpop.f32.mrb[5].mxu0  ;;  %v1549_v27 = vpack.c.bf16 %v1351_v22, %v1350_v21  ;;  %v947_v28 = vsub.f32 %v13896_v23, %v13896_v23 }
 0x12a   : > { %v13902_v29 = vpop.f32.mrb[6].mxu0  ;;  %v1548_v30 = vpack.c.bf16 %v1349_v25, %v1348_v24  ;;  %v945_v31 = vsub.f32 %v13898_v26, %v13898_v26 }
 0x12b   : > { %v13906_v32 = vpop.f32.mrb[7].mxu0  ;;  %v948_v33 = vsub.f32 %v13902_v29, %v13902_v29  ;;  %v1154_v34 = vadd.f32 %v13876_v9, %v947_v28 }
 0x12c   : > { %11846 = vmatprep.mubr.msk.bf16.mxu0 %vm1687_vm0, %v1548_v30  ;;  %v946_v35 = vsub.f32 %v13906_v32, %v13906_v32  ;;  %v1152_v36 = vadd.f32 %v13876_v9, %v945_v31 }
 0x12d   : > { %11847 = vmatmul.mubr.msk.bf16.vlgmr.msra.gmra.mrb[40].mxu0 %vm1687_vm0, %v1549_v27  ;;  %v1155_v37 = vadd.f32 %v13876_v9, %v948_v33  ;;  %v1354_v39 = vmax.f32 %v1154_v34, 0.0 }
 0x12e   : > { %v1153_v38 = vadd.f32 %v13876_v9, %v946_v35  ;;  %v1352_v42 = vmax.f32 %v1152_v36, 0.0 }
 0x12f   : > { %v1355_v40 = vmax.f32 %v1155_v37, 0.0 }
 0x130   : > { %v13918_v41 = vpop.f32.mrb[8].mxu0  ;;  %v1353_v43 = vmax.f32 %v1153_v38, 0.0 }
 0x131   : > { %v13920_v44 = vpop.f32.mrb[9].mxu0  ;;  %v1551_v45 = vpack.c.bf16 %v1355_v40, %v1354_v39  ;;  %v951_v46 = vsub.f32 %v13918_v41, %v13871_v8  ;;  %v983_v47 = vsub.f32 %v13871_v8, %v13918_v41  ;;  %v991_v48 = vsub.f32 %v13918_v41, %v13918_v41 }
 0x132   : > { %v13928_v49 = vpop.f32.mrb[10].mxu0  ;;  %v1550_v50 = vpack.c.bf16 %v1353_v43, %v1352_v42  ;;  %v949_v51 = vsub.f32 %v13920_v44, %v13878_v10  ;;  %v981_v52 = vsub.f32 %v13878_v10, %v13920_v44  ;;  %v989_v53 = vsub.f32 %v13920_v44, %v13920_v44 }
 0x133   : > { %v13936_v54 = vpop.f32.mrb[11].mxu0  ;;  %v952_v55 = vsub.f32 %v13928_v49, %v13882_v12  ;;  %v1158_v56 = vadd.f32 %v13876_v9, %v951_v46  ;;  %v984_v57 = vsub.f32 %v13882_v12, %v13928_v49  ;;  %v1190_v58 = vadd.f32 %v13876_v9, %v983_v47 }
 0x134   : > { %11850 = vmatprep.mubr.msk.bf16.mxu0 %vm1687_vm0, %v1550_v50  ;;  %v950_v59 = vsub.f32 %v13936_v54, %v13886_v14  ;;  %v1156_v60 = vadd.f32 %v13876_v9, %v949_v51  ;;  %v982_v61 = vsub.f32 %v13886_v14, %v13936_v54  ;;  %v1188_v62 = vadd.f32 %v13876_v9, %v981_v52 }
 0x135   : > { %11851 = vmatmul.mubr.msk.bf16.gmra.mrb[44].mxu0 %vm1687_vm0, %v1551_v45  ;;  %v1159_v63 = vadd.f32 %v13876_v9, %v952_v55  ;;  %v1358_v0 = vmax.f32 %v1158_v56, 0.0  ;;  %v1191_v1 = vadd.f32 %v13876_v9, %v984_v57  ;;  %v1390_v2 = vmax.f32 %v1190_v58, 0.0 }
 0x136   : > { %v1157_v3 = vadd.f32 %v13876_v9, %v950_v59  ;;  %v1356_v4 = vmax.f32 %v1156_v60, 0.0  ;;  %v1189_v5 = vadd.f32 %v13876_v9, %v982_v61  ;;  %v1388_v6 = vmax.f32 %v1188_v62, 0.0 }
 0x137   : > { %v1359_v7 = vmax.f32 %v1159_v63, 0.0  ;;  %v1391_v11 = vmax.f32 %v1191_v1, 0.0  ;;  %v990_v13 = vsub.f32 %v13936_v54, %v13936_v54  ;;  %v1196_v15 = vadd.f32 %v13876_v9, %v989_v53 }
 0x138   : > { %v13959_v16 = vpop.f32.mrb[12].mxu0  ;;  %v1357_v17 = vmax.f32 %v1157_v3, 0.0  ;;  %v1389_v18 = vmax.f32 %v1189_v5, 0.0  ;;  %v992_v19 = vsub.f32 %v13928_v49, %v13928_v49  ;;  %v1198_v20 = vadd.f32 %v13876_v9, %v991_v48 }
 0x139   : > { %v13964_v21 = vpop.f32.mrb[13].mxu0  ;;  %v1553_v22 = vpack.c.bf16 %v1359_v7, %v1358_v0  ;;  %v955_v24 = vsub.f32 %v13959_v16, %v13896_v23  ;;  %v13968_v25 = vpack.c.bf16 %v1391_v11, %v1390_v2  ;;  %v987_v27 = vsub.f32 %v13896_v23, %v13959_v16 }
 0x13a   : > { %v13972_v28 = vpop.f32.mrb[14].mxu0  ;;  %v1552_v30 = vpack.c.bf16 %v1357_v17, %v1356_v4  ;;  %v953_v31 = vsub.f32 %v13964_v21, %v13898_v26  ;;  %v13976_v33 = vpack.c.bf16 %v1389_v18, %v1388_v6  ;;  %v985_v34 = vsub.f32 %v13898_v26, %v13964_v21 }
 0x13b   : > { %v13980_v35 = vpop.f32.mrb[15].mxu0  ;;  %v956_v36 = vsub.f32 %v13972_v28, %v13902_v29  ;;  %v1162_v37 = vadd.f32 %v13876_v9, %v955_v24  ;;  %v988_v38 = vsub.f32 %v13902_v29, %v13972_v28  ;;  %v1194_v39 = vadd.f32 %v13876_v9, %v987_v27 }
 0x13c   : > { %11854 = vmatprep.mubr.msk.bf16.mxu0 %vm1687_vm0, %v1552_v30  ;;  %v954_v40 = vsub.f32 %v13980_v35, %v13906_v32  ;;  %v1160_v42 = vadd.f32 %v13876_v9, %v953_v31  ;;  %v986_v43 = vsub.f32 %v13906_v32, %v13980_v35  ;;  %v1192_v45 = vadd.f32 %v13876_v9, %v985_v34 }
 0x13d   : > { %11855 = vmatmul.mubr.msk.bf16.gmra.mrb[48].mxu0 %vm1687_vm0, %v1553_v22  ;;  %v1163_v46 = vadd.f32 %v13876_v9, %v956_v36  ;;  %v1362_v47 = vmax.f32 %v1162_v37, 0.0  ;;  %v1195_v48 = vadd.f32 %v13876_v9, %v988_v38  ;;  %v1394_v50 = vmax.f32 %v1194_v39, 0.0 }
 0x13e   : > { %v1161_v51 = vadd.f32 %v13876_v9, %v954_v40  ;;  %v1360_v52 = vmax.f32 %v1160_v42, 0.0  ;;  %v1193_v53 = vadd.f32 %v13876_v9, %v986_v43  ;;  %v1392_v55 = vmax.f32 %v1192_v45, 0.0 }
 0x13f   : > { %v1363_v56 = vmax.f32 %v1163_v46, 0.0  ;;  %v1395_v57 = vmax.f32 %v1195_v48, 0.0  ;;  %v1197_v58 = vadd.f32 %v13876_v9, %v990_v13  ;;  %v1396_v59 = vmax.f32 %v1196_v15, 0.0 }
 0x140   : > { %v14001_v60 = vpop.f32.mrb[16].mxu0  ;;  %v1361_v61 = vmax.f32 %v1161_v51, 0.0  ;;  %v1393_v62 = vmax.f32 %v1193_v53, 0.0  ;;  %v1199_v63 = vadd.f32 %v13876_v9, %v992_v19  ;;  %v1398_v0 = vmax.f32 %v1198_v20, 0.0 }
 0x141   : > { %v14004_v1 = vpop.f32.mrb[17].mxu0  ;;  %v1555_v2 = vpack.c.bf16 %v1363_v56, %v1362_v47  ;;  %v959_v3 = vsub.f32 %v14001_v60, %v13871_v8  ;;  %v14008_v4 = vpack.c.bf16 %v1395_v57, %v1394_v50  ;;  %v1397_v5 = vmax.f32 %v1197_v58, 0.0 }
 0x142   : > { %v14010_v6 = vpop.f32.mrb[18].mxu0  ;;  %v1554_v7 = vpack.c.bf16 %v1361_v61, %v1360_v52  ;;  %v957_v11 = vsub.f32 %v14004_v1, %v13878_v10  ;;  %v14014_v13 = vpack.c.bf16 %v1393_v62, %v1392_v55  ;;  %v1399_v15 = vmax.f32 %v1199_v63, 0.0 }
 0x143   : > { %v14016_v17 = vpop.f32.mrb[19].mxu0  ;;  %v960_v18 = vsub.f32 %v14010_v6, %v13882_v12  ;;  %v1166_v19 = vadd.f32 %v13876_v9, %v959_v3  ;;  %v14021_v20 = vpack.c.bf16 %v1397_v5, %v1396_v59  ;;  %v993_v22 = vsub.f32 %v13964_v21, %v13964_v21 }
 0x144   : > { %11858 = vmatprep.mubr.msk.bf16.mxu0 %vm1687_vm0, %v1554_v7  ;;  %v958_v24 = vsub.f32 %v14016_v17, %v13886_v14  ;;  %v1164_v27 = vadd.f32 %v13876_v9, %v957_v11  ;;  %v14029_v30 = vpack.c.bf16 %v1399_v15, %v1398_v0  ;;  %v994_v31 = vsub.f32 %v13980_v35, %v13980_v35 }
 0x145   : > { %11859 = vmatmul.mubr.msk.bf16.gmra.mrb[52].mxu0 %vm1687_vm0, %v1555_v2  ;;  %v1167_v34 = vadd.f32 %v13876_v9, %v960_v18  ;;  %v1366_v36 = vmax.f32 %v1166_v19, 0.0  ;;  %v1200_v37 = vadd.f32 %v13876_v9, %v993_v22  ;;  %v995_v38 = vsub.f32 %v13959_v16, %v13959_v16 }
 0x146   : > { %v1165_v39 = vadd.f32 %v13876_v9, %v958_v24  ;;  %v1364_v40 = vmax.f32 %v1164_v27, 0.0  ;;  %v1201_v42 = vadd.f32 %v13876_v9, %v994_v31  ;;  %v996_v43 = vsub.f32 %v13972_v28, %v13972_v28 }
 0x147   : > { %v1367_v45 = vmax.f32 %v1167_v34, 0.0  ;;  %v1400_v46 = vmax.f32 %v1200_v37, 0.0  ;;  %v1202_v47 = vadd.f32 %v13876_v9, %v995_v38  ;;  %v997_v48 = vsub.f32 %v14004_v1, %v13920_v44 }
 0x148   : > { %v14045_v50 = vpop.f32.mrb[20].mxu0  ;;  %v1365_v51 = vmax.f32 %v1165_v39, 0.0  ;;  %v1401_v52 = vmax.f32 %v1201_v42, 0.0  ;;  %v1203_v53 = vadd.f32 %v13876_v9, %v996_v43  ;;  %v998_v55 = vsub.f32 %v14016_v17, %v13936_v54 }
 0x149   : > { %v14050_v56 = vpop.f32.mrb[21].mxu0  ;;  %v1557_v57 = vpack.c.bf16 %v1367_v45, %v1366_v36  ;;  %v963_v58 = vsub.f32 %v14045_v50, %v13896_v23  ;;  %v1402_v59 = vmax.f32 %v1202_v47, 0.0  ;;  %v1204_v61 = vadd.f32 %v13876_v9, %v997_v48 }
 0x14a   : > { %v14055_v62 = vpop.f32.mrb[22].mxu0  ;;  %v1556_v63 = vpack.c.bf16 %v1365_v51, %v1364_v40  ;;  %v961_v0 = vsub.f32 %v14050_v56, %v13898_v26  ;;  %v14059_v2 = vpack.c.bf16 %v1401_v52, %v1400_v46  ;;  %v1403_v3 = vmax.f32 %v1203_v53, 0.0 }
 0x14b   : > { %v14061_v5 = vpop.f32.mrb[23].mxu0  ;;  %v964_v7 = vsub.f32 %v14055_v62, %v13902_v29  ;;  %v1170_v11 = vadd.f32 %v13876_v9, %v963_v58  ;;  %v1205_v15 = vadd.f32 %v13876_v9, %v998_v55  ;;  %v1404_v18 = vmax.f32 %v1204_v61, 0.0 }
 0x14c   : > { %18098 = vst [vmem:[#allocation17_spill] sm:$0xff] %v14059_v2  ;;  %11862 = vmatprep.mubr.msk.bf16.mxu0 %vm1687_vm0, %v1556_v63  ;;  %v962_v19 = vsub.f32 %v14061_v5, %v13906_v32  ;;  %v1168_v22 = vadd.f32 %v13876_v9, %v961_v0  ;;  %v14071_v24 = vpack.c.bf16 %v1403_v3, %v1402_v59 }
 0x14d   : > { %v999_v27 = vsub.f32 %v14001_v60, %v13918_v41  ;;  %11863 = vmatmul.mubr.msk.bf16.gmra.mrb[56].mxu0 %vm1687_vm0, %v1557_v57  ;;  %v1171_v31 = vadd.f32 %v13876_v9, %v964_v7  ;;  %v1370_v34 = vmax.f32 %v1170_v11, 0.0  ;;  %v1405_v36 = vmax.f32 %v1205_v15, 0.0 }
 0x14e   : > { %18099 = vst [vmem:[#allocation18_spill] sm:$0xff] %v14071_v24  ;;  %v1000_v37 = vsub.f32 %v14010_v6, %v13928_v49  ;;  %v1169_v38 = vadd.f32 %v13876_v9, %v962_v19  ;;  %v1368_v39 = vmax.f32 %v1168_v22, 0.0  ;;  %v1001_v42 = vsub.f32 %v14050_v56, %v13964_v21 }
 0x14f   : > { %v1206_v40 = vadd.f32 %v13876_v9, %v999_v27  ;;  %v1371_v43 = vmax.f32 %v1171_v31, 0.0  ;;  %v14083_v45 = vpack.c.bf16 %v1405_v36, %v1404_v18  ;;  %v1002_v47 = vsub.f32 %v14061_v5, %v13980_v35 }
 0x150   : > { %v1207_v46 = vadd.f32 %v13876_v9, %v1000_v37  ;;  %v14088_v48 = vpop.f32.mrb[24].mxu0  ;;  %v1369_v51 = vmax.f32 %v1169_v38, 0.0  ;;  %v1208_v53 = vadd.f32 %v13876_v9, %v1001_v42  ;;  %v1003_v55 = vsub.f32 %v14045_v50, %v13959_v16 }
 0x151   : > { %18100 = vst [vmem:[#allocation19_spill] sm:$0xff] %v14083_v45  ;;  %v1406_v52 = vmax.f32 %v1206_v40, 0.0  ;;  %v14093_v57 = vpop.f32.mrb[25].mxu0  ;;  %v1559_v58 = vpack.c.bf16 %v1371_v43, %v1370_v34  ;;  %v967_v59 = vsub.f32 %v14088_v48, %v13871_v8  ;;  %v1209_v63 = vadd.f32 %v13876_v9, %v1002_v47 }
 0x152   : > { %v1407_v61 = vmax.f32 %v1207_v46, 0.0  ;;  %v14098_v0 = vpop.f32.mrb[26].mxu0  ;;  %v1558_v3 = vpack.c.bf16 %v1369_v51, %v1368_v39  ;;  %v965_v7 = vsub.f32 %v14093_v57, %v13878_v10  ;;  %v1408_v11 = vmax.f32 %v1208_v53, 0.0  ;;  %v12818_v53 = vld [vmem:[%s18103_s5] sm:$0xff]  }
 0x153   : > { %v1004_v15 = vsub.f32 %v14055_v62, %v13972_v28  ;;  %v14104_v18 = vpop.f32.mrb[27].mxu0  ;;  %v968_v19 = vsub.f32 %v14098_v0, %v13882_v12  ;;  %v1174_v22 = vadd.f32 %v13876_v9, %v967_v59  ;;  %v1409_v31 = vmax.f32 %v1209_v63, 0.0  ;;  %12046 = vmatprep.subr.bf16.mxu0 %v12818_v53 }
 0x154   : > { %v14109_v27 = vpack.c.bf16 %v1407_v61, %v1406_v52  ;;  %11866 = vmatprep.mubr.msk.bf16.mxu0 %vm1687_vm0, %v1558_v3  ;;  %v966_v34 = vsub.f32 %v14104_v18, %v13886_v14  ;;  %v1172_v36 = vadd.f32 %v13876_v9, %v965_v7  ;;  %v1210_v37 = vadd.f32 %v13876_v9, %v1003_v55 }
 0x155   : > { %v1211_v38 = vadd.f32 %v13876_v9, %v1004_v15  ;;  %11867 = vmatmul.mubr.msk.bf16.gmra.mrb[60].mxu0 %vm1687_vm0, %v1559_v58  ;;  %v1175_v39 = vadd.f32 %v13876_v9, %v968_v19  ;;  %v1374_v40 = vmax.f32 %v1174_v22, 0.0  ;;  %v14119_v42 = vpack.c.bf16 %v1409_v31, %v1408_v11 }
 0x156   : > { %18101 = vst [vmem:[#allocation20_spill] sm:$0xff] %v14109_v27  ;;  %v1005_v43 = vsub.f32 %v14093_v57, %v13920_v44  ;;  %v1173_v46 = vadd.f32 %v13876_v9, %v966_v34  ;;  %v1372_v47 = vmax.f32 %v1172_v36, 0.0  ;;  %v1410_v51 = vmax.f32 %v1210_v37, 0.0  ;;  %12047 = vmatpush3.bf16.msra.mxu0 %v12818_v53 }
 0x157   : > { %18102 = vst [vmem:[#allocation21_spill] sm:$0xff] %v14119_v42  ;;  %v1411_v52 = vmax.f32 %v1211_v38, 0.0  ;;  %v1375_v55 = vmax.f32 %v1175_v39, 0.0  ;;  %v1006_v58 = vsub.f32 %v14104_v18, %v13936_v54  ;;  %v1007_v61 = vsub.f32 %v14088_v48, %v13918_v41 }
 0x158   : > { %v1212_v59 = vadd.f32 %v13876_v9, %v1005_v43  ;;  %v14132_v63 = vpop.f32.mrb[28].mxu0  ;;  %v1373_v3 = vmax.f32 %v1173_v46, 0.0  ;;  %v1008_v11 = vsub.f32 %v14098_v0, %v13928_v49  ;;  %v1021_v15 = vsub.f32 %v13878_v10, %v14004_v1 }
 0x159   : > { %v14134_v7 = vpack.c.bf16 %v1411_v52, %v1410_v51  ;;  %v14140_v19 = vpop.f32.mrb[29].mxu0  ;;  %v1561_v22 = vpack.c.bf16 %v1375_v55, %v1374_v40  ;;  %v971_v31 = vsub.f32 %v14132_v63, %v13896_v23  ;;  %v1213_v34 = vadd.f32 %v13876_v9, %v1006_v58 }
 0x15a   : > { %v1412_v36 = vmax.f32 %v1212_v59, 0.0  ;;  %v14145_v37 = vpop.f32.mrb[30].mxu0  ;;  %v1560_v38 = vpack.c.bf16 %v1373_v3, %v1372_v47  ;;  %v969_v39 = vsub.f32 %v14140_v19, %v13898_v26  ;;  %v1214_v43 = vadd.f32 %v13876_v9, %v1007_v61 }
 0x15b   : > { %18104 = vst [vmem:[#allocation22_spill] sm:$0xff] %v14134_v7  ;;  %v1215_v46 = vadd.f32 %v13876_v9, %v1008_v11  ;;  %v14151_v51 = vpop.f32.mrb[31].mxu0  ;;  %v972_v40 = vsub.f32 %v14145_v37, %v13902_v29  ;;  %v1178_v52 = vadd.f32 %v13876_v9, %v971_v31  ;;  %v1413_v55 = vmax.f32 %v1213_v34, 0.0 }
 0x15c   : > { %v1009_v53 = vsub.f32 %v14140_v19, %v13964_v21  ;;  %11870 = vmatprep.mubr.msk.bf16.mxu1 %vm1687_vm0, %v1560_v38  ;;  %v970_v47 = vsub.f32 %v14151_v51, %v13906_v32  ;;  %v1176_v58 = vadd.f32 %v13876_v9, %v969_v39  ;;  %v1414_v59 = vmax.f32 %v1214_v43, 0.0 }
 0x15d   : > { %v1415_v61 = vmax.f32 %v1215_v46, 0.0  ;;  %11871 = vmatmul.mubr.msk.bf16.vlgmr.msra.gmra.mrb[0].mxu1 %vm1687_vm0, %v1561_v22  ;;  %v1179_v3 = vadd.f32 %v13876_v9, %v972_v40  ;;  %v1378_v11 = vmax.f32 %v1178_v52, 0.0  ;;  %v14164_v7 = vpack.c.bf16 %v1413_v55, %v1412_v36 }
 0x15e   : > { %v1010_v31 = vsub.f32 %v14151_v51, %v13980_v35  ;;  %v1177_v34 = vadd.f32 %v13876_v9, %v970_v47  ;;  %v1376_v38 = vmax.f32 %v1176_v58, 0.0  ;;  %v1216_v27 = vadd.f32 %v13876_v9, %v1009_v53 }
 0x15f   : > { %18105 = vst [vmem:[#allocation23_spill] sm:$0xff] %v14164_v7  ;;  %v14169_v42 = vpack.c.bf16 %v1415_v61, %v1414_v59  ;;  %v1379_v39 = vmax.f32 %v1179_v3, 0.0  ;;  %v1011_v22 = vsub.f32 %v14132_v63, %v13959_v16  ;;  %v1012_v36 = vsub.f32 %v14145_v37, %v13972_v28 }
 0x160   : > { %v1217_v43 = vadd.f32 %v13876_v9, %v1010_v31  ;;  %v14177_v46 = vpop.f32.mrb[32].mxu0  ;;  %v1377_v40 = vmax.f32 %v1177_v34, 0.0  ;;  %v1416_v52 = vmax.f32 %v1216_v27, 0.0  ;;  %v1022_v55 = vsub.f32 %v13886_v14, %v14016_v17 }
 0x161   : > { %18106 = vst [vmem:[#allocation24_spill] sm:$0xff] %v14169_v42  ;;  %v14182_v47 = vadd.f32 %v13876_v9, %v1021_v15  ;;  %v14184_v53 = vpop.f32.mrb[33].mxu0  ;;  %v1563_v58 = vpack.c.bf16 %v1379_v39, %v1378_v11  ;;  %v975_v59 = vsub.f32 %v14177_v46, %v13871_v8  ;;  %v1218_v3 = vadd.f32 %v13876_v9, %v1011_v22 }
 0x162   : > { %v1417_v61 = vmax.f32 %v1217_v43, 0.0  ;;  %v14189_v31 = vpop.f32.mrb[34].mxu0  ;;  %v1562_v42 = vpack.c.bf16 %v1377_v40, %v1376_v38  ;;  %v973_v27 = vsub.f32 %v14184_v53, %v13878_v10  ;;  %v1219_v34 = vadd.f32 %v13876_v9, %v1012_v36 }
 0x163   : > { %v1013_v15 = vsub.f32 %v14184_v53, %v13920_v44  ;;  %v14196_v7 = vpop.f32.mrb[35].mxu0  ;;  %v976_v11 = vsub.f32 %v14189_v31, %v13882_v12  ;;  %v1182_v39 = vadd.f32 %v13876_v9, %v975_v59  ;;  %v1418_v22 = vmax.f32 %v1218_v3, 0.0 }
 0x164   : > { %v14201_v43 = vpack.c.bf16 %v1417_v61, %v1416_v52  ;;  %11874 = vmatprep.mubr.msk.bf16.mxu1 %vm1687_vm0, %v1562_v42  ;;  %v974_v38 = vsub.f32 %v14196_v7, %v13886_v14  ;;  %v1180_v36 = vadd.f32 %v13876_v9, %v973_v27  ;;  %v1419_v40 = vmax.f32 %v1219_v34, 0.0  ;;  %v12819_v34 = vld [vmem:[%s18103_s5 + $0x8] sm:$0xff]  }
 0x165   : > { %v1014_v45 = vsub.f32 %v14196_v7, %v13936_v54  ;;  %11875 = vmatmul.mubr.msk.bf16.gmra.mrb[4].mxu1 %vm1687_vm0, %v1563_v58  ;;  %v1183_v24 = vadd.f32 %v13876_v9, %v976_v11  ;;  %v1382_v10 = vmax.f32 %v1182_v39, 0.0  ;;  %v1220_v52 = vadd.f32 %v13876_v9, %v1013_v15  ;;  %12048 = vmatprep.subr.bf16.mxu0 %v12819_v34 }
 0x166   : > { %18107 = vst [vmem:[#allocation25_spill] sm:$0xff] %v14201_v43  ;;  %v1015_v59 = vsub.f32 %v14177_v46, %v13918_v41  ;;  %v1181_v42 = vadd.f32 %v13876_v9, %v974_v38  ;;  %v1380_v61 = vmax.f32 %v1180_v36, 0.0  ;;  %v14215_v3 = vpack.c.bf16 %v1419_v40, %v1418_v22  ;;  %12049 = vmatpush3.bf16.msra.mxu0 %v12819_v34 }
 0x167   : > { %v1221_v27 = vadd.f32 %v13876_v9, %v1014_v45  ;;  %v1383_v58 = vmax.f32 %v1183_v24, 0.0  ;;  %v1420_v43 = vmax.f32 %v1220_v52, 0.0  ;;  %v1016_v11 = vsub.f32 %v14189_v31, %v13928_v49 }
 0x168   : > { %18108 = vst [vmem:[#allocation26_spill] sm:$0xff] %v14215_v3  ;;  %v1222_v15 = vadd.f32 %v13876_v9, %v1015_v59  ;;  %v14224_v39 = vpop.f32.mrb[36].mxu0  ;;  %v1381_v14 = vmax.f32 %v1181_v42, 0.0  ;;  %v1229_v22 = vadd.f32 %v13876_v9, %v1022_v55  ;;  %v1428_v36 = vmax.f32 %v14182_v47, 0.0 }
 0x169   : > { %18109 = vst [vmem:[#allocation27_spill] sm:$0xff] %v14224_v39  ;;  %v1421_v38 = vmax.f32 %v1221_v27, 0.0  ;;  %v14228_v45 = vpop.f32.mrb[37].mxu0  ;;  %v1565_v40 = vpack.c.bf16 %v1383_v58, %v1382_v10  ;;  %v979_v24 = vsub.f32 %v14224_v39, %v13896_v23  ;;  %v1223_v52 = vadd.f32 %v13876_v9, %v1016_v11 }
 0x16a   : > { %18110 = vst [vmem:[#allocation28_spill] sm:$0xff] %v14228_v45  ;;  %v1422_v3 = vmax.f32 %v1222_v15, 0.0  ;;  %v14233_v59 = vpop.f32.mrb[38].mxu0  ;;  %v1564_v2 = vpack.c.bf16 %v1381_v14, %v1380_v61  ;;  %v977_v42 = vsub.f32 %v14228_v45, %v13898_v26  ;;  %v1017_v47 = vsub.f32 %v14228_v45, %v13964_v21 }
 0x16b   : > { %18111 = vst [vmem:[#allocation29_spill] sm:$0xff] %v14233_v59  ;;  %v14237_v55 = vpack.c.bf16 %v1421_v38, %v1420_v43  ;;  %v14241_v27 = vpop.f32.mrb[39].mxu0  ;;  %v980_v10 = vsub.f32 %v14233_v59, %v13902_v29  ;;  %v1186_v58 = vadd.f32 %v13876_v9, %v979_v24  ;;  %v1423_v11 = vmax.f32 %v1223_v52, 0.0 }
 0x16c   : > { %18113 = vst [vmem:[#allocation31_spill] sm:$0xff] %v14241_v27  ;;  %v1019_v34 = vsub.f32 %v14224_v39, %v13959_v16  ;;  %11878 = vmatprep.mubr.msk.bf16.mxu1 %vm1687_vm0, %v1564_v2  ;;  %v978_v14 = vsub.f32 %v14241_v27, %v13906_v32  ;;  %v1184_v43 = vadd.f32 %v13876_v9, %v977_v42 }
 0x16d   : > { %18112 = vst [vmem:[#allocation30_spill] sm:$0xff] %v14237_v55  ;;  %v1018_v61 = vsub.f32 %v14241_v27, %v13980_v35  ;;  %v1224_v15 = vadd.f32 %v13876_v9, %v1017_v47  ;;  %11879 = vmatmul.mubr.msk.bf16.gmra.mrb[8].mxu1 %vm1687_vm0, %v1565_v40  ;;  %v1187_v38 = vadd.f32 %v13876_v9, %v980_v10  ;;  %v1386_v24 = vmax.f32 %v1186_v58, 0.0  ;;  %v12820_v47 = vld [vmem:[%s18103_s5 + $0x10] sm:$0xff]  }
 0x16e   : > { %v14257_v52 = vpack.c.bf16 %v1423_v11, %v1422_v3  ;;  %v1020_v2 = vsub.f32 %v14233_v59, %v13972_v28  ;;  %v1185_v55 = vadd.f32 %v13876_v9, %v978_v14  ;;  %v1384_v39 = vmax.f32 %v1184_v43, 0.0  ;;  %12050 = vmatprep.subr.bf16.mxu0 %v12820_v47 }
 0x16f   : > { %v1225_v42 = vadd.f32 %v13876_v9, %v1018_v61  ;;  %v1424_v45 = vmax.f32 %v1224_v15, 0.0  ;;  %v1387_v27 = vmax.f32 %v1187_v38, 0.0  ;;  %v1226_v40 = vadd.f32 %v13876_v9, %v1019_v34  ;;  %12051 = vmatpush3.bf16.msra.mxu0 %v12820_v47 }
 0x170   : > { %18114 = vst [vmem:[#allocation32_spill] sm:$0xff] %v14257_v52  ;;  %v1227_v10 = vadd.f32 %v13876_v9, %v1020_v2  ;;  %v1429_v3 = vmax.f32 %v1229_v22, 0.0  ;;  %v1385_v58 = vmax.f32 %v1185_v55, 0.0  ;;  %v1023_v52 = vsub.f32 %v13871_v8, %v14001_v60 }
 0x171   : > { %v1425_v11 = vmax.f32 %v1225_v42, 0.0  ;;  %v1024_v14 = vsub.f32 %v13882_v12, %v14010_v6  ;;  %v1567_v43 = vpack.c.bf16 %v1387_v27, %v1386_v24  ;;  %v1426_v61 = vmax.f32 %v1226_v40, 0.0 }
 0x172   : > { %v1427_v15 = vmax.f32 %v1227_v10, 0.0  ;;  %v14272_v59 = vpack.c.bf16 %v1429_v3, %v1428_v36  ;;  %v1566_v38 = vpack.c.bf16 %v1385_v58, %v1384_v39  ;;  %v1230_v22 = vadd.f32 %v13876_v9, %v1023_v52 }
 0x173   : > { %v14274_v34 = vpack.c.bf16 %v1425_v11, %v1424_v45  ;;  %v1231_v55 = vadd.f32 %v13876_v9, %v1024_v14  ;;  %v1025_v42 = vsub.f32 %v13898_v26, %v14050_v56  ;;  %v1026_v27 = vsub.f32 %v13906_v32, %v14061_v5 }
 0x174   : > { %v14278_v2 = vpack.c.bf16 %v1427_v15, %v1426_v61  ;;  %v1027_v36 = vsub.f32 %v13896_v23, %v14045_v50  ;;  %11882 = vmatprep.mubr.msk.bf16.mxu1 %vm1687_vm0, %v1566_v38  ;;  %v1430_v39 = vmax.f32 %v1230_v22, 0.0  ;;  %v1028_v24 = vsub.f32 %v13902_v29, %v14055_v62 }
 0x175   : > { %v1431_v45 = vmax.f32 %v1231_v55, 0.0  ;;  %v1029_v52 = vsub.f32 %v13920_v44, %v14004_v1  ;;  %11883 = vmatmul.mubr.msk.bf16.gmra.mrb[12].mxu1 %vm1687_vm0, %v1567_v43  ;;  %v1232_v47 = vadd.f32 %v13876_v9, %v1025_v42  ;;  %v1233_v40 = vadd.f32 %v13876_v9, %v1026_v27 }
 0x176   : > { %v1234_v10 = vadd.f32 %v13876_v9, %v1027_v36  ;;  %v1030_v3 = vsub.f32 %v13936_v54, %v14016_v17  ;;  %11886 = vmatprep.mubr.msk.bf16.mxu1 %vm1687_vm0, %v13976_v33  ;;  %v1235_v11 = vadd.f32 %v13876_v9, %v1028_v24  ;;  %v1031_v43 = vsub.f32 %v13918_v41, %v14001_v60 }
 0x177   : > { %v14299_v58 = vpack.c.bf16 %v1431_v45, %v1430_v39  ;;  %v1236_v14 = vadd.f32 %v13876_v9, %v1029_v52  ;;  %v1432_v61 = vmax.f32 %v1232_v47, 0.0  ;;  %v1433_v15 = vmax.f32 %v1233_v40, 0.0 }
 0x178   : > { %v1434_v38 = vmax.f32 %v1234_v10, 0.0  ;;  %v1237_v22 = vadd.f32 %v13876_v9, %v1030_v3  ;;  %v1435_v55 = vmax.f32 %v1235_v11, 0.0  ;;  %v1032_v27 = vsub.f32 %v13928_v49, %v14010_v6 }
 0x179   : > { %18115 = vst [vmem:[#allocation33_spill] sm:$0xff] %v14299_v58  ;;  %v1436_v42 = vmax.f32 %v1236_v14, 0.0  ;;  %v1238_v33 = vadd.f32 %v13876_v9, %v1031_v43  ;;  %v14309_v36 = vpack.c.bf16 %v1433_v15, %v1432_v61  ;;  %v1033_v45 = vsub.f32 %v13964_v21, %v14050_v56 }
 0x17a   : > { %v1437_v39 = vmax.f32 %v1237_v22, 0.0  ;;  %v1034_v24 = vsub.f32 %v13980_v35, %v14061_v5  ;;  %v14315_v52 = vpack.c.bf16 %v1435_v55, %v1434_v38  ;;  %v1239_v47 = vadd.f32 %v13876_v9, %v1032_v27 }
 0x17b   : > { %18116 = vst [vmem:[#allocation34_spill] sm:$0xff] %v14309_v36  ;;  %v1438_v40 = vmax.f32 %v1238_v33, 0.0  ;;  %v1035_v10 = vsub.f32 %v13959_v16, %v14045_v50  ;;  %v1240_v11 = vadd.f32 %v13876_v9, %v1033_v45  ;;  %v1036_v43 = vsub.f32 %v13972_v28, %v14055_v62 }
 0x17c   : > { %18117 = vst [vmem:[#allocation35_spill] sm:$0xff] %v14315_v52  ;;  %v14320_v3 = vpack.c.bf16 %v1437_v39, %v1436_v42  ;;  %v1241_v14 = vadd.f32 %v13876_v9, %v1034_v24  ;;  %v1439_v61 = vmax.f32 %v1239_v47, 0.0  ;;  %v1037_v38 = vsub.f32 %v14004_v1, %v14004_v1 }
 0x17d   : > { %v1242_v15 = vadd.f32 %v13876_v9, %v1035_v10  ;;  %v1038_v22 = vsub.f32 %v14016_v17, %v14016_v17  ;;  %11887 = vmatmul.mubr.msk.bf16.gmra.mrb[16].mxu1 %vm1687_vm0, %v13968_v25  ;;  %v1440_v55 = vmax.f32 %v1240_v11, 0.0  ;;  %v1243_v27 = vadd.f32 %v13876_v9, %v1036_v43  ;;  %v12821_v25 = vld [vmem:[%s18103_s5 + $0x18] sm:$0xff]  }
 0x17e   : > { %18118 = vst [vmem:[#allocation36_spill] sm:$0xff] %v14320_v3  ;;  %v1441_v42 = vmax.f32 %v1241_v14, 0.0  ;;  %v1039_v33 = vsub.f32 %v14001_v60, %v14001_v60  ;;  %11890 = vmatprep.mubr.msk.bf16.mxu1 %vm1687_vm0, %v14014_v13  ;;  %v14338_v39 = vpack.c.bf16 %v1439_v61, %v1438_v40  ;;  %v1244_v24 = vadd.f32 %v13876_v9, %v1037_v38 }
 0x17f   : > { %v1442_v45 = vmax.f32 %v1242_v15, 0.0  ;;  %v1245_v47 = vadd.f32 %v13876_v9, %v1038_v22  ;;  %v1443_v11 = vmax.f32 %v1243_v27, 0.0  ;;  %v1040_v14 = vsub.f32 %v14010_v6, %v14010_v6  ;;  %12052 = vmatprep.subr.bf16.mxu0 %v12821_v25 }
 0x180   : > { %18119 = vst [vmem:[#allocation37_spill] sm:$0xff] %v14338_v39  ;;  %v14345_v10 = vpack.c.bf16 %v1441_v42, %v1440_v55  ;;  %v1246_v43 = vadd.f32 %v13876_v9, %v1039_v33  ;;  %v1444_v13 = vmax.f32 %v1244_v24, 0.0  ;;  %v1041_v61 = vsub.f32 %v14050_v56, %v14050_v56  ;;  %12053 = vmatpush3.bf16.msra.mxu0 %v12821_v25 }
 0x181   : > { %v1445_v40 = vmax.f32 %v1245_v47, 0.0  ;;  %v1042_v15 = vsub.f32 %v14061_v5, %v14061_v5  ;;  %v14354_v38 = vpack.c.bf16 %v1443_v11, %v1442_v45  ;;  %v1247_v22 = vadd.f32 %v13876_v9, %v1040_v14 }
 0x182   : > { %18120 = vst [vmem:[#allocation38_spill] sm:$0xff] %v14345_v10  ;;  %v1446_v55 = vmax.f32 %v1246_v43, 0.0  ;;  %v1043_v42 = vsub.f32 %v14045_v50, %v14045_v50  ;;  %v1248_v33 = vadd.f32 %v13876_v9, %v1041_v61  ;;  %v1044_v47 = vsub.f32 %v14055_v62, %v14055_v62 }
 0x183   : > { %18121 = vst [vmem:[#allocation39_spill] sm:$0xff] %v14354_v38  ;;  %v14359_v27 = vpack.c.bf16 %v1445_v40, %v1444_v13  ;;  %v1249_v24 = vadd.f32 %v13876_v9, %v1042_v15  ;;  %v1447_v10 = vmax.f32 %v1247_v22, 0.0  ;;  %v1045_v11 = vsub.f32 %v14093_v57, %v14004_v1 }
 0x184   : > { %v1250_v45 = vadd.f32 %v13876_v9, %v1043_v42  ;;  %v1046_v14 = vsub.f32 %v14104_v18, %v14016_v17  ;;  %v1448_v43 = vmax.f32 %v1248_v33, 0.0  ;;  %v1251_v13 = vadd.f32 %v13876_v9, %v1044_v47 }
 0x185   : > { %18122 = vst [vmem:[#allocation40_spill] sm:$0xff] %v14359_v27  ;;  %v1449_v25 = vmax.f32 %v1249_v24, 0.0  ;;  %v1047_v40 = vsub.f32 %v14088_v48, %v14001_v60  ;;  %11891 = vmatmul.mubr.msk.bf16.gmra.mrb[20].mxu1 %vm1687_vm0, %v14008_v4  ;;  %v14375_v61 = vpack.c.bf16 %v1447_v10, %v1446_v55  ;;  %v1252_v22 = vadd.f32 %v13876_v9, %v1045_v11 }
 0x186   : > { %v1450_v15 = vmax.f32 %v1250_v45, 0.0  ;;  %v1253_v42 = vadd.f32 %v13876_v9, %v1046_v14  ;;  %11894 = vmatprep.mubr.msk.bf16.mxu1 %vm1687_vm0, %v14021_v20  ;;  %v1451_v24 = vmax.f32 %v1251_v13, 0.0  ;;  %v1048_v47 = vsub.f32 %v14098_v0, %v14010_v6 }
 0x187   : > { %18123 = vst [vmem:[#allocation41_spill] sm:$0xff] %v14375_v61  ;;  %v14381_v33 = vpack.c.bf16 %v1449_v25, %v1448_v43  ;;  %v1254_v27 = vadd.f32 %v13876_v9, %v1047_v40  ;;  %v1452_v38 = vmax.f32 %v1252_v22, 0.0  ;;  %v1049_v10 = vsub.f32 %v14140_v19, %v14050_v56 }
 0x188   : > { %v1453_v4 = vmax.f32 %v1253_v42, 0.0  ;;  %v1050_v55 = vsub.f32 %v14151_v51, %v14061_v5  ;;  %v14390_v45 = vpack.c.bf16 %v1451_v24, %v1450_v15  ;;  %v1255_v20 = vadd.f32 %v13876_v9, %v1048_v47 }
 0x189   : > { %18124 = vst [vmem:[#allocation42_spill] sm:$0xff] %v14381_v33  ;;  %v1454_v11 = vmax.f32 %v1254_v27, 0.0  ;;  %v1051_v14 = vsub.f32 %v14132_v63, %v14045_v50  ;;  %v1256_v25 = vadd.f32 %v13876_v9, %v1049_v10  ;;  %v1052_v40 = vsub.f32 %v14145_v37, %v14055_v62 }
 0x18a   : > { %18125 = vst [vmem:[#allocation43_spill] sm:$0xff] %v14390_v45  ;;  %v14395_v43 = vpack.c.bf16 %v1453_v4, %v1452_v38  ;;  %v1257_v13 = vadd.f32 %v13876_v9, %v1050_v55  ;;  %v1455_v22 = vmax.f32 %v1255_v20, 0.0  ;;  %v1053_v15 = vsub.f32 %v14184_v53, %v14004_v1 }
 0x18b   : > { %v1258_v42 = vadd.f32 %v13876_v9, %v1051_v14  ;;  %v1054_v27 = vsub.f32 %v14196_v7, %v14016_v17  ;;  %v1456_v24 = vmax.f32 %v1256_v25, 0.0  ;;  %v1259_v38 = vadd.f32 %v13876_v9, %v1052_v40  ;;  %v18129_v40 = vld [vmem:[#allocation17_spill] sm:$0xff] }
 0x18c   : > { %18126 = vst [vmem:[#allocation44_spill] sm:$0xff] %v14395_v43  ;;  %v1457_v47 = vmax.f32 %v1257_v13, 0.0  ;;  %v1055_v4 = vsub.f32 %v14177_v46, %v14001_v60  ;;  %v14409_v10 = vpack.c.bf16 %v1455_v22, %v1454_v11  ;;  %v1260_v20 = vadd.f32 %v13876_v9, %v1053_v15 }
 0x18d   : > { %v1458_v55 = vmax.f32 %v1258_v42, 0.0  ;;  %v1261_v14 = vadd.f32 %v13876_v9, %v1054_v27  ;;  %11895 = vmatmul.mubr.msk.bf16.gmra.mrb[24].mxu1 %vm1687_vm0, %v14029_v30  ;;  %v1459_v45 = vmax.f32 %v1259_v38, 0.0  ;;  %v1056_v25 = vsub.f32 %v14189_v31, %v14010_v6  ;;  %v18130_v42 = vld [vmem:[#allocation28_spill] sm:$0xff]  ;;  %v18131_v27 = vld [vmem:[#allocation31_spill] sm:$0xff] }
 0x18e   : > { %18127 = vst [vmem:[#allocation45_spill] sm:$0xff] %v14409_v10  ;;  %v14415_v43 = vpack.c.bf16 %v1457_v47, %v1456_v24  ;;  %v1262_v13 = vadd.f32 %v13876_v9, %v1055_v4  ;;  %11898 = vmatprep.mubr.msk.bf16.mxu1 %vm1687_vm0, %v18129_v40  ;;  %v1460_v11 = vmax.f32 %v1260_v20, 0.0  ;;  %v1057_v15 = vsub.f32 %v18130_v42, %v14050_v56  ;;  %v18133_v38 = vld [vmem:[#allocation27_spill] sm:$0xff] }
 0x18f   : > { %v1461_v22 = vmax.f32 %v1261_v14, 0.0  ;;  %v1058_v10 = vsub.f32 %v18131_v27, %v14061_v5  ;;  %v14426_v30 = vpack.c.bf16 %v1459_v45, %v1458_v55  ;;  %v1263_v24 = vadd.f32 %v13876_v9, %v1056_v25  ;;  %v18135_v14 = vld [vmem:[#allocation29_spill] sm:$0xff]  ;;  %v18136_v45 = vld [vmem:[#allocation15_spill] sm:$0xff]  ;;  %v18137_v25 = vld [vmem:[#allocation16_spill] sm:$0xff] }
 0x190   : > { %18128 = vst [vmem:[#allocation46_spill] sm:$0xff] %v14415_v43  ;;  %v1462_v47 = vmax.f32 %v1262_v13, 0.0  ;;  %v1059_v43 = vsub.f32 %v18133_v38, %v14045_v50  ;;  %v1264_v40 = vadd.f32 %v13876_v9, %v1057_v15  ;;  %v1060_v33 = vsub.f32 %v18135_v14, %v14055_v62 }
 0x191   : > { %18132 = vst [vmem:[#allocation17_spill] sm:$0xff] %v14426_v30  ;;  %v14431_v4 = vpack.c.bf16 %v1461_v22, %v1460_v11  ;;  %v1265_v20 = vadd.f32 %v13876_v9, %v1058_v10  ;;  %v1463_v61 = vmax.f32 %v1263_v24, 0.0  ;;  %v1061_v55 = vsub.f32 %v18136_v45, %v14093_v57 }
 0x192   : > { %v1266_v39 = vadd.f32 %v13876_v9, %v1059_v43  ;;  %v1062_v13 = vsub.f32 %v18137_v25, %v14104_v18  ;;  %v1464_v30 = vmax.f32 %v1264_v40, 0.0  ;;  %v1267_v11 = vadd.f32 %v13876_v9, %v1060_v33 }
 0x193   : > { %18134 = vst [vmem:[#allocation28_spill] sm:$0xff] %v14431_v4  ;;  %v1465_v3 = vmax.f32 %v1265_v20, 0.0  ;;  %v1063_v22 = vsub.f32 %v13871_v8, %v14088_v48  ;;  %v14445_v10 = vpack.c.bf16 %v1463_v61, %v1462_v47  ;;  %v1268_v24 = vadd.f32 %v13876_v9, %v1061_v55  ;;  %v18140_v20 = vld [vmem:[#allocation18_spill] sm:$0xff]  ;;  %v18141_v47 = vld [vmem:[#allocation19_spill] sm:$0xff] }
 0x194   : > { %v1466_v15 = vmax.f32 %v1266_v39, 0.0  ;;  %v1269_v43 = vadd.f32 %v13876_v9, %v1062_v13  ;;  %v1467_v52 = vmax.f32 %v1267_v11, 0.0  ;;  %v1064_v36 = vsub.f32 %v13882_v12, %v14098_v0 }
 0x195   : > { %18138 = vst [vmem:[#allocation31_spill] sm:$0xff] %v14445_v10  ;;  %v14449_v4 = vpack.c.bf16 %v1465_v3, %v1464_v30  ;;  %v1270_v40 = vadd.f32 %v13876_v9, %v1063_v22  ;;  %11899 = vmatmul.mubr.msk.bf16.gmra.mrb[28].mxu1 %vm1687_vm0, %v18140_v20  ;;  %v1468_v33 = vmax.f32 %v1268_v24, 0.0  ;;  %v1065_v39 = vsub.f32 %v13898_v26, %v14140_v19  ;;  %v14467_v9 = vld [vmem:[%s18095_s28] ss:$0 sm:$0xff] }
 0x196   : > { %v1469_v58 = vmax.f32 %v1269_v43, 0.0  ;;  %v1066_v61 = vsub.f32 %v13906_v32, %v14151_v51  ;;  %11902 = vmatprep.mubr.msk.bf16.mxu1 %vm1687_vm0, %v18141_v47  ;;  %v14462_v3 = vpack.c.bf16 %v1467_v52, %v1466_v15  ;;  %v1271_v30 = vadd.f32 %v14467_v9, %v1064_v36 }
 0x197   : > { %18139 = vst [vmem:[#allocation27_spill] sm:$0xff] %v14449_v4  ;;  %v1470_v55 = vmax.f32 %v1270_v40, 0.0  ;;  %v1067_v13 = vsub.f32 %v13896_v23, %v14132_v63  ;;  %v1272_v22 = vadd.f32 %v14467_v9, %v1065_v39  ;;  %v1068_v52 = vsub.f32 %v13902_v29, %v14145_v37 }
 0x198   : > { %18142 = vst [vmem:[#allocation29_spill] sm:$0xff] %v14462_v3  ;;  %v14472_v11 = vpack.c.bf16 %v1469_v58, %v1468_v33  ;;  %v1273_v24 = vadd.f32 %v14467_v9, %v1066_v61  ;;  %v1471_v15 = vmax.f32 %v1271_v30, 0.0  ;;  %v1069_v20 = vsub.f32 %v13920_v44, %v14093_v57 }
 0x199   : > { %v1274_v43 = vadd.f32 %v14467_v9, %v1067_v13  ;;  %v1070_v36 = vsub.f32 %v13936_v54, %v14104_v18  ;;  %v1472_v40 = vmax.f32 %v1272_v22, 0.0  ;;  %v1275_v58 = vadd.f32 %v14467_v9, %v1068_v52 }
 0x19a   : > { %18143 = vst [vmem:[#allocation15_spill] sm:$0xff] %v14472_v11  ;;  %v1473_v47 = vmax.f32 %v1273_v24, 0.0  ;;  %v1071_v33 = vsub.f32 %v13918_v41, %v14088_v48  ;;  %v14486_v39 = vpack.c.bf16 %v1471_v15, %v1470_v55  ;;  %v1276_v30 = vadd.f32 %v14467_v9, %v1069_v20  ;;  %v18146_v15 = vld [vmem:[#allocation20_spill] sm:$0xff] }
 0x19b   : > { %v1474_v61 = vmax.f32 %v1274_v43, 0.0  ;;  %v1277_v13 = vadd.f32 %v14467_v9, %v1070_v36  ;;  %v1475_v3 = vmax.f32 %v1275_v58, 0.0  ;;  %v1072_v4 = vsub.f32 %v13928_v49, %v14098_v0 }
 0x19c   : > { %18144 = vst [vmem:[#allocation16_spill] sm:$0xff] %v14486_v39  ;;  %v14490_v11 = vpack.c.bf16 %v1473_v47, %v1472_v40  ;;  %v1278_v22 = vadd.f32 %v14467_v9, %v1071_v33  ;;  %v1476_v24 = vmax.f32 %v1276_v30, 0.0  ;;  %v1073_v10 = vsub.f32 %v13964_v21, %v14140_v19  ;;  %v18148_v47 = vld [vmem:[#allocation21_spill] sm:$0xff] }
 0x19d   : > { %v1477_v52 = vmax.f32 %v1277_v13, 0.0  ;;  %v1074_v55 = vsub.f32 %v13980_v35, %v14151_v51  ;;  %11903 = vmatmul.mubr.msk.bf16.gmra.mrb[32].mxu1 %vm1687_vm0, %v18146_v15  ;;  %v14501_v43 = vpack.c.bf16 %v1475_v3, %v1474_v61  ;;  %v1279_v20 = vadd.f32 %v14467_v9, %v1072_v4 }
 0x19e   : > { %18145 = vst [vmem:[#allocation18_spill] sm:$0xff] %v14490_v11  ;;  %v1478_v36 = vmax.f32 %v1278_v22, 0.0  ;;  %v1075_v40 = vsub.f32 %v13959_v16, %v14132_v63  ;;  %11906 = vmatprep.mubr.msk.bf16.mxu1 %vm1687_vm0, %v18148_v47  ;;  %v1280_v33 = vadd.f32 %v14467_v9, %v1073_v10  ;;  %v1076_v13 = vsub.f32 %v13972_v28, %v14145_v37 }
 0x19f   : > { %18147 = vst [vmem:[#allocation19_spill] sm:$0xff] %v14501_v43  ;;  %v14508_v58 = vpack.c.bf16 %v1477_v52, %v1476_v24  ;;  %v1281_v30 = vadd.f32 %v14467_v9, %v1074_v55  ;;  %v1479_v3 = vmax.f32 %v1279_v20, 0.0  ;;  %v1077_v4 = vsub.f32 %v14004_v1, %v14093_v57 }
 0x1a0   : > { %v1282_v61 = vadd.f32 %v14467_v9, %v1075_v40  ;;  %v1078_v22 = vsub.f32 %v14016_v17, %v14104_v18  ;;  %v1480_v15 = vmax.f32 %v1280_v33, 0.0  ;;  %v1283_v24 = vadd.f32 %v14467_v9, %v1076_v13 }
 0x1a1   : > { %18149 = vst [vmem:[#allocation20_spill] sm:$0xff] %v14508_v58  ;;  %v1481_v47 = vmax.f32 %v1281_v30, 0.0  ;;  %v1079_v10 = vsub.f32 %v14001_v60, %v14088_v48  ;;  %v14522_v52 = vpack.c.bf16 %v1479_v3, %v1478_v36  ;;  %v1284_v20 = vadd.f32 %v14467_v9, %v1077_v4 }
 0x1a2   : > { %v1482_v55 = vmax.f32 %v1282_v61, 0.0  ;;  %v1285_v40 = vadd.f32 %v14467_v9, %v1078_v22  ;;  %v1483_v43 = vmax.f32 %v1283_v24, 0.0  ;;  %v1080_v11 = vsub.f32 %v14010_v6, %v14098_v0 }
 0x1a3   : > { %18150 = vst [vmem:[#allocation21_spill] sm:$0xff] %v14522_v52  ;;  %v14526_v58 = vpack.c.bf16 %v1481_v47, %v1480_v15  ;;  %v1286_v33 = vadd.f32 %v14467_v9, %v1079_v10  ;;  %v1484_v30 = vmax.f32 %v1284_v20, 0.0  ;;  %v1081_v39 = vsub.f32 %v14050_v56, %v14140_v19  ;;  %v18153_v15 = vld [vmem:[#allocation22_spill] sm:$0xff] }
 0x1a4   : > { %v1485_v13 = vmax.f32 %v1285_v40, 0.0  ;;  %v1082_v36 = vsub.f32 %v14061_v5, %v14151_v51  ;;  %v14535_v3 = vpack.c.bf16 %v1483_v43, %v1482_v55  ;;  %v1287_v61 = vadd.f32 %v14467_v9, %v1080_v11  ;;  %v18155_v43 = vld [vmem:[#allocation23_spill] sm:$0xff] }
 0x1a5   : > { %18151 = vst [vmem:[#allocation47_spill] sm:$0xff] %v14526_v58  ;;  %v1486_v4 = vmax.f32 %v1286_v33, 0.0  ;;  %v1083_v22 = vsub.f32 %v14045_v50, %v14132_v63  ;;  %11907 = vmatmul.mubr.msk.bf16.gmra.mrb[36].mxu1 %vm1687_vm0, %v18153_v15  ;;  %v1288_v24 = vadd.f32 %v14467_v9, %v1081_v39  ;;  %v1084_v20 = vsub.f32 %v14055_v62, %v14145_v37 }
 0x1a6   : > { %18152 = vst [vmem:[#allocation48_spill] sm:$0xff] %v14535_v3  ;;  %v14542_v47 = vpack.c.bf16 %v1485_v13, %v1484_v30  ;;  %v1289_v10 = vadd.f32 %v14467_v9, %v1082_v36  ;;  %11910 = vmatprep.mubr.msk.bf16.mxu1 %vm1687_vm0, %v18155_v43  ;;  %v1487_v11 = vmax.f32 %v1287_v61, 0.0  ;;  %v1085_v40 = vsub.f32 %v14093_v57, %v14093_v57 }
 0x1a7   : > { %v1290_v55 = vadd.f32 %v14467_v9, %v1083_v22  ;;  %v1086_v33 = vsub.f32 %v14104_v18, %v14104_v18  ;;  %v1488_v30 = vmax.f32 %v1288_v24, 0.0  ;;  %v1291_v39 = vadd.f32 %v14467_v9, %v1084_v20 }
 0x1a8   : > { %18154 = vst [vmem:[#allocation22_spill] sm:$0xff] %v14542_v47  ;;  %v1489_v13 = vmax.f32 %v1289_v10, 0.0  ;;  %v1087_v36 = vsub.f32 %v14088_v48, %v14088_v48  ;;  %v14558_v15 = vpack.c.bf16 %v1487_v11, %v1486_v4  ;;  %v1292_v61 = vadd.f32 %v14467_v9, %v1085_v40 }
 0x1a9   : > { %v1490_v47 = vmax.f32 %v1290_v55, 0.0  ;;  %v1293_v22 = vadd.f32 %v14467_v9, %v1086_v33  ;;  %v1491_v3 = vmax.f32 %v1291_v39, 0.0  ;;  %v1088_v58 = vsub.f32 %v14098_v0, %v14098_v0 }
 0x1aa   : > { %18156 = vst [vmem:[#allocation23_spill] sm:$0xff] %v14558_v15  ;;  %v14562_v43 = vpack.c.bf16 %v1489_v13, %v1488_v30  ;;  %v1294_v24 = vadd.f32 %v14467_v9, %v1087_v36  ;;  %v1492_v10 = vmax.f32 %v1292_v61, 0.0  ;;  %v1089_v52 = vsub.f32 %v14140_v19, %v14140_v19  ;;  %v18160_v61 = vld [vmem:[#allocation24_spill] sm:$0xff] }
 0x1ab   : > { %v1493_v20 = vmax.f32 %v1293_v22, 0.0  ;;  %v1090_v4 = vsub.f32 %v14151_v51, %v14151_v51  ;;  %v14571_v11 = vpack.c.bf16 %v1491_v3, %v1490_v47  ;;  %v1295_v55 = vadd.f32 %v14467_v9, %v1088_v58 }
 0x1ac   : > { %18157 = vst [vmem:[#allocation49_spill] sm:$0xff] %v14562_v43  ;;  %v1494_v40 = vmax.f32 %v1294_v24, 0.0  ;;  %v1091_v33 = vsub.f32 %v14132_v63, %v14132_v63  ;;  %v1296_v13 = vadd.f32 %v14467_v9, %v1089_v52  ;;  %v1092_v36 = vsub.f32 %v14145_v37, %v14145_v37  ;;  %v18161_v24 = vld [vmem:[#allocation25_spill] sm:$0xff] }
 0x1ad   : > { %18158 = vst [vmem:[#allocation50_spill] sm:$0xff] %v14571_v11  ;;  %v14576_v30 = vpack.c.bf16 %v1493_v20, %v1492_v10  ;;  %v1297_v39 = vadd.f32 %v14467_v9, %v1090_v4  ;;  %11911 = vmatmul.mubr.msk.bf16.gmra.mrb[40].mxu1 %vm1687_vm0, %v18160_v61  ;;  %v1495_v3 = vmax.f32 %v1295_v55, 0.0  ;;  %v1093_v58 = vsub.f32 %v14184_v53, %v14093_v57 }
 0x1ae   : > { %v1298_v47 = vadd.f32 %v14467_v9, %v1091_v33  ;;  %v1094_v22 = vsub.f32 %v14196_v7, %v14104_v18  ;;  %11914 = vmatprep.mubr.msk.bf16.mxu1 %vm1687_vm0, %v18161_v24  ;;  %v1496_v52 = vmax.f32 %v1296_v13, 0.0  ;;  %v1299_v20 = vadd.f32 %v14467_v9, %v1092_v36 }
 0x1af   : > { %18159 = vst [vmem:[#allocation51_spill] sm:$0xff] %v14576_v30  ;;  %v1497_v10 = vmax.f32 %v1297_v39, 0.0  ;;  %v1095_v4 = vsub.f32 %v14177_v46, %v14088_v48  ;;  %v14594_v61 = vpack.c.bf16 %v1495_v3, %v1494_v40  ;;  %v1300_v33 = vadd.f32 %v14467_v9, %v1093_v58 }
 0x1b0   : > { %v1498_v55 = vmax.f32 %v1298_v47, 0.0  ;;  %v1301_v30 = vadd.f32 %v14467_v9, %v1094_v22  ;;  %v1499_v43 = vmax.f32 %v1299_v20, 0.0  ;;  %v1096_v24 = vsub.f32 %v14189_v31, %v14098_v0 }
 0x1b1   : > { %v14598_v11 = vpack.c.bf16 %v1497_v10, %v1496_v52  ;;  %v1302_v13 = vadd.f32 %v14467_v9, %v1095_v4  ;;  %v1500_v39 = vmax.f32 %v1300_v33, 0.0  ;;  %v1097_v15 = vsub.f32 %v18130_v42, %v14140_v19 }
 0x1b2   : > { %v1501_v36 = vmax.f32 %v1301_v30, 0.0  ;;  %v1098_v40 = vsub.f32 %v18131_v27, %v14151_v51  ;;  %v14607_v3 = vpack.c.bf16 %v1499_v43, %v1498_v55  ;;  %v1303_v47 = vadd.f32 %v14467_v9, %v1096_v24  ;;  %v18163_v24 = vld [vmem:[#allocation26_spill] sm:$0xff] }
 0x1b3   : > { %v1502_v58 = vmax.f32 %v1302_v13, 0.0  ;;  %v1099_v22 = vsub.f32 %v18133_v38, %v14132_v63  ;;  %v1304_v10 = vadd.f32 %v14467_v9, %v1097_v15  ;;  %v1100_v20 = vsub.f32 %v18135_v14, %v14145_v37 }
 0x1b4   : > { %v14612_v52 = vpack.c.bf16 %v1501_v36, %v1500_v39  ;;  %v1305_v30 = vadd.f32 %v14467_v9, %v1098_v40  ;;  %v1503_v4 = vmax.f32 %v1303_v47, 0.0  ;;  %v1101_v43 = vsub.f32 %v18136_v45, %v14184_v53  ;;  %v18164_v40 = vld [vmem:[#allocation30_spill] sm:$0xff] }
 0x1b5   : > { %v1306_v33 = vadd.f32 %v14467_v9, %v1099_v22  ;;  %v1102_v55 = vsub.f32 %v18137_v25, %v14196_v7  ;;  %11915 = vmatmul.mubr.msk.bf16.gmra.mrb[44].mxu1 %vm1687_vm0, %v18163_v24  ;;  %v1504_v13 = vmax.f32 %v1304_v10, 0.0  ;;  %v1307_v15 = vadd.f32 %v14467_v9, %v1100_v20 }
 0x1b6   : > { %18162 = vst [vmem:[#allocation24_spill] sm:$0xff] %v14612_v52  ;;  %v1505_v39 = vmax.f32 %v1305_v30, 0.0  ;;  %v1103_v36 = vsub.f32 %v13871_v8, %v14177_v46  ;;  %11918 = vmatprep.mubr.msk.bf16.mxu1 %vm1687_vm0, %v18164_v40  ;;  %v14630_v47 = vpack.c.bf16 %v1503_v4, %v1502_v58  ;;  %v1308_v45 = vadd.f32 %v14467_v9, %v1101_v43 }
 0x1b7   : > { %v1506_v22 = vmax.f32 %v1306_v33, 0.0  ;;  %v1309_v25 = vadd.f32 %v14467_v9, %v1102_v55  ;;  %v1507_v24 = vmax.f32 %v1307_v15, 0.0  ;;  %v1104_v10 = vsub.f32 %v13882_v12, %v14189_v31 }
 0x1b8   : > { %v14634_v52 = vpack.c.bf16 %v1505_v39, %v1504_v13  ;;  %v1310_v30 = vadd.f32 %v14467_v9, %v1103_v36  ;;  %v1508_v20 = vmax.f32 %v1308_v45, 0.0  ;;  %v1105_v40 = vsub.f32 %v13898_v26, %v18130_v42 }
 0x1b9   : > { %v1509_v8 = vmax.f32 %v1309_v25, 0.0  ;;  %v1106_v58 = vsub.f32 %v13906_v32, %v18131_v27  ;;  %v14643_v4 = vpack.c.bf16 %v1507_v24, %v1506_v22  ;;  %v1311_v33 = vadd.f32 %v14467_v9, %v1104_v10  ;;  %v18165_v10 = vld [vmem:[#allocation32_spill] sm:$0xff] }
 0x1ba   : > { %v1510_v43 = vmax.f32 %v1310_v30, 0.0  ;;  %v1107_v55 = vsub.f32 %v13896_v23, %v18133_v38  ;;  %v1312_v12 = vadd.f32 %v14467_v9, %v1105_v40  ;;  %v1108_v26 = vsub.f32 %v13902_v29, %v18135_v14 }
 0x1bb   : > { %v14648_v13 = vpack.c.bf16 %v1509_v8, %v1508_v20  ;;  %v1313_v39 = vadd.f32 %v14467_v9, %v1106_v58  ;;  %v1511_v15 = vmax.f32 %v1311_v33, 0.0  ;;  %v1109_v36 = vsub.f32 %v13920_v44, %v14184_v53 }
 0x1bc   : > { %v1314_v32 = vadd.f32 %v14467_v9, %v1107_v55  ;;  %v1110_v22 = vsub.f32 %v13936_v54, %v14196_v7  ;;  %v1512_v45 = vmax.f32 %v1312_v12, 0.0  ;;  %v1315_v25 = vadd.f32 %v14467_v9, %v1108_v26 }
 0x1bd   : > { %v1513_v23 = vmax.f32 %v1313_v39, 0.0  ;;  %v1111_v24 = vsub.f32 %v13918_v41, %v14177_v46  ;;  %11919 = vmatmul.mubr.msk.bf16.gmra.mrb[48].mxu1 %vm1687_vm0, %v18165_v10  ;;  %v14664_v29 = vpack.c.bf16 %v1511_v15, %v1510_v43  ;;  %v1316_v20 = vadd.f32 %v14467_v9, %v1109_v36 }
 0x1be   : > { %v1514_v30 = vmax.f32 %v1314_v32, 0.0  ;;  %v1317_v44 = vadd.f32 %v14467_v9, %v1110_v22  ;;  %11922 = vmatprep.mubr.msk.bf16.mxu1 %vm1687_vm0, %v14274_v34  ;;  %v1515_v8 = vmax.f32 %v1315_v25, 0.0  ;;  %v1112_v40 = vsub.f32 %v13928_v49, %v14189_v31 }
 0x1bf   : > { %v14670_v54 = vpack.c.bf16 %v1513_v23, %v1512_v45  ;;  %v1318_v41 = vadd.f32 %v14467_v9, %v1111_v24  ;;  %v1516_v58 = vmax.f32 %v1316_v20, 0.0  ;;  %v1113_v43 = vsub.f32 %v13964_v21, %v18130_v42 }
 0x1c0   : > { %v1517_v33 = vmax.f32 %v1317_v44, 0.0  ;;  %v1114_v55 = vsub.f32 %v13980_v35, %v18131_v27  ;;  %v14679_v12 = vpack.c.bf16 %v1515_v8, %v1514_v30  ;;  %v1319_v34 = vadd.f32 %v14467_v9, %v1112_v40 }
 0x1c1   : > { %v1518_v39 = vmax.f32 %v1318_v41, 0.0  ;;  %v1115_v26 = vsub.f32 %v13959_v16, %v18133_v38  ;;  %v1320_v49 = vadd.f32 %v14467_v9, %v1113_v43  ;;  %v1116_v21 = vsub.f32 %v13972_v28, %v18135_v14 }
 0x1c2   : > { %v14684_v15 = vpack.c.bf16 %v1517_v33, %v1516_v58  ;;  %v1321_v32 = vadd.f32 %v14467_v9, %v1114_v55  ;;  %v1519_v36 = vmax.f32 %v1319_v34, 0.0  ;;  %v1117_v22 = vsub.f32 %v14004_v1, %v14184_v53 }
 0x1c3   : > { %v1322_v35 = vadd.f32 %v14467_v9, %v1115_v26  ;;  %v1118_v45 = vsub.f32 %v14016_v17, %v14196_v7  ;;  %v1520_v23 = vmax.f32 %v1320_v49, 0.0  ;;  %v1323_v25 = vadd.f32 %v14467_v9, %v1116_v21 }
 0x1c4   : > { %v1521_v16 = vmax.f32 %v1321_v32, 0.0  ;;  %v1119_v24 = vsub.f32 %v14001_v60, %v14177_v46  ;;  %v14698_v10 = vpack.c.bf16 %v1519_v36, %v1518_v39  ;;  %v1324_v28 = vadd.f32 %v14467_v9, %v1117_v22 }
 0x1c5   : > { %v1522_v30 = vmax.f32 %v1322_v35, 0.0  ;;  %v1325_v20 = vadd.f32 %v14467_v9, %v1118_v45  ;;  %11923 = vmatmul.mubr.msk.bf16.gmra.mrb[52].mxu1 %vm1687_vm0, %v14278_v2  ;;  %v1523_v17 = vmax.f32 %v1323_v25, 0.0  ;;  %v1120_v44 = vsub.f32 %v14010_v6, %v14189_v31  ;;  %v18166_v25 = vld [vmem:[#allocation33_spill] sm:$0xff] }
 0x1c6   : > { %v14704_v1 = vpack.c.bf16 %v1521_v16, %v1520_v23  ;;  %v1326_v8 = vadd.f32 %v14467_v9, %v1119_v24  ;;  %11926 = vmatprep.mubr.msk.bf16.mxu1 %vm1687_vm0, %v14272_v59  ;;  %v1524_v60 = vmax.f32 %v1324_v28, 0.0  ;;  %v1121_v41 = vsub.f32 %v14050_v56, %v18130_v42 }
 0x1c7   : > { %v1525_v40 = vmax.f32 %v1325_v20, 0.0  ;;  %v1122_v58 = vsub.f32 %v14061_v5, %v18131_v27  ;;  %v14715_v2 = vpack.c.bf16 %v1523_v17, %v1522_v30  ;;  %v1327_v33 = vadd.f32 %v14467_v9, %v1120_v44  ;;  %v18167_v20 = vld [vmem:[#allocation34_spill] sm:$0xff] }
 0x1c8   : > { %v1526_v43 = vmax.f32 %v1326_v8, 0.0  ;;  %v1123_v6 = vsub.f32 %v14045_v50, %v18133_v38  ;;  %v1328_v59 = vadd.f32 %v14467_v9, %v1121_v41  ;;  %v1124_v56 = vsub.f32 %v14055_v62, %v18135_v14 }
 0x1c9   : > { %v14720_v55 = vpack.c.bf16 %v1525_v40, %v1524_v60  ;;  %v1329_v34 = vadd.f32 %v14467_v9, %v1122_v58  ;;  %v1527_v39 = vmax.f32 %v1327_v33, 0.0  ;;  %v1125_v26 = vsub.f32 %v14093_v57, %v14184_v53 }
 0x1ca   : > { %v1330_v5 = vadd.f32 %v14467_v9, %v1123_v6  ;;  %v1126_v49 = vsub.f32 %v14104_v18, %v14196_v7  ;;  %v1528_v32 = vmax.f32 %v1328_v59, 0.0  ;;  %v1331_v21 = vadd.f32 %v14467_v9, %v1124_v56 }
 0x1cb   : > { %v1529_v50 = vmax.f32 %v1329_v34, 0.0  ;;  %v1127_v36 = vsub.f32 %v14088_v48, %v14177_v46  ;;  %v14734_v35 = vpack.c.bf16 %v1527_v39, %v1526_v43  ;;  %v1332_v62 = vadd.f32 %v14467_v9, %v1125_v26 }
 0x1cc   : > { %v1530_v22 = vmax.f32 %v1330_v5, 0.0  ;;  %v1333_v45 = vadd.f32 %v14467_v9, %v1126_v49  ;;  %v1531_v57 = vmax.f32 %v1331_v21, 0.0  ;;  %v1128_v18 = vsub.f32 %v14098_v0, %v14189_v31 }
 0x1cd   : > { %v14738_v23 = vpack.c.bf16 %v1529_v50, %v1528_v32  ;;  %v1334_v16 = vadd.f32 %v14467_v9, %v1127_v36  ;;  %11927 = vmatmul.mubr.msk.bf16.gmra.mrb[56].mxu1 %vm1687_vm0, %v18166_v25  ;;  %v1532_v24 = vmax.f32 %v1332_v62, 0.0  ;;  %v1129_v30 = vsub.f32 %v14140_v19, %v18130_v42  ;;  %v18168_v36 = vld [vmem:[#allocation35_spill] sm:$0xff] }
 0x1ce   : > { %v1533_v48 = vmax.f32 %v1333_v45, 0.0  ;;  %v1130_v28 = vsub.f32 %v14151_v51, %v18131_v27  ;;  %11930 = vmatprep.mubr.msk.bf16.mxu1 %vm1687_vm0, %v18167_v20  ;;  %v14751_v17 = vpack.c.bf16 %v1531_v57, %v1530_v22  ;;  %v1335_v0 = vadd.f32 %v14467_v9, %v1128_v18  ;;  %v18169_v45 = vld [vmem:[#allocation36_spill] sm:$0xff] }
 0x1cf   : > { %v1534_v44 = vmax.f32 %v1334_v16, 0.0  ;;  %v1131_v8 = vsub.f32 %v14132_v63, %v18133_v38  ;;  %v1336_v40 = vadd.f32 %v14467_v9, %v1129_v30  ;;  %v1132_v51 = vsub.f32 %v14145_v37, %v18135_v14 }
 0x1d0   : > { %v14756_v60 = vpack.c.bf16 %v1533_v48, %v1532_v24  ;;  %v1337_v19 = vadd.f32 %v14467_v9, %v1130_v28  ;;  %v1535_v41 = vmax.f32 %v1335_v0, 0.0  ;;  %v1133_v33 = vsub.f32 %v14184_v53, %v14184_v53 }
 0x1d1   : > { %v1338_v58 = vadd.f32 %v14467_v9, %v1131_v8  ;;  %v1134_v43 = vsub.f32 %v14196_v7, %v14196_v7  ;;  %v1536_v6 = vmax.f32 %v1336_v40, 0.0  ;;  %v1339_v59 = vadd.f32 %v14467_v9, %v1132_v51  ;;  %v18170_v40 = vld [vmem:[#allocation37_spill] sm:$0xff]  ;;  %v18173_v51 = vld [vmem:[#allocation40_spill] sm:$0xff] }
 0x1d2   : > { %v1537_v63 = vmax.f32 %v1337_v19, 0.0  ;;  %v1135_v34 = vsub.f32 %v14177_v46, %v14177_v46  ;;  %v14770_v56 = vpack.c.bf16 %v1535_v41, %v1534_v44  ;;  %v1340_v37 = vadd.f32 %v14467_v9, %v1133_v33  ;;  %v18172_v19 = vld [vmem:[#allocation39_spill] sm:$0xff]  ;;  %v18175_v41 = vld [vmem:[#allocation42_spill] sm:$0xff]  ;;  %v18177_v33 = vld [vmem:[#allocation44_spill] sm:$0xff] }
 0x1d3   : > { %v1538_v39 = vmax.f32 %v1338_v58, 0.0  ;;  %v1341_v5 = vadd.f32 %v14467_v9, %v1134_v43  ;;  %v1539_v53 = vmax.f32 %v1339_v59, 0.0  ;;  %v1136_v7 = vsub.f32 %v14189_v31, %v14189_v31  ;;  %v18176_v58 = vld [vmem:[#allocation43_spill] sm:$0xff]  ;;  %v18178_v43 = vld [vmem:[#allocation45_spill] sm:$0xff] }
 0x1d4   : > { %v14774_v26 = vpack.c.bf16 %v1537_v63, %v1536_v6  ;;  %v1342_v49 = vadd.f32 %v14467_v9, %v1135_v34  ;;  %v1540_v32 = vmax.f32 %v1340_v37, 0.0  ;;  %v1137_v46 = vsub.f32 %v18130_v42, %v18130_v42  ;;  %v18179_v6 = vld [vmem:[#allocation46_spill] sm:$0xff] }
 0x1d5   : > { %v1541_v50 = vmax.f32 %v1341_v5, 0.0  ;;  %v1138_v21 = vsub.f32 %v18131_v27, %v18131_v27  ;;  %11931 = vmatmul.mubr.msk.bf16.gmra.mrb[60].mxu1 %vm1687_vm0, %v18168_v36  ;;  %v14785_v22 = vpack.c.bf16 %v1539_v53, %v1538_v39  ;;  %v1343_v62 = vadd.f32 %v14467_v9, %v1136_v7  ;;  %v14829_v63 = vld [vmem:[%s18180_s4] ss:$0 sm:$0xff] }
 0x1d6   : > { %v1139_v31 = vsub.f32 %v18133_v38, %v18133_v38  ;;  %11934 = vmatprep.mubr.msk.bf16.mxu1 %vm1687_vm0, %v18169_v45  ;;  %v1344_v42 = vadd.f32 %v14467_v9, %v1137_v46  ;;  %v1140_v27 = vsub.f32 %v18135_v14, %v18135_v14  ;;  %v1542_v16 = vmax.f32 %v1342_v49, 0.0  ;;  %v18171_v14 = vld [vmem:[#allocation38_spill] sm:$0xff]  ;;  %v18181_v46 = vld [vmem:[#allocation17_spill] sm:$0xff] }
 0x1d7   : > { %v14792_v57 = vpack.c.bf16 %v1541_v50, %v1540_v32  ;;  %v1345_v18 = vadd.f32 %v14467_v9, %v1138_v21  ;;  %v1543_v25 = vmax.f32 %v1343_v62, 0.0  ;;  %v18182_v62 = vld [vmem:[#allocation28_spill] sm:$0xff] }
 0x1d8   : > { %v1346_v24 = vadd.f32 %v14467_v9, %v1139_v31  ;;  %v1544_v48 = vmax.f32 %v1344_v42, 0.0  ;;  %v1347_v38 = vadd.f32 %v14467_v9, %v1140_v27  ;;  %v18174_v9 = vld [vmem:[#allocation41_spill] sm:$0xff] }
 0x1d9   : > { %v1545_v30 = vmax.f32 %v1345_v18, 0.0  ;;  %v14800_v28 = vpack.c.bf16 %v1543_v25, %v1542_v16 }
 0x1da   : > { %v1546_v0 = vmax.f32 %v1346_v24, 0.0  ;;  %v1547_v44 = vmax.f32 %v1347_v38, 0.0 }
 0x1db   : > { %v14802_v20 = vpack.c.bf16 %v1545_v30, %v1544_v48 }
 0x1dc   : > { %v14804_v8 = vpack.c.bf16 %v1547_v44, %v1546_v0  ;;  %v18183_v44 = vld [vmem:[#allocation31_spill] sm:$0xff] }
 0x1dd   : > { %11935 = vmatmul.mubr.msk.bf16.gmra.mrb[64].mxu1 %vm1687_vm0, %v18170_v40 }
 0x1de   : > { %11938 = vmatprep.mubr.msk.bf16.mxu1 %vm1687_vm0, %v18171_v14 }
 0x1e5   : > { %11939 = vmatmul.mubr.msk.bf16.gmra.mrb[68].mxu1 %vm1687_vm0, %v18172_v19  ;;  %v18184_v19 = vld [vmem:[#allocation27_spill] sm:$0xff] }
 0x1e6   : > { %11942 = vmatprep.mubr.msk.bf16.mxu1 %vm1687_vm0, %v18173_v51 }
 0x1ed   : > { %11943 = vmatmul.mubr.msk.bf16.gmra.mrb[72].mxu1 %vm1687_vm0, %v18174_v9 }
 0x1ee   : > { %11946 = vmatprep.mubr.msk.bf16.mxu1 %vm1687_vm0, %v18175_v41 }
 0x1f5   : > { %11947 = vmatmul.mubr.msk.bf16.gmra.mrb[76].mxu1 %vm1687_vm0, %v18176_v58 }
 0x1f6   : > { %11950 = vmatprep.mubr.msk.bf16.mxu1 %vm1687_vm0, %v18177_v33 }
 0x1fd   : > { %11951 = vmatmul.mubr.msk.bf16.gmra.mrb[80].mxu1 %vm1687_vm0, %v18178_v43 }
 0x1fe   : > { %11954 = vmatprep.mubr.msk.bf16.mxu1 %vm1687_vm0, %v18179_v6 }
 0x200   : > { %v11848_v59 = vpop.f32.mrb[40].mxu0 }
 0x201   : > { %v2031_v34 = vadd.f32 %v11848_v59, %v14829_v63  ;;  %v2022_v39 = vpop.f32.mrb[41].mxu0 }
 0x202   : > { %v2023_v37 = vadd.f32 %v14829_v63, %v2022_v39  ;;  %v11849_v5 = vpop.f32.mrb[42].mxu0 }
 0x203   : > { %v2034_v53 = vadd.f32 %v11849_v5, %v14829_v63  ;;  %v2025_v7 = vpop.f32.mrb[43].mxu0  ;;  %v2823_v32 = vmax.f32 %v2031_v34, 0.0 }
 0x204   : > { %v2026_v49 = vadd.f32 %v14829_v63, %v2025_v7  ;;  %v2821_v21 = vmax.f32 %v2023_v37, 0.0 }
 0x205   : > { %v2824_v50 = vmax.f32 %v2034_v53, 0.0  ;;  %11955 = vmatmul.mubr.msk.bf16.gmra.mrb[84].mxu1 %vm1687_vm0, %v18181_v46  ;;  %v18185_v53 = vld [vmem:[#allocation29_spill] sm:$0xff] }
 0x206   : > { %v2822_v36 = vmax.f32 %v2026_v49, 0.0  ;;  %11958 = vmatprep.mubr.msk.bf16.mxu1 %vm1687_vm0, %v18182_v62 }
 0x207   : > { %v3022_v31 = vpack.c.bf16 %v2824_v50, %v2823_v32  ;;  %v18186_v32 = vld [vmem:[#allocation15_spill] sm:$0xff] }
 0x208   : > { %v3021_v45 = vpack.c.bf16 %v2822_v36, %v2821_v21  ;;  %v11852_v42 = vpop.f32.mrb[44].mxu0 }
 0x209   : > { %v2047_v18 = vadd.f32 %v11852_v42, %v14829_v63  ;;  %v2038_v27 = vpop.f32.mrb[45].mxu0 }
 0x20a   : > { %v2039_v16 = vadd.f32 %v14829_v63, %v2038_v27  ;;  %v11853_v25 = vpop.f32.mrb[46].mxu0  ;;  %12054 = vmatprep.mubr.msk.bf16.mxu0 %vm1687_vm0, %v3021_v45 }
 0x20b   : > { %v2050_v24 = vadd.f32 %v11853_v25, %v14829_v63  ;;  %v2041_v48 = vpop.f32.mrb[47].mxu0  ;;  %12055 = vmatmul.mubr.msk.bf16.vlgmr.msra.gmra.mrb[64].mxu0 %vm1687_vm0, %v3022_v31  ;;  %v2827_v38 = vmax.f32 %v2047_v18, 0.0 }
 0x20c   : > { %v2042_v30 = vadd.f32 %v14829_v63, %v2041_v48  ;;  %v2825_v40 = vmax.f32 %v2039_v16, 0.0 }
 0x20d   : > { %v2828_v0 = vmax.f32 %v2050_v24, 0.0  ;;  %11959 = vmatmul.mubr.msk.bf16.gmra.mrb[88].mxu1 %vm1687_vm0, %v18183_v44  ;;  %v18187_v24 = vld [vmem:[#allocation16_spill] sm:$0xff] }
 0x20e   : > { %v2826_v14 = vmax.f32 %v2042_v30, 0.0  ;;  %11962 = vmatprep.mubr.msk.bf16.mxu1 %vm1687_vm0, %v18184_v19 }
 0x20f   : > { %v3024_v51 = vpack.c.bf16 %v2828_v0, %v2827_v38  ;;  %v18188_v38 = vld [vmem:[#allocation18_spill] sm:$0xff] }
 0x210   : > { %v3023_v9 = vpack.c.bf16 %v2826_v14, %v2825_v40  ;;  %v11856_v41 = vpop.f32.mrb[48].mxu0 }
 0x211   : > { %v2063_v58 = vadd.f32 %v11856_v41, %v14829_v63  ;;  %v2054_v33 = vpop.f32.mrb[49].mxu0 }
 0x212   : > { %v2055_v43 = vadd.f32 %v14829_v63, %v2054_v33  ;;  %v11857_v6 = vpop.f32.mrb[50].mxu0  ;;  %12058 = vmatprep.mubr.msk.bf16.mxu0 %vm1687_vm0, %v3023_v9 }
 0x213   : > { %v2066_v59 = vadd.f32 %v11857_v6, %v14829_v63  ;;  %v2057_v34 = vpop.f32.mrb[51].mxu0  ;;  %12059 = vmatmul.mubr.msk.bf16.gmra.mrb[68].mxu0 %vm1687_vm0, %v3024_v51  ;;  %v2831_v37 = vmax.f32 %v2063_v58, 0.0 }
 0x214   : > { %v2058_v39 = vadd.f32 %v14829_v63, %v2057_v34  ;;  %v2829_v7 = vmax.f32 %v2055_v43, 0.0 }
 0x215   : > { %v2832_v5 = vmax.f32 %v2066_v59, 0.0  ;;  %11963 = vmatmul.mubr.msk.bf16.gmra.mrb[92].mxu1 %vm1687_vm0, %v18185_v53  ;;  %v18189_v59 = vld [vmem:[#allocation19_spill] sm:$0xff] }
 0x216   : > { %v2830_v49 = vmax.f32 %v2058_v39, 0.0  ;;  %11966 = vmatprep.mubr.msk.bf16.mxu1 %vm1687_vm0, %v18186_v32 }
 0x217   : > { %v3026_v50 = vpack.c.bf16 %v2832_v5, %v2831_v37  ;;  %v18190_v37 = vld [vmem:[#allocation20_spill] sm:$0xff] }
 0x218   : > { %v3025_v46 = vpack.c.bf16 %v2830_v49, %v2829_v7  ;;  %v11860_v21 = vpop.f32.mrb[52].mxu0 }
 0x219   : > { %v2079_v36 = vadd.f32 %v11860_v21, %v14829_v63  ;;  %v2070_v62 = vpop.f32.mrb[53].mxu0 }
 0x21a   : > { %v2071_v31 = vadd.f32 %v14829_v63, %v2070_v62  ;;  %v11861_v45 = vpop.f32.mrb[54].mxu0  ;;  %12062 = vmatprep.mubr.msk.bf16.mxu0 %vm1687_vm0, %v3025_v46 }
 0x21b   : > { %v2082_v42 = vadd.f32 %v11861_v45, %v14829_v63  ;;  %v2073_v18 = vpop.f32.mrb[55].mxu0  ;;  %12063 = vmatmul.mubr.msk.bf16.gmra.mrb[72].mxu0 %vm1687_vm0, %v3026_v50  ;;  %v2835_v16 = vmax.f32 %v2079_v36, 0.0 }
 0x21c   : > { %v2074_v27 = vadd.f32 %v14829_v63, %v2073_v18  ;;  %v2833_v48 = vmax.f32 %v2071_v31, 0.0 }
 0x21d   : > { %v2836_v25 = vmax.f32 %v2082_v42, 0.0  ;;  %11967 = vmatmul.mubr.msk.bf16.gmra.mrb[96].mxu1 %vm1687_vm0, %v18187_v24  ;;  %v18191_v42 = vld [vmem:[#allocation21_spill] sm:$0xff] }
 0x21e   : > { %v2834_v30 = vmax.f32 %v2074_v27, 0.0  ;;  %11970 = vmatprep.mubr.msk.bf16.mxu1 %vm1687_vm0, %v18188_v38 }
 0x21f   : > { %v3028_v0 = vpack.c.bf16 %v2836_v25, %v2835_v16  ;;  %v18192_v16 = vld [vmem:[#allocation47_spill] sm:$0xff] }
 0x220   : > { %v3027_v44 = vpack.c.bf16 %v2834_v30, %v2833_v48  ;;  %v11864_v40 = vpop.f32.mrb[56].mxu0 }
 0x221   : > { %v2095_v14 = vadd.f32 %v11864_v40, %v14829_v63  ;;  %v2086_v19 = vpop.f32.mrb[57].mxu0 }
 0x222   : > { %v2087_v51 = vadd.f32 %v14829_v63, %v2086_v19  ;;  %v11865_v9 = vpop.f32.mrb[58].mxu0  ;;  %12066 = vmatprep.mubr.msk.bf16.mxu0 %vm1687_vm0, %v3027_v44 }
 0x223   : > { %v2098_v41 = vadd.f32 %v11865_v9, %v14829_v63  ;;  %v2089_v58 = vpop.f32.mrb[59].mxu0  ;;  %12067 = vmatmul.mubr.msk.bf16.gmra.mrb[76].mxu0 %vm1687_vm0, %v3028_v0  ;;  %v2839_v43 = vmax.f32 %v2095_v14, 0.0 }
 0x224   : > { %v2090_v33 = vadd.f32 %v14829_v63, %v2089_v58  ;;  %v2837_v34 = vmax.f32 %v2087_v51, 0.0 }
 0x225   : > { %v2840_v6 = vmax.f32 %v2098_v41, 0.0  ;;  %11971 = vmatmul.mubr.msk.bf16.gmra.mrb[100].mxu1 %vm1687_vm0, %v18189_v59  ;;  %v18193_v41 = vld [vmem:[#allocation48_spill] sm:$0xff] }
 0x226   : > { %v2838_v39 = vmax.f32 %v2090_v33, 0.0  ;;  %11974 = vmatprep.mubr.msk.bf16.mxu1 %vm1687_vm0, %v18190_v37 }
 0x227   : > { %v3030_v5 = vpack.c.bf16 %v2840_v6, %v2839_v43  ;;  %v18194_v43 = vld [vmem:[#allocation22_spill] sm:$0xff] }
 0x228   : > { %v3029_v53 = vpack.c.bf16 %v2838_v39, %v2837_v34  ;;  %v11868_v7 = vpop.f32.mrb[60].mxu0 }
 0x229   : > { %v2111_v49 = vadd.f32 %v11868_v7, %v14829_v63  ;;  %v2102_v32 = vpop.f32.mrb[61].mxu0 }
 0x22a   : > { %v2103_v50 = vadd.f32 %v14829_v63, %v2102_v32  ;;  %v11869_v46 = vpop.f32.mrb[62].mxu0  ;;  %12070 = vmatprep.mubr.msk.bf16.mxu0 %vm1687_vm0, %v3029_v53 }
 0x22b   : > { %v2114_v21 = vadd.f32 %v11869_v46, %v14829_v63  ;;  %v2105_v36 = vpop.f32.mrb[63].mxu0  ;;  %12071 = vmatmul.mubr.msk.bf16.gmra.mrb[80].mxu0 %vm1687_vm0, %v3030_v5  ;;  %v2843_v31 = vmax.f32 %v2111_v49, 0.0 }
 0x22c   : > { %v2106_v62 = vadd.f32 %v14829_v63, %v2105_v36  ;;  %v2841_v18 = vmax.f32 %v2103_v50, 0.0 }
 0x22d   : > { %v2844_v45 = vmax.f32 %v2114_v21, 0.0  ;;  %11975 = vmatmul.mubr.msk.bf16.gmra.mrb[104].mxu1 %vm1687_vm0, %v18191_v42  ;;  %v18195_v21 = vld [vmem:[#allocation23_spill] sm:$0xff] }
 0x22e   : > { %v2842_v27 = vmax.f32 %v2106_v62, 0.0  ;;  %11978 = vmatprep.mubr.msk.bf16.mxu1 %vm1687_vm0, %v18192_v16 }
 0x22f   : > { %v3032_v25 = vpack.c.bf16 %v2844_v45, %v2843_v31  ;;  %v18196_v31 = vld [vmem:[#allocation49_spill] sm:$0xff] }
 0x230   : > { %v3031_v24 = vpack.c.bf16 %v2842_v27, %v2841_v18  ;;  %v11872_v48 = vpop.f32.mrb[0].mxu1 }
 0x231   : > { %v2127_v30 = vadd.f32 %v11872_v48, %v14829_v63  ;;  %v2118_v38 = vpop.f32.mrb[1].mxu1 }
 0x232   : > { %v2119_v0 = vadd.f32 %v14829_v63, %v2118_v38  ;;  %v11873_v44 = vpop.f32.mrb[2].mxu1  ;;  %12074 = vmatprep.mubr.msk.bf16.mxu0 %vm1687_vm0, %v3031_v24 }
 0x233   : > { %v2130_v40 = vadd.f32 %v11873_v44, %v14829_v63  ;;  %v2121_v14 = vpop.f32.mrb[3].mxu1  ;;  %12075 = vmatmul.mubr.msk.bf16.gmra.mrb[84].mxu0 %vm1687_vm0, %v3032_v25  ;;  %v2847_v51 = vmax.f32 %v2127_v30, 0.0 }
 0x234   : > { %v2122_v19 = vadd.f32 %v14829_v63, %v2121_v14  ;;  %v2845_v58 = vmax.f32 %v2119_v0, 0.0 }
 0x235   : > { %v2848_v9 = vmax.f32 %v2130_v40, 0.0  ;;  %11979 = vmatmul.mubr.msk.bf16.gmra.mrb[108].mxu1 %vm1687_vm0, %v18193_v41  ;;  %v18197_v40 = vld [vmem:[#allocation50_spill] sm:$0xff] }
 0x236   : > { %v2846_v33 = vmax.f32 %v2122_v19, 0.0  ;;  %11982 = vmatprep.mubr.msk.bf16.mxu1 %vm1687_vm0, %v18194_v43 }
 0x237   : > { %v3034_v6 = vpack.c.bf16 %v2848_v9, %v2847_v51  ;;  %v18198_v51 = vld [vmem:[#allocation51_spill] sm:$0xff] }
 0x238   : > { %v11876_v59 = vpop.f32.mrb[4].mxu1  ;;  %v3033_v34 = vpack.c.bf16 %v2846_v33, %v2845_v58 }
 0x239   : > { %v2143_v39 = vadd.f32 %v11876_v59, %v14829_v63  ;;  %v2134_v37 = vpop.f32.mrb[5].mxu1 }
 0x23a   : > { %v2135_v5 = vadd.f32 %v14829_v63, %v2134_v37  ;;  %v11877_v53 = vpop.f32.mrb[6].mxu1  ;;  %12078 = vmatprep.mubr.msk.bf16.mxu0 %vm1687_vm0, %v3033_v34 }
 0x23b   : > { %v2146_v7 = vadd.f32 %v11877_v53, %v14829_v63  ;;  %v2137_v49 = vpop.f32.mrb[7].mxu1  ;;  %12079 = vmatmul.mubr.msk.bf16.gmra.mrb[88].mxu0 %vm1687_vm0, %v3034_v6  ;;  %v2851_v50 = vmax.f32 %v2143_v39, 0.0 }
 0x23c   : > { %v2138_v32 = vadd.f32 %v14829_v63, %v2137_v49  ;;  %v2849_v36 = vmax.f32 %v2135_v5, 0.0 }
 0x23d   : > { %v2852_v46 = vmax.f32 %v2146_v7, 0.0  ;;  %11983 = vmatmul.mubr.msk.bf16.gmra.mrb[112].mxu1 %vm1687_vm0, %v18195_v21  ;;  %v12822_v21 = vld [vmem:[%s18013_s7] sm:$0xff]  }
 0x23e   : > { %v2850_v62 = vmax.f32 %v2138_v32, 0.0  ;;  %11986 = vmatprep.mubr.msk.bf16.mxu1 %vm1687_vm0, %v18196_v31  ;;  %12254 = vmatprep.subr.bf16.mxu1 %v12822_v21 }
 0x23f   : > { %v3036_v45 = vpack.c.bf16 %v2852_v46, %v2851_v50  ;;  %12255 = vmatpush3.bf16.msra.mxu1 %v12822_v21 }
 0x240   : > { %v11880_v42 = vpop.f32.mrb[8].mxu1  ;;  %v3035_v18 = vpack.c.bf16 %v2850_v62, %v2849_v36 }
 0x241   : > { %v2159_v27 = vadd.f32 %v11880_v42, %v14829_v63  ;;  %v2150_v16 = vpop.f32.mrb[9].mxu1 }
 0x242   : > { %v2151_v25 = vadd.f32 %v14829_v63, %v2150_v16  ;;  %v11881_v24 = vpop.f32.mrb[10].mxu1  ;;  %12082 = vmatprep.mubr.msk.bf16.mxu0 %vm1687_vm0, %v3035_v18 }
 0x243   : > { %v2162_v48 = vadd.f32 %v11881_v24, %v14829_v63  ;;  %v2153_v30 = vpop.f32.mrb[11].mxu1  ;;  %12083 = vmatmul.mubr.msk.bf16.gmra.mrb[92].mxu0 %vm1687_vm0, %v3036_v45  ;;  %v2855_v0 = vmax.f32 %v2159_v27, 0.0  ;;  %v18199_v24 = vld [vmem:[#allocation24_spill] sm:$0xff] }
 0x244   : > { %v2154_v38 = vadd.f32 %v14829_v63, %v2153_v30  ;;  %v2853_v14 = vmax.f32 %v2151_v25, 0.0 }
 0x245   : > { %v2856_v44 = vmax.f32 %v2162_v48, 0.0  ;;  %11987 = vmatmul.mubr.msk.bf16.gmra.mrb[116].mxu1 %vm1687_vm0, %v18197_v40 }
 0x246   : > { %v2854_v19 = vmax.f32 %v2154_v38, 0.0  ;;  %11990 = vmatprep.mubr.msk.bf16.mxu1 %vm1687_vm0, %v18198_v51 }
 0x247   : > { %v3038_v9 = vpack.c.bf16 %v2856_v44, %v2855_v0 }
 0x248   : > { %v11884_v41 = vpop.f32.mrb[12].mxu1  ;;  %v3037_v58 = vpack.c.bf16 %v2854_v19, %v2853_v14 }
 0x249   : > { %v2175_v33 = vadd.f32 %v11884_v41, %v14829_v63  ;;  %v2166_v43 = vpop.f32.mrb[13].mxu1 }
 0x24a   : > { %v2167_v6 = vadd.f32 %v14829_v63, %v2166_v43  ;;  %v11885_v59 = vpop.f32.mrb[14].mxu1  ;;  %12086 = vmatprep.mubr.msk.bf16.mxu0 %vm1687_vm0, %v3037_v58 }
 0x24b   : > { %v2178_v34 = vadd.f32 %v11885_v59, %v14829_v63  ;;  %v2169_v39 = vpop.f32.mrb[15].mxu1  ;;  %12087 = vmatmul.mubr.msk.bf16.gmra.mrb[96].mxu0 %vm1687_vm0, %v3038_v9  ;;  %v2859_v5 = vmax.f32 %v2175_v33, 0.0 }
 0x24c   : > { %v2170_v37 = vadd.f32 %v14829_v63, %v2169_v39  ;;  %v2857_v7 = vmax.f32 %v2167_v6, 0.0 }
 0x24d   : > { %v2860_v53 = vmax.f32 %v2178_v34, 0.0  ;;  %11991 = vmatmul.mubr.msk.bf16.gmra.mrb[120].mxu1 %vm1687_vm0, %v14594_v61 }
 0x24e   : > { %v2858_v49 = vmax.f32 %v2170_v37, 0.0  ;;  %11994 = vmatprep.mubr.msk.bf16.mxu1 %vm1687_vm0, %v14598_v11 }
 0x24f   : > { %v3040_v32 = vpack.c.bf16 %v2860_v53, %v2859_v5 }
 0x250   : > { %v11888_v50 = vpop.f32.mrb[16].mxu1  ;;  %v3039_v46 = vpack.c.bf16 %v2858_v49, %v2857_v7 }
 0x251   : > { %v2191_v36 = vadd.f32 %v11888_v50, %v14829_v63  ;;  %v2182_v62 = vpop.f32.mrb[17].mxu1 }
 0x252   : > { %v2183_v31 = vadd.f32 %v14829_v63, %v2182_v62  ;;  %v11889_v45 = vpop.f32.mrb[18].mxu1  ;;  %12090 = vmatprep.mubr.msk.bf16.mxu0 %vm1687_vm0, %v3039_v46 }
 0x253   : > { %v2194_v61 = vadd.f32 %v11889_v45, %v14829_v63  ;;  %v2185_v42 = vpop.f32.mrb[19].mxu1  ;;  %12091 = vmatmul.mubr.msk.bf16.gmra.mrb[100].mxu0 %vm1687_vm0, %v3040_v32  ;;  %v2863_v18 = vmax.f32 %v2191_v36, 0.0 }
 0x254   : > { %v2186_v11 = vadd.f32 %v14829_v63, %v2185_v42  ;;  %v2861_v16 = vmax.f32 %v2183_v31, 0.0 }
 0x255   : > { %v2864_v27 = vmax.f32 %v2194_v61, 0.0  ;;  %11995 = vmatmul.mubr.msk.bf16.gmra.mrb[124].mxu1 %vm1687_vm0, %v14607_v3 }
 0x256   : > { %v2862_v25 = vmax.f32 %v2186_v11, 0.0  ;;  %11998 = vmatprep.mubr.msk.bf16.mxu1 %vm1687_vm0, %v18199_v24 }
 0x257   : > { %v3042_v48 = vpack.c.bf16 %v2864_v27, %v2863_v18 }
 0x258   : > { %v11892_v30 = vpop.f32.mrb[20].mxu1  ;;  %v3041_v38 = vpack.c.bf16 %v2862_v25, %v2861_v16 }
 0x259   : > { %v2207_v0 = vadd.f32 %v11892_v30, %v14829_v63  ;;  %v2198_v44 = vpop.f32.mrb[21].mxu1 }
 0x25a   : > { %v2199_v40 = vadd.f32 %v14829_v63, %v2198_v44  ;;  %v11893_v14 = vpop.f32.mrb[22].mxu1  ;;  %12094 = vmatprep.mubr.msk.bf16.mxu0 %vm1687_vm0, %v3041_v38 }
 0x25b   : > { %v2210_v19 = vadd.f32 %v11893_v14, %v14829_v63  ;;  %v2201_v51 = vpop.f32.mrb[23].mxu1  ;;  %12095 = vmatmul.mubr.msk.bf16.gmra.mrb[104].mxu0 %vm1687_vm0, %v3042_v48  ;;  %v2867_v9 = vmax.f32 %v2207_v0, 0.0 }
 0x25c   : > { %v2202_v3 = vadd.f32 %v14829_v63, %v2201_v51  ;;  %v2865_v58 = vmax.f32 %v2199_v40, 0.0 }
 0x25d   : > { %v2868_v41 = vmax.f32 %v2210_v19, 0.0  ;;  %11999 = vmatmul.mubr.msk.bf16.gmra.mrb[128].mxu1 %vm1687_vm0, %v14630_v47 }
 0x25e   : > { %v2866_v33 = vmax.f32 %v2202_v3, 0.0  ;;  %12002 = vmatprep.mubr.msk.bf16.mxu1 %vm1687_vm0, %v14634_v52 }
 0x25f   : > { %v3044_v43 = vpack.c.bf16 %v2868_v41, %v2867_v9 }
 0x260   : > { %v11896_v6 = vpop.f32.mrb[24].mxu1  ;;  %v3043_v59 = vpack.c.bf16 %v2866_v33, %v2865_v58 }
 0x261   : > { %v2223_v34 = vadd.f32 %v11896_v6, %v14829_v63  ;;  %v2214_v39 = vpop.f32.mrb[25].mxu1 }
 0x262   : > { %v2215_v37 = vadd.f32 %v14829_v63, %v2214_v39  ;;  %v11897_v5 = vpop.f32.mrb[26].mxu1  ;;  %12098 = vmatprep.mubr.msk.bf16.mxu0 %vm1687_vm0, %v3043_v59 }
 0x263   : > { %v2226_v53 = vadd.f32 %v11897_v5, %v14829_v63  ;;  %v2217_v7 = vpop.f32.mrb[27].mxu1  ;;  %12099 = vmatmul.mubr.msk.bf16.gmra.mrb[108].mxu0 %vm1687_vm0, %v3044_v43  ;;  %v2871_v49 = vmax.f32 %v2223_v34, 0.0 }
 0x264   : > { %v2218_v47 = vadd.f32 %v14829_v63, %v2217_v7  ;;  %v2869_v32 = vmax.f32 %v2215_v37, 0.0  ;;  %v12823_v7 = vld [vmem:[%s18013_s7 + $0x8] sm:$0xff]  }
 0x265   : > { %v2872_v52 = vmax.f32 %v2226_v53, 0.0  ;;  %12003 = vmatmul.mubr.msk.bf16.gmra.mrb[132].mxu1 %vm1687_vm0, %v14643_v4  ;;  %12256 = vmatprep.subr.bf16.mxu1 %v12823_v7 }
 0x266   : > { %v2870_v50 = vmax.f32 %v2218_v47, 0.0  ;;  %12006 = vmatprep.mubr.msk.bf16.mxu1 %vm1687_vm0, %v14648_v13  ;;  %12257 = vmatpush3.bf16.msra.mxu1 %v12823_v7 }
 0x267   : > { %v3046_v46 = vpack.c.bf16 %v2872_v52, %v2871_v49 }
 0x268   : > { %v11900_v21 = vpop.f32.mrb[28].mxu1  ;;  %v3045_v36 = vpack.c.bf16 %v2870_v50, %v2869_v32 }
 0x269   : > { %v2239_v62 = vadd.f32 %v11900_v21, %v14829_v63  ;;  %v2230_v31 = vpop.f32.mrb[29].mxu1 }
 0x26a   : > { %v2231_v45 = vadd.f32 %v14829_v63, %v2230_v31  ;;  %v11901_v61 = vpop.f32.mrb[30].mxu1  ;;  %12102 = vmatprep.mubr.msk.bf16.mxu0 %vm1687_vm0, %v3045_v36 }
 0x26b   : > { %v2242_v42 = vadd.f32 %v11901_v61, %v14829_v63  ;;  %v2233_v11 = vpop.f32.mrb[31].mxu1  ;;  %12103 = vmatmul.mubr.msk.bf16.gmra.mrb[112].mxu0 %vm1687_vm0, %v3046_v46  ;;  %v2875_v18 = vmax.f32 %v2239_v62, 0.0 }
 0x26c   : > { %v2234_v4 = vadd.f32 %v14829_v63, %v2233_v11  ;;  %v2873_v27 = vmax.f32 %v2231_v45, 0.0 }
 0x26d   : > { %v2876_v13 = vmax.f32 %v2242_v42, 0.0  ;;  %12007 = vmatmul.mubr.msk.bf16.gmra.mrb[136].mxu1 %vm1687_vm0, %v14664_v29 }
 0x26e   : > { %v2874_v16 = vmax.f32 %v2234_v4, 0.0  ;;  %12010 = vmatprep.mubr.msk.bf16.mxu1 %vm1687_vm0, %v14670_v54 }
 0x26f   : > { %v3048_v25 = vpack.c.bf16 %v2876_v13, %v2875_v18 }
 0x270   : > { %v11904_v24 = vpop.f32.mrb[32].mxu1  ;;  %v3047_v48 = vpack.c.bf16 %v2874_v16, %v2873_v27 }
 0x271   : > { %v2246_v30 = vpop.f32.mrb[33].mxu1  ;;  %v2255_v38 = vadd.f32 %v11904_v24, %v14829_v63 }
 0x272   : > { %v11905_v0 = vpop.f32.mrb[34].mxu1  ;;  %12106 = vmatprep.mubr.msk.bf16.mxu0 %vm1687_vm0, %v3047_v48  ;;  %v2247_v44 = vadd.f32 %v14829_v63, %v2246_v30 }
 0x273   : > { %v2249_v40 = vpop.f32.mrb[35].mxu1  ;;  %12107 = vmatmul.mubr.msk.bf16.gmra.mrb[116].mxu0 %vm1687_vm0, %v3048_v25  ;;  %v2258_v29 = vadd.f32 %v11905_v0, %v14829_v63  ;;  %v2879_v54 = vmax.f32 %v2255_v38, 0.0 }
 0x274   : > { %v2250_v14 = vadd.f32 %v14829_v63, %v2249_v40  ;;  %v2877_v51 = vmax.f32 %v2247_v44, 0.0 }
 0x275   : > { %12011 = vmatmul.mubr.msk.bf16.gmra.mrb[140].mxu1 %vm1687_vm0, %v14679_v12  ;;  %v2880_v19 = vmax.f32 %v2258_v29, 0.0 }
 0x276   : > { %12014 = vmatprep.mubr.msk.bf16.mxu1 %vm1687_vm0, %v14684_v15  ;;  %v2878_v3 = vmax.f32 %v2250_v14, 0.0 }
 0x277   : > { %v3050_v9 = vpack.c.bf16 %v2880_v19, %v2879_v54 }
 0x278   : > { %v11908_v41 = vpop.f32.mrb[36].mxu1  ;;  %v3049_v58 = vpack.c.bf16 %v2878_v3, %v2877_v51 }
 0x279   : > { %v2262_v33 = vpop.f32.mrb[37].mxu1  ;;  %v2271_v43 = vadd.f32 %v11908_v41, %v14829_v63 }
 0x27a   : > { %v11909_v6 = vpop.f32.mrb[38].mxu1  ;;  %12110 = vmatprep.mubr.msk.bf16.mxu0 %vm1687_vm0, %v3049_v58  ;;  %v2263_v59 = vadd.f32 %v14829_v63, %v2262_v33 }
 0x27b   : > { %v2265_v34 = vpop.f32.mrb[39].mxu1  ;;  %12111 = vmatmul.mubr.msk.bf16.gmra.mrb[120].mxu0 %vm1687_vm0, %v3050_v9  ;;  %v2274_v12 = vadd.f32 %v11909_v6, %v14829_v63  ;;  %v2883_v39 = vmax.f32 %v2271_v43, 0.0 }
 0x27c   : > { %v2266_v15 = vadd.f32 %v14829_v63, %v2265_v34  ;;  %v2881_v5 = vmax.f32 %v2263_v59, 0.0  ;;  %v12824_v59 = vld [vmem:[%s18013_s7 + $0x10] sm:$0xff]  }
 0x27d   : > { %12015 = vmatmul.mubr.msk.bf16.gmra.mrb[144].mxu1 %vm1687_vm0, %v14698_v10  ;;  %v2884_v37 = vmax.f32 %v2274_v12, 0.0  ;;  %12258 = vmatprep.subr.bf16.mxu1 %v12824_v59 }
 0x27e   : > { %12018 = vmatprep.mubr.msk.bf16.mxu1 %vm1687_vm0, %v14704_v1  ;;  %v2882_v53 = vmax.f32 %v2266_v15, 0.0  ;;  %12259 = vmatpush3.bf16.msra.mxu1 %v12824_v59 }
 0x27f   : > { %v3052_v47 = vpack.c.bf16 %v2884_v37, %v2883_v39 }
 0x280   : > { %v11912_v49 = vpop.f32.mrb[40].mxu1  ;;  %v3051_v52 = vpack.c.bf16 %v2882_v53, %v2881_v5 }
 0x281   : > { %v2287_v32 = vadd.f32 %v11912_v49, %v14829_v63  ;;  %v2278_v50 = vpop.f32.mrb[41].mxu1  ;;  %v12825_v49 = vld [vmem:[%s18013_s7 + $0x18] sm:$0xff]  }
 0x282   : > { %v2279_v10 = vadd.f32 %v14829_v63, %v2278_v50  ;;  %v11913_v46 = vpop.f32.mrb[42].mxu1  ;;  %12114 = vmatprep.mubr.msk.bf16.mxu0 %vm1687_vm0, %v3051_v52  ;;  %12260 = vmatprep.subr.bf16.mxu1 %v12825_v49 }
 0x283   : > { %v2290_v1 = vadd.f32 %v11913_v46, %v14829_v63  ;;  %v2281_v21 = vpop.f32.mrb[43].mxu1  ;;  %12115 = vmatmul.mubr.msk.bf16.gmra.mrb[124].mxu0 %vm1687_vm0, %v3052_v47  ;;  %v2887_v62 = vmax.f32 %v2287_v32, 0.0  ;;  %12261 = vmatpush3.bf16.msra.mxu1 %v12825_v49 }
 0x284   : > { %v2282_v36 = vadd.f32 %v14829_v63, %v2281_v21  ;;  %v2885_v45 = vmax.f32 %v2279_v10, 0.0  ;;  %v12826_v10 = vld [vmem:[%s18013_s7 + $0x20] sm:$0xff]  }
 0x285   : > { %v2888_v31 = vmax.f32 %v2290_v1, 0.0  ;;  %12019 = vmatmul.mubr.msk.bf16.gmra.mrb[148].mxu1 %vm1687_vm0, %v14715_v2  ;;  %12262 = vmatprep.subr.bf16.mxu1 %v12826_v10 }
 0x286   : > { %v2886_v61 = vmax.f32 %v2282_v36, 0.0  ;;  %12022 = vmatprep.mubr.msk.bf16.mxu1 %vm1687_vm0, %v14720_v55 }
 0x287   : > { %v3054_v42 = vpack.c.bf16 %v2888_v31, %v2887_v62  ;;  %12263 = vmatpush3.bf16.msra.mxu1 %v12826_v10 }
 0x288   : > { %v3053_v11 = vpack.c.bf16 %v2886_v61, %v2885_v45  ;;  %v11916_v4 = vpop.f32.mrb[44].mxu1 }
 0x289   : > { %v2303_v18 = vadd.f32 %v11916_v4, %v14829_v63  ;;  %v2294_v13 = vpop.f32.mrb[45].mxu1 }
 0x28a   : > { %v2295_v27 = vadd.f32 %v14829_v63, %v2294_v13  ;;  %v11917_v16 = vpop.f32.mrb[46].mxu1  ;;  %12118 = vmatprep.mubr.msk.bf16.mxu0 %vm1687_vm0, %v3053_v11 }
 0x28b   : > { %v2306_v25 = vadd.f32 %v11917_v16, %v14829_v63  ;;  %v2297_v24 = vpop.f32.mrb[47].mxu1  ;;  %12119 = vmatmul.mubr.msk.bf16.gmra.mrb[128].mxu0 %vm1687_vm0, %v3054_v42  ;;  %v2891_v48 = vmax.f32 %v2303_v18, 0.0 }
 0x28c   : > { %v2298_v2 = vadd.f32 %v14829_v63, %v2297_v24  ;;  %v2889_v30 = vmax.f32 %v2295_v27, 0.0 }
 0x28d   : > { %v2892_v55 = vmax.f32 %v2306_v25, 0.0  ;;  %12023 = vmatmul.mubr.msk.bf16.gmra.mrb[152].mxu1 %vm1687_vm0, %v14734_v35 }
 0x28e   : > { %v2890_v38 = vmax.f32 %v2298_v2, 0.0  ;;  %12026 = vmatprep.mubr.msk.bf16.mxu1 %vm1687_vm0, %v14738_v23 }
 0x28f   : > { %v3056_v0 = vpack.c.bf16 %v2892_v55, %v2891_v48 }
 0x290   : > { %v3055_v44 = vpack.c.bf16 %v2890_v38, %v2889_v30  ;;  %v11920_v40 = vpop.f32.mrb[48].mxu1 }
 0x291   : > { %v2319_v29 = vadd.f32 %v11920_v40, %v14829_v63  ;;  %v2310_v14 = vpop.f32.mrb[49].mxu1 }
 0x292   : > { %v2311_v54 = vadd.f32 %v14829_v63, %v2310_v14  ;;  %v11921_v19 = vpop.f32.mrb[50].mxu1  ;;  %12122 = vmatprep.mubr.msk.bf16.mxu0 %vm1687_vm0, %v3055_v44 }
 0x293   : > { %v2322_v51 = vadd.f32 %v11921_v19, %v14829_v63  ;;  %v2313_v3 = vpop.f32.mrb[51].mxu1  ;;  %12123 = vmatmul.mubr.msk.bf16.gmra.mrb[132].mxu0 %vm1687_vm0, %v3056_v0  ;;  %v2895_v9 = vmax.f32 %v2319_v29, 0.0 }
 0x294   : > { %v2314_v35 = vadd.f32 %v14829_v63, %v2313_v3  ;;  %v2893_v41 = vmax.f32 %v2311_v54, 0.0 }
 0x295   : > { %v2896_v23 = vmax.f32 %v2322_v51, 0.0  ;;  %12027 = vmatmul.mubr.msk.bf16.gmra.mrb[156].mxu1 %vm1687_vm0, %v14751_v17 }
 0x296   : > { %v2894_v58 = vmax.f32 %v2314_v35, 0.0  ;;  %12030 = vmatprep.mubr.msk.bf16.mxu1 %vm1687_vm0, %v14756_v60 }
 0x297   : > { %v3058_v33 = vpack.c.bf16 %v2896_v23, %v2895_v9 }
 0x298   : > { %v3057_v43 = vpack.c.bf16 %v2894_v58, %v2893_v41  ;;  %v11924_v6 = vpop.f32.mrb[52].mxu1 }
 0x299   : > { %v2335_v34 = vadd.f32 %v11924_v6, %v14829_v63  ;;  %v2326_v12 = vpop.f32.mrb[53].mxu1 }
 0x29a   : > { %v2327_v15 = vadd.f32 %v14829_v63, %v2326_v12  ;;  %v11925_v39 = vpop.f32.mrb[54].mxu1  ;;  %12126 = vmatprep.mubr.msk.bf16.mxu0 %vm1687_vm0, %v3057_v43 }
 0x29b   : > { %v2338_v17 = vadd.f32 %v11925_v39, %v14829_v63  ;;  %v2329_v37 = vpop.f32.mrb[55].mxu1  ;;  %12127 = vmatmul.mubr.msk.bf16.gmra.mrb[136].mxu0 %vm1687_vm0, %v3058_v33  ;;  %v2899_v5 = vmax.f32 %v2335_v34, 0.0 }
 0x29c   : > { %v2330_v60 = vadd.f32 %v14829_v63, %v2329_v37  ;;  %v2897_v7 = vmax.f32 %v2327_v15, 0.0 }
 0x29d   : > { %v2900_v53 = vmax.f32 %v2338_v17, 0.0  ;;  %12031 = vmatmul.mubr.msk.bf16.gmra.mrb[160].mxu1 %vm1687_vm0, %v14770_v56 }
 0x29e   : > { %v2898_v47 = vmax.f32 %v2330_v60, 0.0  ;;  %12034 = vmatprep.mubr.msk.bf16.mxu1 %vm1687_vm0, %v14774_v26 }
 0x29f   : > { %v3060_v52 = vpack.c.bf16 %v2900_v53, %v2899_v5 }
 0x2a0   : > { %v3059_v32 = vpack.c.bf16 %v2898_v47, %v2897_v7  ;;  %v11928_v50 = vpop.f32.mrb[56].mxu1 }
 0x2a1   : > { %v2351_v46 = vadd.f32 %v11928_v50, %v14829_v63  ;;  %v2342_v56 = vpop.f32.mrb[57].mxu1 }
 0x2a2   : > { %v2343_v1 = vadd.f32 %v14829_v63, %v2342_v56  ;;  %v11929_v21 = vpop.f32.mrb[58].mxu1  ;;  %12130 = vmatprep.mubr.msk.bf16.mxu0 %vm1687_vm0, %v3059_v32 }
 0x2a3   : > { %v2354_v26 = vadd.f32 %v11929_v21, %v14829_v63  ;;  %v2345_v36 = vpop.f32.mrb[59].mxu1  ;;  %12131 = vmatmul.mubr.msk.bf16.gmra.mrb[140].mxu0 %vm1687_vm0, %v3060_v52  ;;  %v2903_v31 = vmax.f32 %v2351_v46, 0.0 }
 0x2a4   : > { %v2346_v62 = vadd.f32 %v14829_v63, %v2345_v36  ;;  %v2901_v61 = vmax.f32 %v2343_v1, 0.0 }
 0x2a5   : > { %v2904_v45 = vmax.f32 %v2354_v26, 0.0  ;;  %12035 = vmatmul.mubr.msk.bf16.gmra.mrb[164].mxu1 %vm1687_vm0, %v14785_v22  ;;  %v12827_v22 = vld [vmem:[%s18013_s7 + $0x28] sm:$0xff]  }
 0x2a6   : > { %v2902_v42 = vmax.f32 %v2346_v62, 0.0  ;;  %12038 = vmatprep.mubr.msk.bf16.mxu1 %vm1687_vm0, %v14792_v57  ;;  %v12828_v57 = vld [vmem:[%s18013_s7 + $0x30] sm:$0xff]   ;;  %12264 = vmatprep.subr.bf16.mxu1 %v12827_v22 }
 0x2a7   : > { %v3062_v11 = vpack.c.bf16 %v2904_v45, %v2903_v31  ;;  %12265 = vmatpush3.bf16.msra.mxu1 %v12827_v22 }
 0x2a8   : > { %v3061_v4 = vpack.c.bf16 %v2902_v42, %v2901_v61  ;;  %v11932_v18 = vpop.f32.mrb[60].mxu1  ;;  %12266 = vmatprep.subr.bf16.mxu1 %v12828_v57 }
 0x2a9   : > { %v2367_v13 = vadd.f32 %v11932_v18, %v14829_v63  ;;  %v2358_v27 = vpop.f32.mrb[61].mxu1 }
 0x2aa   : > { %v2359_v16 = vadd.f32 %v14829_v63, %v2358_v27  ;;  %v11933_v25 = vpop.f32.mrb[62].mxu1  ;;  %12134 = vmatprep.mubr.msk.bf16.mxu0 %vm1687_vm0, %v3061_v4 }
 0x2ab   : > { %v2370_v24 = vadd.f32 %v11933_v25, %v14829_v63  ;;  %v2361_v2 = vpop.f32.mrb[63].mxu1  ;;  %12135 = vmatmul.mubr.msk.bf16.gmra.mrb[144].mxu0 %vm1687_vm0, %v3062_v11  ;;  %v2907_v55 = vmax.f32 %v2367_v13, 0.0  ;;  %12267 = vmatpush3.bf16.msra.mxu1 %v12828_v57 }
 0x2ac   : > { %v2362_v48 = vadd.f32 %v14829_v63, %v2361_v2  ;;  %v2905_v38 = vmax.f32 %v2359_v16, 0.0 }
 0x2ad   : > { %v2908_v30 = vmax.f32 %v2370_v24, 0.0  ;;  %12039 = vmatmul.mubr.msk.bf16.gmra.mrb[168].mxu1 %vm1687_vm0, %v14800_v28  ;;  %v12829_v28 = vld [vmem:[%s18013_s7 + $0x38] sm:$0xff]  }
 0x2ae   : > { %v2906_v0 = vmax.f32 %v2362_v48, 0.0  ;;  %12042 = vmatprep.mubr.msk.bf16.mxu1 %vm1687_vm0, %v14802_v20  ;;  %12268 = vmatprep.subr.bf16.mxu1 %v12829_v28 }
 0x2af   : > { %v3064_v44 = vpack.c.bf16 %v2908_v30, %v2907_v55  ;;  %12269 = vmatpush3.bf16.msra.mxu1 %v12829_v28 }
 0x2b0   : > { %v3063_v40 = vpack.c.bf16 %v2906_v0, %v2905_v38  ;;  %v11936_v29 = vpop.f32.mrb[64].mxu1 }
 0x2b1   : > { %v2383_v14 = vadd.f32 %v11936_v29, %v14829_v63  ;;  %v2374_v54 = vpop.f32.mrb[65].mxu1 }
 0x2b2   : > { %v2375_v19 = vadd.f32 %v14829_v63, %v2374_v54  ;;  %v11937_v51 = vpop.f32.mrb[66].mxu1  ;;  %12138 = vmatprep.mubr.msk.bf16.mxu0 %vm1687_vm0, %v3063_v40 }
 0x2b3   : > { %v2386_v20 = vadd.f32 %v11937_v51, %v14829_v63  ;;  %v2377_v3 = vpop.f32.mrb[67].mxu1  ;;  %12139 = vmatmul.mubr.msk.bf16.gmra.mrb[148].mxu0 %vm1687_vm0, %v3064_v44  ;;  %v2911_v9 = vmax.f32 %v2383_v14, 0.0 }
 0x2b4   : > { %v2378_v35 = vadd.f32 %v14829_v63, %v2377_v3  ;;  %v2909_v41 = vmax.f32 %v2375_v19, 0.0 }
 0x2b5   : > { %v2912_v23 = vmax.f32 %v2386_v20, 0.0  ;;  %12043 = vmatmul.mubr.msk.bf16.gmra.mrb[172].mxu1 %vm1687_vm0, %v14804_v8 }
 0x2b6   : > { %v2910_v58 = vmax.f32 %v2378_v35, 0.0 }
 0x2b7   : > { %v3066_v33 = vpack.c.bf16 %v2912_v23, %v2911_v9 }
 0x2b8   : > { %v3065_v43 = vpack.c.bf16 %v2910_v58, %v2909_v41  ;;  %v11940_v6 = vpop.f32.mrb[68].mxu1 }
 0x2b9   : > { %v2399_v59 = vadd.f32 %v11940_v6, %v14829_v63  ;;  %v2390_v34 = vpop.f32.mrb[69].mxu1 }
 0x2ba   : > { %v2391_v12 = vadd.f32 %v14829_v63, %v2390_v34  ;;  %v11941_v15 = vpop.f32.mrb[70].mxu1  ;;  %12142 = vmatprep.mubr.msk.bf16.mxu0 %vm1687_vm0, %v3065_v43 }
 0x2bb   : > { %v2402_v39 = vadd.f32 %v11941_v15, %v14829_v63  ;;  %v2393_v17 = vpop.f32.mrb[71].mxu1  ;;  %12143 = vmatmul.mubr.msk.bf16.gmra.mrb[152].mxu0 %vm1687_vm0, %v3066_v33  ;;  %v2915_v37 = vmax.f32 %v2399_v59, 0.0 }
 0x2bc   : > { %v2394_v8 = vadd.f32 %v14829_v63, %v2393_v17  ;;  %v2913_v5 = vmax.f32 %v2391_v12, 0.0 }
 0x2bd   : > { %v2916_v60 = vmax.f32 %v2402_v39, 0.0 }
 0x2be   : > { %v2914_v53 = vmax.f32 %v2394_v8, 0.0 }
 0x2bf   : > { %v3068_v7 = vpack.c.bf16 %v2916_v60, %v2915_v37 }
 0x2c0   : > { %v3067_v47 = vpack.c.bf16 %v2914_v53, %v2913_v5  ;;  %v11944_v49 = vpop.f32.mrb[72].mxu1  ;;  %v12830_v53 = vld [vmem:[%s18018_s12] ss:$36 sps:$4 sm:$0xff]  }
 0x2c1   : > { %v2415_v52 = vadd.f32 %v11944_v49, %v14829_v63  ;;  %v2406_v32 = vpop.f32.mrb[73].mxu1 }
 0x2c2   : > { %v2407_v50 = vadd.f32 %v14829_v63, %v2406_v32  ;;  %v11945_v10 = vpop.f32.mrb[74].mxu1  ;;  %12146 = vmatprep.mubr.msk.bf16.mxu0 %vm1687_vm0, %v3067_v47 }
 0x2c3   : > { %v2418_v46 = vadd.f32 %v11945_v10, %v14829_v63  ;;  %v2409_v56 = vpop.f32.mrb[75].mxu1  ;;  %12147 = vmatmul.mubr.msk.bf16.gmra.mrb[156].mxu0 %vm1687_vm0, %v3068_v7  ;;  %v2919_v21 = vmax.f32 %v2415_v52, 0.0  ;;  %v12832_v7 = vld [vmem:[%s18018_s12 + $0x4] ss:$36 sps:$4 sm:$0xff]  }
 0x2c4   : > { %v2410_v1 = vadd.f32 %v14829_v63, %v2409_v56  ;;  %v2917_v36 = vmax.f32 %v2407_v50, 0.0  ;;  %7817 = vmatprep.subr.bf16.mxu0 %v12832_v7 }
 0x2c5   : > { %v2920_v26 = vmax.f32 %v2418_v46, 0.0  ;;  %7818 = vmatpush1.bf16.msra.mxu0 %v12830_v53 }
 0x2c6   : > { %v2918_v62 = vmax.f32 %v2410_v1, 0.0  ;;  %v12833_v1 = vld [vmem:[%s18018_s12 + $0x48] ss:$36 sps:$4 sm:$0xff]  }
 0x2c7   : > { %v3070_v31 = vpack.c.bf16 %v2920_v26, %v2919_v21  ;;  %v12835_v21 = vld [vmem:[%s18018_s12 + $0x4c] ss:$36 sps:$4 sm:$0xff]  }
 0x2c8   : > { %v3069_v45 = vpack.c.bf16 %v2918_v62, %v2917_v36  ;;  %v11948_v61 = vpop.f32.mrb[76].mxu1  ;;  %7819 = vmatprep.subr.bf16.mxu0 %v12835_v21 }
 0x2c9   : > { %v2431_v42 = vadd.f32 %v11948_v61, %v14829_v63  ;;  %v2422_v11 = vpop.f32.mrb[77].mxu1  ;;  %v15137_v61 = vld [vmem:[%s18200_s6] ss:$0 sm:$0xff]  ;;  %7820 = vmatpush1.bf16.msra.mxu0 %v12833_v1 }
 0x2ca   : > { %v2423_v4 = vadd.f32 %v14829_v63, %v2422_v11  ;;  %v11949_v18 = vpop.f32.mrb[78].mxu1  ;;  %12150 = vmatprep.mubr.msk.bf16.mxu0 %vm1687_vm0, %v3069_v45 }
 0x2cb   : > { %v2434_v13 = vadd.f32 %v11949_v18, %v14829_v63  ;;  %v2425_v27 = vpop.f32.mrb[79].mxu1  ;;  %12151 = vmatmul.mubr.msk.bf16.gmra.mrb[160].mxu0 %vm1687_vm0, %v3070_v31  ;;  %v2923_v25 = vmax.f32 %v2431_v42, 0.0 }
 0x2cc   : > { %v2426_v16 = vadd.f32 %v14829_v63, %v2425_v27  ;;  %v2921_v24 = vmax.f32 %v2423_v4, 0.0  ;;  %v12836_v27 = vld [vmem:[%s18018_s12 + $0x90] ss:$36 sps:$4 sm:$0xff]  }
 0x2cd   : > { %v2924_v22 = vmax.f32 %v2434_v13, 0.0 }
 0x2ce   : > { %v2922_v2 = vmax.f32 %v2426_v16, 0.0  ;;  %v12838_v16 = vld [vmem:[%s18018_s12 + $0x94] ss:$36 sps:$4 sm:$0xff]  }
 0x2cf   : > { %v3072_v57 = vpack.c.bf16 %v2924_v22, %v2923_v25  ;;  %7821 = vmatprep.subr.bf16.mxu0 %v12838_v16 }
 0x2d0   : > { %v3071_v48 = vpack.c.bf16 %v2922_v2, %v2921_v24  ;;  %v11952_v55 = vpop.f32.mrb[80].mxu1  ;;  %7822 = vmatpush1.bf16.msra.mxu0 %v12836_v27 }
 0x2d1   : > { %v2447_v30 = vadd.f32 %v11952_v55, %v14829_v63  ;;  %v2438_v38 = vpop.f32.mrb[81].mxu1 }
 0x2d2   : > { %v2439_v0 = vadd.f32 %v14829_v63, %v2438_v38  ;;  %v11953_v44 = vpop.f32.mrb[82].mxu1  ;;  %12154 = vmatprep.mubr.msk.bf16.mxu0 %vm1687_vm0, %v3071_v48 }
 0x2d3   : > { %v2450_v40 = vadd.f32 %v11953_v44, %v14829_v63  ;;  %v2441_v29 = vpop.f32.mrb[83].mxu1  ;;  %12155 = vmatmul.mubr.msk.bf16.gmra.mrb[164].mxu0 %vm1687_vm0, %v3072_v57  ;;  %v2927_v54 = vmax.f32 %v2447_v30, 0.0  ;;  %v12839_v44 = vld [vmem:[%s18018_s12 + $0xd8] ss:$36 sps:$4 sm:$0xff]  }
 0x2d4   : > { %v2442_v14 = vadd.f32 %v14829_v63, %v2441_v29  ;;  %v2925_v51 = vmax.f32 %v2439_v0, 0.0 }
 0x2d5   : > { %v2928_v19 = vmax.f32 %v2450_v40, 0.0  ;;  %v12841_v40 = vld [vmem:[%s18018_s12 + $0xdc] ss:$36 sps:$4 sm:$0xff]  }
 0x2d6   : > { %v2926_v28 = vmax.f32 %v2442_v14, 0.0  ;;  %7823 = vmatprep.subr.bf16.mxu0 %v12841_v40 }
 0x2d7   : > { %v3074_v20 = vpack.c.bf16 %v2928_v19, %v2927_v54  ;;  %7824 = vmatpush1.bf16.msra.mxu0 %v12839_v44 }
 0x2d8   : > { %v3073_v3 = vpack.c.bf16 %v2926_v28, %v2925_v51  ;;  %v11956_v35 = vpop.f32.mrb[84].mxu1 }
 0x2d9   : > { %v2463_v9 = vadd.f32 %v11956_v35, %v14829_v63  ;;  %v2454_v23 = vpop.f32.mrb[85].mxu1 }
 0x2da   : > { %v2455_v41 = vadd.f32 %v14829_v63, %v2454_v23  ;;  %v11957_v58 = vpop.f32.mrb[86].mxu1  ;;  %12158 = vmatprep.mubr.msk.bf16.mxu0 %vm1687_vm0, %v3073_v3 }
 0x2db   : > { %v2466_v33 = vadd.f32 %v11957_v58, %v14829_v63  ;;  %v2457_v43 = vpop.f32.mrb[87].mxu1  ;;  %12159 = vmatmul.mubr.msk.bf16.gmra.mrb[168].mxu0 %vm1687_vm0, %v3074_v20  ;;  %v2931_v59 = vmax.f32 %v2463_v9, 0.0 }
 0x2dc   : > { %v2458_v6 = vadd.f32 %v14829_v63, %v2457_v43  ;;  %v2929_v12 = vmax.f32 %v2455_v41, 0.0  ;;  %v15120_v63 = vld [vmem:[%s18180_s4] ss:$0 sm:$0xff] }
 0x2dd   : > { %v2932_v34 = vmax.f32 %v2466_v33, 0.0 }
 0x2de   : > { %v2930_v15 = vmax.f32 %v2458_v6, 0.0  ;;  %v12056_v39 = vpop.f32.mrb[64].mxu0 }
 0x2df   : > { %v3076_v17 = vpack.c.bf16 %v2932_v34, %v2931_v59  ;;  %v3494_v8 = vpop.f32.mrb[65].mxu0  ;;  %v3503_v48 = vadd.f32 %v12056_v39, %v15137_v61  ;;  %v12842_v59 = vld [vmem:[%s18018_s12 + $0x120] ss:$36 sps:$4 sm:$0xff]  }
 0x2e0   : > { %v3075_v37 = vpack.c.bf16 %v2930_v15, %v2929_v12  ;;  %v11960_v60 = vpop.f32.mrb[88].mxu1  ;;  %v12057_v5 = vpop.f32.mrb[66].mxu0  ;;  %v3495_v55 = vadd.f32 %v15137_v61, %v3494_v8  ;;  %v12844_v34 = vld [vmem:[%s18018_s12 + $0x124] ss:$36 sps:$4 sm:$0xff]  }
 0x2e1   : > { %v2479_v47 = vadd.f32 %v15120_v63, %v11960_v60  ;;  %v2470_v49 = vpop.f32.mrb[89].mxu1  ;;  %v3497_v52 = vpop.f32.mrb[67].mxu0  ;;  %v3506_v29 = vadd.f32 %v12057_v5, %v15137_v61  ;;  %v4295_v3 = vmax.f32 %v3503_v48, 0.0  ;;  %7825 = vmatprep.subr.bf16.mxu0 %v12844_v34 }
 0x2e2   : > { %v2471_v32 = vadd.f32 %v15120_v63, %v2470_v49  ;;  %v11961_v50 = vpop.f32.mrb[90].mxu1  ;;  %12162 = vmatprep.mubr.msk.bf16.mxu0 %vm1687_vm0, %v3075_v37  ;;  %v3498_v19 = vadd.f32 %v15137_v61, %v3497_v52  ;;  %v4293_v35 = vmax.f32 %v3495_v55, 0.0  ;;  %7826 = vmatpush1.bf16.msra.mxu0 %v12842_v59 }
 0x2e3   : > { %v2482_v10 = vadd.f32 %v15120_v63, %v11961_v50  ;;  %v2473_v46 = vpop.f32.mrb[91].mxu1  ;;  %12163 = vmatmul.mubr.msk.bf16.gmra.mrb[172].mxu0 %vm1687_vm0, %v3076_v17  ;;  %v2935_v26 = vmax.f32 %v2479_v47, 0.0  ;;  %v4296_v12 = vmax.f32 %v3506_v29, 0.0 }
 0x2e4   : > { %v2474_v56 = vadd.f32 %v15120_v63, %v2473_v46  ;;  %v2933_v62 = vmax.f32 %v2471_v32, 0.0  ;;  %v4294_v60 = vmax.f32 %v3498_v19, 0.0 }
 0x2e5   : > { %v2936_v36 = vmax.f32 %v2482_v10, 0.0 }
 0x2e6   : > { %v2934_v31 = vmax.f32 %v2474_v56, 0.0  ;;  %v12060_v45 = vpop.f32.mrb[68].mxu0 }
 0x2e7   : > { %v3078_v42 = vpack.c.bf16 %v2936_v36, %v2935_v26  ;;  %v3510_v11 = vpop.f32.mrb[69].mxu0  ;;  %v3519_v49 = vadd.f32 %v12060_v45, %v15137_v61 }
 0x2e8   : > { %v3077_v4 = vpack.c.bf16 %v2934_v31, %v2933_v62  ;;  %v11964_v18 = vpop.f32.mrb[92].mxu1  ;;  %v15139_v13 = vpop.f32.mrb[70].mxu0  ;;  %v3511_v46 = vadd.f32 %v15137_v61, %v3510_v11  ;;  %v12847_v11 = vld [vmem:[%s18018_s12 + $0x16c] ss:$36 sps:$4 sm:$0xff]  }
 0x2e9   : > { %v2495_v25 = vadd.f32 %v15120_v63, %v11964_v18  ;;  %v2486_v22 = vpop.f32.mrb[93].mxu1  ;;  %v15148_v24 = vpop.f32.mrb[71].mxu0  ;;  %v12845_v18 = vld [vmem:[%s18018_s12 + $0x168] ss:$36 sps:$4 sm:$0xff]   ;;  %v3522_v27 = vadd.f32 %v15139_v13, %v15137_v61  ;;  %7827 = vmatprep.subr.bf16.mxu0 %v12847_v11 }
 0x2ea   : > { %v2487_v2 = vadd.f32 %v15120_v63, %v2486_v22  ;;  %v11965_v57 = vpop.f32.mrb[94].mxu1  ;;  %12166 = vmatprep.mubr.msk.bf16.mxu0 %vm1687_vm0, %v3077_v4  ;;  %7828 = vmatpush1.bf16.msra.mxu0 %v12845_v18  ;;  %v12854_v18 = vld [vmem:[%s18018_s12 + $0x240] ss:$36 sps:$4 sm:$0xff]  }
 0x2eb   : > { %v2498_v30 = vadd.f32 %v15120_v63, %v11965_v57  ;;  %v2489_v38 = vpop.f32.mrb[95].mxu1  ;;  %12167 = vmatmul.mubr.msk.bf16.gmra.mrb[176].mxu0 %vm1687_vm0, %v3078_v42  ;;  %v2939_v14 = vmax.f32 %v2495_v25, 0.0  ;;  %v3514_v57 = vadd.f32 %v15137_v61, %v15148_v24  ;;  %v12856_v11 = vld [vmem:[%s18018_s12 + $0x244] ss:$36 sps:$4 sm:$0xff]  }
 0x2ec   : > { %v2490_v0 = vadd.f32 %v15120_v63, %v2489_v38  ;;  %v2937_v51 = vmax.f32 %v2487_v2, 0.0  ;;  %v4299_v2 = vmax.f32 %v3519_v49, 0.0 }
 0x2ed   : > { %v2940_v54 = vmax.f32 %v2498_v30, 0.0 }
 0x2ee   : > { %v2938_v28 = vmax.f32 %v2490_v0, 0.0  ;;  %v12064_v20 = vpop.f32.mrb[72].mxu0  ;;  %v4297_v0 = vmax.f32 %v3511_v46, 0.0 }
 0x2ef   : > { %v3080_v9 = vpack.c.bf16 %v2940_v54, %v2939_v14  ;;  %v3535_v23 = vadd.f32 %v12064_v20, %v15137_v61  ;;  %v3526_v41 = vpop.f32.mrb[73].mxu0  ;;  %v12850_v20 = vld [vmem:[%s18018_s12 + $0x1b4] ss:$36 sps:$4 sm:$0xff]  }
 0x2f0   : > { %v3079_v58 = vpack.c.bf16 %v2938_v28, %v2937_v51  ;;  %v3527_v33 = vadd.f32 %v15137_v61, %v3526_v41  ;;  %v11968_v43 = vpop.f32.mrb[96].mxu1  ;;  %v12065_v6 = vpop.f32.mrb[74].mxu0  ;;  %v12848_v28 = vld [vmem:[%s18018_s12 + $0x1b0] ss:$36 sps:$4 sm:$0xff]   ;;  %7829 = vmatprep.subr.bf16.mxu0 %v12850_v20 }
 0x2f1   : > { %v4303_v15 = vmax.f32 %v3535_v23, 0.0  ;;  %v2511_v39 = vadd.f32 %v15120_v63, %v11968_v43  ;;  %v3538_v17 = vadd.f32 %v12065_v6, %v15137_v61  ;;  %v2502_v8 = vpop.f32.mrb[97].mxu1  ;;  %v3529_v37 = vpop.f32.mrb[75].mxu0  ;;  %7830 = vmatpush1.bf16.msra.mxu0 %v12848_v28  ;;  %v12862_v28 = vld [vmem:[%s18018_s12 + $0x2d4] ss:$36 sps:$4 sm:$0xff]  }
 0x2f2   : > { %v4301_v5 = vmax.f32 %v3527_v33, 0.0  ;;  %v2503_v53 = vadd.f32 %v15120_v63, %v2502_v8  ;;  %v3530_v7 = vadd.f32 %v15137_v61, %v3529_v37  ;;  %v11969_v47 = vpop.f32.mrb[98].mxu1  ;;  %12170 = vmatprep.mubr.msk.bf16.mxu0 %vm1687_vm0, %v3079_v58  ;;  %v4298_v58 = vmax.f32 %v3514_v57, 0.0  ;;  %v12851_v37 = vld [vmem:[%s18018_s12 + $0x1f8] ss:$36 sps:$4 sm:$0xff]  }
 0x2f3   : > { %v15179_v52 = vadd.f32 %v4303_v15, %v4295_v3  ;;  %v4304_v32 = vmax.f32 %v3538_v17, 0.0  ;;  %v2514_v50 = vadd.f32 %v15120_v63, %v11969_v47  ;;  %v2505_v10 = vpop.f32.mrb[99].mxu1  ;;  %12171 = vmatmul.mubr.msk.bf16.gmra.mrb[180].mxu0 %vm1687_vm0, %v3080_v9  ;;  %v2943_v26 = vmax.f32 %v2511_v39, 0.0 }
 0x2f4   : > { %v15184_v56 = vadd.f32 %v4301_v5, %v4293_v35  ;;  %v4302_v1 = vmax.f32 %v3530_v7, 0.0  ;;  %v2506_v21 = vadd.f32 %v15120_v63, %v2505_v10  ;;  %v2941_v62 = vmax.f32 %v2503_v53, 0.0 }
 0x2f5   : > { %v15187_v36 = vadd.f32 %v4304_v32, %v4296_v12  ;;  %v2944_v31 = vmax.f32 %v2514_v50, 0.0  ;;  %v4300_v3 = vmax.f32 %v3522_v27, 0.0 }
 0x2f6   : > { %v15189_v45 = vadd.f32 %v4302_v1, %v4294_v60  ;;  %v2942_v42 = vmax.f32 %v2506_v21, 0.0  ;;  %v12068_v4 = vpop.f32.mrb[76].mxu0  ;;  %v12853_v60 = vld [vmem:[%s18018_s12 + $0x1fc] ss:$36 sps:$4 sm:$0xff]  }
 0x2f7   : > { %v3082_v16 = vpack.c.bf16 %v2944_v31, %v2943_v26  ;;  %v3551_v25 = vadd.f32 %v12068_v4, %v15137_v61  ;;  %v3542_v22 = vpop.f32.mrb[77].mxu0  ;;  %7831 = vmatprep.subr.bf16.mxu0 %v12853_v60 }
 0x2f8   : > { %v3081_v48 = vpack.c.bf16 %v2942_v42, %v2941_v62  ;;  %v3543_v55 = vadd.f32 %v15137_v61, %v3542_v22  ;;  %v11972_v30 = vpop.f32.mrb[100].mxu1  ;;  %v12069_v38 = vpop.f32.mrb[78].mxu0  ;;  %7832 = vmatpush1.bf16.msra.mxu0 %v12851_v37 }
 0x2f9   : > { %v4307_v44 = vmax.f32 %v3551_v25, 0.0  ;;  %v2527_v40 = vadd.f32 %v15120_v63, %v11972_v30  ;;  %v3554_v13 = vadd.f32 %v12069_v38, %v15137_v61  ;;  %v2518_v29 = vpop.f32.mrb[101].mxu1  ;;  %v3545_v14 = vpop.f32.mrb[79].mxu0  ;;  %7833 = vmatprep.subr.bf16.mxu0 %v12856_v11 }
 0x2fa   : > { %v4305_v54 = vmax.f32 %v3543_v55, 0.0  ;;  %v2519_v19 = vadd.f32 %v15120_v63, %v2518_v29  ;;  %v3546_v24 = vadd.f32 %v15137_v61, %v3545_v14  ;;  %v11973_v51 = vpop.f32.mrb[102].mxu1  ;;  %12174 = vmatprep.mubr.msk.bf16.mxu0 %vm1687_vm0, %v3081_v48  ;;  %v12859_v55 = vld [vmem:[%s18018_s12 + $0x28c] ss:$36 sps:$4 sm:$0xff]  }
 0x2fb   : > { %v15214_v35 = vadd.f32 %v4307_v44, %v4299_v2  ;;  %v4308_v9 = vmax.f32 %v3554_v13, 0.0  ;;  %v2530_v23 = vadd.f32 %v15120_v63, %v11973_v51  ;;  %v2521_v41 = vpop.f32.mrb[103].mxu1  ;;  %12175 = vmatmul.mubr.msk.bf16.gmra.mrb[184].mxu0 %vm1687_vm0, %v3082_v16  ;;  %v2947_v59 = vmax.f32 %v2527_v40, 0.0 }
 0x2fc   : > { %v15218_v33 = vadd.f32 %v4305_v54, %v4297_v0  ;;  %v4306_v43 = vmax.f32 %v3546_v24, 0.0  ;;  %v2522_v6 = vadd.f32 %v15120_v63, %v2521_v41  ;;  %v2945_v12 = vmax.f32 %v2519_v19, 0.0  ;;  %7834 = vmatpush1.bf16.msra.mxu0 %v12854_v18  ;;  %v12860_v41 = vld [vmem:[%s18018_s12 + $0x2d0] ss:$36 sps:$4 sm:$0xff]  }
 0x2fd   : > { %v15221_v34 = vadd.f32 %v4308_v9, %v4300_v3  ;;  %v2948_v15 = vmax.f32 %v2530_v23, 0.0  ;;  %7835 = vmatprep.subr.bf16.mxu0 %v12859_v55 }
 0x2fe   : > { %v15223_v39 = vadd.f32 %v4306_v43, %v4298_v58  ;;  %v2946_v17 = vmax.f32 %v2522_v6, 0.0  ;;  %v12072_v8 = vpop.f32.mrb[80].mxu0 }
 0x2ff   : > { %v3084_v5 = vpack.c.bf16 %v2948_v15, %v2947_v59  ;;  %v3567_v53 = vadd.f32 %v12072_v8, %v15137_v61  ;;  %v3558_v7 = vpop.f32.mrb[81].mxu0 }
 0x300   : > { %v3083_v47 = vpack.c.bf16 %v2946_v17, %v2945_v12  ;;  %v3559_v49 = vadd.f32 %v15137_v61, %v3558_v7  ;;  %v11976_v32 = vpop.f32.mrb[104].mxu1  ;;  %v12073_v50 = vpop.f32.mrb[82].mxu0  ;;  %v12865_v12 = vld [vmem:[%s18018_s12 + $0x31c] ss:$36 sps:$4 sm:$0xff]  }
 0x301   : > { %v4311_v10 = vmax.f32 %v3567_v53, 0.0  ;;  %v2543_v46 = vadd.f32 %v15120_v63, %v11976_v32  ;;  %v3570_v1 = vadd.f32 %v12073_v50, %v15137_v61  ;;  %v2534_v21 = vpop.f32.mrb[105].mxu1  ;;  %v3561_v26 = vpop.f32.mrb[83].mxu0  ;;  %v12863_v32 = vld [vmem:[%s18018_s12 + $0x318] ss:$36 sps:$4 sm:$0xff]  }
 0x302   : > { %v4309_v62 = vmax.f32 %v3559_v49, 0.0  ;;  %v2535_v31 = vadd.f32 %v15120_v63, %v2534_v21  ;;  %v3562_v42 = vadd.f32 %v15137_v61, %v3561_v26  ;;  %v11977_v4 = vpop.f32.mrb[106].mxu1  ;;  %12178 = vmatprep.mubr.msk.bf16.mxu0 %vm1687_vm0, %v3083_v47 }
 0x303   : > { %v4312_v27 = vmax.f32 %v3570_v1, 0.0  ;;  %v2546_v16 = vadd.f32 %v15120_v63, %v11977_v4  ;;  %v2537_v25 = vpop.f32.mrb[107].mxu1  ;;  %12179 = vmatmul.mubr.msk.bf16.gmra.mrb[188].mxu0 %vm1687_vm0, %v3084_v5  ;;  %v15247_v22 = vadd.f32 %v15179_v52, %v4311_v10  ;;  %v2951_v30 = vmax.f32 %v2543_v46, 0.0  ;;  %v12857_v52 = vld [vmem:[%s18018_s12 + $0x288] ss:$36 sps:$4 sm:$0xff]  }
 0x304   : > { %v4310_v2 = vmax.f32 %v3562_v42, 0.0  ;;  %v2538_v57 = vadd.f32 %v15120_v63, %v2537_v25  ;;  %v15251_v48 = vadd.f32 %v15184_v56, %v4309_v62  ;;  %v2949_v44 = vmax.f32 %v2535_v31, 0.0  ;;  %7836 = vmatpush1.bf16.msra.mxu0 %v12857_v52  ;;  %v12868_v42 = vld [vmem:[%s18018_s12 + $0x364] ss:$36 sps:$4 sm:$0xff]  }
 0x305   : > { %v2952_v38 = vmax.f32 %v2546_v16, 0.0  ;;  %v15257_v0 = vadd.f32 %v15187_v36, %v4312_v27  ;;  %7837 = vmatprep.subr.bf16.mxu0 %v12862_v28  ;;  %v12866_v16 = vld [vmem:[%s18018_s12 + $0x360] ss:$36 sps:$4 sm:$0xff]  }
 0x306   : > { %v2950_v40 = vmax.f32 %v2538_v57, 0.0  ;;  %v12076_v13 = vpop.f32.mrb[84].mxu0  ;;  %v15263_v56 = vadd.f32 %v15189_v45, %v4310_v2 }
 0x307   : > { %v3086_v29 = vpack.c.bf16 %v2952_v38, %v2951_v30  ;;  %v3583_v14 = vadd.f32 %v12076_v13, %v15137_v61  ;;  %v3574_v54 = vpop.f32.mrb[85].mxu0 }
 0x308   : > { %v3085_v19 = vpack.c.bf16 %v2950_v40, %v2949_v44  ;;  %v3575_v36 = vadd.f32 %v15137_v61, %v3574_v54  ;;  %v11980_v24 = vpop.f32.mrb[108].mxu1  ;;  %v12077_v51 = vpop.f32.mrb[86].mxu0  ;;  %7838 = vmatpush1.bf16.msra.mxu0 %v12860_v41 }
 0x309   : > { %v4315_v20 = vmax.f32 %v3583_v14, 0.0  ;;  %v2559_v3 = vadd.f32 %v15120_v63, %v11980_v24  ;;  %v3586_v45 = vadd.f32 %v12077_v51, %v15137_v61  ;;  %v2550_v9 = vpop.f32.mrb[109].mxu1  ;;  %v3577_v23 = vpop.f32.mrb[87].mxu0  ;;  %7839 = vmatprep.subr.bf16.mxu0 %v12865_v12  ;;  %v12871_v14 = vld [vmem:[%s18018_s12 + $0x3ac] ss:$36 sps:$4 sm:$0xff]  }
 0x30a   : > { %v4313_v58 = vmax.f32 %v3575_v36, 0.0  ;;  %v2551_v43 = vadd.f32 %v15120_v63, %v2550_v9  ;;  %v3578_v6 = vadd.f32 %v15137_v61, %v3577_v23  ;;  %v11981_v59 = vpop.f32.mrb[110].mxu1  ;;  %12182 = vmatprep.mubr.msk.bf16.mxu0 %vm1687_vm0, %v3085_v19  ;;  %v12869_v36 = vld [vmem:[%s18018_s12 + $0x3a8] ss:$36 sps:$4 sm:$0xff]  }
 0x30b   : > { %v4316_v15 = vmax.f32 %v3586_v45, 0.0  ;;  %v2562_v17 = vadd.f32 %v15120_v63, %v11981_v59  ;;  %v2553_v8 = vpop.f32.mrb[111].mxu1  ;;  %12183 = vmatmul.mubr.msk.bf16.gmra.mrb[192].mxu0 %vm1687_vm0, %v3086_v29  ;;  %v15284_v37 = vadd.f32 %v15214_v35, %v4315_v20  ;;  %v2955_v7 = vmax.f32 %v2559_v3, 0.0  ;;  %v12874_v20 = vld [vmem:[%s18018_s12 + $0x3f4] ss:$36 sps:$4 sm:$0xff]  }
 0x30c   : > { %v4314_v60 = vmax.f32 %v3578_v6, 0.0  ;;  %v2554_v5 = vadd.f32 %v15120_v63, %v2553_v8  ;;  %v15288_v53 = vadd.f32 %v15218_v33, %v4313_v58  ;;  %v2953_v50 = vmax.f32 %v2551_v43, 0.0  ;;  %7840 = vmatpush1.bf16.msra.mxu0 %v12863_v32 }
 0x30d   : > { %v2956_v47 = vmax.f32 %v2562_v17, 0.0  ;;  %v15291_v49 = vadd.f32 %v15221_v34, %v4316_v15  ;;  %7841 = vmatprep.subr.bf16.mxu0 %v12868_v42  ;;  %v12872_v15 = vld [vmem:[%s18018_s12 + $0x3f0] ss:$36 sps:$4 sm:$0xff]  }
 0x30e   : > { %v2954_v10 = vmax.f32 %v2554_v5, 0.0  ;;  %v12080_v35 = vpop.f32.mrb[88].mxu0  ;;  %v15297_v46 = vadd.f32 %v15223_v39, %v4314_v60 }
 0x30f   : > { %v3088_v1 = vpack.c.bf16 %v2956_v47, %v2955_v7  ;;  %v3599_v33 = vadd.f32 %v12080_v35, %v15137_v61  ;;  %v3590_v21 = vpop.f32.mrb[89].mxu0 }
 0x310   : > { %v3087_v26 = vpack.c.bf16 %v2954_v10, %v2953_v50  ;;  %v3591_v34 = vadd.f32 %v15137_v61, %v3590_v21  ;;  %v11984_v62 = vpop.f32.mrb[112].mxu1  ;;  %v12081_v31 = vpop.f32.mrb[90].mxu0  ;;  %7842 = vmatpush1.bf16.msra.mxu0 %v12866_v16 }
 0x311   : > { %v4319_v4 = vmax.f32 %v3599_v33, 0.0  ;;  %v2575_v18 = vadd.f32 %v15120_v63, %v11984_v62  ;;  %v3602_v39 = vadd.f32 %v12081_v31, %v15137_v61  ;;  %v2566_v11 = vpop.f32.mrb[113].mxu1  ;;  %v3593_v27 = vpop.f32.mrb[91].mxu0  ;;  %7843 = vmatprep.subr.bf16.mxu0 %v12871_v14  ;;  %v12877_v33 = vld [vmem:[%s18018_s12 + $0x43c] ss:$36 sps:$4 sm:$0xff]  }
 0x312   : > { %v4317_v25 = vmax.f32 %v3591_v34, 0.0  ;;  %v2567_v2 = vadd.f32 %v15120_v63, %v2566_v11  ;;  %v3594_v57 = vadd.f32 %v15137_v61, %v3593_v27  ;;  %v11985_v55 = vpop.f32.mrb[114].mxu1  ;;  %12186 = vmatprep.mubr.msk.bf16.mxu0 %vm1687_vm0, %v3087_v26  ;;  %v12875_v34 = vld [vmem:[%s18018_s12 + $0x438] ss:$36 sps:$4 sm:$0xff]  }
 0x313   : > { %v15313_v30 = vadd.f32 %v15247_v22, %v4319_v4  ;;  %v4320_v38 = vmax.f32 %v3602_v39, 0.0  ;;  %v2578_v52 = vadd.f32 %v15120_v63, %v11985_v55  ;;  %v2569_v44 = vpop.f32.mrb[115].mxu1  ;;  %12187 = vmatmul.mubr.msk.bf16.gmra.mrb[196].mxu0 %vm1687_vm0, %v3088_v1  ;;  %v2959_v54 = vmax.f32 %v2575_v18, 0.0 }
 0x314   : > { %v15318_v40 = vadd.f32 %v15251_v48, %v4317_v25  ;;  %v4318_v13 = vmax.f32 %v3594_v57, 0.0  ;;  %v2570_v29 = vadd.f32 %v15120_v63, %v2569_v44  ;;  %v2957_v24 = vmax.f32 %v2567_v2, 0.0  ;;  %7844 = vmatpush1.bf16.msra.mxu0 %v12869_v36 }
 0x315   : > { %v15325_v22 = vadd.f32 %v15257_v0, %v4320_v38  ;;  %v2960_v19 = vmax.f32 %v2578_v52, 0.0  ;;  %7845 = vmatprep.subr.bf16.mxu0 %v12874_v20 }
 0x316   : > { %v15331_v48 = vadd.f32 %v15263_v56, %v4318_v13  ;;  %v2958_v51 = vmax.f32 %v2570_v29, 0.0  ;;  %v12084_v28 = vpop.f32.mrb[92].mxu0 }
 0x317   : > { %v3090_v3 = vpack.c.bf16 %v2960_v19, %v2959_v54  ;;  %v3615_v0 = vadd.f32 %v12084_v28, %v15137_v61  ;;  %v3606_v45 = vpop.f32.mrb[93].mxu0 }
 0x318   : > { %v3089_v9 = vpack.c.bf16 %v2958_v51, %v2957_v24  ;;  %v3607_v23 = vadd.f32 %v15137_v61, %v3606_v45  ;;  %v11988_v41 = vpop.f32.mrb[116].mxu1  ;;  %v12085_v58 = vpop.f32.mrb[94].mxu0  ;;  %7846 = vmatpush1.bf16.msra.mxu0 %v12872_v15 }
 0x319   : > { %v4323_v43 = vmax.f32 %v3615_v0, 0.0  ;;  %v2591_v56 = vadd.f32 %v15120_v63, %v11988_v41  ;;  %v3618_v6 = vadd.f32 %v12085_v58, %v15137_v61  ;;  %v2582_v59 = vpop.f32.mrb[117].mxu1  ;;  %v3609_v12 = vpop.f32.mrb[95].mxu0  ;;  %7847 = vmatprep.subr.bf16.mxu0 %v12877_v33 }
 0x31a   : > { %v4321_v17 = vmax.f32 %v3607_v23, 0.0  ;;  %v2583_v8 = vadd.f32 %v15120_v63, %v2582_v59  ;;  %v3610_v60 = vadd.f32 %v15137_v61, %v3609_v12  ;;  %v11989_v5 = vpop.f32.mrb[118].mxu1  ;;  %12190 = vmatprep.mubr.msk.bf16.mxu0 %vm1687_vm0, %v3089_v9 }
 0x31b   : > { %v15347_v7 = vadd.f32 %v15284_v37, %v4323_v43  ;;  %v4324_v47 = vmax.f32 %v3618_v6, 0.0  ;;  %v2594_v32 = vadd.f32 %v15120_v63, %v11989_v5  ;;  %v2585_v50 = vpop.f32.mrb[119].mxu1  ;;  %12191 = vmatmul.mubr.msk.bf16.gmra.mrb[200].mxu0 %vm1687_vm0, %v3090_v3  ;;  %v2963_v21 = vmax.f32 %v2591_v56, 0.0 }
 0x31c   : > { %v15352_v10 = vadd.f32 %v15288_v53, %v4321_v17  ;;  %v4322_v35 = vmax.f32 %v3610_v60, 0.0  ;;  %v2586_v1 = vadd.f32 %v15120_v63, %v2585_v50  ;;  %v2961_v62 = vmax.f32 %v2583_v8, 0.0  ;;  %7848 = vmatpush1.bf16.msra.mxu0 %v12875_v34 }
 0x31d   : > { %v15359_v37 = vadd.f32 %v15291_v49, %v4324_v47  ;;  %v2964_v26 = vmax.f32 %v2594_v32, 0.0 }
 0x31e   : > { %v15365_v53 = vadd.f32 %v15297_v46, %v4322_v35  ;;  %v2962_v31 = vmax.f32 %v2586_v1, 0.0  ;;  %v12088_v42 = vpop.f32.mrb[96].mxu0 }
 0x31f   : > { %v3092_v4 = vpack.c.bf16 %v2964_v26, %v2963_v21  ;;  %v3631_v18 = vadd.f32 %v12088_v42, %v15137_v61  ;;  %v3622_v39 = vpop.f32.mrb[97].mxu0 }
 0x320   : > { %v3091_v11 = vpack.c.bf16 %v2962_v31, %v2961_v62  ;;  %v3623_v49 = vadd.f32 %v15137_v61, %v3622_v39  ;;  %v11992_v27 = vpop.f32.mrb[120].mxu1  ;;  %v12089_v16 = vpop.f32.mrb[98].mxu0 }
 0x321   : > { %v4327_v25 = vmax.f32 %v3631_v18, 0.0  ;;  %v2607_v2 = vadd.f32 %v15120_v63, %v11992_v27  ;;  %v3634_v57 = vadd.f32 %v12089_v16, %v15137_v61  ;;  %v2598_v55 = vpop.f32.mrb[121].mxu1  ;;  %v3625_v46 = vpop.f32.mrb[99].mxu0 }
 0x322   : > { %v4325_v38 = vmax.f32 %v3623_v49, 0.0  ;;  %v2599_v52 = vadd.f32 %v15120_v63, %v2598_v55  ;;  %v3626_v44 = vadd.f32 %v15137_v61, %v3625_v46  ;;  %v11993_v13 = vpop.f32.mrb[122].mxu1  ;;  %12194 = vmatprep.mubr.msk.bf16.mxu0 %vm1687_vm0, %v3091_v11 }
 0x323   : > { %v4504_v29 = vadd.f32 %v15313_v30, %v4327_v25  ;;  %v4328_v14 = vmax.f32 %v3634_v57, 0.0  ;;  %v2610_v54 = vadd.f32 %v15120_v63, %v11993_v13  ;;  %v2601_v19 = vpop.f32.mrb[123].mxu1  ;;  %12195 = vmatmul.mubr.msk.bf16.gmra.mrb[204].mxu0 %vm1687_vm0, %v3092_v4  ;;  %v2967_v28 = vmax.f32 %v2607_v2, 0.0 }
 0x324   : > { %v4496_v36 = vadd.f32 %v15318_v40, %v4325_v38  ;;  %v4326_v24 = vmax.f32 %v3626_v44, 0.0  ;;  %v2602_v51 = vadd.f32 %v15120_v63, %v2601_v19  ;;  %v2965_v0 = vmax.f32 %v2599_v52, 0.0 }
 0x325   : > { %v4508_v20 = vadd.f32 %v15325_v22, %v4328_v14  ;;  %v2968_v3 = vmax.f32 %v2610_v54, 0.0  ;;  %v4656_v23 = vmul.f32 0.2, %v4504_v29 }
 0x326   : > { %v4500_v45 = vadd.f32 %v15331_v48, %v4326_v24  ;;  %v2966_v9 = vmax.f32 %v2602_v51, 0.0  ;;  %v12092_v30 = vpop.f32.mrb[100].mxu0  ;;  %v4654_v6 = vmul.f32 0.2, %v4496_v36 }
 0x327   : > { %v4657_v41 = vmul.f32 0.2, %v4508_v20  ;;  %v3094_v58 = vpack.c.bf16 %v2968_v3, %v2967_v28  ;;  %v3647_v43 = vadd.f32 %v12092_v30, %v15137_v61  ;;  %v3638_v56 = vpop.f32.mrb[101].mxu0 }
 0x328   : > { %v4655_v40 = vmul.f32 0.2, %v4500_v45  ;;  %v3093_v59 = vpack.c.bf16 %v2966_v9, %v2965_v0  ;;  %v3639_v12 = vadd.f32 %v15137_v61, %v3638_v56  ;;  %v11996_v15 = vpop.f32.mrb[124].mxu1  ;;  %v12093_v17 = vpop.f32.mrb[102].mxu0 }
 0x329   : > { %v15383_v22 = vpack.c.bf16 %v4657_v41, %v4656_v23  ;;  %v4331_v8 = vmax.f32 %v3647_v43, 0.0  ;;  %v2623_v48 = vadd.f32 %v15120_v63, %v11996_v15  ;;  %v3650_v60 = vadd.f32 %v12093_v17, %v15137_v61  ;;  %v2614_v5 = vpop.f32.mrb[125].mxu1  ;;  %v3641_v47 = vpop.f32.mrb[103].mxu0 }
 0x32a   : > { %v15387_v32 = vpack.c.bf16 %v4655_v40, %v4654_v6  ;;  %v4329_v50 = vmax.f32 %v3639_v12, 0.0  ;;  %v2615_v35 = vadd.f32 %v15120_v63, %v2614_v5  ;;  %v3642_v1 = vadd.f32 %v15137_v61, %v3641_v47  ;;  %v11997_v33 = vpop.f32.mrb[126].mxu1  ;;  %12198 = vmatprep.mubr.msk.bf16.mxu0 %vm1687_vm0, %v3093_v59 }
 0x32b   : > { %v4520_v21 = vadd.f32 %v15347_v7, %v4331_v8  ;;  %v4332_v26 = vmax.f32 %v3650_v60, 0.0  ;;  %v2626_v34 = vadd.f32 %v15120_v63, %v11997_v33  ;;  %v2617_v62 = vpop.f32.mrb[127].mxu1  ;;  %12199 = vmatmul.mubr.msk.bf16.gmra.mrb[208].mxu0 %vm1687_vm0, %v3094_v58  ;;  %v2971_v18 = vmax.f32 %v2623_v48, 0.0 }
 0x32c   : > { %v4512_v31 = vadd.f32 %v15352_v10, %v4329_v50  ;;  %v4330_v42 = vmax.f32 %v3642_v1, 0.0  ;;  %v2618_v4 = vadd.f32 %v15120_v63, %v2617_v62  ;;  %12270 = vmatprep.mubr.bf16.mxu1 %v15387_v32  ;;  %v2969_v7 = vmax.f32 %v2615_v35, 0.0 }
 0x32d   : > { %v4524_v39 = vadd.f32 %v15359_v37, %v4332_v26  ;;  %v2972_v11 = vmax.f32 %v2626_v34, 0.0  ;;  %12271 = vmatmul.mubr.bf16.vlgmr.msra.gmra.mrb[176].mxu1 %v15383_v22  ;;  %v4660_v25 = vmul.f32 0.2, %v4520_v21 }
 0x32e   : > { %v4516_v49 = vadd.f32 %v15365_v53, %v4330_v42  ;;  %v2970_v27 = vmax.f32 %v2618_v4, 0.0  ;;  %v12096_v16 = vpop.f32.mrb[104].mxu0  ;;  %v4658_v55 = vmul.f32 0.2, %v4512_v31 }
 0x32f   : > { %v4661_v2 = vmul.f32 0.2, %v4524_v39  ;;  %v3096_v57 = vpack.c.bf16 %v2972_v11, %v2971_v18  ;;  %v3654_v10 = vpop.f32.mrb[105].mxu0  ;;  %v3663_v8 = vadd.f32 %v12096_v16, %v15137_v61 }
 0x330   : > { %v4659_v46 = vmul.f32 0.2, %v4516_v49  ;;  %v3095_v38 = vpack.c.bf16 %v2970_v27, %v2969_v7  ;;  %v12000_v52 = vpop.f32.mrb[128].mxu1  ;;  %v12097_v44 = vpop.f32.mrb[106].mxu0  ;;  %v3655_v5 = vadd.f32 %v15137_v61, %v3654_v10 }
 0x331   : > { %v15401_v13 = vpack.c.bf16 %v4661_v2, %v4660_v25  ;;  %v2639_v37 = vadd.f32 %v15120_v63, %v12000_v52  ;;  %v2630_v29 = vpop.f32.mrb[129].mxu1  ;;  %v3657_v14 = vpop.f32.mrb[107].mxu0  ;;  %v3666_v1 = vadd.f32 %v12097_v44, %v15137_v61  ;;  %v4335_v18 = vmax.f32 %v3663_v8, 0.0 }
 0x332   : > { %v15404_v54 = vpack.c.bf16 %v4659_v46, %v4658_v55  ;;  %v2631_v53 = vadd.f32 %v15120_v63, %v2630_v29  ;;  %v12001_v19 = vpop.f32.mrb[130].mxu1  ;;  %12202 = vmatprep.mubr.msk.bf16.mxu0 %vm1687_vm0, %v3095_v38  ;;  %v3658_v34 = vadd.f32 %v15137_v61, %v3657_v14  ;;  %v4333_v16 = vmax.f32 %v3655_v5, 0.0 }
 0x333   : > { %v2642_v36 = vadd.f32 %v15120_v63, %v12001_v19  ;;  %v2633_v24 = vpop.f32.mrb[131].mxu1  ;;  %12203 = vmatmul.mubr.msk.bf16.gmra.mrb[212].mxu0 %vm1687_vm0, %v3096_v57  ;;  %v2975_v28 = vmax.f32 %v2639_v37, 0.0  ;;  %v4336_v55 = vmax.f32 %v3666_v1, 0.0 }
 0x334   : > { %v2634_v51 = vadd.f32 %v15120_v63, %v2633_v24  ;;  %12274 = vmatprep.mubr.bf16.mxu1 %v15404_v54  ;;  %v2973_v3 = vmax.f32 %v2631_v53, 0.0  ;;  %v4334_v37 = vmax.f32 %v3658_v34, 0.0 }
 0x335   : > { %v2976_v20 = vmax.f32 %v2642_v36, 0.0  ;;  %12275 = vmatmul.mubr.bf16.gmra.mrb[180].mxu1 %v15401_v13 }
 0x336   : > { %v2974_v0 = vmax.f32 %v2634_v51, 0.0  ;;  %v12100_v45 = vpop.f32.mrb[108].mxu0 }
 0x337   : > { %v3098_v9 = vpack.c.bf16 %v2976_v20, %v2975_v28  ;;  %v3670_v30 = vpop.f32.mrb[109].mxu0  ;;  %v3679_v19 = vadd.f32 %v12100_v45, %v15137_v61 }
 0x338   : > { %v3097_v23 = vpack.c.bf16 %v2974_v0, %v2973_v3  ;;  %v12004_v41 = vpop.f32.mrb[132].mxu1  ;;  %v12101_v58 = vpop.f32.mrb[110].mxu0  ;;  %v3671_v28 = vadd.f32 %v15137_v61, %v3670_v30 }
 0x339   : > { %v2655_v43 = vadd.f32 %v15120_v63, %v12004_v41  ;;  %v2646_v56 = vpop.f32.mrb[133].mxu1  ;;  %v3673_v6 = vpop.f32.mrb[111].mxu0 }
 0x33a   : > { %v2647_v40 = vadd.f32 %v15120_v63, %v2646_v56  ;;  %v12005_v59 = vpop.f32.mrb[134].mxu1  ;;  %12206 = vmatprep.mubr.msk.bf16.mxu0 %vm1687_vm0, %v3097_v23  ;;  %v3682_v23 = vadd.f32 %v12101_v58, %v15137_v61  ;;  %v4337_v58 = vmax.f32 %v3671_v28, 0.0 }
 0x33b   : > { %v2658_v12 = vadd.f32 %v15120_v63, %v12005_v59  ;;  %v2649_v15 = vpop.f32.mrb[135].mxu1  ;;  %12207 = vmatmul.mubr.msk.bf16.gmra.mrb[216].mxu0 %vm1687_vm0, %v3098_v9  ;;  %v2979_v48 = vmax.f32 %v2655_v43, 0.0 }
 0x33c   : > { %v2650_v17 = vadd.f32 %v15120_v63, %v2649_v15  ;;  %v2977_v47 = vmax.f32 %v2647_v40, 0.0  ;;  %v3674_v40 = vadd.f32 %v15137_v61, %v3673_v6  ;;  %v4340_v1 = vmax.f32 %v3682_v23, 0.0 }
 0x33d   : > { %v2980_v60 = vmax.f32 %v2658_v12, 0.0 }
 0x33e   : > { %v2978_v50 = vmax.f32 %v2650_v17, 0.0  ;;  %v12104_v35 = vpop.f32.mrb[112].mxu0  ;;  %v4339_v17 = vmax.f32 %v3679_v19, 0.0 }
 0x33f   : > { %v3100_v33 = vpack.c.bf16 %v2980_v60, %v2979_v48  ;;  %v3695_v21 = vadd.f32 %v12104_v35, %v15137_v61  ;;  %v3686_v26 = vpop.f32.mrb[113].mxu0 }
 0x340   : > { %v3099_v62 = vpack.c.bf16 %v2978_v50, %v2977_v47  ;;  %v3687_v31 = vadd.f32 %v15137_v61, %v3686_v26  ;;  %v12008_v42 = vpop.f32.mrb[136].mxu1  ;;  %v12105_v4 = vpop.f32.mrb[114].mxu0 }
 0x341   : > { %v4343_v39 = vmax.f32 %v3695_v21, 0.0  ;;  %v2671_v11 = vadd.f32 %v15120_v63, %v12008_v42  ;;  %v3698_v7 = vadd.f32 %v12105_v4, %v15137_v61  ;;  %v2662_v49 = vpop.f32.mrb[137].mxu1  ;;  %v3689_v27 = vpop.f32.mrb[115].mxu0 }
 0x342   : > { %v4341_v25 = vmax.f32 %v3687_v31, 0.0  ;;  %v2663_v2 = vadd.f32 %v15120_v63, %v2662_v49  ;;  %v3690_v57 = vadd.f32 %v15137_v61, %v3689_v27  ;;  %v12009_v10 = vpop.f32.mrb[138].mxu1  ;;  %12210 = vmatprep.mubr.msk.bf16.mxu0 %vm1687_vm0, %v3099_v62  ;;  %v4338_v62 = vmax.f32 %v3674_v40, 0.0 }
 0x343   : > { %v15430_v46 = vadd.f32 %v4343_v39, %v4335_v18  ;;  %v4344_v38 = vmax.f32 %v3698_v7, 0.0  ;;  %v2674_v52 = vadd.f32 %v15120_v63, %v12009_v10  ;;  %v2665_v44 = vpop.f32.mrb[139].mxu1  ;;  %12211 = vmatmul.mubr.msk.bf16.gmra.mrb[220].mxu0 %vm1687_vm0, %v3100_v33  ;;  %v2983_v36 = vmax.f32 %v2671_v11, 0.0 }
 0x344   : > { %v15434_v29 = vadd.f32 %v4341_v25, %v4333_v16  ;;  %v4342_v14 = vmax.f32 %v3690_v57, 0.0  ;;  %v2666_v53 = vadd.f32 %v15120_v63, %v2665_v44  ;;  %v2981_v20 = vmax.f32 %v2663_v2, 0.0 }
 0x345   : > { %v15438_v24 = vadd.f32 %v4344_v38, %v4336_v55  ;;  %v2984_v51 = vmax.f32 %v2674_v52, 0.0 }
 0x346   : > { %v15441_v3 = vadd.f32 %v4342_v14, %v4334_v37  ;;  %v2982_v0 = vmax.f32 %v2666_v53, 0.0  ;;  %v12108_v9 = vpop.f32.mrb[116].mxu0 }
 0x347   : > { %v3102_v41 = vpack.c.bf16 %v2984_v51, %v2983_v36  ;;  %v3711_v43 = vadd.f32 %v12108_v9, %v15137_v61  ;;  %v3702_v56 = vpop.f32.mrb[117].mxu0 }
 0x348   : > { %v3101_v45 = vpack.c.bf16 %v2982_v0, %v2981_v20  ;;  %v3703_v59 = vadd.f32 %v15137_v61, %v3702_v56  ;;  %v12012_v12 = vpop.f32.mrb[140].mxu1  ;;  %v12109_v15 = vpop.f32.mrb[118].mxu0 }
 0x349   : > { %v4347_v30 = vmax.f32 %v3711_v43, 0.0  ;;  %v2687_v8 = vadd.f32 %v15120_v63, %v12012_v12  ;;  %v3714_v48 = vadd.f32 %v12109_v15, %v15137_v61  ;;  %v2678_v60 = vpop.f32.mrb[141].mxu1  ;;  %v3705_v5 = vpop.f32.mrb[119].mxu0 }
 0x34a   : > { %v4345_v47 = vmax.f32 %v3703_v59, 0.0  ;;  %v2679_v50 = vadd.f32 %v15120_v63, %v2678_v60  ;;  %v3706_v35 = vadd.f32 %v15137_v61, %v3705_v5  ;;  %v12013_v6 = vpop.f32.mrb[142].mxu1  ;;  %12214 = vmatprep.mubr.msk.bf16.mxu0 %vm1687_vm0, %v3101_v45 }
 0x34b   : > { %v15452_v33 = vadd.f32 %v4347_v30, %v4339_v17  ;;  %v4348_v21 = vmax.f32 %v3714_v48, 0.0  ;;  %v2690_v26 = vadd.f32 %v15120_v63, %v12013_v6  ;;  %v2681_v34 = vpop.f32.mrb[143].mxu1  ;;  %12215 = vmatmul.mubr.msk.bf16.gmra.mrb[224].mxu0 %vm1687_vm0, %v3102_v41  ;;  %v2987_v18 = vmax.f32 %v2687_v8, 0.0 }
 0x34c   : > { %v15456_v31 = vadd.f32 %v4345_v47, %v4337_v58  ;;  %v4346_v42 = vmax.f32 %v3706_v35, 0.0  ;;  %v2682_v4 = vadd.f32 %v15120_v63, %v2681_v34  ;;  %v2985_v7 = vmax.f32 %v2679_v50, 0.0  ;;  %v15468_v63 = vld [vmem:[%s18180_s4] ss:$0 sm:$0xff] }
 0x34d   : > { %v15459_v39 = vadd.f32 %v4348_v21, %v4340_v1  ;;  %v2988_v11 = vmax.f32 %v2690_v26, 0.0 }
 0x34e   : > { %v15461_v49 = vadd.f32 %v4346_v42, %v4338_v62  ;;  %v2986_v27 = vmax.f32 %v2682_v4, 0.0  ;;  %v12112_v16 = vpop.f32.mrb[120].mxu0 }
 0x34f   : > { %v3104_v25 = vpack.c.bf16 %v2988_v11, %v2987_v18  ;;  %v3727_v2 = vadd.f32 %v12112_v16, %v15137_v61  ;;  %v3718_v57 = vpop.f32.mrb[121].mxu0  ;;  %v12880_v16 = vld [vmem:[%s18018_s12 + $0x484] ss:$36 sps:$4 sm:$0xff]  }
 0x350   : > { %v3103_v10 = vpack.c.bf16 %v2986_v27, %v2985_v7  ;;  %v3719_v55 = vadd.f32 %v15137_v61, %v3718_v57  ;;  %v12016_v38 = vpop.f32.mrb[144].mxu1  ;;  %v12113_v52 = vpop.f32.mrb[122].mxu0  ;;  %7890 = vmatprep.subr.bf16.mxu0 %v12880_v16 }
 0x351   : > { %v4351_v44 = vmax.f32 %v3727_v2, 0.0  ;;  %v2703_v37 = vadd.f32 %v15468_v63, %v12016_v38  ;;  %v3730_v14 = vadd.f32 %v12113_v52, %v15137_v61  ;;  %v2694_v53 = vpop.f32.mrb[145].mxu1  ;;  %v3721_v19 = vpop.f32.mrb[123].mxu0 }
 0x352   : > { %v4349_v36 = vmax.f32 %v3719_v55, 0.0  ;;  %v2695_v51 = vadd.f32 %v15468_v63, %v2694_v53  ;;  %v3722_v28 = vadd.f32 %v15137_v61, %v3721_v19  ;;  %v12017_v20 = vpop.f32.mrb[146].mxu1  ;;  %12218 = vmatprep.mubr.msk.bf16.mxu0 %vm1687_vm0, %v3103_v10 }
 0x353   : > { %v15476_v0 = vadd.f32 %v15430_v46, %v4351_v44  ;;  %v4352_v9 = vmax.f32 %v3730_v14, 0.0  ;;  %v2706_v23 = vadd.f32 %v15468_v63, %v12017_v20  ;;  %v2697_v41 = vpop.f32.mrb[147].mxu1  ;;  %12219 = vmatmul.mubr.msk.bf16.gmra.mrb[228].mxu0 %vm1687_vm0, %v3104_v25  ;;  %v2991_v45 = vmax.f32 %v2703_v37, 0.0 }
 0x354   : > { %v15481_v43 = vadd.f32 %v15434_v29, %v4349_v36  ;;  %v4350_v56 = vmax.f32 %v3722_v28, 0.0  ;;  %v2698_v40 = vadd.f32 %v15468_v63, %v2697_v41  ;;  %v2989_v12 = vmax.f32 %v2695_v51, 0.0  ;;  %v15493_v29 = vld [vmem:[%s18200_s6] ss:$0 sm:$0xff] }
 0x355   : > { %v15485_v61 = vadd.f32 %v15438_v24, %v4352_v9  ;;  %v2992_v59 = vmax.f32 %v2706_v23, 0.0 }
 0x356   : > { %v15488_v46 = vadd.f32 %v15441_v3, %v4350_v56  ;;  %v2990_v15 = vmax.f32 %v2698_v40, 0.0  ;;  %v12116_v17 = vpop.f32.mrb[124].mxu0 }
 0x357   : > { %v3106_v30 = vpack.c.bf16 %v2992_v59, %v2991_v45  ;;  %v3743_v8 = vadd.f32 %v15493_v29, %v12116_v17  ;;  %v3734_v48 = vpop.f32.mrb[125].mxu0 }
 0x358   : > { %v3105_v60 = vpack.c.bf16 %v2990_v15, %v2989_v12  ;;  %v3735_v24 = vadd.f32 %v15493_v29, %v3734_v48  ;;  %v12020_v5 = vpop.f32.mrb[148].mxu1  ;;  %v12117_v58 = vpop.f32.mrb[126].mxu0 }
 0x359   : > { %v4355_v47 = vmax.f32 %v3743_v8, 0.0  ;;  %v2719_v3 = vadd.f32 %v15468_v63, %v12020_v5  ;;  %v3746_v50 = vadd.f32 %v15493_v29, %v12117_v58  ;;  %v2710_v35 = vpop.f32.mrb[149].mxu1  ;;  %v3737_v6 = vpop.f32.mrb[127].mxu0 }
 0x35a   : > { %v4353_v1 = vmax.f32 %v3735_v24, 0.0  ;;  %v2711_v21 = vadd.f32 %v15468_v63, %v2710_v35  ;;  %v3738_v26 = vadd.f32 %v15493_v29, %v3737_v6  ;;  %v12021_v34 = vpop.f32.mrb[150].mxu1  ;;  %12222 = vmatprep.mubr.msk.bf16.mxu0 %vm1687_vm0, %v3105_v60 }
 0x35b   : > { %v15503_v62 = vadd.f32 %v15452_v33, %v4355_v47  ;;  %v4356_v42 = vmax.f32 %v3746_v50, 0.0  ;;  %v2722_v4 = vadd.f32 %v15468_v63, %v12021_v34  ;;  %v2713_v18 = vpop.f32.mrb[151].mxu1  ;;  %12223 = vmatmul.mubr.msk.bf16.gmra.mrb[232].mxu0 %vm1687_vm0, %v3106_v30  ;;  %v2995_v25 = vmax.f32 %v2719_v3, 0.0 }
 0x35c   : > { %v15508_v11 = vadd.f32 %v15456_v31, %v4353_v1  ;;  %v4354_v7 = vmax.f32 %v3738_v26, 0.0  ;;  %v2714_v27 = vadd.f32 %v15468_v63, %v2713_v18  ;;  %v2993_v57 = vmax.f32 %v2711_v21, 0.0 }
 0x35d   : > { %v15515_v33 = vadd.f32 %v15459_v39, %v4356_v42  ;;  %v2996_v2 = vmax.f32 %v2722_v4, 0.0 }
 0x35e   : > { %v15518_v10 = vadd.f32 %v15461_v49, %v4354_v7  ;;  %v2994_v55 = vmax.f32 %v2714_v27, 0.0  ;;  %v12120_v38 = vpop.f32.mrb[128].mxu0 }
 0x35f   : > { %v3108_v31 = vpack.c.bf16 %v2996_v2, %v2995_v25  ;;  %v3759_v52 = vadd.f32 %v15493_v29, %v12120_v38  ;;  %v3750_v44 = vpop.f32.mrb[129].mxu0 }
 0x360   : > { %v3107_v37 = vpack.c.bf16 %v2994_v55, %v2993_v57  ;;  %v3751_v14 = vadd.f32 %v15493_v29, %v3750_v44  ;;  %v12024_v53 = vpop.f32.mrb[152].mxu1  ;;  %v12121_v19 = vpop.f32.mrb[130].mxu0 }
 0x361   : > { %v4359_v36 = vmax.f32 %v3759_v52, 0.0  ;;  %v2735_v39 = vadd.f32 %v15468_v63, %v12024_v53  ;;  %v3762_v51 = vadd.f32 %v15493_v29, %v12121_v19  ;;  %v2726_v28 = vpop.f32.mrb[153].mxu1  ;;  %v3753_v49 = vpop.f32.mrb[131].mxu0 }
 0x362   : > { %v4357_v20 = vmax.f32 %v3751_v14, 0.0  ;;  %v2727_v9 = vadd.f32 %v15468_v63, %v2726_v28  ;;  %v3754_v23 = vadd.f32 %v15493_v29, %v3753_v49  ;;  %v12025_v41 = vpop.f32.mrb[154].mxu1  ;;  %12226 = vmatprep.mubr.msk.bf16.mxu0 %vm1687_vm0, %v3107_v37 }
 0x363   : > { %v15528_v56 = vadd.f32 %v15476_v0, %v4359_v36  ;;  %v4360_v40 = vmax.f32 %v3762_v51, 0.0  ;;  %v2738_v45 = vadd.f32 %v15468_v63, %v12025_v41  ;;  %v2729_v59 = vpop.f32.mrb[155].mxu1  ;;  %12227 = vmatmul.mubr.msk.bf16.gmra.mrb[236].mxu0 %vm1687_vm0, %v3108_v31  ;;  %v2999_v30 = vmax.f32 %v2735_v39, 0.0 }
 0x364   : > { %v15533_v12 = vadd.f32 %v15481_v43, %v4357_v20  ;;  %v4358_v15 = vmax.f32 %v3754_v23, 0.0  ;;  %v2730_v17 = vadd.f32 %v15468_v63, %v2729_v59  ;;  %v2997_v60 = vmax.f32 %v2727_v9, 0.0 }
 0x365   : > { %v15537_v8 = vadd.f32 %v15485_v61, %v4360_v40  ;;  %v3000_v48 = vmax.f32 %v2738_v45, 0.0 }
 0x366   : > { %v15540_v0 = vadd.f32 %v15488_v46, %v4358_v15  ;;  %v2998_v24 = vmax.f32 %v2730_v17, 0.0  ;;  %v12124_v5 = vpop.f32.mrb[132].mxu0 }
 0x367   : > { %v3110_v58 = vpack.c.bf16 %v3000_v48, %v2999_v30  ;;  %v3775_v47 = vadd.f32 %v15493_v29, %v12124_v5  ;;  %v3766_v3 = vpop.f32.mrb[133].mxu0 }
 0x368   : > { %v3109_v43 = vpack.c.bf16 %v2998_v24, %v2997_v60  ;;  %v3767_v50 = vadd.f32 %v15493_v29, %v3766_v3  ;;  %v12028_v35 = vpop.f32.mrb[156].mxu1  ;;  %v12125_v6 = vpop.f32.mrb[134].mxu0 }
 0x369   : > { %v4363_v1 = vmax.f32 %v3775_v47, 0.0  ;;  %v2751_v61 = vadd.f32 %v15468_v63, %v12028_v35  ;;  %v3778_v21 = vadd.f32 %v15493_v29, %v12125_v6  ;;  %v2742_v26 = vpop.f32.mrb[157].mxu1  ;;  %v3769_v34 = vpop.f32.mrb[135].mxu0 }
 0x36a   : > { %v4361_v46 = vmax.f32 %v3767_v50, 0.0  ;;  %v2743_v42 = vadd.f32 %v15468_v63, %v2742_v26  ;;  %v3770_v4 = vadd.f32 %v15493_v29, %v3769_v34  ;;  %v12029_v18 = vpop.f32.mrb[158].mxu1  ;;  %12230 = vmatprep.mubr.msk.bf16.mxu0 %vm1687_vm0, %v3109_v43 }
 0x36b   : > { %v15550_v7 = vadd.f32 %v15503_v62, %v4363_v1  ;;  %v4364_v27 = vmax.f32 %v3778_v21, 0.0  ;;  %v2754_v16 = vadd.f32 %v15468_v63, %v12029_v18  ;;  %v2745_v25 = vpop.f32.mrb[159].mxu1  ;;  %12231 = vmatmul.mubr.msk.bf16.gmra.mrb[240].mxu0 %vm1687_vm0, %v3110_v58  ;;  %v3003_v38 = vmax.f32 %v2751_v61, 0.0 }
 0x36c   : > { %v15555_v2 = vadd.f32 %v15508_v11, %v4361_v46  ;;  %v4362_v57 = vmax.f32 %v3770_v4, 0.0  ;;  %v2746_v55 = vadd.f32 %v15468_v63, %v2745_v25  ;;  %v3001_v44 = vmax.f32 %v2743_v42, 0.0 }
 0x36d   : > { %v15559_v31 = vadd.f32 %v15515_v33, %v4364_v27  ;;  %v3004_v52 = vmax.f32 %v2754_v16, 0.0 }
 0x36e   : > { %v15562_v62 = vadd.f32 %v15518_v10, %v4362_v57  ;;  %v3002_v37 = vmax.f32 %v2746_v55, 0.0  ;;  %v12128_v14 = vpop.f32.mrb[136].mxu0 }
 0x36f   : > { %v3112_v53 = vpack.c.bf16 %v3004_v52, %v3003_v38  ;;  %v3791_v19 = vadd.f32 %v15493_v29, %v12128_v14  ;;  %v3782_v36 = vpop.f32.mrb[137].mxu0 }
 0x370   : > { %v3111_v11 = vpack.c.bf16 %v3002_v37, %v3001_v44  ;;  %v3783_v39 = vadd.f32 %v15493_v29, %v3782_v36  ;;  %v12032_v51 = vpop.f32.mrb[160].mxu1  ;;  %v12129_v28 = vpop.f32.mrb[138].mxu0 }
 0x371   : > { %v4367_v49 = vmax.f32 %v3791_v19, 0.0  ;;  %v2767_v33 = vadd.f32 %v15468_v63, %v12032_v51  ;;  %v3794_v20 = vadd.f32 %v15493_v29, %v12129_v28  ;;  %v2758_v9 = vpop.f32.mrb[161].mxu1  ;;  %v3785_v23 = vpop.f32.mrb[139].mxu0 }
 0x372   : > { %v4365_v10 = vmax.f32 %v3783_v39, 0.0  ;;  %v2759_v41 = vadd.f32 %v15468_v63, %v2758_v9  ;;  %v3786_v40 = vadd.f32 %v15493_v29, %v3785_v23  ;;  %v12033_v45 = vpop.f32.mrb[162].mxu1  ;;  %12234 = vmatprep.mubr.msk.bf16.mxu0 %vm1687_vm0, %v3111_v11 }
 0x373   : > { %v4536_v59 = vadd.f32 %v15528_v56, %v4367_v49  ;;  %v4368_v15 = vmax.f32 %v3794_v20, 0.0  ;;  %v2770_v17 = vadd.f32 %v15468_v63, %v12033_v45  ;;  %v2761_v30 = vpop.f32.mrb[163].mxu1  ;;  %12235 = vmatmul.mubr.msk.bf16.gmra.mrb[244].mxu0 %vm1687_vm0, %v3112_v53  ;;  %v3007_v5 = vmax.f32 %v2767_v33, 0.0 }
 0x374   : > { %v4528_v48 = vadd.f32 %v15533_v12, %v4365_v10  ;;  %v4366_v60 = vmax.f32 %v3786_v40, 0.0  ;;  %v2762_v24 = vadd.f32 %v15468_v63, %v2761_v30  ;;  %v3005_v3 = vmax.f32 %v2759_v41, 0.0 }
 0x375   : > { %v4540_v58 = vadd.f32 %v15537_v8, %v4368_v15  ;;  %v3008_v47 = vmax.f32 %v2770_v17, 0.0  ;;  %v4664_v35 = vmul.f32 0.2, %v4536_v59 }
 0x376   : > { %v4532_v43 = vadd.f32 %v15540_v0, %v4366_v60  ;;  %v3006_v50 = vmax.f32 %v2762_v24, 0.0  ;;  %v12132_v56 = vpop.f32.mrb[140].mxu0  ;;  %v4662_v26 = vmul.f32 0.2, %v4528_v48 }
 0x377   : > { %v4665_v6 = vmul.f32 0.2, %v4540_v58  ;;  %v3114_v1 = vpack.c.bf16 %v3008_v47, %v3007_v5  ;;  %v3807_v61 = vadd.f32 %v15493_v29, %v12132_v56  ;;  %v3798_v21 = vpop.f32.mrb[141].mxu0 }
 0x378   : > { %v4663_v12 = vmul.f32 0.2, %v4532_v43  ;;  %v3113_v34 = vpack.c.bf16 %v3006_v50, %v3005_v3  ;;  %v3799_v46 = vadd.f32 %v15493_v29, %v3798_v21  ;;  %v12036_v42 = vpop.f32.mrb[164].mxu1  ;;  %v12133_v4 = vpop.f32.mrb[142].mxu0 }
 0x379   : > { %v15580_v8 = vpack.c.bf16 %v4665_v6, %v4664_v35  ;;  %v4371_v18 = vmax.f32 %v3807_v61, 0.0  ;;  %v2783_v0 = vadd.f32 %v15468_v63, %v12036_v42  ;;  %v3810_v27 = vadd.f32 %v15493_v29, %v12133_v4  ;;  %v2774_v16 = vpop.f32.mrb[165].mxu1  ;;  %v3801_v25 = vpop.f32.mrb[143].mxu0 }
 0x37a   : > { %v15584_v57 = vpack.c.bf16 %v4663_v12, %v4662_v26  ;;  %v4369_v55 = vmax.f32 %v3799_v46, 0.0  ;;  %v2775_v38 = vadd.f32 %v15468_v63, %v2774_v16  ;;  %v3802_v52 = vadd.f32 %v15493_v29, %v3801_v25  ;;  %v12037_v44 = vpop.f32.mrb[166].mxu1  ;;  %12238 = vmatprep.mubr.msk.bf16.mxu0 %vm1687_vm0, %v3113_v34 }
 0x37b   : > { %v4552_v37 = vadd.f32 %v15550_v7, %v4371_v18  ;;  %v4372_v14 = vmax.f32 %v3810_v27, 0.0  ;;  %v2786_v53 = vadd.f32 %v15468_v63, %v12037_v44  ;;  %v2777_v19 = vpop.f32.mrb[167].mxu1  ;;  %12239 = vmatmul.mubr.msk.bf16.gmra.mrb[248].mxu0 %vm1687_vm0, %v3114_v1  ;;  %v3011_v51 = vmax.f32 %v2783_v0, 0.0 }
 0x37c   : > { %v4544_v36 = vadd.f32 %v15555_v2, %v4369_v55  ;;  %v4370_v11 = vmax.f32 %v3802_v52, 0.0  ;;  %v2778_v39 = vadd.f32 %v15468_v63, %v2777_v19  ;;  %12278 = vmatprep.mubr.bf16.mxu1 %v15584_v57  ;;  %v3009_v7 = vmax.f32 %v2775_v38, 0.0 }
 0x37d   : > { %v4556_v28 = vadd.f32 %v15559_v31, %v4372_v14  ;;  %v3012_v49 = vmax.f32 %v2786_v53, 0.0  ;;  %12279 = vmatmul.mubr.bf16.gmra.mrb[184].mxu1 %v15580_v8  ;;  %v4668_v23 = vmul.f32 0.2, %v4552_v37 }
 0x37e   : > { %v4548_v33 = vadd.f32 %v15562_v62, %v4370_v11  ;;  %v3010_v20 = vmax.f32 %v2778_v39, 0.0  ;;  %v12136_v9 = vpop.f32.mrb[144].mxu0  ;;  %v4666_v40 = vmul.f32 0.2, %v4544_v36 }
 0x37f   : > { %v4669_v10 = vmul.f32 0.2, %v4556_v28  ;;  %v3116_v41 = vpack.c.bf16 %v3012_v49, %v3011_v51  ;;  %v3814_v2 = vpop.f32.mrb[145].mxu0  ;;  %v3823_v25 = vadd.f32 %v15493_v29, %v12136_v9 }
 0x380   : > { %v4667_v45 = vmul.f32 0.2, %v4548_v33  ;;  %v3115_v59 = vpack.c.bf16 %v3010_v20, %v3009_v7  ;;  %v12040_v15 = vpop.f32.mrb[168].mxu1  ;;  %v12137_v17 = vpop.f32.mrb[146].mxu0  ;;  %v3815_v52 = vadd.f32 %v15493_v29, %v3814_v2 }
 0x381   : > { %v15598_v30 = vpack.c.bf16 %v4669_v10, %v4668_v23  ;;  %v2799_v31 = vadd.f32 %v15468_v63, %v12040_v15  ;;  %v2790_v48 = vpop.f32.mrb[169].mxu1  ;;  %v3817_v60 = vpop.f32.mrb[147].mxu0  ;;  %v3826_v53 = vadd.f32 %v15493_v29, %v12137_v17  ;;  %v4375_v49 = vmax.f32 %v3823_v25, 0.0 }
 0x382   : > { %v15601_v24 = vpack.c.bf16 %v4667_v45, %v4666_v40  ;;  %v2791_v62 = vadd.f32 %v15468_v63, %v2790_v48  ;;  %v12041_v5 = vpop.f32.mrb[170].mxu1  ;;  %12242 = vmatprep.mubr.msk.bf16.mxu0 %vm1687_vm0, %v3115_v59  ;;  %v3818_v39 = vadd.f32 %v15493_v29, %v3817_v60  ;;  %v4373_v9 = vmax.f32 %v3815_v52, 0.0 }
 0x383   : > { %v2802_v58 = vadd.f32 %v15468_v63, %v12041_v5  ;;  %v2793_v47 = vpop.f32.mrb[171].mxu1  ;;  %12243 = vmatmul.mubr.msk.bf16.gmra.mrb[252].mxu0 %vm1687_vm0, %v3116_v41  ;;  %v3015_v43 = vmax.f32 %v2799_v31, 0.0  ;;  %v4376_v41 = vmax.f32 %v3826_v53, 0.0 }
 0x384   : > { %v2794_v3 = vadd.f32 %v15468_v63, %v2793_v47  ;;  %12282 = vmatprep.mubr.bf16.mxu1 %v15601_v24  ;;  %v3013_v56 = vmax.f32 %v2791_v62, 0.0  ;;  %v4374_v45 = vmax.f32 %v3818_v39, 0.0 }
 0x385   : > { %v3016_v50 = vmax.f32 %v2802_v58, 0.0  ;;  %12283 = vmatmul.mubr.bf16.gmra.mrb[188].mxu1 %v15598_v30 }
 0x386   : > { %v3014_v35 = vmax.f32 %v2794_v3, 0.0  ;;  %v12140_v6 = vpop.f32.mrb[148].mxu0 }
 0x387   : > { %v3118_v1 = vpack.c.bf16 %v3016_v50, %v3015_v43  ;;  %v3830_v61 = vpop.f32.mrb[149].mxu0  ;;  %v3839_v17 = vadd.f32 %v15493_v29, %v12140_v6 }
 0x388   : > { %v3117_v21 = vpack.c.bf16 %v3014_v35, %v3013_v56  ;;  %v12044_v26 = vpop.f32.mrb[172].mxu1  ;;  %v12141_v12 = vpop.f32.mrb[150].mxu0  ;;  %v3831_v48 = vadd.f32 %v15493_v29, %v3830_v61  ;;  %v12878_v56 = vld [vmem:[%s18018_s12 + $0x480] ss:$36 sps:$4 sm:$0xff]  }
 0x389   : > { %v2815_v34 = vadd.f32 %v15468_v63, %v12044_v26  ;;  %v2806_v46 = vpop.f32.mrb[173].mxu1  ;;  %v3833_v42 = vpop.f32.mrb[151].mxu0  ;;  %v3842_v5 = vadd.f32 %v15493_v29, %v12141_v12  ;;  %v4379_v35 = vmax.f32 %v3839_v17, 0.0  ;;  %v12890_v17 = vld [vmem:[%s18018_s12 + $0x5a0] ss:$36 sps:$4 sm:$0xff]  }
 0x38a   : > { %v2807_v4 = vadd.f32 %v15468_v63, %v2806_v46  ;;  %v12045_v18 = vpop.f32.mrb[174].mxu1  ;;  %12246 = vmatprep.mubr.msk.bf16.mxu0 %vm1687_vm0, %v3117_v21  ;;  %v3834_v3 = vadd.f32 %v15493_v29, %v3833_v42  ;;  %v12883_v21 = vld [vmem:[%s18018_s12 + $0x4cc] ss:$36 sps:$4 sm:$0xff]   ;;  %v4377_v26 = vmax.f32 %v3831_v48, 0.0 }
 0x38b   : > { %v2818_v0 = vadd.f32 %v15468_v63, %v12045_v18  ;;  %v2809_v27 = vpop.f32.mrb[175].mxu1  ;;  %12247 = vmatmul.mubr.msk.bf16.gmra.mrb[0].mxu0 %vm1687_vm0, %v3118_v1  ;;  %v3019_v55 = vmax.f32 %v2815_v34, 0.0  ;;  %v4380_v46 = vmax.f32 %v3842_v5, 0.0 }
 0x38c   : > { %v2810_v16 = vadd.f32 %v15468_v63, %v2809_v27  ;;  %v3017_v44 = vmax.f32 %v2807_v4, 0.0  ;;  %v4378_v18 = vmax.f32 %v3834_v3, 0.0 }
 0x38d   : > { %v3020_v38 = vmax.f32 %v2818_v0, 0.0 }
 0x38e   : > { %v3018_v37 = vmax.f32 %v2810_v16, 0.0  ;;  %v12144_v14 = vpop.f32.mrb[152].mxu0  ;;  %v12881_v16 = vld [vmem:[%s18018_s12 + $0x4c8] ss:$36 sps:$4 sm:$0xff]  }
 0x38f   : > { %v3120_v19 = vpack.c.bf16 %v3020_v38, %v3019_v55  ;;  %v3855_v36 = vadd.f32 %v15493_v29, %v12144_v14  ;;  %v3846_v11 = vpop.f32.mrb[153].mxu0  ;;  %v12886_v55 = vld [vmem:[%s18018_s12 + $0x514] ss:$36 sps:$4 sm:$0xff]  }
 0x390   : > { %v3119_v51 = vpack.c.bf16 %v3018_v37, %v3017_v44  ;;  %v3847_v63 = vadd.f32 %v15493_v29, %v3846_v11  ;;  %v12145_v28 = vpop.f32.mrb[154].mxu0 }
 0x391   : > { %v4383_v7 = vmax.f32 %v3855_v36, 0.0  ;;  %v3858_v33 = vadd.f32 %v15493_v29, %v12145_v28  ;;  %v3849_v20 = vpop.f32.mrb[155].mxu0 }
 0x392   : > { %v4381_v23 = vmax.f32 %v3847_v63, 0.0  ;;  %v3850_v10 = vadd.f32 %v15493_v29, %v3849_v20  ;;  %12250 = vmatprep.mubr.msk.bf16.mxu0 %vm1687_vm0, %v3119_v51  ;;  %v12889_v51 = vld [vmem:[%s18018_s12 + $0x55c] ss:$36 sps:$4 sm:$0xff]  }
 0x393   : > { %v4565_v2 = vadd.f32 %v4383_v7, %v4375_v49  ;;  %v4384_v40 = vmax.f32 %v3858_v33, 0.0  ;;  %12251 = vmatmul.mubr.msk.bf16.gmra.mrb[4].mxu0 %vm1687_vm0, %v3120_v19  ;;  %v12884_v19 = vld [vmem:[%s18018_s12 + $0x510] ss:$36 sps:$4 sm:$0xff]  }
 0x394   : > { %v4557_v59 = vadd.f32 %v4381_v23, %v4373_v9  ;;  %v4382_v15 = vmax.f32 %v3850_v10, 0.0  ;;  %7849 = vmatprep.mubr.bf16.mxu0 %v15584_v57  ;;  %v12887_v9 = vld [vmem:[%s18018_s12 + $0x558] ss:$36 sps:$4 sm:$0xff]   ;;  %v12892_v10 = vld [vmem:[%s18018_s12 + $0x5a4] ss:$36 sps:$4 sm:$0xff]  }
 0x395   : > { %v4569_v31 = vadd.f32 %v4384_v40, %v4376_v41 }
 0x396   : > { %v4561_v60 = vadd.f32 %v4382_v15, %v4374_v45  ;;  %v12148_v62 = vpop.f32.mrb[156].mxu0 }
 0x397   : > { %v3871_v58 = vadd.f32 %v15493_v29, %v12148_v62  ;;  %v3862_v47 = vpop.f32.mrb[157].mxu0 }
 0x398   : > { %v3863_v43 = vadd.f32 %v15493_v29, %v3862_v47  ;;  %v12149_v50 = vpop.f32.mrb[158].mxu0 }
 0x399   : > { %v4387_v6 = vmax.f32 %v3871_v58, 0.0  ;;  %v3874_v1 = vadd.f32 %v15493_v29, %v12149_v50  ;;  %v3865_v61 = vpop.f32.mrb[159].mxu0 }
 0x39a   : > { %v4385_v12 = vmax.f32 %v3863_v43, 0.0  ;;  %v3866_v34 = vadd.f32 %v15493_v29, %v3865_v61 }
 0x39b   : > { %v4581_v42 = vadd.f32 %v4387_v6, %v4379_v35  ;;  %v4388_v4 = vmax.f32 %v3874_v1, 0.0  ;;  %7850 = vmatmul.mubr.bf16.vlgmr.msra.gmra.mrb[8].mxu0 %v15387_v32  ;;  %v12898_v6 = vld [vmem:[%s18018_s12 + $0x634] ss:$36 sps:$4 sm:$0xff]  }
 0x39c   : > { %v4573_v0 = vadd.f32 %v4385_v12, %v4377_v26  ;;  %v4386_v27 = vmax.f32 %v3866_v34, 0.0  ;;  %7859 = vmatprep.mubr.bf16.mxu0 %v15580_v8  ;;  %7891 = vmatpush1.bf16.msra.mxu0 %v12878_v56  ;;  %v12893_v56 = vld [vmem:[%s18018_s12 + $0x5e8] ss:$36 sps:$4 sm:$0xff]  }
 0x39d   : > { %v4585_v25 = vadd.f32 %v4388_v4, %v4380_v46  ;;  %7892 = vmatprep.subr.bf16.mxu0 %v12883_v21  ;;  %v12896_v46 = vld [vmem:[%s18018_s12 + $0x630] ss:$36 sps:$4 sm:$0xff]  }
 0x39e   : > { %v4577_v38 = vadd.f32 %v4386_v27, %v4378_v18  ;;  %v12152_v52 = vpop.f32.mrb[160].mxu0 }
 0x39f   : > { %v3887_v44 = vadd.f32 %v15493_v29, %v12152_v52  ;;  %v3878_v37 = vpop.f32.mrb[161].mxu0 }
 0x3a0   : > { %v3879_v14 = vadd.f32 %v15493_v29, %v3878_v37  ;;  %v12153_v53 = vpop.f32.mrb[162].mxu0  ;;  %7893 = vmatpush1.bf16.msra.mxu0 %v12881_v16 }
 0x3a1   : > { %v4391_v36 = vmax.f32 %v3887_v44, 0.0  ;;  %v3890_v11 = vadd.f32 %v15493_v29, %v12153_v53  ;;  %v3881_v39 = vpop.f32.mrb[163].mxu0  ;;  %7894 = vmatprep.subr.bf16.mxu0 %v12886_v55  ;;  %v12899_v44 = vld [vmem:[%s18018_s12 + $0x678] ss:$36 sps:$4 sm:$0xff]  }
 0x3a2   : > { %v4389_v63 = vmax.f32 %v3879_v14, 0.0  ;;  %v3882_v28 = vadd.f32 %v15493_v29, %v3881_v39  ;;  %v12904_v14 = vld [vmem:[%s18018_s12 + $0x6c4] ss:$36 sps:$4 sm:$0xff]  }
 0x3a3   : > { %v4566_v49 = vadd.f32 %v4565_v2, %v4391_v36  ;;  %v4392_v7 = vmax.f32 %v3890_v11, 0.0  ;;  %7860 = vmatmul.mubr.bf16.gmra.mrb[12].mxu0 %v15383_v22 }
 0x3a4   : > { %v4558_v33 = vadd.f32 %v4557_v59, %v4389_v63  ;;  %v4390_v20 = vmax.f32 %v3882_v28, 0.0  ;;  %7869 = vmatprep.mubr.bf16.mxu0 %v15601_v24  ;;  %7895 = vmatpush1.bf16.msra.mxu0 %v12884_v19  ;;  %v12902_v63 = vld [vmem:[%s18018_s12 + $0x6c0] ss:$36 sps:$4 sm:$0xff]  }
 0x3a5   : > { %v4570_v23 = vadd.f32 %v4569_v31, %v4392_v7  ;;  %7896 = vmatprep.subr.bf16.mxu0 %v12889_v51 }
 0x3a6   : > { %v4562_v41 = vadd.f32 %v4561_v60, %v4390_v20  ;;  %v12156_v2 = vpop.f32.mrb[164].mxu0  ;;  %v12895_v60 = vld [vmem:[%s18018_s12 + $0x5ec] ss:$36 sps:$4 sm:$0xff]  }
 0x3a7   : > { %v3903_v40 = vadd.f32 %v15493_v29, %v12156_v2  ;;  %v3894_v45 = vpop.f32.mrb[165].mxu0 }
 0x3a8   : > { %v3895_v59 = vadd.f32 %v15493_v29, %v3894_v45  ;;  %v12157_v15 = vpop.f32.mrb[166].mxu0  ;;  %7897 = vmatpush1.bf16.msra.mxu0 %v12887_v9 }
 0x3a9   : > { %v4395_v48 = vmax.f32 %v3903_v40, 0.0  ;;  %v3906_v31 = vadd.f32 %v15493_v29, %v12157_v15  ;;  %v3897_v62 = vpop.f32.mrb[167].mxu0  ;;  %7898 = vmatprep.subr.bf16.mxu0 %v12892_v10  ;;  %v12905_v40 = vld [vmem:[%s18018_s12 + $0x708] ss:$36 sps:$4 sm:$0xff]  }
 0x3aa   : > { %v4393_v5 = vmax.f32 %v3895_v59, 0.0  ;;  %v3898_v58 = vadd.f32 %v15493_v29, %v3897_v62  ;;  %v12910_v59 = vld [vmem:[%s18018_s12 + $0x754] ss:$36 sps:$4 sm:$0xff]  }
 0x3ab   : > { %v4582_v47 = vadd.f32 %v4581_v42, %v4395_v48  ;;  %v4396_v3 = vmax.f32 %v3906_v31, 0.0  ;;  %7870 = vmatmul.mubr.bf16.gmra.mrb[16].mxu0 %v15404_v54 }
 0x3ac   : > { %v4574_v43 = vadd.f32 %v4573_v0, %v4393_v5  ;;  %v4394_v50 = vmax.f32 %v3898_v58, 0.0  ;;  %7879 = vmatprep.mubr.bf16.mxu0 %v15598_v30  ;;  %7899 = vmatpush1.bf16.msra.mxu0 %v12890_v17  ;;  %v12901_v0 = vld [vmem:[%s18018_s12 + $0x67c] ss:$36 sps:$4 sm:$0xff]   ;;  %v12908_v5 = vld [vmem:[%s18018_s12 + $0x750] ss:$36 sps:$4 sm:$0xff]  }
 0x3ad   : > { %v4586_v35 = vadd.f32 %v4585_v25, %v4396_v3  ;;  %7900 = vmatprep.subr.bf16.mxu0 %v12895_v60 }
 0x3ae   : > { %v4578_v1 = vadd.f32 %v4577_v38, %v4394_v50  ;;  %v12160_v61 = vpop.f32.mrb[168].mxu0 }
 0x3af   : > { %v3919_v21 = vadd.f32 %v15493_v29, %v12160_v61  ;;  %v3910_v26 = vpop.f32.mrb[169].mxu0 }
 0x3b0   : > { %v3911_v12 = vadd.f32 %v15493_v29, %v3910_v26  ;;  %v12161_v34 = vpop.f32.mrb[170].mxu0  ;;  %7901 = vmatpush1.bf16.msra.mxu0 %v12893_v56 }
 0x3b1   : > { %v4399_v42 = vmax.f32 %v3919_v21, 0.0  ;;  %v3922_v4 = vadd.f32 %v15493_v29, %v12161_v34  ;;  %v3913_v18 = vpop.f32.mrb[171].mxu0  ;;  %7902 = vmatprep.subr.bf16.mxu0 %v12898_v6  ;;  %v12911_v21 = vld [vmem:[%s18018_s12 + $0x798] ss:$36 sps:$4 sm:$0xff]  }
 0x3b2   : > { %v4397_v27 = vmax.f32 %v3911_v12, 0.0  ;;  %v3914_v16 = vadd.f32 %v15493_v29, %v3913_v18  ;;  %v12916_v12 = vld [vmem:[%s18018_s12 + $0x7e4] ss:$36 sps:$4 sm:$0xff]  }
 0x3b3   : > { %v4567_v25 = vadd.f32 %v4566_v49, %v4399_v42  ;;  %v4400_v55 = vmax.f32 %v3922_v4, 0.0  ;;  %7880 = vmatmul.mubr.bf16.gmra.mrb[20].mxu0 %v15401_v13  ;;  %v12914_v42 = vld [vmem:[%s18018_s12 + $0x7e0] ss:$36 sps:$4 sm:$0xff]  }
 0x3b4   : > { %v4559_v38 = vadd.f32 %v4558_v33, %v4397_v27  ;;  %v4398_v52 = vmax.f32 %v3914_v16, 0.0  ;;  %7903 = vmatpush1.bf16.msra.mxu0 %v12896_v46  ;;  %v12907_v33 = vld [vmem:[%s18018_s12 + $0x70c] ss:$36 sps:$4 sm:$0xff]  }
 0x3b5   : > { %v4571_v37 = vadd.f32 %v4570_v23, %v4400_v55  ;;  %7904 = vmatprep.subr.bf16.mxu0 %v12901_v0 }
 0x3b6   : > { %v4563_v53 = vadd.f32 %v4562_v41, %v4398_v52  ;;  %v12164_v19 = vpop.f32.mrb[172].mxu0 }
 0x3b7   : > { %v3935_v36 = vadd.f32 %v15493_v29, %v12164_v19  ;;  %v3926_v11 = vpop.f32.mrb[173].mxu0 }
 0x3b8   : > { %v3927_v39 = vadd.f32 %v15493_v29, %v3926_v11  ;;  %v12165_v51 = vpop.f32.mrb[174].mxu0  ;;  %7905 = vmatpush1.bf16.msra.mxu0 %v12899_v44 }
 0x3b9   : > { %v4403_v28 = vmax.f32 %v3935_v36, 0.0  ;;  %v3938_v49 = vadd.f32 %v15493_v29, %v12165_v51  ;;  %v3929_v7 = vpop.f32.mrb[175].mxu0  ;;  %7906 = vmatprep.subr.bf16.mxu0 %v12904_v14 }
 0x3ba   : > { %v4401_v20 = vmax.f32 %v3927_v39, 0.0  ;;  %v3930_v9 = vadd.f32 %v15493_v29, %v3929_v7 }
 0x3bb   : > { %v4583_v23 = vadd.f32 %v4582_v47, %v4403_v28  ;;  %v4404_v10 = vmax.f32 %v3938_v49, 0.0  ;;  %v12917_v49 = vld [vmem:[%s18018_s12 + $0x828] ss:$36 sps:$4 sm:$0xff]  }
 0x3bc   : > { %v4575_v41 = vadd.f32 %v4574_v43, %v4401_v20  ;;  %v4402_v2 = vmax.f32 %v3930_v9, 0.0  ;;  %7907 = vmatpush1.bf16.msra.mxu0 %v12902_v63  ;;  %v12913_v43 = vld [vmem:[%s18018_s12 + $0x79c] ss:$36 sps:$4 sm:$0xff]  }
 0x3bd   : > { %v4587_v45 = vadd.f32 %v4586_v35, %v4404_v10  ;;  %7908 = vmatprep.subr.bf16.mxu0 %v12907_v33  ;;  %v12922_v33 = vld [vmem:[%s18018_s12 + $0x874] ss:$36 sps:$4 sm:$0xff]  }
 0x3be   : > { %v4579_v15 = vadd.f32 %v4578_v1, %v4402_v2  ;;  %v12168_v17 = vpop.f32.mrb[176].mxu0 }
 0x3bf   : > { %v3951_v48 = vadd.f32 %v15493_v29, %v12168_v17  ;;  %v3942_v31 = vpop.f32.mrb[177].mxu0 }
 0x3c0   : > { %v3943_v62 = vadd.f32 %v15493_v29, %v3942_v31  ;;  %v12169_v60 = vpop.f32.mrb[178].mxu0  ;;  %7909 = vmatpush1.bf16.msra.mxu0 %v12905_v40 }
 0x3c1   : > { %v4407_v58 = vmax.f32 %v3951_v48, 0.0  ;;  %v3954_v47 = vadd.f32 %v15493_v29, %v12169_v60  ;;  %v3945_v3 = vpop.f32.mrb[179].mxu0  ;;  %7910 = vmatprep.subr.bf16.mxu0 %v12910_v59  ;;  %v12928_v60 = vld [vmem:[%s18018_s12 + $0x904] ss:$36 sps:$4 sm:$0xff]  }
 0x3c2   : > { %v4405_v50 = vmax.f32 %v3943_v62, 0.0  ;;  %v3946_v56 = vadd.f32 %v15493_v29, %v3945_v3  ;;  %v12923_v62 = vld [vmem:[%s18018_s12 + $0x8b8] ss:$36 sps:$4 sm:$0xff]  }
 0x3c3   : > { %v4568_v35 = vadd.f32 %v4567_v25, %v4407_v58  ;;  %v4408_v6 = vmax.f32 %v3954_v47, 0.0 }
 0x3c4   : > { %v4560_v1 = vadd.f32 %v4559_v38, %v4405_v50  ;;  %v4406_v61 = vmax.f32 %v3946_v56, 0.0  ;;  %7911 = vmatpush1.bf16.msra.mxu0 %v12908_v5 }
 0x3c5   : > { %v4572_v26 = vadd.f32 %v4571_v37, %v4408_v6  ;;  %7912 = vmatprep.subr.bf16.mxu0 %v12913_v43  ;;  %v4672_v4 = vmul.f32 0.2, %v4568_v35 }
 0x3c6   : > { %v4564_v34 = vadd.f32 %v4563_v53, %v4406_v61  ;;  %v12172_v46 = vpop.f32.mrb[180].mxu0  ;;  %v4670_v16 = vmul.f32 0.2, %v4560_v1  ;;  %v12919_v53 = vld [vmem:[%s18018_s12 + $0x82c] ss:$36 sps:$4 sm:$0xff]  }
 0x3c7   : > { %v4673_v18 = vmul.f32 0.2, %v4572_v26  ;;  %v3967_v0 = vadd.f32 %v15493_v29, %v12172_v46  ;;  %v3958_v27 = vpop.f32.mrb[181].mxu0 }
 0x3c8   : > { %v4671_v25 = vmul.f32 0.2, %v4564_v34  ;;  %v3959_v55 = vadd.f32 %v15493_v29, %v3958_v27  ;;  %v12173_v38 = vpop.f32.mrb[182].mxu0  ;;  %7913 = vmatpush1.bf16.msra.mxu0 %v12911_v21 }
 0x3c9   : > { %v15739_v52 = vpack.c.bf16 %v4673_v18, %v4672_v4  ;;  %v4411_v44 = vmax.f32 %v3967_v0, 0.0  ;;  %v3970_v37 = vadd.f32 %v15493_v29, %v12173_v38  ;;  %v3961_v14 = vpop.f32.mrb[183].mxu0  ;;  %7914 = vmatprep.subr.bf16.mxu0 %v12916_v12 }
 0x3ca   : > { %v15745_v19 = vpack.c.bf16 %v4671_v25, %v4670_v16  ;;  %v4409_v36 = vmax.f32 %v3959_v55, 0.0  ;;  %v3962_v11 = vadd.f32 %v15493_v29, %v3961_v14 }
 0x3cb   : > { %v4584_v39 = vadd.f32 %v4583_v23, %v4411_v44  ;;  %v4412_v51 = vmax.f32 %v3970_v37, 0.0  ;;  %v12920_v23 = vld [vmem:[%s18018_s12 + $0x870] ss:$36 sps:$4 sm:$0xff]  }
 0x3cc   : > { %v4576_v63 = vadd.f32 %v4575_v41, %v4409_v36  ;;  %v4410_v28 = vmax.f32 %v3962_v11, 0.0  ;;  %12286 = vmatprep.mubr.bf16.mxu1 %v15745_v19  ;;  %7915 = vmatpush1.bf16.msra.mxu0 %v12914_v42 }
 0x3cd   : > { %v4588_v7 = vadd.f32 %v4587_v45, %v4412_v51  ;;  %12287 = vmatmul.mubr.bf16.gmra.mrb[192].mxu1 %v15739_v52  ;;  %7916 = vmatprep.subr.bf16.mxu0 %v12919_v53  ;;  %v4676_v10 = vmul.f32 0.2, %v4584_v39 }
 0x3ce   : > { %v4580_v20 = vadd.f32 %v4579_v15, %v4410_v28  ;;  %v12176_v9 = vpop.f32.mrb[184].mxu0  ;;  %v4674_v40 = vmul.f32 0.2, %v4576_v63  ;;  %v12925_v15 = vld [vmem:[%s18018_s12 + $0x8bc] ss:$36 sps:$4 sm:$0xff]  }
 0x3cf   : > { %v4677_v41 = vmul.f32 0.2, %v4588_v7  ;;  %v3974_v2 = vpop.f32.mrb[185].mxu0  ;;  %v3983_v43 = vadd.f32 %v15493_v29, %v12176_v9 }
 0x3d0   : > { %v4675_v59 = vmul.f32 0.2, %v4580_v20  ;;  %v12177_v17 = vpop.f32.mrb[186].mxu0  ;;  %7917 = vmatpush1.bf16.msra.mxu0 %v12917_v49  ;;  %v3975_v50 = vadd.f32 %v15493_v29, %v3974_v2 }
 0x3d1   : > { %v15759_v45 = vpack.c.bf16 %v4677_v41, %v4676_v10  ;;  %v3977_v48 = vpop.f32.mrb[187].mxu0  ;;  %7918 = vmatprep.subr.bf16.mxu0 %v12922_v33  ;;  %v3986_v35 = vadd.f32 %v15493_v29, %v12177_v17  ;;  %v4415_v12 = vmax.f32 %v3983_v43, 0.0 }
 0x3d2   : > { %v15764_v31 = vpack.c.bf16 %v4675_v59, %v4674_v40  ;;  %v3978_v61 = vadd.f32 %v15493_v29, %v3977_v48  ;;  %v4413_v4 = vmax.f32 %v3975_v50, 0.0 }
 0x3d3   : > { %v4416_v27 = vmax.f32 %v3986_v35, 0.0  ;;  %v15795_v35 = vld [vmem:[%s18200_s6] ss:$0 sm:$0xff] }
 0x3d4   : > { %12290 = vmatprep.mubr.bf16.mxu1 %v15764_v31  ;;  %7919 = vmatpush1.bf16.msra.mxu0 %v12920_v23  ;;  %v4414_v55 = vmax.f32 %v3978_v61, 0.0 }
 0x3d5   : > { %12291 = vmatmul.mubr.bf16.gmra.mrb[196].mxu1 %v15759_v45  ;;  %7920 = vmatprep.subr.bf16.mxu0 %v12925_v15 }
 0x3d6   : > { %v12180_v5 = vpop.f32.mrb[188].mxu0 }
 0x3d7   : > { %v3990_v58 = vpop.f32.mrb[189].mxu0  ;;  %v3999_v37 = vadd.f32 %v15493_v29, %v12180_v5 }
 0x3d8   : > { %v12181_v47 = vpop.f32.mrb[190].mxu0  ;;  %7921 = vmatpush1.bf16.msra.mxu0 %v12923_v62  ;;  %v3991_v53 = vadd.f32 %v15493_v29, %v3990_v58 }
 0x3d9   : > { %v3993_v3 = vpop.f32.mrb[191].mxu0  ;;  %7963 = vmatprep.subr.bf16.mxu0 %v12928_v60  ;;  %v4002_v39 = vadd.f32 %v15493_v29, %v12181_v47  ;;  %v4419_v33 = vmax.f32 %v3999_v37, 0.0 }
 0x3da   : > { %v3994_v28 = vadd.f32 %v15493_v29, %v3993_v3  ;;  %v4417_v10 = vmax.f32 %v3991_v53, 0.0 }
 0x3db   : > { %v4420_v40 = vmax.f32 %v4002_v39, 0.0 }
 0x3dc   : > { %v4418_v48 = vmax.f32 %v3994_v28, 0.0 }
 0x3de   : > { %v12184_v56 = vpop.f32.mrb[192].mxu0 }
 0x3df   : > { %v4015_v6 = vadd.f32 %v15493_v29, %v12184_v56  ;;  %v4006_v1 = vpop.f32.mrb[193].mxu0 }
 0x3e0   : > { %v4007_v21 = vadd.f32 %v15493_v29, %v4006_v1  ;;  %v12185_v26 = vpop.f32.mrb[194].mxu0 }
 0x3e1   : > { %v4423_v34 = vmax.f32 %v4015_v6, 0.0  ;;  %v4018_v46 = vadd.f32 %v15493_v29, %v12185_v26  ;;  %v4009_v42 = vpop.f32.mrb[195].mxu0 }
 0x3e2   : > { %v4421_v18 = vmax.f32 %v4007_v21, 0.0  ;;  %v4010_v0 = vadd.f32 %v15493_v29, %v4009_v42  ;;  %v12957_v42 = vld [vmem:[%s18015_s9 + $0x8] sm:$0xff]  }
 0x3e3   : > { %v4597_v16 = vadd.f32 %v4423_v34, %v4415_v12  ;;  %v4424_v25 = vmax.f32 %v4018_v46, 0.0  ;;  %v12953_v34 = vld [vmem:[%s18015_s9] sm:$0xff]  }
 0x3e4   : > { %v4589_v38 = vadd.f32 %v4421_v18, %v4413_v4  ;;  %v4422_v44 = vmax.f32 %v4010_v0, 0.0  ;;  %12310 = vmatprep.subr.bf16.mxu1 %v12953_v34 }
 0x3e5   : > { %v4601_v14 = vadd.f32 %v4424_v25, %v4416_v27  ;;  %12311 = vmatpush3.bf16.msra.mxu1 %v12953_v34 }
 0x3e6   : > { %v4593_v36 = vadd.f32 %v4422_v44, %v4414_v55  ;;  %v12188_v11 = vpop.f32.mrb[196].mxu0  ;;  %12312 = vmatprep.subr.bf16.mxu1 %v12957_v42 }
 0x3e7   : > { %v4031_v51 = vadd.f32 %v15493_v29, %v12188_v11  ;;  %v4022_v63 = vpop.f32.mrb[197].mxu0 }
 0x3e8   : > { %v4023_v49 = vadd.f32 %v15493_v29, %v4022_v63  ;;  %v12189_v7 = vpop.f32.mrb[198].mxu0 }
 0x3e9   : > { %v4427_v20 = vmax.f32 %v4031_v51, 0.0  ;;  %v4034_v9 = vadd.f32 %v15493_v29, %v12189_v7  ;;  %v4025_v23 = vpop.f32.mrb[199].mxu0  ;;  %12313 = vmatpush3.bf16.msra.mxu1 %v12957_v42  ;;  %v12965_v51 = vld [vmem:[%s18015_s9 + $0x18] sm:$0xff]  }
 0x3ea   : > { %v4425_v41 = vmax.f32 %v4023_v49, 0.0  ;;  %v4026_v2 = vadd.f32 %v15493_v29, %v4025_v23 }
 0x3eb   : > { %v4613_v59 = vadd.f32 %v4427_v20, %v4419_v33  ;;  %v4428_v17 = vmax.f32 %v4034_v9, 0.0  ;;  %v15818_v20 = vld [vmem:[%s18014_s8] ss:$0 sm:$0xff] }
 0x3ec   : > { %v4605_v15 = vadd.f32 %v4425_v41, %v4417_v10  ;;  %v4426_v62 = vmax.f32 %v4026_v2, 0.0 }
 0x3ed   : > { %v4617_v60 = vadd.f32 %v4428_v17, %v4420_v40 }
 0x3ee   : > { %v4609_v5 = vadd.f32 %v4426_v62, %v4418_v48  ;;  %v12192_v58 = vpop.f32.mrb[200].mxu0 }
 0x3ef   : > { %v4047_v47 = vadd.f32 %v15493_v29, %v12192_v58  ;;  %v4038_v3 = vpop.f32.mrb[201].mxu0 }
 0x3f0   : > { %v4039_v43 = vadd.f32 %v15493_v29, %v4038_v3  ;;  %v12193_v50 = vpop.f32.mrb[202].mxu0 }
 0x3f1   : > { %v4431_v56 = vmax.f32 %v4047_v47, 0.0  ;;  %v4050_v6 = vadd.f32 %v15795_v35, %v12193_v50  ;;  %v4041_v1 = vpop.f32.mrb[203].mxu0 }
 0x3f2   : > { %v4429_v61 = vmax.f32 %v4039_v43, 0.0  ;;  %v4042_v21 = vadd.f32 %v15795_v35, %v4041_v1 }
 0x3f3   : > { %v4598_v26 = vadd.f32 %v4597_v16, %v4431_v56  ;;  %v4432_v12 = vmax.f32 %v4050_v6, 0.0  ;;  %v12961_v16 = vld [vmem:[%s18015_s9 + $0x10] sm:$0xff]  }
 0x3f4   : > { %v4590_v29 = vadd.f32 %v4589_v38, %v4429_v61  ;;  %v4430_v46 = vmax.f32 %v4042_v21, 0.0  ;;  %12314 = vmatprep.subr.bf16.mxu1 %v12961_v16 }
 0x3f5   : > { %v4602_v4 = vadd.f32 %v4601_v14, %v4432_v12  ;;  %12315 = vmatpush3.bf16.msra.mxu1 %v12961_v16 }
 0x3f6   : > { %v4594_v18 = vadd.f32 %v4593_v36, %v4430_v46  ;;  %v12196_v0 = vpop.f32.mrb[204].mxu0  ;;  %12316 = vmatprep.subr.bf16.mxu1 %v12965_v51 }
 0x3f7   : > { %v4063_v27 = vadd.f32 %v15795_v35, %v12196_v0  ;;  %v4054_v25 = vpop.f32.mrb[205].mxu0 }
 0x3f8   : > { %v4055_v55 = vadd.f32 %v15795_v35, %v4054_v25  ;;  %v12197_v38 = vpop.f32.mrb[206].mxu0 }
 0x3f9   : > { %v4435_v44 = vmax.f32 %v4063_v27, 0.0  ;;  %v4066_v37 = vadd.f32 %v15795_v35, %v12197_v38  ;;  %v4057_v53 = vpop.f32.mrb[207].mxu0  ;;  %12317 = vmatpush3.bf16.msra.mxu1 %v12965_v51 }
 0x3fa   : > { %v4433_v14 = vmax.f32 %v4055_v55, 0.0  ;;  %v4058_v36 = vadd.f32 %v15795_v35, %v4057_v53 }
 0x3fb   : > { %v4614_v11 = vadd.f32 %v4613_v59, %v4435_v44  ;;  %v4436_v39 = vmax.f32 %v4066_v37, 0.0 }
 0x3fc   : > { %v4606_v63 = vadd.f32 %v4605_v15, %v4433_v14  ;;  %v4434_v28 = vmax.f32 %v4058_v36, 0.0 }
 0x3fd   : > { %v4618_v49 = vadd.f32 %v4617_v60, %v4436_v39 }
 0x3fe   : > { %v4610_v7 = vadd.f32 %v4609_v5, %v4434_v28  ;;  %v12200_v33 = vpop.f32.mrb[208].mxu0 }
 0x3ff   : > { %v4079_v9 = vadd.f32 %v15795_v35, %v12200_v33  ;;  %v4070_v23 = vpop.f32.mrb[209].mxu0 }
 0x400   : > { %v4071_v10 = vadd.f32 %v15795_v35, %v4070_v23  ;;  %v12201_v41 = vpop.f32.mrb[210].mxu0  ;;  %v12272_v2 = vpop.f32.mrb[176].mxu1 }
 0x401   : > { %v4439_v40 = vmax.f32 %v4079_v9, 0.0  ;;  %v4082_v59 = vadd.f32 %v15795_v35, %v12201_v41  ;;  %v4828_v17 = vadd.f32 %v12272_v2, %v15818_v20  ;;  %v4073_v48 = vpop.f32.mrb[211].mxu0  ;;  %v4819_v15 = vpop.f32.mrb[177].mxu1 }
 0x402   : > { %v4437_v62 = vmax.f32 %v4071_v10, 0.0  ;;  %v4074_v60 = vadd.f32 %v15795_v35, %v4073_v48  ;;  %v4820_v5 = vadd.f32 %v15818_v20, %v4819_v15  ;;  %v12273_v58 = vpop.f32.mrb[178].mxu1 }
 0x403   : > { %v4599_v47 = vadd.f32 %v4598_v26, %v4439_v40  ;;  %v4440_v3 = vmax.f32 %v4082_v59, 0.0  ;;  %v4831_v43 = vadd.f32 %v12273_v58, %v15818_v20  ;;  %v4822_v50 = vpop.f32.mrb[179].mxu1  ;;  %v4980_v21 = vmax.f32 %v4828_v17, 0.0 }
 0x404   : > { %v4591_v56 = vadd.f32 %v4590_v29, %v4437_v62  ;;  %v4438_v6 = vmax.f32 %v4074_v60, 0.0  ;;  %v4823_v1 = vadd.f32 %v15818_v20, %v4822_v50  ;;  %v4978_v46 = vmax.f32 %v4820_v5, 0.0 }
 0x405   : > { %v4603_v61 = vadd.f32 %v4602_v4, %v4440_v3  ;;  %v4981_v12 = vmax.f32 %v4831_v43, 0.0 }
 0x406   : > { %v4595_v34 = vadd.f32 %v4594_v18, %v4438_v6  ;;  %v4979_v42 = vmax.f32 %v4823_v1, 0.0  ;;  %v12204_v0 = vpop.f32.mrb[212].mxu0 }
 0x407   : > { %v15828_v27 = vpack.c.bf16 %v4981_v12, %v4980_v21  ;;  %v4095_v25 = vadd.f32 %v15795_v35, %v12204_v0  ;;  %v4086_v26 = vpop.f32.mrb[213].mxu0 }
 0x408   : > { %v15831_v16 = vpack.c.bf16 %v4979_v42, %v4978_v46  ;;  %v4087_v55 = vadd.f32 %v15795_v35, %v4086_v26  ;;  %v12205_v29 = vpop.f32.mrb[214].mxu0  ;;  %v12276_v38 = vpop.f32.mrb[180].mxu1 }
 0x409   : > { %v4443_v44 = vmax.f32 %v4095_v25, 0.0  ;;  %v4098_v4 = vadd.f32 %v15795_v35, %v12205_v29  ;;  %v4844_v37 = vadd.f32 %v12276_v38, %v15818_v20  ;;  %v4089_v18 = vpop.f32.mrb[215].mxu0  ;;  %v4835_v53 = vpop.f32.mrb[181].mxu1 }
 0x40a   : > { %v4441_v14 = vmax.f32 %v4087_v55, 0.0  ;;  %v4090_v36 = vadd.f32 %v15795_v35, %v4089_v18  ;;  %v4836_v39 = vadd.f32 %v15818_v20, %v4835_v53  ;;  %v12277_v51 = vpop.f32.mrb[182].mxu1 }
 0x40b   : > { %v4615_v28 = vadd.f32 %v4614_v11, %v4443_v44  ;;  %v4444_v33 = vmax.f32 %v4098_v4, 0.0  ;;  %v4847_v9 = vadd.f32 %v12277_v51, %v15818_v20  ;;  %v4838_v23 = vpop.f32.mrb[183].mxu1  ;;  %v4984_v59 = vmax.f32 %v4844_v37, 0.0  ;;  %v12926_v51 = vld [vmem:[%s18018_s12 + $0x900] ss:$36 sps:$4 sm:$0xff]  }
 0x40c   : > { %v4607_v10 = vadd.f32 %v4606_v63, %v4441_v14  ;;  %v4442_v41 = vmax.f32 %v4090_v36, 0.0  ;;  %v4839_v2 = vadd.f32 %v15818_v20, %v4838_v23  ;;  %v4982_v15 = vmax.f32 %v4836_v39, 0.0  ;;  %v12931_v23 = vld [vmem:[%s18018_s12 + $0x94c] ss:$36 sps:$4 sm:$0xff]  }
 0x40d   : > { %v4619_v40 = vadd.f32 %v4618_v49, %v4444_v33  ;;  %v4985_v17 = vmax.f32 %v4847_v9, 0.0 }
 0x40e   : > { %v4611_v48 = vadd.f32 %v4610_v7, %v4442_v41  ;;  %v4983_v62 = vmax.f32 %v4839_v2, 0.0  ;;  %v12208_v60 = vpop.f32.mrb[216].mxu0 }
 0x40f   : > { %v15840_v5 = vpack.c.bf16 %v4985_v17, %v4984_v59  ;;  %v4111_v58 = vadd.f32 %v15795_v35, %v12208_v60  ;;  %v4102_v11 = vpop.f32.mrb[217].mxu0 }
 0x410   : > { %v15843_v3 = vpack.c.bf16 %v4983_v62, %v4982_v15  ;;  %v4103_v43 = vadd.f32 %v15795_v35, %v4102_v11  ;;  %v12209_v63 = vpop.f32.mrb[218].mxu0 }
 0x411   : > { %v4447_v50 = vmax.f32 %v4111_v58, 0.0  ;;  %v4114_v6 = vadd.f32 %v15795_v35, %v12209_v63  ;;  %v4105_v49 = vpop.f32.mrb[219].mxu0 }
 0x412   : > { %v4445_v1 = vmax.f32 %v4103_v43, 0.0  ;;  %v4106_v7 = vadd.f32 %v15795_v35, %v4105_v49  ;;  %v12937_v49 = vld [vmem:[%s18018_s12 + $0x9dc] ss:$36 sps:$4 sm:$0xff]  }
 0x413   : > { %v4600_v21 = vadd.f32 %v4599_v47, %v4447_v50  ;;  %v4448_v12 = vmax.f32 %v4114_v6, 0.0  ;;  %v12932_v6 = vld [vmem:[%s18018_s12 + $0x990] ss:$36 sps:$4 sm:$0xff]  }
 0x414   : > { %v4592_v46 = vadd.f32 %v4591_v56, %v4445_v1  ;;  %v4446_v42 = vmax.f32 %v4106_v7, 0.0  ;;  %v12935_v7 = vld [vmem:[%s18018_s12 + $0x9d8] ss:$36 sps:$4 sm:$0xff]  }
 0x415   : > { %v4604_v0 = vadd.f32 %v4603_v61, %v4448_v12  ;;  %v4680_v55 = vmul.f32 0.2, %v4600_v21  ;;  %v12940_v12 = vld [vmem:[%s18018_s12 + $0xa24] ss:$36 sps:$4 sm:$0xff]  }
 0x416   : > { %v4596_v25 = vadd.f32 %v4595_v34, %v4446_v42  ;;  %v12212_v26 = vpop.f32.mrb[220].mxu0  ;;  %v4678_v4 = vmul.f32 0.2, %v4592_v46 }
 0x417   : > { %v4681_v29 = vmul.f32 0.2, %v4604_v0  ;;  %v4127_v38 = vadd.f32 %v15795_v35, %v12212_v26  ;;  %v4118_v44 = vpop.f32.mrb[221].mxu0  ;;  %v12938_v0 = vld [vmem:[%s18018_s12 + $0xa20] ss:$36 sps:$4 sm:$0xff]  }
 0x418   : > { %v4679_v37 = vmul.f32 0.2, %v4596_v25  ;;  %v4119_v18 = vadd.f32 %v15795_v35, %v4118_v44  ;;  %v12213_v53 = vpop.f32.mrb[222].mxu0  ;;  %v12943_v25 = vld [vmem:[%s18018_s12 + $0xa6c] ss:$36 sps:$4 sm:$0xff]  }
 0x419   : > { %v15850_v14 = vpack.c.bf16 %v4681_v29, %v4680_v55  ;;  %v4451_v36 = vmax.f32 %v4127_v38, 0.0  ;;  %v4130_v47 = vadd.f32 %v15795_v35, %v12213_v53  ;;  %v4121_v56 = vpop.f32.mrb[223].mxu0  ;;  %v12941_v38 = vld [vmem:[%s18018_s12 + $0xa68] ss:$36 sps:$4 sm:$0xff]  }
 0x41a   : > { %v15853_v39 = vpack.c.bf16 %v4679_v37, %v4678_v4  ;;  %v4449_v61 = vmax.f32 %v4119_v18, 0.0  ;;  %v4122_v34 = vadd.f32 %v15795_v35, %v4121_v56  ;;  %v12946_v18 = vld [vmem:[%s18018_s12 + $0xab4] ss:$36 sps:$4 sm:$0xff]  }
 0x41b   : > { %v4616_v33 = vadd.f32 %v4615_v28, %v4451_v36  ;;  %v4452_v9 = vmax.f32 %v4130_v47, 0.0  ;;  %v12929_v28 = vld [vmem:[%s18018_s12 + $0x948] ss:$36 sps:$4 sm:$0xff]  }
 0x41c   : > { %v4608_v41 = vadd.f32 %v4607_v10, %v4449_v61  ;;  %v4450_v2 = vmax.f32 %v4122_v34, 0.0  ;;  %12294 = vmatprep.mubr.bf16.mxu1 %v15853_v39  ;;  %7922 = vmatprep.mubr.bf16.mxu0 %v15853_v39  ;;  %v12934_v10 = vld [vmem:[%s18018_s12 + $0x994] ss:$36 sps:$4 sm:$0xff]  }
 0x41d   : > { %v4620_v59 = vadd.f32 %v4619_v40, %v4452_v9  ;;  %12295 = vmatmul.mubr.bf16.gmra.mrb[200].mxu1 %v15850_v14  ;;  %7923 = vmatmul.mubr.bf16.vlgmr.msra.gmra.mrb[8].mxu0 %v15745_v19  ;;  %v4684_v62 = vmul.f32 0.2, %v4616_v33 }
 0x41e   : > { %v4612_v17 = vadd.f32 %v4611_v48, %v4450_v2  ;;  %v12216_v15 = vpop.f32.mrb[224].mxu0  ;;  %7932 = vmatprep.mubr.bf16.mxu0 %v15850_v14  ;;  %7964 = vmatpush1.bf16.msra.mxu0 %v12926_v51  ;;  %v4682_v58 = vmul.f32 0.2, %v4608_v41  ;;  %v12944_v41 = vld [vmem:[%s18018_s12 + $0xab0] ss:$36 sps:$4 sm:$0xff]  }
 0x41f   : > { %v4685_v60 = vmul.f32 0.2, %v4620_v59  ;;  %v4134_v40 = vpop.f32.mrb[225].mxu0  ;;  %7965 = vmatprep.subr.bf16.mxu0 %v12931_v23  ;;  %v4143_v26 = vadd.f32 %v15795_v35, %v12216_v15  ;;  %v12949_v15 = vld [vmem:[%s18018_s12 + $0xafc] ss:$36 sps:$4 sm:$0xff]  }
 0x420   : > { %v4683_v11 = vmul.f32 0.2, %v4612_v17  ;;  %v12217_v43 = vpop.f32.mrb[226].mxu0  ;;  %v4135_v55 = vadd.f32 %v15795_v35, %v4134_v40 }
 0x421   : > { %v15873_v48 = vpack.c.bf16 %v4685_v60, %v4684_v62  ;;  %v4137_v63 = vpop.f32.mrb[227].mxu0  ;;  %v4146_v44 = vadd.f32 %v15795_v35, %v12217_v43  ;;  %v4455_v56 = vmax.f32 %v4143_v26, 0.0 }
 0x422   : > { %v15875_v50 = vpack.c.bf16 %v4683_v11, %v4682_v58  ;;  %7966 = vmatpush1.bf16.msra.mxu0 %v12929_v28  ;;  %v4138_v53 = vadd.f32 %v15795_v35, %v4137_v63  ;;  %v4453_v33 = vmax.f32 %v4135_v55, 0.0  ;;  %v12947_v63 = vld [vmem:[%s18018_s12 + $0xaf8] ss:$36 sps:$4 sm:$0xff]  }
 0x423   : > { %7967 = vmatprep.subr.bf16.mxu0 %v12934_v10  ;;  %v4456_v2 = vmax.f32 %v4146_v44, 0.0 }
 0x424   : > { %12298 = vmatprep.mubr.bf16.mxu1 %v15875_v50  ;;  %v4454_v28 = vmax.f32 %v4138_v53, 0.0 }
 0x425   : > { %12299 = vmatmul.mubr.bf16.gmra.mrb[204].mxu1 %v15873_v48  ;;  %7933 = vmatmul.mubr.bf16.gmra.mrb[12].mxu0 %v15739_v52 }
 0x426   : > { %v12220_v1 = vpop.f32.mrb[228].mxu0  ;;  %7942 = vmatprep.mubr.bf16.mxu0 %v15875_v50  ;;  %7968 = vmatpush1.bf16.msra.mxu0 %v12932_v6  ;;  %v18052_v6 = vmov 0  }
 0x427   : > { %v4150_v21 = vpop.f32.mrb[229].mxu0  ;;  %7969 = vmatprep.subr.bf16.mxu0 %v12937_v49  ;;  %v4159_v60 = vadd.f32 %v15795_v35, %v12220_v1 }
 0x428   : > { %v12221_v46 = vpop.f32.mrb[230].mxu0  ;;  %v4151_v58 = vadd.f32 %v15795_v35, %v4150_v21  ;;  %v12952_v21 = vld [vmem:[%s18018_s12 + $0x14] ss:$36 sps:$4 sm:$0xff]  }
 0x429   : > { %v4153_v42 = vpop.f32.mrb[231].mxu0  ;;  %v4162_v49 = vadd.f32 %v15795_v35, %v12221_v46  ;;  %v4459_v26 = vmax.f32 %v4159_v60, 0.0 }
 0x42a   : > { %7970 = vmatpush1.bf16.msra.mxu0 %v12935_v7  ;;  %v4457_v44 = vmax.f32 %v4151_v58, 0.0 }
 0x42b   : > { %7971 = vmatprep.subr.bf16.mxu0 %v12940_v12  ;;  %v4154_v12 = vadd.f32 %v15795_v35, %v4153_v42 }
 0x42d   : > { %7943 = vmatmul.mubr.bf16.gmra.mrb[16].mxu0 %v15764_v31 }
 0x42e   : > { %v12224_v29 = vpop.f32.mrb[232].mxu0  ;;  %7952 = vmatprep.mubr.bf16.mxu0 %v15873_v48  ;;  %7972 = vmatpush1.bf16.msra.mxu0 %v12938_v0 }
 0x42f   : > { %v4175_v4 = vadd.f32 %v15795_v35, %v12224_v29  ;;  %v4166_v37 = vpop.f32.mrb[233].mxu0  ;;  %7973 = vmatprep.subr.bf16.mxu0 %v12943_v25 }
 0x430   : > { %v4167_v36 = vadd.f32 %v15795_v35, %v4166_v37  ;;  %v12225_v47 = vpop.f32.mrb[234].mxu0  ;;  %v4460_v37 = vmax.f32 %v4162_v49, 0.0 }
 0x431   : > { %v4463_v61 = vmax.f32 %v4175_v4, 0.0  ;;  %v4178_v34 = vadd.f32 %v15795_v35, %v12225_v47  ;;  %v4169_v51 = vpop.f32.mrb[235].mxu0 }
 0x432   : > { %v4461_v9 = vmax.f32 %v4167_v36, 0.0  ;;  %v4170_v23 = vadd.f32 %v15795_v35, %v4169_v51  ;;  %7974 = vmatpush1.bf16.msra.mxu0 %v12941_v38  ;;  %v4458_v36 = vmax.f32 %v4154_v12, 0.0 }
 0x433   : > { %v4629_v59 = vadd.f32 %v4463_v61, %v4455_v56  ;;  %v4464_v17 = vmax.f32 %v4178_v34, 0.0  ;;  %7975 = vmatprep.subr.bf16.mxu0 %v12946_v18 }
 0x434   : > { %v4621_v10 = vadd.f32 %v4461_v9, %v4453_v33  ;;  %v4462_v62 = vmax.f32 %v4170_v23, 0.0 }
 0x435   : > { %v4633_v40 = vadd.f32 %v4464_v17, %v4456_v2  ;;  %7953 = vmatmul.mubr.bf16.gmra.mrb[20].mxu0 %v15759_v45 }
 0x436   : > { %v4625_v11 = vadd.f32 %v4462_v62, %v4454_v28  ;;  %v12228_v43 = vpop.f32.mrb[236].mxu0  ;;  %7976 = vmatpush1.bf16.msra.mxu0 %v12944_v41  ;;  %7995 = vmatprep.mubr.bf16.mxu0 %v18052_v6 }
 0x437   : > { %v4191_v7 = vadd.f32 %v15795_v35, %v12228_v43  ;;  %v4182_v1 = vpop.f32.mrb[237].mxu0  ;;  %7977 = vmatprep.subr.bf16.mxu0 %v12949_v15 }
 0x438   : > { %v4183_v0 = vadd.f32 %v15795_v35, %v4182_v1  ;;  %v12229_v25 = vpop.f32.mrb[238].mxu0 }
 0x439   : > { %v4467_v55 = vmax.f32 %v4191_v7, 0.0  ;;  %v4194_v29 = vadd.f32 %v15795_v35, %v12229_v25  ;;  %v4185_v38 = vpop.f32.mrb[239].mxu0 }
 0x43a   : > { %v4465_v46 = vmax.f32 %v4183_v0, 0.0  ;;  %v4186_v4 = vadd.f32 %v15795_v35, %v4185_v38  ;;  %7978 = vmatpush1.bf16.msra.mxu0 %v12947_v63 }
 0x43b   : > { %v4645_v18 = vadd.f32 %v4467_v55, %v4459_v26  ;;  %v4468_v53 = vmax.f32 %v4194_v29, 0.0  ;;  %8255 = vmatprep.subr.bf16.mxu0 %v12952_v21 }
 0x43c   : > { %v4637_v47 = vadd.f32 %v4465_v46, %v4457_v44  ;;  %v4466_v42 = vmax.f32 %v4186_v4, 0.0 }
 0x43d   : > { %v4649_v56 = vadd.f32 %v4468_v53, %v4460_v37 }
 0x43e   : > { %v4641_v61 = vadd.f32 %v4466_v42, %v4458_v36  ;;  %v12232_v34 = vpop.f32.mrb[240].mxu0 }
 0x43f   : > { %v4207_v51 = vadd.f32 %v15795_v35, %v12232_v34  ;;  %v4198_v33 = vpop.f32.mrb[241].mxu0 }
 0x440   : > { %v4199_v9 = vadd.f32 %v15795_v35, %v4198_v33  ;;  %v12233_v23 = vpop.f32.mrb[242].mxu0 }
 0x441   : > { %v4471_v41 = vmax.f32 %v4207_v51, 0.0  ;;  %v4210_v2 = vadd.f32 %v15795_v35, %v12233_v23  ;;  %v4201_v17 = vpop.f32.mrb[243].mxu0 }
 0x442   : > { %v4469_v15 = vmax.f32 %v4199_v9, 0.0  ;;  %v4202_v28 = vadd.f32 %v15795_v35, %v4201_v17 }
 0x443   : > { %v4630_v62 = vadd.f32 %v4629_v59, %v4471_v41  ;;  %v4472_v60 = vmax.f32 %v4210_v2, 0.0 }
 0x444   : > { %v4622_v58 = vadd.f32 %v4621_v10, %v4469_v15  ;;  %v4470_v43 = vmax.f32 %v4202_v28, 0.0 }
 0x445   : > { %v4634_v63 = vadd.f32 %v4633_v40, %v4472_v60 }
 0x446   : > { %v4626_v49 = vadd.f32 %v4625_v11, %v4470_v43  ;;  %v12236_v7 = vpop.f32.mrb[244].mxu0 }
 0x447   : > { %v4223_v1 = vadd.f32 %v15795_v35, %v12236_v7  ;;  %v4214_v21 = vpop.f32.mrb[245].mxu0 }
 0x448   : > { %v4215_v12 = vadd.f32 %v15795_v35, %v4214_v21  ;;  %v12237_v0 = vpop.f32.mrb[246].mxu0 }
 0x449   : > { %v4475_v25 = vmax.f32 %v4223_v1, 0.0  ;;  %v4226_v26 = vadd.f32 %v15795_v35, %v12237_v0  ;;  %v4217_v55 = vpop.f32.mrb[247].mxu0 }
 0x44a   : > { %v4473_v29 = vmax.f32 %v4215_v12, 0.0  ;;  %v4218_v38 = vadd.f32 %v15795_v35, %v4217_v55 }
 0x44b   : > { %v4646_v59 = vadd.f32 %v4645_v18, %v4475_v25  ;;  %v4476_v44 = vmax.f32 %v4226_v26, 0.0 }
 0x44c   : > { %v4638_v10 = vadd.f32 %v4637_v47, %v4473_v29  ;;  %v4474_v46 = vmax.f32 %v4218_v38, 0.0 }
 0x44d   : > { %v4650_v40 = vadd.f32 %v4649_v56, %v4476_v44 }
 0x44e   : > { %v4642_v11 = vadd.f32 %v4641_v61, %v4474_v46  ;;  %v12240_v4 = vpop.f32.mrb[248].mxu0 }
 0x44f   : > { %v4239_v37 = vadd.f32 %v15795_v35, %v12240_v4  ;;  %v4230_v53 = vpop.f32.mrb[249].mxu0 }
 0x450   : > { %v4231_v36 = vadd.f32 %v15795_v35, %v4230_v53  ;;  %v12241_v42 = vpop.f32.mrb[250].mxu0  ;;  %v12280_v34 = vpop.f32.mrb[184].mxu1 }
 0x451   : > { %v4479_v51 = vmax.f32 %v4239_v37, 0.0  ;;  %v4242_v33 = vadd.f32 %v15795_v35, %v12241_v42  ;;  %v4860_v9 = vadd.f32 %v12280_v34, %v15818_v20  ;;  %v4233_v23 = vpop.f32.mrb[251].mxu0  ;;  %v4851_v18 = vpop.f32.mrb[185].mxu1 }
 0x452   : > { %v4477_v41 = vmax.f32 %v4231_v36, 0.0  ;;  %v4234_v47 = vadd.f32 %v15795_v35, %v4233_v23  ;;  %v4852_v56 = vadd.f32 %v15818_v20, %v4851_v18  ;;  %v12281_v61 = vpop.f32.mrb[186].mxu1 }
 0x453   : > { %v4631_v2 = vadd.f32 %v4630_v62, %v4479_v51  ;;  %v4480_v17 = vmax.f32 %v4242_v33, 0.0  ;;  %v4863_v15 = vadd.f32 %v12281_v61, %v15818_v20  ;;  %v4854_v28 = vpop.f32.mrb[187].mxu1  ;;  %v4988_v21 = vmax.f32 %v4860_v9, 0.0 }
 0x454   : > { %v4623_v60 = vadd.f32 %v4622_v58, %v4477_v41  ;;  %v4478_v43 = vmax.f32 %v4234_v47, 0.0  ;;  %v4855_v7 = vadd.f32 %v15818_v20, %v4854_v28  ;;  %v4986_v25 = vmax.f32 %v4852_v56, 0.0 }
 0x455   : > { %v4635_v1 = vadd.f32 %v4634_v63, %v4480_v17  ;;  %v4989_v12 = vmax.f32 %v4863_v15, 0.0 }
 0x456   : > { %v4627_v0 = vadd.f32 %v4626_v49, %v4478_v43  ;;  %v4987_v26 = vmax.f32 %v4855_v7, 0.0  ;;  %v12244_v55 = vpop.f32.mrb[252].mxu0 }
 0x457   : > { %v15953_v29 = vpack.c.bf16 %v4989_v12, %v4988_v21  ;;  %v4255_v38 = vadd.f32 %v15795_v35, %v12244_v55  ;;  %v4246_v62 = vpop.f32.mrb[253].mxu0 }
 0x458   : > { %v15956_v44 = vpack.c.bf16 %v4987_v26, %v4986_v25  ;;  %v4247_v46 = vadd.f32 %v15795_v35, %v4246_v62  ;;  %v12245_v58 = vpop.f32.mrb[254].mxu0  ;;  %v12284_v4 = vpop.f32.mrb[188].mxu1 }
 0x459   : > { %v4483_v37 = vmax.f32 %v4255_v38, 0.0  ;;  %v4258_v63 = vadd.f32 %v15795_v35, %v12245_v58  ;;  %v4876_v53 = vadd.f32 %v12284_v4, %v15818_v20  ;;  %v4249_v49 = vpop.f32.mrb[255].mxu0  ;;  %v4867_v36 = vpop.f32.mrb[189].mxu1 }
 0x45a   : > { %v4481_v42 = vmax.f32 %v4247_v46, 0.0  ;;  %v4250_v34 = vadd.f32 %v15795_v35, %v4249_v49  ;;  %v4868_v51 = vadd.f32 %v15818_v20, %v4867_v36  ;;  %v12285_v33 = vpop.f32.mrb[190].mxu1 }
 0x45b   : > { %v4647_v9 = vadd.f32 %v4646_v59, %v4483_v37  ;;  %v4484_v23 = vmax.f32 %v4258_v63, 0.0  ;;  %v4879_v18 = vadd.f32 %v12285_v33, %v15818_v20  ;;  %v4870_v41 = vpop.f32.mrb[191].mxu1  ;;  %v4992_v15 = vmax.f32 %v4876_v53, 0.0 }
 0x45c   : > { %v4639_v47 = vadd.f32 %v4638_v10, %v4481_v42  ;;  %v4482_v56 = vmax.f32 %v4250_v34, 0.0  ;;  %v4871_v61 = vadd.f32 %v15818_v20, %v4870_v41  ;;  %v4990_v7 = vmax.f32 %v4868_v51, 0.0 }
 0x45d   : > { %v4651_v17 = vadd.f32 %v4650_v40, %v4484_v23  ;;  %v4993_v28 = vmax.f32 %v4879_v18, 0.0 }
 0x45e   : > { %v4643_v43 = vadd.f32 %v4642_v11, %v4482_v56  ;;  %v4991_v21 = vmax.f32 %v4871_v61, 0.0  ;;  %v12248_v12 = vpop.f32.mrb[0].mxu0 }
 0x45f   : > { %v15965_v25 = vpack.c.bf16 %v4993_v28, %v4992_v15  ;;  %v4271_v26 = vadd.f32 %v15795_v35, %v12248_v12  ;;  %v4262_v59 = vpop.f32.mrb[1].mxu0  ;;  %v12956_v12 = vld [vmem:[%s18018_s12 + $0x5c] ss:$36 sps:$4 sm:$0xff]  }
 0x460   : > { %v15968_v55 = vpack.c.bf16 %v4991_v21, %v4990_v7  ;;  %v4263_v38 = vadd.f32 %v15795_v35, %v4262_v59  ;;  %v12249_v10 = vpop.f32.mrb[2].mxu0 }
 0x461   : > { %v4487_v62 = vmax.f32 %v4271_v26, 0.0  ;;  %v4274_v46 = vadd.f32 %v15795_v35, %v12249_v10  ;;  %v4265_v40 = vpop.f32.mrb[3].mxu0 }
 0x462   : > { %v4485_v58 = vmax.f32 %v4263_v38, 0.0  ;;  %v4266_v11 = vadd.f32 %v15795_v35, %v4265_v40 }
 0x463   : > { %v4632_v4 = vadd.f32 %v4631_v2, %v4487_v62  ;;  %v4488_v37 = vmax.f32 %v4274_v46, 0.0 }
 0x464   : > { %v4624_v63 = vadd.f32 %v4623_v60, %v4485_v58  ;;  %v4486_v53 = vmax.f32 %v4266_v11, 0.0 }
 0x465   : > { %v4636_v49 = vadd.f32 %v4635_v1, %v4488_v37  ;;  %v4688_v34 = vmul.f32 0.2, %v4632_v4  ;;  %v12950_v1 = vld [vmem:[%s18018_s12 + $0x10] ss:$36 sps:$4 sm:$0xff]   ;;  %v12958_v4 = vld [vmem:[%s18018_s12 + $0xa0] ss:$36 sps:$4 sm:$0xff]  }
 0x466   : > { %v4628_v36 = vadd.f32 %v4627_v0, %v4486_v53  ;;  %v12252_v42 = vpop.f32.mrb[4].mxu0  ;;  %v4686_v18 = vmul.f32 0.2, %v4624_v63  ;;  %v12962_v63 = vld [vmem:[%s18018_s12 + $0xe8] ss:$36 sps:$4 sm:$0xff]  }
 0x467   : > { %v4689_v51 = vmul.f32 0.2, %v4636_v49  ;;  %v4287_v33 = vadd.f32 %v15795_v35, %v12252_v42  ;;  %v4278_v23 = vpop.f32.mrb[5].mxu0  ;;  %v12968_v53 = vld [vmem:[%s18018_s12 + $0x134] ss:$36 sps:$4 sm:$0xff]  }
 0x468   : > { %v4687_v41 = vmul.f32 0.2, %v4628_v36  ;;  %v4279_v56 = vadd.f32 %v15795_v35, %v4278_v23  ;;  %v12253_v61 = vpop.f32.mrb[6].mxu0  ;;  %v12966_v49 = vld [vmem:[%s18018_s12 + $0x130] ss:$36 sps:$4 sm:$0xff]  }
 0x469   : > { %v15975_v15 = vpack.c.bf16 %v4689_v51, %v4688_v34  ;;  %v4491_v28 = vmax.f32 %v4287_v33, 0.0  ;;  %v4290_v2 = vadd.f32 %v15795_v35, %v12253_v61  ;;  %v4281_v60 = vpop.f32.mrb[7].mxu0  ;;  %v12971_v36 = vld [vmem:[%s18018_s12 + $0x17c] ss:$36 sps:$4 sm:$0xff]   ;;  %v12974_v42 = vld [vmem:[%s18018_s12 + $0x1c4] ss:$36 sps:$4 sm:$0xff]  }
 0x46a   : > { %v15981_v0 = vpack.c.bf16 %v4687_v41, %v4686_v18  ;;  %v4489_v7 = vmax.f32 %v4279_v56, 0.0  ;;  %v4282_v21 = vadd.f32 %v15795_v35, %v4281_v60  ;;  %v12954_v35 = vld [vmem:[%s18018_s12 + $0x58] ss:$36 sps:$4 sm:$0xff]   ;;  %v12972_v34 = vld [vmem:[%s18018_s12 + $0x1c0] ss:$36 sps:$4 sm:$0xff]  }
 0x46b   : > { %v4648_v26 = vadd.f32 %v4647_v9, %v4491_v28  ;;  %v4492_v59 = vmax.f32 %v4290_v2, 0.0  ;;  %v12960_v9 = vld [vmem:[%s18018_s12 + $0xa4] ss:$36 sps:$4 sm:$0xff]   ;;  %v12980_v51 = vld [vmem:[%s18018_s12 + $0x254] ss:$36 sps:$4 sm:$0xff]  }
 0x46c   : > { %v4640_v38 = vadd.f32 %v4639_v47, %v4489_v7  ;;  %v4490_v10 = vmax.f32 %v4282_v21, 0.0  ;;  %12302 = vmatprep.mubr.bf16.mxu1 %v15981_v0  ;;  %7996 = vmatmul.mubr.bf16.vlgmr.msra.gmra.mrb[8].mxu0 %v15981_v0  ;;  %v12978_v33 = vld [vmem:[%s18018_s12 + $0x250] ss:$36 sps:$4 sm:$0xff]   ;;  %v12981_v18 = vld [vmem:[%s18018_s12 + $0x298] ss:$36 sps:$4 sm:$0xff]  }
 0x46d   : > { %v4652_v62 = vadd.f32 %v4651_v17, %v4492_v59  ;;  %8256 = vmatpush1.bf16.msra.mxu0 %v12950_v1  ;;  %12303 = vmatmul.mubr.bf16.gmra.mrb[208].mxu1 %v15975_v15  ;;  %v4692_v47 = vmul.f32 0.2, %v4648_v26  ;;  %v13076_v23 = vld [vmem:[%s18018_s12 + $0xc] ss:$36 sps:$4 sm:$0xff]   ;;  %v12986_v41 = vld [vmem:[%s18018_s12 + $0x2e4] ss:$36 sps:$4 sm:$0xff]  }
 0x46e   : > { %v4644_v46 = vadd.f32 %v4643_v43, %v4490_v10  ;;  %8257 = vmatprep.subr.bf16.mxu0 %v12956_v12  ;;  %8005 = vmatprep.mubr.bf16.mxu0 %v18052_v6  ;;  %v4690_v58 = vmul.f32 0.2, %v4640_v38  ;;  %v12964_v43 = vld [vmem:[%s18018_s12 + $0xec] ss:$36 sps:$4 sm:$0xff]   ;;  %v12984_v61 = vld [vmem:[%s18018_s12 + $0x2e0] ss:$36 sps:$4 sm:$0xff]  }
 0x46f   : > { %v4693_v40 = vmul.f32 0.2, %v4652_v62  ;;  %8036 = vmatprep.subr.bf16.mxu1 %v13076_v23  ;;  %v13080_v56 = vld [vmem:[%s18018_s12 + $0x50] ss:$36 sps:$4 sm:$0xff]   ;;  %v12987_v28 = vld [vmem:[%s18018_s12 + $0x328] ss:$36 sps:$4 sm:$0xff]  }
 0x470   : > { %v4691_v11 = vmul.f32 0.2, %v4644_v46  ;;  %v13086_v2 = vld [vmem:[%s18018_s12 + $0x98] ss:$36 sps:$4 sm:$0xff]   ;;  %v13091_v7 = vld [vmem:[%s18018_s12 + $0xe0] ss:$36 sps:$4 sm:$0xff]  }
 0x471   : > { %v15997_v17 = vpack.c.bf16 %v4693_v40, %v4692_v47  ;;  %8258 = vmatpush1.bf16.msra.mxu0 %v12954_v35  ;;  %v13088_v60 = vld [vmem:[%s18018_s12 + $0x9c] ss:$36 sps:$4 sm:$0xff]   ;;  %v12992_v1 = vld [vmem:[%s18018_s12 + $0x374] ss:$36 sps:$4 sm:$0xff]   ;;  %v13093_v21 = vld [vmem:[%s18018_s12 + $0xe4] ss:$36 sps:$4 sm:$0xff]  }
 0x472   : > { %v16002_v37 = vpack.c.bf16 %v4691_v11, %v4690_v58  ;;  %8259 = vmatprep.subr.bf16.mxu0 %v12960_v9  ;;  %v12995_v12 = vld [vmem:[%s18018_s12 + $0x3bc] ss:$36 sps:$4 sm:$0xff]   ;;  %v13096_v59 = vld [vmem:[%s18018_s12 + $0x128] ss:$36 sps:$4 sm:$0xff]  }
 0x473   : > { %v12993_v26 = vld [vmem:[%s18018_s12 + $0x3b8] ss:$36 sps:$4 sm:$0xff]   ;;  %v13098_v38 = vld [vmem:[%s18018_s12 + $0x12c] ss:$36 sps:$4 sm:$0xff]   ;;  %v12998_v10 = vld [vmem:[%s18018_s12 + $0x404] ss:$36 sps:$4 sm:$0xff]  }
 0x474   : > { %12306 = vmatprep.mubr.bf16.mxu1 %v16002_v37  ;;  %8006 = vmatmul.mubr.bf16.gmra.mrb[12].mxu0 %v15975_v15  ;;  %v12996_v9 = vld [vmem:[%s18018_s12 + $0x400] ss:$36 sps:$4 sm:$0xff]   ;;  %v13001_v58 = vld [vmem:[%s18018_s12 + $0x44c] ss:$36 sps:$4 sm:$0xff]  }
 0x475   : > { %8260 = vmatpush1.bf16.msra.mxu0 %v12958_v4  ;;  %12307 = vmatmul.mubr.bf16.gmra.mrb[212].mxu1 %v15997_v17 }
 0x476   : > { %12318 = vmatprep.mubr.msk.bf16.mxu1 %vm1687_vm0, %v15831_v16  ;;  %8261 = vmatprep.subr.bf16.mxu0 %v12964_v43  ;;  %v12969_v16 = vld [vmem:[%s18018_s12 + $0x178] ss:$36 sps:$4 sm:$0xff]  }
 0x477   : > { %8015 = vmatprep.mubr.bf16.mxu0 %v18052_v6 }
 0x479   : > { %8262 = vmatpush1.bf16.msra.mxu0 %v12962_v63  ;;  %v13102_v63 = vld [vmem:[%s18018_s12 + $0x170] ss:$36 sps:$4 sm:$0xff]  }
 0x47a   : > { %8263 = vmatprep.subr.bf16.mxu0 %v12968_v53 }
 0x47c   : > { %8016 = vmatmul.mubr.bf16.gmra.mrb[16].mxu0 %v16002_v37 }
 0x47d   : > { %8264 = vmatpush1.bf16.msra.mxu0 %v12966_v49  ;;  %12319 = vmatmul.mubr.msk.bf16.vlgmr.msra.gmra.mrb[216].mxu1 %vm1687_vm0, %v15828_v27  ;;  %v12977_v27 = vld [vmem:[%s18018_s12 + $0x20c] ss:$36 sps:$4 sm:$0xff]  }
 0x47e   : > { %12322 = vmatprep.mubr.msk.bf16.mxu1 %vm1687_vm0, %v15843_v3  ;;  %8265 = vmatprep.subr.bf16.mxu0 %v12971_v36  ;;  %v12975_v3 = vld [vmem:[%s18018_s12 + $0x208] ss:$36 sps:$4 sm:$0xff]  }
 0x47f   : > { %8025 = vmatprep.mubr.bf16.mxu0 %v18052_v6  ;;  %v12999_v36 = vld [vmem:[%s18018_s12 + $0x448] ss:$36 sps:$4 sm:$0xff]  }
 0x481   : > { %8266 = vmatpush1.bf16.msra.mxu0 %v12969_v16  ;;  %v13104_v16 = vld [vmem:[%s18018_s12 + $0x174] ss:$36 sps:$4 sm:$0xff]  }
 0x482   : > { %8267 = vmatprep.subr.bf16.mxu0 %v12974_v42 }
 0x484   : > { %8026 = vmatmul.mubr.bf16.gmra.mrb[20].mxu0 %v15997_v17 }
 0x485   : > { %8268 = vmatpush1.bf16.msra.mxu0 %v12972_v34  ;;  %12323 = vmatmul.mubr.msk.bf16.gmra.mrb[220].mxu1 %vm1687_vm0, %v15840_v5  ;;  %v13074_v5 = vld [vmem:[%s18018_s12 + $0x8] ss:$36 sps:$4 sm:$0xff]  }
 0x486   : > { %8287 = vmatprep.mubr.bf16.mxu0 %v15584_v57  ;;  %12326 = vmatprep.mubr.msk.bf16.mxu1 %vm1687_vm0, %v15956_v44  ;;  %v12983_v44 = vld [vmem:[%s18018_s12 + $0x29c] ss:$36 sps:$4 sm:$0xff]  }
 0x487   : > { %8269 = vmatprep.subr.bf16.mxu0 %v12977_v27  ;;  %8037 = vmatpush1.bf16.msra.mxu1 %v13074_v5  ;;  %v13004_v27 = vld [vmem:[%s18018_s12 + $0x494] ss:$36 sps:$4 sm:$0xff]  }
 0x488   : > { %v13002_v5 = vld [vmem:[%s18018_s12 + $0x490] ss:$36 sps:$4 sm:$0xff]  }
 0x489   : > { %8270 = vmatpush1.bf16.msra.mxu0 %v12975_v3 }
 0x48a   : > { %8271 = vmatprep.subr.bf16.mxu0 %v12980_v51 }
 0x48d   : > { %8272 = vmatpush1.bf16.msra.mxu0 %v12978_v33  ;;  %12327 = vmatmul.mubr.msk.bf16.gmra.mrb[224].mxu1 %vm1687_vm0, %v15953_v29  ;;  %v13082_v29 = vld [vmem:[%s18018_s12 + $0x54] ss:$36 sps:$4 sm:$0xff]  }
 0x48e   : > { %12330 = vmatprep.mubr.msk.bf16.mxu1 %vm1687_vm0, %v15968_v55  ;;  %8273 = vmatprep.subr.bf16.mxu0 %v12983_v44  ;;  %v12989_v55 = vld [vmem:[%s18018_s12 + $0x32c] ss:$36 sps:$4 sm:$0xff]  }
 0x48f   : > { %8038 = vmatprep.subr.bf16.mxu1 %v13082_v29 }
 0x490   : > { %8039 = vmatpush1.bf16.msra.mxu1 %v13080_v56 }
 0x491   : > { %8274 = vmatpush1.bf16.msra.mxu0 %v12981_v18  ;;  %8040 = vmatprep.subr.bf16.mxu1 %v13088_v60  ;;  %v13108_v18 = vld [vmem:[%s18018_s12 + $0x1b8] ss:$36 sps:$4 sm:$0xff]  }
 0x492   : > { %8275 = vmatprep.subr.bf16.mxu0 %v12986_v41  ;;  %v13110_v41 = vld [vmem:[%s18018_s12 + $0x1bc] ss:$36 sps:$4 sm:$0xff]  }
 0x494   : > { %8041 = vmatpush1.bf16.msra.mxu1 %v13086_v2 }
 0x495   : > { %8276 = vmatpush1.bf16.msra.mxu0 %v12984_v61  ;;  %12331 = vmatmul.mubr.msk.bf16.gmra.mrb[228].mxu1 %vm1687_vm0, %v15965_v25  ;;  %v12990_v25 = vld [vmem:[%s18018_s12 + $0x370] ss:$36 sps:$4 sm:$0xff]   ;;  %v13007_v61 = vld [vmem:[%s18018_s12 + $0x4dc] ss:$36 sps:$4 sm:$0xff]  }
 0x496   : > { %8277 = vmatprep.subr.bf16.mxu0 %v12989_v55  ;;  %8042 = vmatprep.subr.bf16.mxu1 %v13093_v21 }
 0x498   : > { %8043 = vmatpush1.bf16.msra.mxu1 %v13091_v7  ;;  %v13113_v7 = vld [vmem:[%s18018_s12 + $0x200] ss:$36 sps:$4 sm:$0xff]  }
 0x499   : > { %8278 = vmatpush1.bf16.msra.mxu0 %v12987_v28  ;;  %8044 = vmatprep.subr.bf16.mxu1 %v13098_v38 }
 0x49a   : > { %8279 = vmatprep.subr.bf16.mxu0 %v12992_v1 }
 0x49c   : > { %8045 = vmatpush1.bf16.msra.mxu1 %v13096_v59 }
 0x49d   : > { %8280 = vmatpush1.bf16.msra.mxu0 %v12990_v25  ;;  %8046 = vmatprep.subr.bf16.mxu1 %v13104_v16  ;;  %v13005_v25 = vld [vmem:[%s18018_s12 + $0x4d8] ss:$36 sps:$4 sm:$0xff]   ;;  %v13025_v16 = vld [vmem:[%s18018_s12 + $0x68c] ss:$36 sps:$4 sm:$0xff]  }
 0x49e   : > { %8281 = vmatprep.subr.bf16.mxu0 %v12995_v12 }
 0x4a0   : > { %v12288_v62 = vpop.f32.mrb[192].mxu1  ;;  %8047 = vmatpush1.bf16.msra.mxu1 %v13102_v63  ;;  %v13130_v63 = vld [vmem:[%s18018_s12 + $0x2d8] ss:$36 sps:$4 sm:$0xff]  }
 0x4a1   : > { %v4892_v35 = vadd.f32 %v12288_v62, %v15818_v20  ;;  %8282 = vmatpush1.bf16.msra.mxu0 %v12993_v26  ;;  %v4883_v46 = vpop.f32.mrb[193].mxu1  ;;  %8048 = vmatprep.subr.bf16.mxu1 %v13110_v41  ;;  %v13115_v26 = vld [vmem:[%s18018_s12 + $0x204] ss:$36 sps:$4 sm:$0xff]   ;;  %v13120_v62 = vld [vmem:[%s18018_s12 + $0x24c] ss:$36 sps:$4 sm:$0xff]  }
 0x4a2   : > { %v4884_v47 = vadd.f32 %v15818_v20, %v4883_v46  ;;  %v12289_v40 = vpop.f32.mrb[194].mxu1  ;;  %8283 = vmatprep.subr.bf16.mxu0 %v12998_v10  ;;  %v13008_v10 = vld [vmem:[%s18018_s12 + $0x520] ss:$36 sps:$4 sm:$0xff]   ;;  %v13118_v46 = vld [vmem:[%s18018_s12 + $0x248] ss:$36 sps:$4 sm:$0xff]  }
 0x4a3   : > { %v4895_v11 = vadd.f32 %v12289_v40, %v15818_v20  ;;  %v4886_v4 = vpop.f32.mrb[195].mxu1  ;;  %v4996_v53 = vmax.f32 %v4892_v35, 0.0  ;;  %v13013_v35 = vld [vmem:[%s18018_s12 + $0x56c] ss:$36 sps:$4 sm:$0xff]  }
 0x4a4   : > { %v4887_v43 = vadd.f32 %v15818_v20, %v4886_v4  ;;  %v4994_v42 = vmax.f32 %v4884_v47, 0.0  ;;  %8049 = vmatpush1.bf16.msra.mxu1 %v13108_v18  ;;  %v13016_v47 = vld [vmem:[%s18018_s12 + $0x5b4] ss:$36 sps:$4 sm:$0xff]   ;;  %v13019_v4 = vld [vmem:[%s18018_s12 + $0x5fc] ss:$36 sps:$4 sm:$0xff]  }
 0x4a5   : > { %v4997_v49 = vmax.f32 %v4895_v11, 0.0  ;;  %8284 = vmatpush1.bf16.msra.mxu0 %v12996_v9  ;;  %8050 = vmatprep.subr.bf16.mxu1 %v13115_v26  ;;  %v13011_v9 = vld [vmem:[%s18018_s12 + $0x568] ss:$36 sps:$4 sm:$0xff]   ;;  %v13124_v40 = vld [vmem:[%s18018_s12 + $0x290] ss:$36 sps:$4 sm:$0xff]  }
 0x4a6   : > { %v4995_v34 = vmax.f32 %v4887_v43, 0.0  ;;  %8285 = vmatprep.subr.bf16.mxu0 %v13001_v58  ;;  %v13126_v58 = vld [vmem:[%s18018_s12 + $0x294] ss:$36 sps:$4 sm:$0xff]   ;;  %v13034_v18 = vld [vmem:[%s18018_s12 + $0x764] ss:$36 sps:$4 sm:$0xff]  }
 0x4a7   : > { %v5027_v3 = vpack.c.bf16 %v4997_v49, %v4996_v53  ;;  %v13014_v11 = vld [vmem:[%s18018_s12 + $0x5b0] ss:$36 sps:$4 sm:$0xff]   ;;  %v13017_v43 = vld [vmem:[%s18018_s12 + $0x5f8] ss:$36 sps:$4 sm:$0xff]   ;;  %v13022_v49 = vld [vmem:[%s18018_s12 + $0x644] ss:$36 sps:$4 sm:$0xff]  }
 0x4a8   : > { %v5026_v51 = vpack.c.bf16 %v4995_v34, %v4994_v42  ;;  %v12292_v33 = vpop.f32.mrb[196].mxu1  ;;  %8051 = vmatpush1.bf16.msra.mxu1 %v13113_v7  ;;  %v13132_v53 = vld [vmem:[%s18018_s12 + $0x2dc] ss:$36 sps:$4 sm:$0xff]   ;;  %v13023_v42 = vld [vmem:[%s18018_s12 + $0x688] ss:$36 sps:$4 sm:$0xff]  }
 0x4a9   : > { %v4908_v23 = vadd.f32 %v12292_v33, %v15818_v20  ;;  %8286 = vmatpush1.bf16.msra.mxu0 %v12999_v36  ;;  %v4899_v44 = vpop.f32.mrb[197].mxu1  ;;  %8052 = vmatprep.subr.bf16.mxu1 %v13120_v62  ;;  %v13020_v36 = vld [vmem:[%s18018_s12 + $0x640] ss:$36 sps:$4 sm:$0xff]   ;;  %v13028_v34 = vld [vmem:[%s18018_s12 + $0x6d4] ss:$36 sps:$4 sm:$0xff]  }
 0x4aa   : > { %v4900_v56 = vadd.f32 %v15818_v20, %v4899_v44  ;;  %v12293_v29 = vpop.f32.mrb[198].mxu1  ;;  %12334 = vmatprep.mubr.msk.bf16.mxu1 %vm1687_vm0, %v5026_v51  ;;  %8328 = vmatprep.subr.bf16.mxu0 %v13004_v27  ;;  %v13135_v27 = vld [vmem:[%s18018_s12 + $0x320] ss:$36 sps:$4 sm:$0xff]   ;;  %v13026_v51 = vld [vmem:[%s18018_s12 + $0x6d0] ss:$36 sps:$4 sm:$0xff]  }
 0x4ab   : > { %v4911_v55 = vadd.f32 %v12293_v29, %v15818_v20  ;;  %v4902_v28 = vpop.f32.mrb[199].mxu1  ;;  %12335 = vmatmul.mubr.msk.bf16.gmra.mrb[232].mxu1 %vm1687_vm0, %v5027_v3  ;;  %v5000_v60 = vmax.f32 %v4908_v23, 0.0  ;;  %v13137_v3 = vld [vmem:[%s18018_s12 + $0x324] ss:$36 sps:$4 sm:$0xff]   ;;  %v13142_v33 = vld [vmem:[%s18018_s12 + $0x36c] ss:$36 sps:$4 sm:$0xff]  }
 0x4ac   : > { %v4903_v2 = vadd.f32 %v15818_v20, %v4902_v28  ;;  %8288 = vmatmul.mubr.bf16.vlgmr.msra.gmra.mrb[24].mxu0 %v15387_v32  ;;  %v4998_v21 = vmax.f32 %v4900_v56, 0.0  ;;  %v13010_v20 = vld [vmem:[%s18018_s12 + $0x524] ss:$36 sps:$4 sm:$0xff]   ;;  %8053 = vmatpush1.bf16.msra.mxu1 %v13118_v46  ;;  %v13029_v44 = vld [vmem:[%s18018_s12 + $0x718] ss:$36 sps:$4 sm:$0xff]  }
 0x4ad   : > { %v5001_v1 = vmax.f32 %v4911_v55, 0.0  ;;  %8297 = vmatprep.mubr.bf16.mxu0 %v15580_v8  ;;  %8329 = vmatpush1.bf16.msra.mxu0 %v13002_v5  ;;  %v13031_v5 = vld [vmem:[%s18018_s12 + $0x71c] ss:$36 sps:$4 sm:$0xff]   ;;  %v13140_v23 = vld [vmem:[%s18018_s12 + $0x368] ss:$36 sps:$4 sm:$0xff]  }
 0x4ae   : > { %v4999_v12 = vmax.f32 %v4903_v2, 0.0  ;;  %8330 = vmatprep.subr.bf16.mxu0 %v13007_v61  ;;  %8054 = vmatprep.subr.bf16.mxu1 %v13126_v58  ;;  %v13146_v41 = vld [vmem:[%s18018_s12 + $0x3b0] ss:$36 sps:$4 sm:$0xff]   ;;  %v13032_v29 = vld [vmem:[%s18018_s12 + $0x760] ss:$36 sps:$4 sm:$0xff]  }
 0x4af   : > { %v5029_v59 = vpack.c.bf16 %v5001_v1, %v5000_v60  ;;  %v13148_v56 = vld [vmem:[%s18018_s12 + $0x3b4] ss:$36 sps:$4 sm:$0xff]   ;;  %v13037_v61 = vld [vmem:[%s18018_s12 + $0x7ac] ss:$36 sps:$4 sm:$0xff]   ;;  %v13152_v28 = vld [vmem:[%s18018_s12 + $0x3fc] ss:$36 sps:$4 sm:$0xff]  }
 0x4b0   : > { %v5028_v38 = vpack.c.bf16 %v4999_v12, %v4998_v21  ;;  %8055 = vmatpush1.bf16.msra.mxu1 %v13124_v40  ;;  %v13150_v55 = vld [vmem:[%s18018_s12 + $0x3f8] ss:$36 sps:$4 sm:$0xff]   ;;  %v13035_v2 = vld [vmem:[%s18018_s12 + $0x7a8] ss:$36 sps:$4 sm:$0xff]   ;;  %v13038_v7 = vld [vmem:[%s18018_s12 + $0x7f0] ss:$36 sps:$4 sm:$0xff]  }
 0x4b1   : > { %8331 = vmatpush1.bf16.msra.mxu0 %v13005_v25  ;;  %8056 = vmatprep.subr.bf16.mxu1 %v13132_v53  ;;  %v13040_v60 = vld [vmem:[%s18018_s12 + $0x7f4] ss:$36 sps:$4 sm:$0xff]   ;;  %v13156_v1 = vld [vmem:[%s18018_s12 + $0x444] ss:$36 sps:$4 sm:$0xff]   ;;  %v13043_v21 = vld [vmem:[%s18018_s12 + $0x83c] ss:$36 sps:$4 sm:$0xff]  }
 0x4b2   : > { %12338 = vmatprep.mubr.msk.bf16.mxu1 %vm1687_vm0, %v5028_v38  ;;  %8332 = vmatprep.subr.bf16.mxu0 %v13010_v20  ;;  %v13154_v25 = vld [vmem:[%s18018_s12 + $0x440] ss:$36 sps:$4 sm:$0xff]   ;;  %v13041_v12 = vld [vmem:[%s18018_s12 + $0x838] ss:$36 sps:$4 sm:$0xff]   ;;  %v13160_v20 = vld [vmem:[%s18018_s12 + $0x48c] ss:$36 sps:$4 sm:$0xff]  }
 0x4b3   : > { %12339 = vmatmul.mubr.msk.bf16.gmra.mrb[236].mxu1 %vm1687_vm0, %v5029_v59  ;;  %v13046_v26 = vld [vmem:[%s18018_s12 + $0x884] ss:$36 sps:$4 sm:$0xff]   ;;  %v13049_v38 = vld [vmem:[%s18018_s12 + $0x8cc] ss:$36 sps:$4 sm:$0xff]   ;;  %v13052_v62 = vld [vmem:[%s18018_s12 + $0x914] ss:$36 sps:$4 sm:$0xff]  }
 0x4b4   : > { %8298 = vmatmul.mubr.bf16.gmra.mrb[28].mxu0 %v15383_v22  ;;  %8057 = vmatpush1.bf16.msra.mxu1 %v13130_v63  ;;  %v13044_v59 = vld [vmem:[%s18018_s12 + $0x880] ss:$36 sps:$4 sm:$0xff]  }
 0x4b5   : > { %8307 = vmatprep.mubr.bf16.mxu0 %v15601_v24  ;;  %8333 = vmatpush1.bf16.msra.mxu0 %v13008_v10  ;;  %v13047_v10 = vld [vmem:[%s18018_s12 + $0x8c8] ss:$36 sps:$4 sm:$0xff]   ;;  %v13055_v46 = vld [vmem:[%s18018_s12 + $0x95c] ss:$36 sps:$4 sm:$0xff]  }
 0x4b6   : > { %8334 = vmatprep.subr.bf16.mxu0 %v13013_v35  ;;  %8058 = vmatprep.subr.bf16.mxu1 %v13137_v3  ;;  %v13050_v35 = vld [vmem:[%s18018_s12 + $0x910] ss:$36 sps:$4 sm:$0xff]   ;;  %v16341_v58 = vld [vmem:[%s18014_s8] ss:$0 sm:$0xff]  ;;  %v13059_v3 = vld [vmem:[%s18018_s12 + $0x9e8] ss:$36 sps:$4 sm:$0xff]  }
 0x4b8   : > { %8059 = vmatpush1.bf16.msra.mxu1 %v13135_v27 }
 0x4b9   : > { %8335 = vmatpush1.bf16.msra.mxu0 %v13011_v9  ;;  %8060 = vmatprep.subr.bf16.mxu1 %v13142_v33  ;;  %v13053_v9 = vld [vmem:[%s18018_s12 + $0x958] ss:$36 sps:$4 sm:$0xff]  }
 0x4ba   : > { %8336 = vmatprep.subr.bf16.mxu0 %v13016_v47  ;;  %v13058_v47 = vld [vmem:[%s18018_s12 + $0x9a4] ss:$36 sps:$4 sm:$0xff]  }
 0x4bc   : > { %8308 = vmatmul.mubr.bf16.gmra.mrb[32].mxu0 %v15404_v54  ;;  %8061 = vmatpush1.bf16.msra.mxu1 %v13140_v23 }
 0x4bd   : > { %8317 = vmatprep.mubr.bf16.mxu0 %v15598_v30  ;;  %8337 = vmatpush1.bf16.msra.mxu0 %v13014_v11 }
 0x4be   : > { %8338 = vmatprep.subr.bf16.mxu0 %v13019_v4  ;;  %8062 = vmatprep.subr.bf16.mxu1 %v13148_v56 }
 0x4c0   : > { %8063 = vmatpush1.bf16.msra.mxu1 %v13146_v41 }
 0x4c1   : > { %8339 = vmatpush1.bf16.msra.mxu0 %v13017_v43  ;;  %8064 = vmatprep.subr.bf16.mxu1 %v13152_v28  ;;  %v13056_v43 = vld [vmem:[%s18018_s12 + $0x9a0] ss:$36 sps:$4 sm:$0xff]  }
 0x4c2   : > { %8340 = vmatprep.subr.bf16.mxu0 %v13022_v49  ;;  %v13061_v49 = vld [vmem:[%s18018_s12 + $0x9ec] ss:$36 sps:$4 sm:$0xff]   ;;  %v13067_v28 = vld [vmem:[%s18018_s12 + $0xa7c] ss:$36 sps:$4 sm:$0xff]  }
 0x4c4   : > { %8318 = vmatmul.mubr.bf16.gmra.mrb[36].mxu0 %v15401_v13  ;;  %8065 = vmatpush1.bf16.msra.mxu1 %v13150_v55 }
 0x4c5   : > { %8341 = vmatpush1.bf16.msra.mxu0 %v13020_v36  ;;  %8360 = vmatprep.mubr.bf16.mxu0 %v15853_v39 }
 0x4c6   : > { %8342 = vmatprep.subr.bf16.mxu0 %v13025_v16  ;;  %8066 = vmatprep.subr.bf16.mxu1 %v13156_v1 }
 0x4c8   : > { %8067 = vmatpush1.bf16.msra.mxu1 %v13154_v25 }
 0x4c9   : > { %8343 = vmatpush1.bf16.msra.mxu0 %v13023_v42  ;;  %8109 = vmatprep.subr.bf16.mxu1 %v13160_v20 }
 0x4ca   : > { %8344 = vmatprep.subr.bf16.mxu0 %v13028_v34 }
 0x4cd   : > { %8345 = vmatpush1.bf16.msra.mxu0 %v13026_v51 }
 0x4ce   : > { %8346 = vmatprep.subr.bf16.mxu0 %v13031_v5  ;;  %v13064_v5 = vld [vmem:[%s18018_s12 + $0xa34] ss:$36 sps:$4 sm:$0xff]  }
 0x4d1   : > { %8347 = vmatpush1.bf16.msra.mxu0 %v13029_v44 }
 0x4d2   : > { %8348 = vmatprep.subr.bf16.mxu0 %v13034_v18 }
 0x4d5   : > { %8349 = vmatpush1.bf16.msra.mxu0 %v13032_v29  ;;  %v13062_v29 = vld [vmem:[%s18018_s12 + $0xa30] ss:$36 sps:$4 sm:$0xff]  }
 0x4d6   : > { %8350 = vmatprep.subr.bf16.mxu0 %v13037_v61 }
 0x4d9   : > { %8351 = vmatpush1.bf16.msra.mxu0 %v13035_v2 }
 0x4da   : > { %8352 = vmatprep.subr.bf16.mxu0 %v13040_v60 }
 0x4dd   : > { %8353 = vmatpush1.bf16.msra.mxu0 %v13038_v7 }
 0x4de   : > { %8354 = vmatprep.subr.bf16.mxu0 %v13043_v21  ;;  %v13065_v21 = vld [vmem:[%s18018_s12 + $0xa78] ss:$36 sps:$4 sm:$0xff]  }
 0x4e1   : > { %8355 = vmatpush1.bf16.msra.mxu0 %v13041_v12 }
 0x4e2   : > { %8356 = vmatprep.subr.bf16.mxu0 %v13046_v26  ;;  %v13070_v26 = vld [vmem:[%s18018_s12 + $0xac4] ss:$36 sps:$4 sm:$0xff]  }
 0x4e5   : > { %8357 = vmatpush1.bf16.msra.mxu0 %v13044_v59 }
 0x4e6   : > { %8358 = vmatprep.subr.bf16.mxu0 %v13049_v38 }
 0x4e9   : > { %8359 = vmatpush1.bf16.msra.mxu0 %v13047_v10  ;;  %v13068_v10 = vld [vmem:[%s18018_s12 + $0xac0] ss:$36 sps:$4 sm:$0xff]  }
 0x4ea   : > { %8401 = vmatprep.subr.bf16.mxu0 %v13052_v62  ;;  %v13073_v62 = vld [vmem:[%s18018_s12 + $0xb0c] ss:$36 sps:$4 sm:$0xff]  }
 0x4ec   : > { %8361 = vmatmul.mubr.bf16.vlgmr.msra.gmra.mrb[24].mxu0 %v15745_v19 }
 0x4ed   : > { %8370 = vmatprep.mubr.bf16.mxu0 %v15850_v14  ;;  %8402 = vmatpush1.bf16.msra.mxu0 %v13050_v35  ;;  %v13071_v35 = vld [vmem:[%s18018_s12 + $0xb08] ss:$36 sps:$4 sm:$0xff]  }
 0x4ee   : > { %8403 = vmatprep.subr.bf16.mxu0 %v13055_v46  ;;  %v13077_v46 = vld [vmem:[%s18018_s12 + $0x260] ss:$36 sps:$4 sm:$0xff]  }
 0x4f0   : > { %v12296_v40 = vpop.f32.mrb[200].mxu1 }
 0x4f1   : > { %v4924_v11 = vadd.f32 %v16341_v58, %v12296_v40  ;;  %8404 = vmatpush1.bf16.msra.mxu0 %v13053_v9  ;;  %v4915_v4 = vpop.f32.mrb[201].mxu1  ;;  %v13078_v9 = vld [vmem:[%s18018_s12 + $0x20] ss:$36 sps:$4 sm:$0xff]   ;;  %v13083_v40 = vld [vmem:[%s18018_s12 + $0x68] ss:$36 sps:$4 sm:$0xff]  }
 0x4f2   : > { %v4916_v63 = vadd.f32 %v16341_v58, %v4915_v4  ;;  %v12297_v53 = vpop.f32.mrb[202].mxu1  ;;  %8405 = vmatprep.subr.bf16.mxu0 %v13058_v47  ;;  %v13079_v47 = vld [vmem:[%s18018_s12 + $0x2a8] ss:$36 sps:$4 sm:$0xff]   ;;  %v13085_v4 = vld [vmem:[%s18018_s12 + $0xb0] ss:$36 sps:$4 sm:$0xff]  }
 0x4f3   : > { %v4927_v36 = vadd.f32 %v16341_v58, %v12297_v53  ;;  %v4918_v16 = vpop.f32.mrb[203].mxu1  ;;  %v5004_v34 = vmax.f32 %v4924_v11, 0.0  ;;  %v13084_v11 = vld [vmem:[%s18018_s12 + $0x2f0] ss:$36 sps:$4 sm:$0xff]   ;;  %v13094_v53 = vld [vmem:[%s18018_s12 + $0x380] ss:$36 sps:$4 sm:$0xff]  }
 0x4f4   : > { %v4919_v42 = vadd.f32 %v16341_v58, %v4918_v16  ;;  %8371 = vmatmul.mubr.bf16.gmra.mrb[28].mxu0 %v15739_v52  ;;  %v5002_v51 = vmax.f32 %v4916_v63, 0.0  ;;  %v13090_v63 = vld [vmem:[%s18018_s12 + $0xf8] ss:$36 sps:$4 sm:$0xff]   ;;  %v13100_v16 = vld [vmem:[%s18018_s12 + $0x188] ss:$36 sps:$4 sm:$0xff]  }
 0x4f5   : > { %v5005_v27 = vmax.f32 %v4927_v36, 0.0  ;;  %8380 = vmatprep.mubr.bf16.mxu0 %v15875_v50  ;;  %8406 = vmatpush1.bf16.msra.mxu0 %v13056_v43  ;;  %v13089_v43 = vld [vmem:[%s18018_s12 + $0x338] ss:$36 sps:$4 sm:$0xff]   ;;  %v13099_v36 = vld [vmem:[%s18018_s12 + $0x3c8] ss:$36 sps:$4 sm:$0xff]  }
 0x4f6   : > { %v5003_v33 = vmax.f32 %v4919_v42, 0.0  ;;  %8407 = vmatprep.subr.bf16.mxu0 %v13061_v49  ;;  %v13095_v49 = vld [vmem:[%s18018_s12 + $0x140] ss:$36 sps:$4 sm:$0xff]   ;;  %v13101_v42 = vld [vmem:[%s18018_s12 + $0x410] ss:$36 sps:$4 sm:$0xff]  }
 0x4f7   : > { %v5031_v23 = vpack.c.bf16 %v5005_v27, %v5004_v34  ;;  %v13105_v34 = vld [vmem:[%s18018_s12 + $0x1d0] ss:$36 sps:$4 sm:$0xff]   ;;  %v13106_v27 = vld [vmem:[%s18018_s12 + $0x458] ss:$36 sps:$4 sm:$0xff]  }
 0x4f8   : > { %v5030_v44 = vpack.c.bf16 %v5003_v33, %v5002_v51  ;;  %v12300_v18 = vpop.f32.mrb[204].mxu1  ;;  %v13111_v51 = vld [vmem:[%s18018_s12 + $0x6e0] ss:$36 sps:$4 sm:$0xff]  }
 0x4f9   : > { %v4940_v41 = vadd.f32 %v16341_v58, %v12300_v18  ;;  %8408 = vmatpush1.bf16.msra.mxu0 %v13059_v3  ;;  %v4931_v56 = vpop.f32.mrb[205].mxu1  ;;  %v13107_v3 = vld [vmem:[%s18018_s12 + $0x218] ss:$36 sps:$4 sm:$0xff]   ;;  %v13112_v33 = vld [vmem:[%s18018_s12 + $0x4a0] ss:$36 sps:$4 sm:$0xff]  }
 0x4fa   : > { %v4932_v61 = vadd.f32 %v16341_v58, %v4931_v56  ;;  %v12301_v55 = vpop.f32.mrb[206].mxu1  ;;  %12342 = vmatprep.mubr.msk.bf16.mxu1 %vm1687_vm0, %v5030_v44  ;;  %8409 = vmatprep.subr.bf16.mxu0 %v13064_v5  ;;  %v13116_v5 = vld [vmem:[%s18018_s12 + $0x728] ss:$36 sps:$4 sm:$0xff]   ;;  %v13121_v44 = vld [vmem:[%s18018_s12 + $0x770] ss:$36 sps:$4 sm:$0xff]  }
 0x4fb   : > { %v4943_v2 = vadd.f32 %v16341_v58, %v12301_v55  ;;  %v4934_v60 = vpop.f32.mrb[207].mxu1  ;;  %12343 = vmatmul.mubr.msk.bf16.gmra.mrb[240].mxu1 %vm1687_vm0, %v5031_v23  ;;  %v5008_v25 = vmax.f32 %v4940_v41, 0.0  ;;  %v13117_v23 = vld [vmem:[%s18018_s12 + $0x4e8] ss:$36 sps:$4 sm:$0xff]   ;;  %v13122_v18 = vld [vmem:[%s18018_s12 + $0x530] ss:$36 sps:$4 sm:$0xff]  }
 0x4fc   : > { %v4935_v1 = vadd.f32 %v16341_v58, %v4934_v60  ;;  %8381 = vmatmul.mubr.bf16.gmra.mrb[32].mxu0 %v15764_v31  ;;  %v5006_v12 = vmax.f32 %v4932_v61, 0.0  ;;  %v13123_v41 = vld [vmem:[%s18018_s12 + $0x7b8] ss:$36 sps:$4 sm:$0xff]   ;;  %v13129_v61 = vld [vmem:[%s18018_s12 + $0x5c0] ss:$36 sps:$4 sm:$0xff]  }
 0x4fd   : > { %v5009_v7 = vmax.f32 %v4943_v2, 0.0  ;;  %8390 = vmatprep.mubr.bf16.mxu0 %v15873_v48  ;;  %8410 = vmatpush1.bf16.msra.mxu0 %v13062_v29  ;;  %v13127_v56 = vld [vmem:[%s18018_s12 + $0x578] ss:$36 sps:$4 sm:$0xff]   ;;  %v13128_v29 = vld [vmem:[%s18018_s12 + $0x800] ss:$36 sps:$4 sm:$0xff]  }
 0x4fe   : > { %v5007_v20 = vmax.f32 %v4935_v1, 0.0  ;;  %8411 = vmatprep.subr.bf16.mxu0 %v13067_v28  ;;  %v13133_v55 = vld [vmem:[%s18018_s12 + $0x848] ss:$36 sps:$4 sm:$0xff]   ;;  %v13138_v2 = vld [vmem:[%s18018_s12 + $0x890] ss:$36 sps:$4 sm:$0xff]  }
 0x4ff   : > { %v5033_v59 = vpack.c.bf16 %v5009_v7, %v5008_v25  ;;  %v13134_v28 = vld [vmem:[%s18018_s12 + $0x608] ss:$36 sps:$4 sm:$0xff]  }
 0x500   : > { %v5032_v38 = vpack.c.bf16 %v5007_v20, %v5006_v12  ;;  %v13139_v20 = vld [vmem:[%s18018_s12 + $0x650] ss:$36 sps:$4 sm:$0xff]  }
 0x501   : > { %8412 = vmatpush1.bf16.msra.mxu0 %v13065_v21 }
 0x502   : > { %12346 = vmatprep.mubr.msk.bf16.mxu1 %vm1687_vm0, %v5032_v38  ;;  %8413 = vmatprep.subr.bf16.mxu0 %v13070_v26 }
 0x503   : > { %12347 = vmatmul.mubr.msk.bf16.gmra.mrb[244].mxu1 %vm1687_vm0, %v5033_v59 }
 0x504   : > { %8391 = vmatmul.mubr.bf16.gmra.mrb[36].mxu0 %v15759_v45 }
 0x505   : > { %8414 = vmatpush1.bf16.msra.mxu0 %v13068_v10  ;;  %8433 = vmatprep.mubr.bf16.mxu0 %v18052_v6 }
 0x506   : > { %8415 = vmatprep.subr.bf16.mxu0 %v13073_v62  ;;  %v13143_v62 = vld [vmem:[%s18018_s12 + $0x8d8] ss:$36 sps:$4 sm:$0xff]  }
 0x509   : > { %8416 = vmatpush1.bf16.msra.mxu0 %v13071_v35 }
 0x50a   : > { %11606 = vmatprep.subr.bf16.mxu0 %v13077_v46 }
 0x50c   : > { %8434 = vmatmul.mubr.bf16.vlgmr.msra.gmra.mrb[24].mxu0 %v15981_v0 }
 0x50d   : > { %11607 = vmatpush3.bf16.msra.mxu0 %v13078_v9  ;;  %8443 = vmatprep.mubr.bf16.mxu0 %v18052_v6 }
 0x50e   : > { %11608 = vmatprep.subr.bf16.mxu0 %v13079_v47 }
 0x511   : > { %11609 = vmatpush3.bf16.msra.mxu0 %v13083_v40 }
 0x512   : > { %11610 = vmatprep.subr.bf16.mxu0 %v13084_v11 }
 0x514   : > { %8444 = vmatmul.mubr.bf16.gmra.mrb[28].mxu0 %v15975_v15 }
 0x515   : > { %11611 = vmatpush3.bf16.msra.mxu0 %v13085_v4  ;;  %8453 = vmatprep.mubr.bf16.mxu0 %v18052_v6  ;;  %v13144_v4 = vld [vmem:[%s18018_s12 + $0x698] ss:$36 sps:$4 sm:$0xff]  }
 0x516   : > { %11612 = vmatprep.subr.bf16.mxu0 %v13089_v43 }
 0x519   : > { %11613 = vmatpush3.bf16.msra.mxu0 %v13090_v63 }
 0x51a   : > { %11614 = vmatprep.subr.bf16.mxu0 %v13094_v53  ;;  %v13145_v53 = vld [vmem:[%s18018_s12 + $0x920] ss:$36 sps:$4 sm:$0xff]  }
 0x51c   : > { %8454 = vmatmul.mubr.bf16.gmra.mrb[32].mxu0 %v16002_v37 }
 0x51d   : > { %11615 = vmatpush3.bf16.msra.mxu0 %v13095_v49  ;;  %8463 = vmatprep.mubr.bf16.mxu0 %v18052_v6 }
 0x51e   : > { %11616 = vmatprep.subr.bf16.mxu0 %v13099_v36 }
 0x521   : > { %11617 = vmatpush3.bf16.msra.mxu0 %v13100_v16 }
 0x522   : > { %11618 = vmatprep.subr.bf16.mxu0 %v13101_v42 }
 0x524   : > { %8464 = vmatmul.mubr.bf16.gmra.mrb[36].mxu0 %v15997_v17 }
 0x525   : > { %11619 = vmatpush3.bf16.msra.mxu0 %v13105_v34  ;;  %8725 = vmatprep.mubr.bf16.mxu0 %v15584_v57 }
 0x526   : > { %11620 = vmatprep.subr.bf16.mxu0 %v13106_v27 }
 0x529   : > { %11621 = vmatpush3.bf16.msra.mxu0 %v13107_v3 }
 0x52a   : > { %11646 = vmatprep.subr.bf16.mxu0 %v13111_v51 }
 0x52c   : > { %8726 = vmatmul.mubr.bf16.vlgmr.msra.gmra.mrb[40].mxu0 %v15387_v32 }
 0x52d   : > { %8733 = vmatprep.mubr.bf16.mxu0 %v15580_v8  ;;  %11647 = vmatpush3.bf16.msra.mxu0 %v13112_v33 }
 0x52e   : > { %11648 = vmatprep.subr.bf16.mxu0 %v13116_v5 }
 0x531   : > { %11649 = vmatpush3.bf16.msra.mxu0 %v13117_v23 }
 0x532   : > { %11650 = vmatprep.subr.bf16.mxu0 %v13121_v44 }
 0x534   : > { %8734 = vmatmul.mubr.bf16.gmra.mrb[44].mxu0 %v15383_v22 }
 0x535   : > { %8741 = vmatprep.mubr.bf16.mxu0 %v15601_v24  ;;  %11651 = vmatpush3.bf16.msra.mxu0 %v13122_v18  ;;  %v13149_v18 = vld [vmem:[%s18018_s12 + $0x968] ss:$36 sps:$4 sm:$0xff]  }
 0x536   : > { %11652 = vmatprep.subr.bf16.mxu0 %v13123_v41 }
 0x539   : > { %11653 = vmatpush3.bf16.msra.mxu0 %v13127_v56 }
 0x53a   : > { %11654 = vmatprep.subr.bf16.mxu0 %v13128_v29 }
 0x53c   : > { %8742 = vmatmul.mubr.bf16.gmra.mrb[48].mxu0 %v15404_v54 }
 0x53d   : > { %8749 = vmatprep.mubr.bf16.mxu0 %v15598_v30  ;;  %11655 = vmatpush3.bf16.msra.mxu0 %v13129_v61 }
 0x53e   : > { %11656 = vmatprep.subr.bf16.mxu0 %v13133_v55 }
 0x53f   : > { %v7997_v60 = vpop.f32.mrb[8].mxu0 }
 0x540   : > { %v12304_v1 = vpop.f32.mrb[208].mxu1  ;;  %v7999_v25 = vpop.f32.mrb[9].mxu0 }
 0x541   : > { %v4956_v7 = vadd.f32 %v16341_v58, %v12304_v1  ;;  %11657 = vmatpush3.bf16.msra.mxu0 %v13134_v28  ;;  %v4947_v21 = vpop.f32.mrb[209].mxu1  ;;  %v8001_v12 = vpop.f32.mrb[10].mxu0  ;;  %v16535_v1 = vld [vmem:[%s18016_s10] ss:$0 sm:$0xff] }
 0x542   : > { %v4948_v26 = vadd.f32 %v16341_v58, %v4947_v21  ;;  %v16500_v59 = vpack.c.bf16 %v8001_v12, %v7997_v60  ;;  %v12305_v38 = vpop.f32.mrb[210].mxu1  ;;  %v8003_v10 = vpop.f32.mrb[11].mxu0  ;;  %11658 = vmatprep.subr.bf16.mxu0 %v13138_v2 }
 0x543   : > { %v4959_v35 = vadd.f32 %v16341_v58, %v12305_v38  ;;  %v16506_v46 = vpack.c.bf16 %v8003_v10, %v7999_v25  ;;  %v4950_v9 = vpop.f32.mrb[211].mxu1  ;;  %v5012_v40 = vmax.f32 %v4956_v7, 0.0  ;;  %v13153_v25 = vld [vmem:[%s18018_s12 + $0x9b0] ss:$36 sps:$4 sm:$0xff]  }
 0x544   : > { %v4951_v47 = vadd.f32 %v16341_v58, %v4950_v9  ;;  %8750 = vmatmul.mubr.bf16.gmra.mrb[52].mxu0 %v15401_v13  ;;  %v5010_v43 = vmax.f32 %v4948_v26, 0.0 }
 0x545   : > { %v5013_v11 = vmax.f32 %v4959_v35, 0.0  ;;  %11659 = vmatpush3.bf16.msra.mxu0 %v13139_v20  ;;  %8790 = vmatprep.mubr.bf16.mxu0 %v15853_v39 }
 0x546   : > { %v5011_v63 = vmax.f32 %v4951_v47, 0.0  ;;  %11660 = vmatprep.subr.bf16.mxu0 %v13143_v62 }
 0x547   : > { %v5035_v49 = vpack.c.bf16 %v5013_v11, %v5012_v40  ;;  %v8007_v36 = vpop.f32.mrb[12].mxu0  ;;  %v13157_v40 = vld [vmem:[%s18018_s12 + $0x9f8] ss:$36 sps:$4 sm:$0xff]   ;;  %v16551_v11 = vld [vmem:[%s18017_s11] ss:$0 sm:$0xff] }
 0x548   : > { %v5034_v16 = vpack.c.bf16 %v5011_v63, %v5010_v43  ;;  %v12308_v42 = vpop.f32.mrb[212].mxu1  ;;  %v8009_v34 = vpop.f32.mrb[13].mxu0 }
 0x549   : > { %v4972_v27 = vadd.f32 %v16341_v58, %v12308_v42  ;;  %11661 = vmatpush3.bf16.msra.mxu0 %v13144_v4  ;;  %v4963_v3 = vpop.f32.mrb[213].mxu1  ;;  %v8011_v51 = vpop.f32.mrb[14].mxu0 }
 0x54a   : > { %v4964_v33 = vadd.f32 %v16341_v58, %v4963_v3  ;;  %v16519_v5 = vpack.c.bf16 %v8011_v51, %v8007_v36  ;;  %v12309_v23 = vpop.f32.mrb[214].mxu1  ;;  %12350 = vmatprep.mubr.msk.bf16.mxu1 %vm1687_vm0, %v5034_v16  ;;  %v8013_v44 = vpop.f32.mrb[15].mxu0  ;;  %12358 = vmatprep.subr.bf16.mxu0 %v13145_v53  ;;  %v13161_v3 = vld [vmem:[%s18018_s12 + $0xa40] ss:$36 sps:$4 sm:$0xff]  }
 0x54b   : > { %v4975_v41 = vadd.f32 %v16341_v58, %v12309_v23  ;;  %v16526_v56 = vpack.c.bf16 %v8013_v44, %v8009_v34  ;;  %v4966_v29 = vpop.f32.mrb[215].mxu1  ;;  %12351 = vmatmul.mubr.msk.bf16.gmra.mrb[248].mxu1 %vm1687_vm0, %v5035_v49  ;;  %v5016_v55 = vmax.f32 %v4972_v27, 0.0 }
 0x54c   : > { %v4967_v61 = vadd.f32 %v16341_v58, %v4966_v29  ;;  %8791 = vmatmul.mubr.bf16.vlgmr.msra.gmra.mrb[56].mxu0 %v15745_v19  ;;  %v5014_v2 = vmax.f32 %v4964_v33, 0.0 }
 0x54d   : > { %v5017_v28 = vmax.f32 %v4975_v41, 0.0  ;;  %8798 = vmatprep.mubr.bf16.mxu0 %v15850_v14  ;;  %12359 = vmatpush3.bf16.msra.mxu0 %v13145_v53  ;;  %v13158_v41 = vld [vmem:[%s18018_s12 + $0x488] ss:$36 sps:$4 sm:$0xff]  }
 0x54e   : > { %v5015_v60 = vmax.f32 %v4967_v61, 0.0  ;;  %12360 = vmatprep.subr.bf16.mxu0 %v13149_v18 }
 0x54f   : > { %v5037_v58 = vpack.c.bf16 %v5017_v28, %v5016_v55  ;;  %v8017_v7 = vpop.f32.mrb[16].mxu0 }
 0x550   : > { %v5036_v21 = vpack.c.bf16 %v5015_v60, %v5014_v2  ;;  %v12320_v12 = vpop.f32.mrb[216].mxu1  ;;  %v8019_v20 = vpop.f32.mrb[17].mxu0 }
 0x551   : > { %v5180_v26 = vadd.f32 %v12320_v12, %v16535_v1  ;;  %12361 = vmatpush3.bf16.msra.mxu0 %v13149_v18  ;;  %v5171_v38 = vpop.f32.mrb[217].mxu1  ;;  %v8021_v10 = vpop.f32.mrb[18].mxu0 }
 0x552   : > { %v5172_v62 = vadd.f32 %v16535_v1, %v5171_v38  ;;  %v16542_v35 = vpack.c.bf16 %v8021_v10, %v8017_v7  ;;  %v12321_v9 = vpop.f32.mrb[218].mxu1  ;;  %12354 = vmatprep.mubr.msk.bf16.mxu1 %vm1687_vm0, %v5036_v21  ;;  %v8023_v47 = vpop.f32.mrb[19].mxu0  ;;  %12362 = vmatprep.subr.bf16.mxu0 %v13153_v25  ;;  %v13164_v38 = vld [vmem:[%s18018_s12 + $0x4d4] ss:$36 sps:$4 sm:$0xff]  }
 0x553   : > { %v5332_v4 = vmax.f32 %v5180_v26, 0.0  ;;  %v5183_v43 = vadd.f32 %v12321_v9, %v16535_v1  ;;  %v16554_v63 = vpack.c.bf16 %v8023_v47, %v8019_v20  ;;  %v5174_v53 = vpop.f32.mrb[219].mxu1  ;;  %12355 = vmatmul.mubr.msk.bf16.gmra.mrb[252].mxu1 %vm1687_vm0, %v5037_v58  ;;  %v13165_v9 = vld [vmem:[%s18018_s12 + $0xa88] ss:$36 sps:$4 sm:$0xff]  }
 0x554   : > { %v5330_v49 = vmax.f32 %v5172_v62, 0.0  ;;  %v5175_v36 = vadd.f32 %v16535_v1, %v5174_v53  ;;  %8799 = vmatmul.mubr.bf16.gmra.mrb[60].mxu0 %v15739_v52  ;;  %8068 = vmatprep.mubr.bf16.mxu1 %v15584_v57  ;;  %v13162_v62 = vld [vmem:[%s18018_s12 + $0x4d0] ss:$36 sps:$4 sm:$0xff]  }
 0x555   : > { %v5333_v16 = vmax.f32 %v5183_v43, 0.0  ;;  %8806 = vmatprep.mubr.bf16.mxu0 %v15875_v50  ;;  %12363 = vmatpush3.bf16.msra.mxu0 %v13153_v25  ;;  %v5379_v42 = vmul.f32 %v16551_v11, %v5332_v4  ;;  %v13168_v43 = vld [vmem:[%s18018_s12 + $0x51c] ss:$36 sps:$4 sm:$0xff]  }
 0x556   : > { %v5331_v34 = vmax.f32 %v5175_v36, 0.0  ;;  %12364 = vmatprep.subr.bf16.mxu0 %v13157_v40  ;;  %v5377_v27 = vmul.f32 %v16551_v11, %v5330_v49 }
 0x557   : > { %v8027_v51 = vpop.f32.mrb[20].mxu0  ;;  %v5423_v33 = vsel %vm1687_vm0, %v5379_v42, 0.0  ;;  %v5380_v28 = vmul.f32 %v16551_v11, %v5333_v16  ;;  %v13169_v16 = vld [vmem:[%s18018_s12 + $0xad0] ss:$36 sps:$4 sm:$0xff]  }
 0x558   : > { %v8029_v23 = vpop.f32.mrb[21].mxu0  ;;  %5424 = vadd.xlane.f32.xlu1 %v5423_v33  ;;  %v12324_v44 = vpop.f32.mrb[220].mxu1  ;;  %v5417_v18 = vsel %vm1687_vm0, %v5377_v27, 0.0  ;;  %v5378_v7 = vmul.f32 %v16551_v11, %v5331_v34 }
 0x559   : > { %12365 = vmatpush3.bf16.msra.mxu0 %v13157_v40  ;;  %v5196_v29 = vadd.f32 %v12324_v44, %v16535_v1  ;;  %v8031_v61 = vpop.f32.mrb[22].mxu0  ;;  %5418 = vadd.xlane.f32.xlu0 %v5417_v18  ;;  %v5187_v55 = vpop.f32.mrb[221].mxu1  ;;  %v5426_v40 = vsel %vm1687_vm0, %v5380_v28, 0.0 }
 0x55a   : > { %v16573_v2 = vpack.c.bf16 %v8031_v61, %v8027_v51  ;;  %v5188_v60 = vadd.f32 %v16535_v1, %v5187_v55  ;;  %v12325_v25 = vpop.f32.mrb[222].mxu1  ;;  %v8033_v58 = vpop.f32.mrb[23].mxu0  ;;  %12366 = vmatprep.subr.bf16.mxu0 %v13161_v3  ;;  %v5420_v36 = vsel %vm1687_vm0, %v5378_v7, 0.0  ;;  %v13173_v7 = vld [vmem:[%s18018_s12 + $0xb18] ss:$36 sps:$4 sm:$0xff]  }
 0x55b   : > { %v5336_v21 = vmax.f32 %v5196_v29, 0.0  ;;  %v5199_v12 = vadd.f32 %v12325_v25, %v16535_v1  ;;  %v16578_v20 = vpack.c.bf16 %v8033_v58, %v8029_v23  ;;  %v5190_v26 = vpop.f32.mrb[223].mxu1  ;;  %8069 = vmatmul.mubr.bf16.vlgmr.msra.gmra.mrb[0].mxu1 %v15387_v32  ;;  %v13172_v29 = vld [vmem:[%s18018_s12 + $0x564] ss:$36 sps:$4 sm:$0xff]  }
 0x55c   : > { %v5191_v10 = vadd.f32 %v16535_v1, %v5190_v26  ;;  %8110 = vmatpush1.bf16.msra.mxu1 %v13158_v41  ;;  %8807 = vmatmul.mubr.bf16.gmra.mrb[64].mxu0 %v15764_v31  ;;  %v5334_v53 = vmax.f32 %v5188_v60, 0.0  ;;  %v13170_v58 = vld [vmem:[%s18018_s12 + $0x560] ss:$36 sps:$4 sm:$0xff]   ;;  %v13176_v26 = vld [vmem:[%s18018_s12 + $0x5ac] ss:$36 sps:$4 sm:$0xff]  }
 0x55d   : > { %v5337_v47 = vmax.f32 %v5199_v12, 0.0  ;;  %8814 = vmatprep.mubr.bf16.mxu0 %v15873_v48  ;;  %12367 = vmatpush3.bf16.msra.mxu0 %v13161_v3  ;;  %v5383_v4 = vmul.f32 %v16551_v11, %v5336_v21  ;;  %v13166_v3 = vld [vmem:[%s18018_s12 + $0x518] ss:$36 sps:$4 sm:$0xff]  }
 0x55e   : > { %v5335_v49 = vmax.f32 %v5191_v10, 0.0  ;;  %5427 = vadd.xlane.f32.xlu1 %v5426_v40  ;;  %8078 = vmatprep.mubr.bf16.mxu1 %v15580_v8  ;;  %v5381_v41 = vmul.f32 %v16551_v11, %v5334_v53 }
 0x55f   : > { %5421 = vadd.xlane.f32.xlu0 %v5420_v36  ;;  %8111 = vmatprep.subr.bf16.mxu1 %v13164_v38  ;;  %v5384_v42 = vmul.f32 %v16551_v11, %v5337_v47  ;;  %v5435_v27 = vsel %vm1687_vm0, %v5383_v4, 0.0 }
 0x560   : > { %8112 = vmatpush1.bf16.msra.mxu1 %v13162_v62  ;;  %12368 = vmatprep.subr.bf16.mxu0 %v13165_v9  ;;  %v12328_v34 = vpop.f32.mrb[224].mxu1  ;;  %v5382_v61 = vmul.f32 %v16551_v11, %v5335_v49  ;;  %v5429_v62 = vsel %vm1687_vm0, %v5381_v41, 0.0  ;;  %v13174_v49 = vld [vmem:[%s18018_s12 + $0x5a8] ss:$36 sps:$4 sm:$0xff]   ;;  %v13177_v41 = vld [vmem:[%s18018_s12 + $0x5f0] ss:$36 sps:$4 sm:$0xff]  }
 0x561   : > { %v5212_v51 = vadd.f32 %v12328_v34, %v16535_v1  ;;  %12369 = vmatpush3.bf16.msra.mxu0 %v13165_v9  ;;  %v5203_v33 = vpop.f32.mrb[225].mxu1  ;;  %8113 = vmatprep.subr.bf16.mxu1 %v13168_v43  ;;  %v5438_v23 = vsel %vm1687_vm0, %v5384_v42, 0.0 }
 0x562   : > { %v5204_v44 = vadd.f32 %v16535_v1, %v5203_v33  ;;  %5439 = vadd.xlane.f32.xlu1 %v5438_v23  ;;  %v12329_v18 = vpop.f32.mrb[226].mxu1  ;;  %12370 = vmatprep.subr.bf16.mxu0 %v13169_v16  ;;  %v5432_v9 = vsel %vm1687_vm0, %v5382_v61, 0.0 }
 0x563   : > { %v5340_v55 = vmax.f32 %v5212_v51, 0.0  ;;  %5436 = vadd.xlane.f32.xlu0 %v5435_v27  ;;  %v5215_v28 = vadd.f32 %v12329_v18, %v16535_v1  ;;  %v5206_v60 = vpop.f32.mrb[227].mxu1  ;;  %8079 = vmatmul.mubr.bf16.gmra.mrb[4].mxu1 %v15383_v22  ;;  %v13179_v27 = vld [vmem:[%s18018_s12 + $0x5f4] ss:$36 sps:$4 sm:$0xff]  }
 0x564   : > { %v5207_v25 = vadd.f32 %v16535_v1, %v5206_v60  ;;  %8114 = vmatpush1.bf16.msra.mxu1 %v13166_v3  ;;  %8815 = vmatmul.mubr.bf16.gmra.mrb[68].mxu0 %v15759_v45  ;;  %v5338_v38 = vmax.f32 %v5204_v44, 0.0 }
 0x565   : > { %v5341_v21 = vmax.f32 %v5215_v28, 0.0  ;;  %8088 = vmatprep.mubr.bf16.mxu1 %v15601_v24  ;;  %12371 = vmatpush3.bf16.msra.mxu0 %v13169_v16  ;;  %v5387_v12 = vmul.f32 %v16551_v11, %v5340_v55 }
 0x566   : > { %v5339_v10 = vmax.f32 %v5207_v25, 0.0  ;;  %12374 = vmatprep.mubr.bf16.mxu0 %v15981_v0  ;;  %8115 = vmatprep.subr.bf16.mxu1 %v13172_v29  ;;  %v5385_v34 = vmul.f32 %v16551_v11, %v5338_v38  ;;  %v13182_v25 = vld [vmem:[%s18018_s12 + $0x63c] ss:$36 sps:$4 sm:$0xff]   ;;  %v13185_v38 = vld [vmem:[%s18018_s12 + $0x684] ss:$36 sps:$4 sm:$0xff]  }
 0x567   : > { %5430 = vadd.xlane.f32.xlu0 %v5429_v62  ;;  %5433 = vadd.xlane.f32.xlu1 %v5432_v9  ;;  %v5388_v47 = vmul.f32 %v16551_v11, %v5341_v21  ;;  %v5447_v4 = vsel %vm1687_vm0, %v5387_v12, 0.0  ;;  %v13180_v21 = vld [vmem:[%s18018_s12 + $0x638] ss:$36 sps:$4 sm:$0xff]   ;;  %v13183_v62 = vld [vmem:[%s18018_s12 + $0x680] ss:$36 sps:$4 sm:$0xff]  }
 0x568   : > { %8116 = vmatpush1.bf16.msra.mxu1 %v13170_v58  ;;  %12372 = vmatprep.subr.bf16.mxu0 %v13173_v7  ;;  %v12332_v40 = vpop.f32.mrb[228].mxu1  ;;  %v5386_v3 = vmul.f32 %v16551_v11, %v5339_v10  ;;  %v5441_v28 = vsel %vm1687_vm0, %v5385_v34, 0.0 }
 0x569   : > { %v5228_v43 = vadd.f32 %v12332_v40, %v16535_v1  ;;  %12373 = vmatpush3.bf16.msra.mxu0 %v13173_v7  ;;  %v5219_v53 = vpop.f32.mrb[229].mxu1  ;;  %8117 = vmatprep.subr.bf16.mxu1 %v13176_v26  ;;  %v5450_v36 = vsel %vm1687_vm0, %v5388_v47, 0.0  ;;  %v13188_v40 = vld [vmem:[%s18018_s12 + $0x6cc] ss:$36 sps:$4 sm:$0xff]  }
 0x56a   : > { %v5220_v16 = vadd.f32 %v16535_v1, %v5219_v53  ;;  %v12333_v42 = vpop.f32.mrb[230].mxu1  ;;  %v5444_v60 = vsel %vm1687_vm0, %v5386_v3, 0.0  ;;  %v13189_v53 = vld [vmem:[%s18018_s12 + $0x710] ss:$36 sps:$4 sm:$0xff]  }
 0x56b   : > { %v5344_v51 = vmax.f32 %v5228_v43, 0.0  ;;  %5448 = vadd.xlane.f32.xlu0 %v5447_v4  ;;  %v5231_v33 = vadd.f32 %v12333_v42, %v16535_v1  ;;  %5451 = vadd.xlane.f32.xlu1 %v5450_v36  ;;  %v5222_v23 = vpop.f32.mrb[231].mxu1  ;;  %v13186_v4 = vld [vmem:[%s18018_s12 + $0x6c8] ss:$36 sps:$4 sm:$0xff]   ;;  %v13191_v43 = vld [vmem:[%s18018_s12 + $0x714] ss:$36 sps:$4 sm:$0xff]  }
 0x56c   : > { %v5223_v44 = vadd.f32 %v16535_v1, %v5222_v23  ;;  %8089 = vmatmul.mubr.bf16.gmra.mrb[8].mxu1 %v15404_v54  ;;  %12375 = vmatmul.mubr.bf16.vlgmr.msra.gmra.mrb[72].mxu0 %v15975_v15  ;;  %v5342_v61 = vmax.f32 %v5220_v16, 0.0  ;;  %v13194_v36 = vld [vmem:[%s18018_s12 + $0x75c] ss:$36 sps:$4 sm:$0xff]  }
 0x56d   : > { %v5345_v18 = vmax.f32 %v5231_v33, 0.0  ;;  %8118 = vmatpush1.bf16.msra.mxu1 %v13174_v49  ;;  %8098 = vmatprep.mubr.bf16.mxu1 %v15598_v30  ;;  %v5391_v29 = vmul.f32 %v16551_v11, %v5344_v51  ;;  %v13192_v23 = vld [vmem:[%s18018_s12 + $0x758] ss:$36 sps:$4 sm:$0xff]  }
 0x56e   : > { %v5343_v55 = vmax.f32 %v5223_v44, 0.0  ;;  %12378 = vmatprep.mubr.bf16.mxu0 %v16002_v37  ;;  %8119 = vmatprep.subr.bf16.mxu1 %v13179_v27  ;;  %v5389_v26 = vmul.f32 %v16551_v11, %v5342_v61 }
 0x56f   : > { %5442 = vadd.xlane.f32.xlu0 %v5441_v28  ;;  %5445 = vadd.xlane.f32.xlu1 %v5444_v60  ;;  %v5392_v58 = vmul.f32 %v16551_v11, %v5345_v18  ;;  %v5459_v7 = vsel %vm1687_vm0, %v5391_v29, 0.0  ;;  %v13195_v28 = vld [vmem:[%s18018_s12 + $0x7a0] ss:$36 sps:$4 sm:$0xff]  }
 0x570   : > { %v5390_v10 = vmul.f32 %v16551_v11, %v5343_v55  ;;  %v5453_v9 = vsel %vm1687_vm0, %v5389_v26, 0.0 }
 0x571   : > { %8120 = vmatpush1.bf16.msra.mxu1 %v13177_v41  ;;  %v5462_v12 = vsel %vm1687_vm0, %v5392_v58, 0.0  ;;  %v13197_v41 = vld [vmem:[%s18018_s12 + $0x7a4] ss:$36 sps:$4 sm:$0xff]  }
 0x572   : > { %8121 = vmatprep.subr.bf16.mxu1 %v13182_v25  ;;  %v5456_v47 = vsel %vm1687_vm0, %v5390_v10, 0.0 }
 0x573   : > { %5460 = vadd.xlane.f32.xlu0 %v5459_v7  ;;  %5463 = vadd.xlane.f32.xlu1 %v5462_v12 }
 0x574   : > { %8099 = vmatmul.mubr.bf16.gmra.mrb[12].mxu1 %v15401_v13  ;;  %12379 = vmatmul.mubr.bf16.gmra.mrb[76].mxu0 %v15997_v17 }
 0x575   : > { %8122 = vmatpush1.bf16.msra.mxu1 %v13180_v21  ;;  %8141 = vmatprep.mubr.bf16.mxu1 %v15853_v39  ;;  %v13200_v21 = vld [vmem:[%s18018_s12 + $0x7ec] ss:$36 sps:$4 sm:$0xff]  }
 0x576   : > { %8123 = vmatprep.subr.bf16.mxu1 %v13185_v38 }
 0x577   : > { %5454 = vadd.xlane.f32.xlu0 %v5453_v9  ;;  %5457 = vadd.xlane.f32.xlu1 %v5456_v47 }
 0x579   : > { %8124 = vmatpush1.bf16.msra.mxu1 %v13183_v62 }
 0x57a   : > { %8125 = vmatprep.subr.bf16.mxu1 %v13188_v40 }
 0x57d   : > { %8126 = vmatpush1.bf16.msra.mxu1 %v13186_v4 }
 0x57e   : > { %v12336_v49 = vpop.f32.mrb[232].mxu1  ;;  %8127 = vmatprep.subr.bf16.mxu1 %v13191_v43  ;;  %v13198_v43 = vld [vmem:[%s18018_s12 + $0x7e8] ss:$36 sps:$4 sm:$0xff]  }
 0x57f   : > { %v5244_v16 = vadd.f32 %v12336_v49, %v16535_v1  ;;  %v5235_v42 = vpop.f32.mrb[233].mxu1 }
 0x580   : > { %v5236_v34 = vadd.f32 %v16535_v1, %v5235_v42  ;;  %v12337_v27 = vpop.f32.mrb[234].mxu1 }
 0x581   : > { %v5348_v3 = vmax.f32 %v5244_v16, 0.0  ;;  %8128 = vmatpush1.bf16.msra.mxu1 %v13189_v53  ;;  %v5247_v51 = vadd.f32 %v12337_v27, %v16535_v1  ;;  %v5238_v33 = vpop.f32.mrb[235].mxu1  ;;  %v13203_v16 = vld [vmem:[%s18018_s12 + $0x834] ss:$36 sps:$4 sm:$0xff]  }
 0x582   : > { %v5346_v44 = vmax.f32 %v5236_v34, 0.0  ;;  %v5239_v18 = vadd.f32 %v16535_v1, %v5238_v33  ;;  %8129 = vmatprep.subr.bf16.mxu1 %v13194_v36 }
 0x583   : > { %v5349_v29 = vmax.f32 %v5247_v51, 0.0  ;;  %v5395_v61 = vmul.f32 %v16551_v11, %v5348_v3  ;;  %v13201_v51 = vld [vmem:[%s18018_s12 + $0x830] ss:$36 sps:$4 sm:$0xff]  }
 0x584   : > { %v5347_v55 = vmax.f32 %v5239_v18, 0.0  ;;  %v5393_v58 = vmul.f32 %v16551_v11, %v5346_v44  ;;  %v13206_v18 = vld [vmem:[%s18018_s12 + $0x87c] ss:$36 sps:$4 sm:$0xff]  }
 0x585   : > { %8130 = vmatpush1.bf16.msra.mxu1 %v13192_v23  ;;  %v5471_v60 = vsel %vm1687_vm0, %v5395_v61, 0.0  ;;  %v5396_v25 = vmul.f32 %v16551_v11, %v5349_v29  ;;  %v13204_v61 = vld [vmem:[%s18018_s12 + $0x878] ss:$36 sps:$4 sm:$0xff]  }
 0x586   : > { %v12340_v7 = vpop.f32.mrb[236].mxu1  ;;  %8131 = vmatprep.subr.bf16.mxu1 %v13197_v41  ;;  %5472 = vadd.xlane.f32.xlu0 %v5471_v60  ;;  %v5394_v10 = vmul.f32 %v16551_v11, %v5347_v55  ;;  %v5465_v53 = vsel %vm1687_vm0, %v5393_v58, 0.0  ;;  %v13212_v58 = vld [vmem:[%s18018_s12 + $0x90c] ss:$36 sps:$4 sm:$0xff]  }
 0x587   : > { %v5260_v12 = vadd.f32 %v12340_v7, %v16535_v1  ;;  %v5251_v26 = vpop.f32.mrb[237].mxu1  ;;  %v5474_v38 = vsel %vm1687_vm0, %v5396_v25, 0.0  ;;  %v13207_v25 = vld [vmem:[%s18018_s12 + $0x8c0] ss:$36 sps:$4 sm:$0xff]   ;;  %v13210_v7 = vld [vmem:[%s18018_s12 + $0x908] ss:$36 sps:$4 sm:$0xff]  }
 0x588   : > { %v5252_v62 = vadd.f32 %v16535_v1, %v5251_v26  ;;  %v12341_v9 = vpop.f32.mrb[238].mxu1  ;;  %5475 = vadd.xlane.f32.xlu1 %v5474_v38  ;;  %v5468_v34 = vsel %vm1687_vm0, %v5394_v10, 0.0  ;;  %v13218_v26 = vld [vmem:[%s18018_s12 + $0x99c] ss:$36 sps:$4 sm:$0xff]   ;;  %v13221_v10 = vld [vmem:[%s18018_s12 + $0x9e4] ss:$36 sps:$4 sm:$0xff]  }
 0x589   : > { %v5352_v47 = vmax.f32 %v5260_v12, 0.0  ;;  %8132 = vmatpush1.bf16.msra.mxu1 %v13195_v28  ;;  %v5263_v40 = vadd.f32 %v12341_v9, %v16535_v1  ;;  %v5254_v4 = vpop.f32.mrb[239].mxu1  ;;  %v13209_v28 = vld [vmem:[%s18018_s12 + $0x8c4] ss:$36 sps:$4 sm:$0xff]   ;;  %v13213_v12 = vld [vmem:[%s18018_s12 + $0x950] ss:$36 sps:$4 sm:$0xff]  }
 0x58a   : > { %v5350_v49 = vmax.f32 %v5252_v62, 0.0  ;;  %v5255_v36 = vadd.f32 %v16535_v1, %v5254_v4  ;;  %8133 = vmatprep.subr.bf16.mxu1 %v13200_v21  ;;  %5466 = vadd.xlane.f32.xlu0 %v5465_v53  ;;  %v13215_v21 = vld [vmem:[%s18018_s12 + $0x954] ss:$36 sps:$4 sm:$0xff]   ;;  %v13219_v62 = vld [vmem:[%s18018_s12 + $0x9e0] ss:$36 sps:$4 sm:$0xff]  }
 0x58b   : > { %v5353_v42 = vmax.f32 %v5263_v40, 0.0  ;;  %v5399_v27 = vmul.f32 %v16551_v11, %v5352_v47  ;;  %v13216_v38 = vld [vmem:[%s18018_s12 + $0x998] ss:$36 sps:$4 sm:$0xff]   ;;  %v13224_v9 = vld [vmem:[%s18018_s12 + $0xa2c] ss:$36 sps:$4 sm:$0xff]  }
 0x58c   : > { %v5351_v3 = vmax.f32 %v5255_v36, 0.0  ;;  %5469 = vadd.xlane.f32.xlu1 %v5468_v34  ;;  %v5397_v44 = vmul.f32 %v16551_v11, %v5350_v49  ;;  %v13222_v47 = vld [vmem:[%s18018_s12 + $0xa28] ss:$36 sps:$4 sm:$0xff]   ;;  %v13227_v40 = vld [vmem:[%s18018_s12 + $0xa74] ss:$36 sps:$4 sm:$0xff]  }
 0x58d   : > { %8134 = vmatpush1.bf16.msra.mxu1 %v13198_v43  ;;  %v5483_v33 = vsel %vm1687_vm0, %v5399_v27, 0.0  ;;  %v5400_v23 = vmul.f32 %v16551_v11, %v5353_v42  ;;  %v13225_v4 = vld [vmem:[%s18018_s12 + $0xa70] ss:$36 sps:$4 sm:$0xff]   ;;  %v13230_v43 = vld [vmem:[%s18018_s12 + $0xabc] ss:$36 sps:$4 sm:$0xff]  }
 0x58e   : > { %8135 = vmatprep.subr.bf16.mxu1 %v13203_v16  ;;  %5484 = vadd.xlane.f32.xlu0 %v5483_v33  ;;  %v5398_v29 = vmul.f32 %v16551_v11, %v5351_v3  ;;  %v5477_v55 = vsel %vm1687_vm0, %v5397_v44, 0.0  ;;  %v13228_v53 = vld [vmem:[%s18018_s12 + $0xab8] ss:$36 sps:$4 sm:$0xff]   ;;  %v13233_v49 = vld [vmem:[%s18018_s12 + $0xb04] ss:$36 sps:$4 sm:$0xff]  }
 0x58f   : > { %v5486_v41 = vsel %vm1687_vm0, %v5400_v23, 0.0  ;;  %v13231_v36 = vld [vmem:[%s18018_s12 + $0xb00] ss:$36 sps:$4 sm:$0xff]   ;;  %v13234_v42 = vld [vmem:[%s18018_s12 + $0x18] ss:$36 sps:$4 sm:$0xff]  }
 0x590   : > { %5487 = vadd.xlane.f32.xlu1 %v5486_v41  ;;  %v5480_v60 = vsel %vm1687_vm0, %v5398_v29, 0.0  ;;  %v13236_v16 = vld [vmem:[%s18018_s12 + $0x1c] ss:$36 sps:$4 sm:$0xff]   ;;  %v13239_v34 = vld [vmem:[%s18018_s12 + $0x64] ss:$36 sps:$4 sm:$0xff]  }
 0x591   : > { %8136 = vmatpush1.bf16.msra.mxu1 %v13201_v51  ;;  %v13237_v27 = vld [vmem:[%s18018_s12 + $0x60] ss:$36 sps:$4 sm:$0xff]   ;;  %v13242_v3 = vld [vmem:[%s18018_s12 + $0xac] ss:$36 sps:$4 sm:$0xff]   ;;  %v13245_v33 = vld [vmem:[%s18018_s12 + $0xf4] ss:$36 sps:$4 sm:$0xff]  }
 0x592   : > { %8137 = vmatprep.subr.bf16.mxu1 %v13206_v18  ;;  %5478 = vadd.xlane.f32.xlu0 %v5477_v55  ;;  %v13240_v51 = vld [vmem:[%s18018_s12 + $0xa8] ss:$36 sps:$4 sm:$0xff]   ;;  %v13243_v23 = vld [vmem:[%s18018_s12 + $0xf0] ss:$36 sps:$4 sm:$0xff]   ;;  %v13248_v44 = vld [vmem:[%s18018_s12 + $0x13c] ss:$36 sps:$4 sm:$0xff]  }
 0x593   : > { %v13246_v18 = vld [vmem:[%s18018_s12 + $0x138] ss:$36 sps:$4 sm:$0xff]   ;;  %v13251_v41 = vld [vmem:[%s18018_s12 + $0x184] ss:$36 sps:$4 sm:$0xff]   ;;  %v13254_v55 = vld [vmem:[%s18018_s12 + $0x1cc] ss:$36 sps:$4 sm:$0xff]  }
 0x594   : > { %5481 = vadd.xlane.f32.xlu1 %v5480_v60  ;;  %v13249_v29 = vld [vmem:[%s18018_s12 + $0x180] ss:$36 sps:$4 sm:$0xff]  }
 0x595   : > { %8138 = vmatpush1.bf16.msra.mxu1 %v13204_v61 }
 0x596   : > { %8139 = vmatprep.subr.bf16.mxu1 %v13209_v28 }
 0x599   : > { %8140 = vmatpush1.bf16.msra.mxu1 %v13207_v25 }
 0x59a   : > { %8182 = vmatprep.subr.bf16.mxu1 %v13212_v58 }
 0x59c   : > { %8142 = vmatmul.mubr.bf16.vlgmr.msra.gmra.mrb[0].mxu1 %v15745_v19 }
 0x59d   : > { %8151 = vmatprep.mubr.bf16.mxu1 %v15850_v14  ;;  %8183 = vmatpush1.bf16.msra.mxu1 %v13210_v7 }
 0x59e   : > { %8184 = vmatprep.subr.bf16.mxu1 %v13215_v21 }
 0x5a1   : > { %8185 = vmatpush1.bf16.msra.mxu1 %v13213_v12 }
 0x5a2   : > { %8186 = vmatprep.subr.bf16.mxu1 %v13218_v26  ;;  %v13252_v26 = vld [vmem:[%s18018_s12 + $0x1c8] ss:$36 sps:$4 sm:$0xff]  }
 0x5a4   : > { %8152 = vmatmul.mubr.bf16.gmra.mrb[4].mxu1 %v15739_v52 }
 0x5a5   : > { %8161 = vmatprep.mubr.bf16.mxu1 %v15875_v50  ;;  %8187 = vmatpush1.bf16.msra.mxu1 %v13216_v38 }
 0x5a6   : > { %8188 = vmatprep.subr.bf16.mxu1 %v13221_v10 }
 0x5a9   : > { %8189 = vmatpush1.bf16.msra.mxu1 %v13219_v62  ;;  %v13257_v62 = vld [vmem:[%s18018_s12 + $0x214] ss:$36 sps:$4 sm:$0xff]  }
 0x5aa   : > { %8190 = vmatprep.subr.bf16.mxu1 %v13224_v9 }
 0x5ac   : > { %8162 = vmatmul.mubr.bf16.gmra.mrb[8].mxu1 %v15764_v31 }
 0x5ad   : > { %8171 = vmatprep.mubr.bf16.mxu1 %v15873_v48  ;;  %8191 = vmatpush1.bf16.msra.mxu1 %v13222_v47 }
 0x5ae   : > { %8192 = vmatprep.subr.bf16.mxu1 %v13227_v40 }
 0x5b1   : > { %8193 = vmatpush1.bf16.msra.mxu1 %v13225_v4  ;;  %v13255_v4 = vld [vmem:[%s18018_s12 + $0x210] ss:$36 sps:$4 sm:$0xff]  }
 0x5b2   : > { %8194 = vmatprep.subr.bf16.mxu1 %v13230_v43 }
 0x5b4   : > { %8172 = vmatmul.mubr.bf16.gmra.mrb[12].mxu1 %v15759_v45 }
 0x5b5   : > { %8195 = vmatpush1.bf16.msra.mxu1 %v13228_v53  ;;  %8214 = vmatprep.mubr.bf16.mxu1 %v18052_v6 }
 0x5b6   : > { %8196 = vmatprep.subr.bf16.mxu1 %v13233_v49 }
 0x5b9   : > { %8197 = vmatpush1.bf16.msra.mxu1 %v13231_v36 }
 0x5ba   : > { %8474 = vmatprep.subr.bf16.mxu1 %v13236_v16  ;;  %v13260_v16 = vld [vmem:[%s18018_s12 + $0x25c] ss:$36 sps:$4 sm:$0xff]  }
 0x5bc   : > { %8215 = vmatmul.mubr.bf16.vlgmr.msra.gmra.mrb[0].mxu1 %v15981_v0 }
 0x5bd   : > { %8475 = vmatpush1.bf16.msra.mxu1 %v13234_v42  ;;  %8224 = vmatprep.mubr.bf16.mxu1 %v18052_v6 }
 0x5be   : > { %8476 = vmatprep.subr.bf16.mxu1 %v13239_v34 }
 0x5c1   : > { %8477 = vmatpush1.bf16.msra.mxu1 %v13237_v27 }
 0x5c2   : > { %8478 = vmatprep.subr.bf16.mxu1 %v13242_v3 }
 0x5c4   : > { %8225 = vmatmul.mubr.bf16.gmra.mrb[4].mxu1 %v15975_v15 }
 0x5c5   : > { %8479 = vmatpush1.bf16.msra.mxu1 %v13240_v51  ;;  %8234 = vmatprep.mubr.bf16.mxu1 %v18052_v6 }
 0x5c6   : > { %8480 = vmatprep.subr.bf16.mxu1 %v13245_v33 }
 0x5c9   : > { %8481 = vmatpush1.bf16.msra.mxu1 %v13243_v23 }
 0x5ca   : > { %8482 = vmatprep.subr.bf16.mxu1 %v13248_v44 }
 0x5cc   : > { %8235 = vmatmul.mubr.bf16.gmra.mrb[8].mxu1 %v16002_v37 }
 0x5cd   : > { %8483 = vmatpush1.bf16.msra.mxu1 %v13246_v18  ;;  %8244 = vmatprep.mubr.bf16.mxu1 %v18052_v6  ;;  %v13258_v18 = vld [vmem:[%s18018_s12 + $0x258] ss:$36 sps:$4 sm:$0xff]  }
 0x5ce   : > { %v12344_v61 = vpop.f32.mrb[240].mxu1  ;;  %8484 = vmatprep.subr.bf16.mxu1 %v13251_v41 }
 0x5cf   : > { %v5276_v28 = vadd.f32 %v12344_v61, %v16535_v1  ;;  %v5267_v60 = vpop.f32.mrb[241].mxu1 }
 0x5d0   : > { %v5268_v25 = vadd.f32 %v16535_v1, %v5267_v60  ;;  %v12345_v58 = vpop.f32.mrb[242].mxu1 }
 0x5d1   : > { %v5356_v7 = vmax.f32 %v5276_v28, 0.0  ;;  %8485 = vmatpush1.bf16.msra.mxu1 %v13249_v29  ;;  %v5279_v21 = vadd.f32 %v12345_v58, %v16535_v1  ;;  %v5270_v12 = vpop.f32.mrb[243].mxu1 }
 0x5d2   : > { %v5354_v38 = vmax.f32 %v5268_v25, 0.0  ;;  %v5271_v10 = vadd.f32 %v16535_v1, %v5270_v12  ;;  %8486 = vmatprep.subr.bf16.mxu1 %v13254_v55  ;;  %v13263_v55 = vld [vmem:[%s18018_s12 + $0x2a4] ss:$36 sps:$4 sm:$0xff]  }
 0x5d3   : > { %v5357_v9 = vmax.f32 %v5279_v21, 0.0  ;;  %v5403_v47 = vmul.f32 %v16551_v11, %v5356_v7  ;;  %v13261_v7 = vld [vmem:[%s18018_s12 + $0x2a0] ss:$36 sps:$4 sm:$0xff]  }
 0x5d4   : > { %v5355_v40 = vmax.f32 %v5271_v10, 0.0  ;;  %8245 = vmatmul.mubr.bf16.gmra.mrb[12].mxu1 %v15997_v17  ;;  %v5401_v49 = vmul.f32 %v16551_v11, %v5354_v38 }
 0x5d5   : > { %8487 = vmatpush1.bf16.msra.mxu1 %v13252_v26  ;;  %8506 = vmatprep.mubr.bf16.mxu1 %v15584_v57  ;;  %v5495_v43 = vsel %vm1687_vm0, %v5403_v47, 0.0  ;;  %v5404_v53 = vmul.f32 %v16551_v11, %v5357_v9  ;;  %v13266_v26 = vld [vmem:[%s18018_s12 + $0x2ec] ss:$36 sps:$4 sm:$0xff]  }
 0x5d6   : > { %v12348_v36 = vpop.f32.mrb[244].mxu1  ;;  %8488 = vmatprep.subr.bf16.mxu1 %v13257_v62  ;;  %5496 = vadd.xlane.f32.xlu0 %v5495_v43  ;;  %v5402_v27 = vmul.f32 %v16551_v11, %v5355_v40  ;;  %v5489_v41 = vsel %vm1687_vm0, %v5401_v49, 0.0  ;;  %v13264_v40 = vld [vmem:[%s18018_s12 + $0x2e8] ss:$36 sps:$4 sm:$0xff]   ;;  %v13269_v49 = vld [vmem:[%s18018_s12 + $0x334] ss:$36 sps:$4 sm:$0xff]  }
 0x5d7   : > { %v5292_v42 = vadd.f32 %v12348_v36, %v16535_v1  ;;  %v5283_v57 = vpop.f32.mrb[245].mxu1  ;;  %v5498_v34 = vsel %vm1687_vm0, %v5404_v53, 0.0 }
 0x5d8   : > { %v5284_v3 = vadd.f32 %v16535_v1, %v5283_v57  ;;  %v12349_v51 = vpop.f32.mrb[246].mxu1  ;;  %5499 = vadd.xlane.f32.xlu1 %v5498_v34  ;;  %v5492_v60 = vsel %vm1687_vm0, %v5402_v27, 0.0  ;;  %v13272_v34 = vld [vmem:[%s18018_s12 + $0x37c] ss:$36 sps:$4 sm:$0xff]  }
 0x5d9   : > { %v5360_v33 = vmax.f32 %v5292_v42, 0.0  ;;  %8489 = vmatpush1.bf16.msra.mxu1 %v13255_v4  ;;  %v5295_v23 = vadd.f32 %v12349_v51, %v16535_v1  ;;  %v5286_v44 = vpop.f32.mrb[247].mxu1  ;;  %v13267_v42 = vld [vmem:[%s18018_s12 + $0x330] ss:$36 sps:$4 sm:$0xff]  }
 0x5da   : > { %v5358_v29 = vmax.f32 %v5284_v3, 0.0  ;;  %v5287_v61 = vadd.f32 %v16535_v1, %v5286_v44  ;;  %8490 = vmatprep.subr.bf16.mxu1 %v13260_v16  ;;  %5490 = vadd.xlane.f32.xlu0 %v5489_v41 }
 0x5db   : > { %v5361_v28 = vmax.f32 %v5295_v23, 0.0  ;;  %v5407_v25 = vmul.f32 %v16551_v11, %v5360_v33  ;;  %v13270_v33 = vld [vmem:[%s18018_s12 + $0x378] ss:$36 sps:$4 sm:$0xff]  }
 0x5dc   : > { %v5359_v58 = vmax.f32 %v5287_v61, 0.0  ;;  %5493 = vadd.xlane.f32.xlu1 %v5492_v60  ;;  %v5405_v12 = vmul.f32 %v16551_v11, %v5358_v29 }
 0x5dd   : > { %8491 = vmatpush1.bf16.msra.mxu1 %v13258_v18  ;;  %v5507_v1 = vsel %vm1687_vm0, %v5407_v25, 0.0  ;;  %v5408_v21 = vmul.f32 %v16551_v11, %v5361_v28  ;;  %v13275_v18 = vld [vmem:[%s18018_s12 + $0x3c4] ss:$36 sps:$4 sm:$0xff]   ;;  %v13278_v28 = vld [vmem:[%s18018_s12 + $0x40c] ss:$36 sps:$4 sm:$0xff]  }
 0x5de   : > { %8492 = vmatprep.subr.bf16.mxu1 %v13263_v55  ;;  %5508 = vadd.xlane.f32.xlu0 %v5507_v1  ;;  %v5406_v62 = vmul.f32 %v16551_v11, %v5359_v58  ;;  %v5501_v4 = vsel %vm1687_vm0, %v5405_v12, 0.0  ;;  %v13273_v55 = vld [vmem:[%s18018_s12 + $0x3c0] ss:$36 sps:$4 sm:$0xff]  }
 0x5df   : > { %v8435_v38 = vpop.f32.mrb[24].mxu0  ;;  %v5510_v10 = vsel %vm1687_vm0, %v5408_v21, 0.0 }
 0x5e0   : > { %v8437_v9 = vpop.f32.mrb[25].mxu0  ;;  %5511 = vadd.xlane.f32.xlu1 %v5510_v10  ;;  %v5504_v36 = vsel %vm1687_vm0, %v5406_v62, 0.0  ;;  %v13281_v62 = vld [vmem:[%s18018_s12 + $0x454] ss:$36 sps:$4 sm:$0xff]  }
 0x5e1   : > { %8493 = vmatpush1.bf16.msra.mxu1 %v13261_v7  ;;  %v8439_v47 = vpop.f32.mrb[26].mxu0 }
 0x5e2   : > { %v16906_v43 = vpack.c.bf16 %v8439_v47, %v8435_v38  ;;  %v8441_v53 = vpop.f32.mrb[27].mxu0  ;;  %8494 = vmatprep.subr.bf16.mxu1 %v13266_v26  ;;  %5502 = vadd.xlane.f32.xlu0 %v5501_v4  ;;  %v13276_v26 = vld [vmem:[%s18018_s12 + $0x408] ss:$36 sps:$4 sm:$0xff]   ;;  %v13279_v4 = vld [vmem:[%s18018_s12 + $0x450] ss:$36 sps:$4 sm:$0xff]  }
 0x5e3   : > { %v16911_v11 = vpack.c.bf16 %v8441_v53, %v8437_v9 }
 0x5e4   : > { %5505 = vadd.xlane.f32.xlu1 %v5504_v36 }
 0x5e5   : > { %8495 = vmatpush1.bf16.msra.mxu1 %v13264_v40  ;;  %v5425_v16 = vpop.xlane.xlu1 %5424 }
 0x5e6   : > { %13400 = vtanh.f32 %v5425_v16  ;;  %v5419_v57 = vpop.xlane.xlu0 %5418  ;;  %8496 = vmatprep.subr.bf16.mxu1 %v13269_v49  ;;  %v13284_v49 = vld [vmem:[%s18018_s12 + $0x49c] ss:$36 sps:$4 sm:$0xff]  }
 0x5e7   : > { %v8445_v27 = vpop.f32.mrb[28].mxu0  ;;  %13402 = vtanh.f32 %v5419_v57 }
 0x5e8   : > { %v8447_v3 = vpop.f32.mrb[29].mxu0 }
 0x5e9   : > { %8497 = vmatpush1.bf16.msra.mxu1 %v13267_v42  ;;  %v8449_v51 = vpop.f32.mrb[30].mxu0 }
 0x5ea   : > { %v16923_v23 = vpack.c.bf16 %v8449_v51, %v8445_v27  ;;  %v8451_v44 = vpop.f32.mrb[31].mxu0  ;;  %8498 = vmatprep.subr.bf16.mxu1 %v13272_v34 }
 0x5eb   : > { %v16928_v41 = vpack.c.bf16 %v8451_v44, %v8447_v3  ;;  %v5428_v29 = vpop.xlane.xlu1 %5427  ;;  %v13282_v3 = vld [vmem:[%s18018_s12 + $0x498] ss:$36 sps:$4 sm:$0xff]  }
 0x5ec   : > { %13404 = vtanh.f32 %v5428_v29  ;;  %v5422_v61 = vpop.xlane.xlu0 %5421 }
 0x5ed   : > { %13406 = vtanh.f32 %v5422_v61  ;;  %8499 = vmatpush1.bf16.msra.mxu1 %v13270_v33 }
 0x5ee   : > { %8500 = vmatprep.subr.bf16.mxu1 %v13275_v18  ;;  %v13287_v18 = vld [vmem:[%s18018_s12 + $0x4e4] ss:$36 sps:$4 sm:$0xff]  }
 0x5ef   : > { %v8455_v60 = vpop.f32.mrb[32].mxu0  ;;  %v5440_v25 = vpop.xlane.xlu1 %5439 }
 0x5f0   : > { %v16943_v58 = vpop.eup %13400  ;;  %v5437_v7 = vpop.xlane.xlu0 %5436  ;;  %13408 = vtanh.f32 %v5440_v25  ;;  %v13290_v25 = vld [vmem:[%s18018_s12 + $0x52c] ss:$36 sps:$4 sm:$0xff]  }
 0x5f1   : > { %v8457_v1 = vpop.f32.mrb[33].mxu0  ;;  %v16945_v21 = vpop.eup %13402  ;;  %10352 = vst.msk [vmem:[%s16938_s2 + $0x10] sm:$0xff] %vm10349_vm1, %v16943_v58  ;;  %13410 = vtanh.f32 %v5437_v7  ;;  %8501 = vmatpush1.bf16.msra.mxu1 %v13273_v55 }
 0x5f2   : > { %v8459_v12 = vpop.f32.mrb[34].mxu0  ;;  %10350 = vst.msk [vmem:[%s16938_s2] sm:$0xff] %vm10349_vm1, %v16945_v21  ;;  %8502 = vmatprep.subr.bf16.mxu1 %v13278_v28 }
 0x5f3   : > { %v16956_v38 = vpack.c.bf16 %v8459_v12, %v8455_v60  ;;  %v8461_v10 = vpop.f32.mrb[35].mxu0  ;;  %v13285_v60 = vld [vmem:[%s18018_s12 + $0x4e0] ss:$36 sps:$4 sm:$0xff]  }
 0x5f4   : > { %v16961_v9 = vpack.c.bf16 %v8461_v10, %v8457_v1  ;;  %v5431_v47 = vpop.xlane.xlu0 %5430  ;;  %v5434_v40 = vpop.xlane.xlu1 %5433 }
 0x5f5   : > { %13412 = vtanh.f32 %v5431_v47  ;;  %8503 = vmatpush1.bf16.msra.mxu1 %v13276_v26  ;;  %v13288_v47 = vld [vmem:[%s18018_s12 + $0x528] ss:$36 sps:$4 sm:$0xff]  }
 0x5f6   : > { %v16966_v53 = vpop.eup %13404  ;;  %13414 = vtanh.f32 %v5434_v40  ;;  %8504 = vmatprep.subr.bf16.mxu1 %v13281_v62 }
 0x5f7   : > { %v16971_v36 = vpop.eup %13406  ;;  %10353 = vst.msk [vmem:[%s16938_s2 + $0x18] sm:$0xff] %vm10349_vm1, %v16966_v53  ;;  %v8465_v16 = vpop.f32.mrb[36].mxu0 }
 0x5f8   : > { %10351 = vst.msk [vmem:[%s16938_s2 + $0x8] sm:$0xff] %vm10349_vm1, %v16971_v36  ;;  %v5449_v42 = vpop.xlane.xlu0 %5448  ;;  %v8467_v57 = vpop.f32.mrb[37].mxu0 }
 0x5f9   : > { %13416 = vtanh.f32 %v5449_v42  ;;  %8505 = vmatpush1.bf16.msra.mxu1 %v13279_v4  ;;  %v5452_v34 = vpop.xlane.xlu1 %5451  ;;  %v8469_v27 = vpop.f32.mrb[38].mxu0  ;;  %v13293_v4 = vld [vmem:[%s18018_s12 + $0x574] ss:$36 sps:$4 sm:$0xff]  }
 0x5fa   : > { %v16982_v51 = vpop.eup %13408  ;;  %13418 = vtanh.f32 %v5452_v34  ;;  %v16984_v33 = vpack.c.bf16 %v8469_v27, %v8465_v16  ;;  %v8471_v44 = vpop.f32.mrb[39].mxu0  ;;  %8547 = vmatprep.subr.bf16.mxu1 %v13284_v49  ;;  %v13291_v27 = vld [vmem:[%s18018_s12 + $0x570] ss:$36 sps:$4 sm:$0xff]  }
 0x5fb   : > { %18202 = vst [vmem:[#allocation25_spill] sm:$0xff] %v16982_v51  ;;  %v16989_v29 = vpop.eup %13410  ;;  %10357 = vst.msk [vmem:[%s16938_s2 + $0x38] sm:$0xff] %vm10349_vm1, %v16982_v51  ;;  %v16994_v61 = vpack.c.bf16 %v8471_v44, %v8467_v57 }
 0x5fc   : > { %18203 = vst [vmem:[#allocation26_spill] sm:$0xff] %v16989_v29  ;;  %10356 = vst.msk [vmem:[%s16938_s2 + $0x30] sm:$0xff] %vm10349_vm1, %v16989_v29  ;;  %8507 = vmatmul.mubr.bf16.vlgmr.msra.gmra.mrb[16].mxu1 %v15387_v32  ;;  %v5443_v55 = vpop.xlane.xlu0 %5442 }
 0x5fd   : > { %13420 = vtanh.f32 %v5443_v55  ;;  %8516 = vmatprep.mubr.bf16.mxu1 %v15580_v8  ;;  %8548 = vmatpush1.bf16.msra.mxu1 %v13282_v3  ;;  %v5446_v28 = vpop.xlane.xlu1 %5445 }
 0x5fe   : > { %13422 = vtanh.f32 %v5446_v28  ;;  %8549 = vmatprep.subr.bf16.mxu1 %v13287_v18 }
 0x5ff   : > { %v17007_v7 = vpop.eup %13412  ;;  %v11622_v32 = vpop.f32.mrb[40].mxu0 }
 0x600   : > { %18204 = vst [vmem:[#allocation30_spill] sm:$0xff] %v17007_v7  ;;  %v17009_v1 = vpop.eup %13414  ;;  %10354 = vst.msk [vmem:[%s16938_s2 + $0x20] sm:$0xff] %vm10349_vm1, %v17007_v7  ;;  %v5461_v8 = vpop.xlane.xlu0 %5460 }
 0x601   : > { %18205 = vst [vmem:[#allocation32_spill] sm:$0xff] %v17009_v1  ;;  %v11623_v12 = vpop.f32.mrb[41].mxu0  ;;  %10355 = vst.msk [vmem:[%s16938_s2 + $0x28] sm:$0xff] %vm10349_vm1, %v17009_v1  ;;  %13424 = vtanh.f32 %v5461_v8  ;;  %8550 = vmatpush1.bf16.msra.mxu1 %v13285_v60  ;;  %v5464_v10 = vpop.xlane.xlu1 %5463  ;;  %v13294_v60 = vld [vmem:[%s18018_s12 + $0x5b8] ss:$36 sps:$4 sm:$0xff]  }
 0x602   : > { %v17017_v26 = vadd.f32 %v11623_v12, %v11622_v32  ;;  %v11625_v62 = vpop.f32.mrb[42].mxu0  ;;  %13426 = vtanh.f32 %v5464_v10  ;;  %8551 = vmatprep.subr.bf16.mxu1 %v13290_v25  ;;  %v13299_v32 = vld [vmem:[%s18018_s12 + $0x604] ss:$36 sps:$4 sm:$0xff]  }
 0x603   : > { %v11626_v40 = vpop.f32.mrb[43].mxu0  ;;  %v17025_v49 = vpop.eup %13416 }
 0x604   : > { %18206 = vst [vmem:[#allocation33_spill] sm:$0xff] %v17025_v49  ;;  %v17027_v16 = vadd.f32 %v11626_v40, %v11625_v62  ;;  %v17029_v42 = vpop.eup %13418  ;;  %10360 = vst.msk [vmem:[%s16938_s2 + $0x50] sm:$0xff] %vm10349_vm1, %v17025_v49  ;;  %8517 = vmatmul.mubr.bf16.gmra.mrb[20].mxu1 %v15383_v22  ;;  %v5455_v57 = vpop.xlane.xlu0 %5454  ;;  %v13296_v22 = vld [vmem:[%s18018_s12 + $0x5bc] ss:$36 sps:$4 sm:$0xff]  }
 0x605   : > { %18207 = vst [vmem:[#allocation34_spill] sm:$0xff] %v17029_v42  ;;  %10361 = vst.msk [vmem:[%s16938_s2 + $0x58] sm:$0xff] %vm10349_vm1, %v17029_v42  ;;  %13428 = vtanh.f32 %v5455_v57  ;;  %8526 = vmatprep.mubr.bf16.mxu1 %v15601_v24  ;;  %8552 = vmatpush1.bf16.msra.mxu1 %v13288_v47  ;;  %v5458_v34 = vpop.xlane.xlu1 %5457  ;;  %v13297_v62 = vld [vmem:[%s18018_s12 + $0x600] ss:$36 sps:$4 sm:$0xff]   ;;  %v13302_v47 = vld [vmem:[%s18018_s12 + $0x64c] ss:$36 sps:$4 sm:$0xff]  }
 0x606   : > { %13430 = vtanh.f32 %v5458_v34  ;;  %8553 = vmatprep.subr.bf16.mxu1 %v13293_v4 }
 0x607   : > { %v17045_v3 = vpop.eup %13420  ;;  %v11628_v44 = vpop.f32.mrb[44].mxu0 }
 0x608   : > { %18208 = vst [vmem:[#allocation35_spill] sm:$0xff] %v17045_v3  ;;  %v17047_v18 = vpop.eup %13422  ;;  %10358 = vst.msk [vmem:[%s16938_s2 + $0x40] sm:$0xff] %vm10349_vm1, %v17045_v3  ;;  %v11629_v24 = vpop.f32.mrb[45].mxu0 }
 0x609   : > { %18209 = vst [vmem:[#allocation36_spill] sm:$0xff] %v17047_v18  ;;  %10359 = vst.msk [vmem:[%s16938_s2 + $0x48] sm:$0xff] %vm10349_vm1, %v17047_v18  ;;  %8554 = vmatpush1.bf16.msra.mxu1 %v13291_v27  ;;  %v17055_v55 = vadd.f32 %v11629_v24, %v11628_v44  ;;  %v11631_v28 = vpop.f32.mrb[46].mxu0  ;;  %v13300_v27 = vld [vmem:[%s18018_s12 + $0x648] ss:$36 sps:$4 sm:$0xff]  }
 0x60a   : > { %v11632_v25 = vpop.f32.mrb[47].mxu0  ;;  %8555 = vmatprep.subr.bf16.mxu1 %v13296_v22  ;;  %v13305_v44 = vld [vmem:[%s18018_s12 + $0x694] ss:$36 sps:$4 sm:$0xff]  }
 0x60b   : > { %v17063_v8 = vpop.eup %13424  ;;  %v17065_v12 = vadd.f32 %v11632_v25, %v11631_v28  ;;  %v13303_v25 = vld [vmem:[%s18018_s12 + $0x690] ss:$36 sps:$4 sm:$0xff]  }
 0x60c   : > { %18210 = vst [vmem:[#allocation37_spill] sm:$0xff] %v17063_v8  ;;  %v17067_v10 = vpop.eup %13426  ;;  %10364 = vst.msk [vmem:[%s16938_s2 + $0x70] sm:$0xff] %vm10349_vm1, %v17063_v8  ;;  %8527 = vmatmul.mubr.bf16.gmra.mrb[24].mxu1 %v15404_v54 }
 0x60d   : > { %18211 = vst [vmem:[#allocation38_spill] sm:$0xff] %v17067_v10  ;;  %10365 = vst.msk [vmem:[%s16938_s2 + $0x78] sm:$0xff] %vm10349_vm1, %v17067_v10  ;;  %8536 = vmatprep.mubr.bf16.mxu1 %v15598_v30  ;;  %8556 = vmatpush1.bf16.msra.mxu1 %v13294_v60 }
 0x60e   : > { %8557 = vmatprep.subr.bf16.mxu1 %v13299_v32  ;;  %v13308_v32 = vld [vmem:[%s18018_s12 + $0x6dc] ss:$36 sps:$4 sm:$0xff]  }
 0x60f   : > { %v17083_v40 = vpop.eup %13428  ;;  %v11634_v4 = vpop.f32.mrb[48].mxu0 }
 0x610   : > { %18212 = vst [vmem:[#allocation39_spill] sm:$0xff] %v17083_v40  ;;  %v17085_v57 = vpop.eup %13430  ;;  %10362 = vst.msk [vmem:[%s16938_s2 + $0x60] sm:$0xff] %vm10349_vm1, %v17083_v40  ;;  %v11635_v54 = vpop.f32.mrb[49].mxu0 }
 0x611   : > { %18213 = vst [vmem:[#allocation40_spill] sm:$0xff] %v17085_v57  ;;  %10363 = vst.msk [vmem:[%s16938_s2 + $0x68] sm:$0xff] %vm10349_vm1, %v17085_v57  ;;  %8558 = vmatpush1.bf16.msra.mxu1 %v13297_v62  ;;  %v17093_v30 = vadd.f32 %v11635_v54, %v11634_v4  ;;  %v11637_v34 = vpop.f32.mrb[50].mxu0 }
 0x612   : > { %v11638_v22 = vpop.f32.mrb[51].mxu0  ;;  %8559 = vmatprep.subr.bf16.mxu1 %v13302_v47 }
 0x613   : > { %v17101_v24 = vadd.f32 %v11638_v22, %v11637_v34  ;;  %v5473_v28 = vpop.xlane.xlu0 %5472  ;;  %v13306_v34 = vld [vmem:[%s18018_s12 + $0x6d8] ss:$36 sps:$4 sm:$0xff]   ;;  %v13311_v22 = vld [vmem:[%s18018_s12 + $0x724] ss:$36 sps:$4 sm:$0xff]  }
 0x614   : > { %8537 = vmatmul.mubr.bf16.gmra.mrb[28].mxu1 %v15401_v13  ;;  %13432 = vtanh.f32 %v5473_v28 }
 0x615   : > { %8560 = vmatpush1.bf16.msra.mxu1 %v13300_v27  ;;  %8579 = vmatprep.mubr.bf16.mxu1 %v15853_v39  ;;  %v5476_v60 = vpop.xlane.xlu1 %5475 }
 0x616   : > { %13434 = vtanh.f32 %v5476_v60  ;;  %8561 = vmatprep.subr.bf16.mxu1 %v13305_v44 }
 0x617   : > { %v11640_v62 = vpop.f32.mrb[52].mxu0  ;;  %v5467_v47 = vpop.xlane.xlu0 %5466 }
 0x618   : > { %v11641_v4 = vpop.f32.mrb[53].mxu0  ;;  %13436 = vtanh.f32 %v5467_v47 }
 0x619   : > { %8562 = vmatpush1.bf16.msra.mxu1 %v13303_v25  ;;  %v17111_v13 = vadd.f32 %v11641_v4, %v11640_v62  ;;  %v11643_v54 = vpop.f32.mrb[54].mxu0  ;;  %v5470_v39 = vpop.xlane.xlu1 %5469  ;;  %v13309_v25 = vld [vmem:[%s18018_s12 + $0x720] ss:$36 sps:$4 sm:$0xff]  }
 0x61a   : > { %v11644_v27 = vpop.f32.mrb[55].mxu0  ;;  %13438 = vtanh.f32 %v5470_v39  ;;  %8563 = vmatprep.subr.bf16.mxu1 %v13308_v32  ;;  %v13314_v32 = vld [vmem:[%s18018_s12 + $0x76c] ss:$36 sps:$4 sm:$0xff]   ;;  %v17135_v4 = vld [vmem:[%s18016_s10] ss:$0 sm:$0xff] }
 0x61b   : > { %v17119_v44 = vadd.f32 %v11644_v27, %v11643_v54  ;;  %v5485_v28 = vpop.xlane.xlu0 %5484 }
 0x61c   : > { %13440 = vtanh.f32 %v5485_v28 }
 0x61d   : > { %8564 = vmatpush1.bf16.msra.mxu1 %v13306_v34  ;;  %v5488_v60 = vpop.xlane.xlu1 %5487 }
 0x61e   : > { %v17124_v62 = vpop.eup %13432  ;;  %13442 = vtanh.f32 %v5488_v60  ;;  %v12352_v47 = vpop.f32.mrb[248].mxu1  ;;  %8565 = vmatprep.subr.bf16.mxu1 %v13311_v22 }
 0x61f   : > { %18214 = vst [vmem:[#allocation41_spill] sm:$0xff] %v17124_v62  ;;  %10368 = vst.msk [vmem:[%s16938_s2 + $0x90] sm:$0xff] %vm10349_vm1, %v17124_v62  ;;  %v5308_v54 = vadd.f32 %v17135_v4, %v12352_v47  ;;  %v11662_v39 = vpop.f32.mrb[56].mxu0  ;;  %v5299_v34 = vpop.f32.mrb[249].mxu1  ;;  %v13312_v47 = vld [vmem:[%s18018_s12 + $0x768] ss:$36 sps:$4 sm:$0xff]  }
 0x620   : > { %v17138_v27 = vpop.eup %13434  ;;  %v5300_v22 = vadd.f32 %v17135_v4, %v5299_v34  ;;  %v11663_v28 = vpop.f32.mrb[57].mxu0 }
 0x621   : > { %18215 = vst [vmem:[#allocation42_spill] sm:$0xff] %v17138_v27  ;;  %v5479_v60 = vpop.xlane.xlu0 %5478  ;;  %10369 = vst.msk [vmem:[%s16938_s2 + $0x98] sm:$0xff] %vm10349_vm1, %v17138_v27  ;;  %v5364_v6 = vmax.f32 %v5308_v54, 0.0  ;;  %8566 = vmatpush1.bf16.msra.mxu1 %v13309_v25  ;;  %v11664_v62 = vadd.f32 %v11663_v28, %v11662_v39  ;;  %v12353_v57 = vpop.f32.mrb[250].mxu1  ;;  %v13317_v25 = vld [vmem:[%s18018_s12 + $0x7b4] ss:$36 sps:$4 sm:$0xff]  }
 0x622   : > { %v11665_v40 = vpop.f32.mrb[58].mxu0  ;;  %v17147_v10 = vpop.eup %13436  ;;  %v5362_v8 = vmax.f32 %v5300_v22, 0.0  ;;  %13444 = vtanh.f32 %v5479_v60  ;;  %v5311_v34 = vadd.f32 %v17135_v4, %v12353_v57  ;;  %8567 = vmatprep.subr.bf16.mxu1 %v13314_v32  ;;  %v17164_v57 = vld [vmem:[%s18017_s11] ss:$0 sm:$0xff] }
 0x623   : > { %18216 = vst [vmem:[#allocation43_spill] sm:$0xff] %v17147_v10  ;;  %v5302_v18 = vpop.f32.mrb[251].mxu1  ;;  %v11666_v3 = vpop.f32.mrb[59].mxu0  ;;  %10366 = vst.msk [vmem:[%s16938_s2 + $0x80] sm:$0xff] %vm10349_vm1, %v17147_v10  ;;  %v5411_v32 = vmul.f32 %v17164_v57, %v5364_v6  ;;  %v13320_v6 = vld [vmem:[%s18018_s12 + $0x7fc] ss:$36 sps:$4 sm:$0xff]  }
 0x624   : > { %v5303_v54 = vadd.f32 %v17135_v4, %v5302_v18  ;;  %v5482_v39 = vpop.xlane.xlu1 %5481  ;;  %v17157_v28 = vpop.eup %13438  ;;  %v5365_v22 = vmax.f32 %v5311_v34, 0.0  ;;  %v17159_v27 = vadd.f32 %v11666_v3, %v11665_v40  ;;  %v13315_v18 = vld [vmem:[%s18018_s12 + $0x7b0] ss:$36 sps:$4 sm:$0xff]  }
 0x625   : > { %18217 = vst [vmem:[#allocation44_spill] sm:$0xff] %v17157_v28  ;;  %13446 = vtanh.f32 %v5482_v39  ;;  %10367 = vst.msk [vmem:[%s16938_s2 + $0x88] sm:$0xff] %vm10349_vm1, %v17157_v28  ;;  %8568 = vmatpush1.bf16.msra.mxu1 %v13312_v47  ;;  %v5519_v34 = vsel %vm1687_vm0, %v5411_v32, 0.0  ;;  %v17182_v47 = vadd.f32 %v11664_v62, %v17017_v26 }
 0x626   : > { %v5363_v60 = vmax.f32 %v5303_v54, 0.0  ;;  %v17173_v3 = vpop.eup %13440  ;;  %v12356_v40 = vpop.f32.mrb[252].mxu1  ;;  %8569 = vmatprep.subr.bf16.mxu1 %v13317_v25  ;;  %v5412_v39 = vmul.f32 %v17164_v57, %v5365_v22  ;;  %v5409_v54 = vmul.f32 %v17164_v57, %v5362_v8  ;;  %5520 = vadd.xlane.f32.xlu0 %v5519_v34  ;;  %v13318_v34 = vld [vmem:[%s18018_s12 + $0x7f8] ss:$36 sps:$4 sm:$0xff]  }
 0x627   : > { %18218 = vst [vmem:[#allocation45_spill] sm:$0xff] %v17173_v3  ;;  %10372 = vst.msk [vmem:[%s16938_s2 + $0xb0] sm:$0xff] %vm10349_vm1, %v17173_v3  ;;  %v5324_v28 = vadd.f32 %v17135_v4, %v12356_v40  ;;  %v11668_v25 = vpop.f32.mrb[60].mxu0  ;;  %v5315_v32 = vpop.f32.mrb[253].mxu1 }
 0x628   : > { %v17188_v10 = vpop.eup %13442  ;;  %v5316_v22 = vadd.f32 %v17135_v4, %v5315_v32  ;;  %v11669_v42 = vpop.f32.mrb[61].mxu0  ;;  %v5522_v1 = vsel %vm1687_vm0, %v5412_v39, 0.0  ;;  %v5410_v8 = vmul.f32 %v17164_v57, %v5363_v60  ;;  %v5513_v32 = vsel %vm1687_vm0, %v5409_v54, 0.0 }
 0x629   : > { %18219 = vst [vmem:[#allocation46_spill] sm:$0xff] %v17188_v10  ;;  %v12357_v49 = vpop.f32.mrb[254].mxu1  ;;  %10373 = vst.msk [vmem:[%s16938_s2 + $0xb8] sm:$0xff] %vm10349_vm1, %v17188_v10  ;;  %v5368_v26 = vmax.f32 %v5324_v28, 0.0  ;;  %8570 = vmatpush1.bf16.msra.mxu1 %v13315_v18  ;;  %v11671_v62 = vpop.f32.mrb[62].mxu0  ;;  %5523 = vadd.xlane.f32.xlu1 %v5522_v1  ;;  %v11670_v7 = vadd.f32 %v11669_v42, %v11668_v25 }
 0x62a   : > { %v5318_v40 = vpop.f32.mrb[255].mxu1  ;;  %v5366_v3 = vmax.f32 %v5316_v22, 0.0  ;;  %v5327_v39 = vadd.f32 %v17135_v4, %v12357_v49  ;;  %v11672_v51 = vpop.f32.mrb[63].mxu0  ;;  %8571 = vmatprep.subr.bf16.mxu1 %v13320_v6  ;;  %v13323_v1 = vld [vmem:[%s18018_s12 + $0x844] ss:$36 sps:$4 sm:$0xff]   ;;  %5514 = vadd.xlane.f32.xlu0 %v5513_v32  ;;  %v5516_v54 = vsel %vm1687_vm0, %v5410_v8, 0.0 }
 0x62b   : > { %v5319_v60 = vadd.f32 %v17135_v4, %v5318_v40  ;;  %v11673_v28 = vadd.f32 %v11672_v51, %v11671_v62  ;;  %v13321_v49 = vld [vmem:[%s18018_s12 + $0x840] ss:$36 sps:$4 sm:$0xff]   ;;  %v8801_v51 = vadd.f32 %v11670_v7, %v17055_v55  ;;  %v13326_v22 = vld [vmem:[%s18018_s12 + $0x88c] ss:$36 sps:$4 sm:$0xff]   ;;  %v5415_v8 = vmul.f32 %v17164_v57, %v5368_v26 }
 0x62c   : > { %v17205_v18 = vpop.eup %13444  ;;  %v5369_v10 = vmax.f32 %v5327_v39, 0.0  ;;  %v5413_v42 = vmul.f32 %v17164_v57, %v5366_v3  ;;  %v8796_v7 = vadd.f32 %v17159_v27, %v17027_v16  ;;  %v13324_v26 = vld [vmem:[%s18018_s12 + $0x888] ss:$36 sps:$4 sm:$0xff]   ;;  %v13329_v16 = vld [vmem:[%s18018_s12 + $0x8d4] ss:$36 sps:$4 sm:$0xff]  }
 0x62d   : > { %v5367_v29 = vmax.f32 %v5319_v60, 0.0  ;;  %10370 = vst.msk [vmem:[%s16938_s2 + $0xa0] sm:$0xff] %vm10349_vm1, %v17205_v18  ;;  %8572 = vmatpush1.bf16.msra.mxu1 %v13318_v34  ;;  %5517 = vadd.xlane.f32.xlu1 %v5516_v54  ;;  %v8804_v4 = vadd.f32 %v11673_v28, %v17065_v12  ;;  %v5531_v39 = vsel %vm1687_vm0, %v5415_v8, 0.0  ;;  %v13327_v60 = vld [vmem:[%s18018_s12 + $0x8d0] ss:$36 sps:$4 sm:$0xff]  }
 0x62e   : > { %8573 = vmatprep.subr.bf16.mxu1 %v13323_v1  ;;  %v5525_v25 = vsel %vm1687_vm0, %v5413_v42, 0.0  ;;  %v5416_v40 = vmul.f32 %v17164_v57, %v5369_v10  ;;  %v13332_v28 = vld [vmem:[%s18018_s12 + $0x91c] ss:$36 sps:$4 sm:$0xff]  }
 0x62f   : > { %v17217_v6 = vpop.eup %13446  ;;  %v5414_v3 = vmul.f32 %v17164_v57, %v5367_v29  ;;  %v11674_v62 = vpop.f32.mrb[64].mxu0  ;;  %5526 = vadd.xlane.f32.xlu0 %v5525_v25  ;;  %v13330_v25 = vld [vmem:[%s18018_s12 + $0x918] ss:$36 sps:$4 sm:$0xff]  }
 0x630   : > { %10371 = vst.msk [vmem:[%s16938_s2 + $0xa8] sm:$0xff] %vm10349_vm1, %v17217_v6  ;;  %v11675_v55 = vpop.f32.mrb[65].mxu0  ;;  %v5534_v57 = vsel %vm1687_vm0, %v5416_v40, 0.0 }
 0x631   : > { %v5528_v12 = vsel %vm1687_vm0, %v5414_v3, 0.0  ;;  %8574 = vmatpush1.bf16.msra.mxu1 %v13321_v49  ;;  %v11676_v29 = vadd.f32 %v11675_v55, %v11674_v62  ;;  %v11677_v34 = vpop.f32.mrb[66].mxu0  ;;  %v13333_v62 = vld [vmem:[%s18018_s12 + $0x960] ss:$36 sps:$4 sm:$0xff]  }
 0x632   : > { %5529 = vadd.xlane.f32.xlu1 %v5528_v12  ;;  %v11678_v32 = vpop.f32.mrb[67].mxu0  ;;  %8575 = vmatprep.subr.bf16.mxu1 %v13326_v22  ;;  %v13338_v12 = vld [vmem:[%s18018_s12 + $0x9ac] ss:$36 sps:$4 sm:$0xff]  }
 0x633   : > { %v11679_v27 = vadd.f32 %v11678_v32, %v11677_v34  ;;  %5532 = vadd.xlane.f32.xlu0 %v5531_v39  ;;  %v8809_v10 = vadd.f32 %v11676_v29, %v17093_v30 }
 0x635   : > { %8576 = vmatpush1.bf16.msra.mxu1 %v13324_v26  ;;  %v8812_v1 = vadd.f32 %v11679_v27, %v17101_v24  ;;  %v13335_v24 = vld [vmem:[%s18018_s12 + $0x964] ss:$36 sps:$4 sm:$0xff]  }
 0x636   : > { %5535 = vadd.xlane.f32.xlu1 %v5534_v57  ;;  %8577 = vmatprep.subr.bf16.mxu1 %v13329_v16 }
 0x637   : > { %v11680_v54 = vpop.f32.mrb[68].mxu0 }
 0x638   : > { %v11681_v42 = vpop.f32.mrb[69].mxu0 }
 0x639   : > { %8578 = vmatpush1.bf16.msra.mxu1 %v13327_v60  ;;  %v11682_v49 = vadd.f32 %v11681_v42, %v11680_v54  ;;  %v11683_v30 = vpop.f32.mrb[70].mxu0  ;;  %v13347_v42 = vld [vmem:[%s18018_s12 + $0xa84] ss:$36 sps:$4 sm:$0xff]  }
 0x63a   : > { %v11684_v3 = vpop.f32.mrb[71].mxu0  ;;  %8620 = vmatprep.subr.bf16.mxu1 %v13332_v28 }
 0x63b   : > { %v11685_v22 = vadd.f32 %v11684_v3, %v11683_v30  ;;  %v8817_v8 = vadd.f32 %v11682_v49, %v17111_v13  ;;  %v13350_v3 = vld [vmem:[%s18018_s12 + $0xacc] ss:$36 sps:$4 sm:$0xff]  }
 0x63c   : > { %8580 = vmatmul.mubr.bf16.vlgmr.msra.gmra.mrb[16].mxu1 %v15745_v19 }
 0x63d   : > { %8589 = vmatprep.mubr.bf16.mxu1 %v15850_v14  ;;  %8621 = vmatpush1.bf16.msra.mxu1 %v13330_v25  ;;  %v8820_v55 = vadd.f32 %v11685_v22, %v17119_v44  ;;  %v13336_v14 = vld [vmem:[%s18018_s12 + $0x9a8] ss:$36 sps:$4 sm:$0xff]   ;;  %v13341_v44 = vld [vmem:[%s18018_s12 + $0x9f4] ss:$36 sps:$4 sm:$0xff]  }
 0x63e   : > { %8622 = vmatprep.subr.bf16.mxu1 %v13335_v24  ;;  %v18220_v24 = vmov 0  }
 0x63f   : > { %v12376_v40 = vpop.f32.mrb[72].mxu0 }
 0x640   : > { %v8866_v29 = vadd.f32 %v12376_v40, %v8801_v51  ;;  %v8857_v34 = vpop.f32.mrb[73].mxu0 }
 0x641   : > { %8623 = vmatpush1.bf16.msra.mxu1 %v13333_v62  ;;  %v8858_v19 = vadd.f32 %v8857_v34, %v17182_v47  ;;  %v12377_v13 = vpop.f32.mrb[74].mxu0  ;;  %v13339_v47 = vld [vmem:[%s18018_s12 + $0x9f0] ss:$36 sps:$4 sm:$0xff]   ;;  %v13354_v62 = vld [vmem:[%s18019_s13 + $0x20] sm:$0xff]   ;;  %v13355_v34 = vld [vmem:[%s18019_s13 + $0x28] sm:$0xff]  }
 0x642   : > { %v8869_v26 = vadd.f32 %v12377_v13, %v8804_v4  ;;  %v8860_v32 = vpop.f32.mrb[75].mxu0  ;;  %8624 = vmatprep.subr.bf16.mxu1 %v13338_v12  ;;  %v13344_v4 = vld [vmem:[%s18018_s12 + $0xa3c] ss:$36 sps:$4 sm:$0xff]  }
 0x643   : > { %v8861_v39 = vadd.f32 %v8860_v32, %v8796_v7 }
 0x644   : > { %v17271_v16 = vpack.c.bf16 %v8869_v26, %v8866_v29  ;;  %8590 = vmatmul.mubr.bf16.gmra.mrb[20].mxu1 %v15739_v52  ;;  %v13358_v26 = vld [vmem:[%s18019_s13] sm:$0xff]  }
 0x645   : > { %v17274_v51 = vpack.c.bf16 %v8861_v39, %v8858_v19  ;;  %8599 = vmatprep.mubr.bf16.mxu1 %v15875_v50  ;;  %8625 = vmatpush1.bf16.msra.mxu1 %v13336_v14  ;;  %v13342_v50 = vld [vmem:[%s18018_s12 + $0xa38] ss:$36 sps:$4 sm:$0xff]  }
 0x646   : > { %8626 = vmatprep.subr.bf16.mxu1 %v13341_v44  ;;  %v13357_v14 = vld [vmem:[%s18019_s13 + $0x38] sm:$0xff]  }
 0x647   : > { %v12380_v27 = vpop.f32.mrb[76].mxu0  ;;  %v13361_v44 = vld [vmem:[%s18019_s13 + $0x18] sm:$0xff]  }
 0x648   : > { %v8882_v7 = vadd.f32 %v12380_v27, %v8817_v8  ;;  %v8873_v57 = vpop.f32.mrb[77].mxu0 }
 0x649   : > { %8627 = vmatpush1.bf16.msra.mxu1 %v13339_v47  ;;  %v8874_v60 = vadd.f32 %v8873_v57, %v8809_v10  ;;  %v12381_v52 = vpop.f32.mrb[78].mxu0  ;;  %v13345_v10 = vld [vmem:[%s18018_s12 + $0xa80] ss:$36 sps:$4 sm:$0xff]  }
 0x64a   : > { %v8885_v28 = vadd.f32 %v12381_v52, %v8820_v55  ;;  %v8876_v54 = vpop.f32.mrb[79].mxu0  ;;  %8628 = vmatprep.subr.bf16.mxu1 %v13344_v4  ;;  %v13362_v47 = vld [vmem:[%s18019_s13 + $0x40] sm:$0xff]  }
 0x64b   : > { %v8877_v49 = vadd.f32 %v8876_v54, %v8812_v1  ;;  %v13348_v1 = vld [vmem:[%s18018_s12 + $0xac8] ss:$36 sps:$4 sm:$0xff]  }
 0x64c   : > { %v17289_v30 = vpack.c.bf16 %v8885_v28, %v8882_v7  ;;  %8600 = vmatmul.mubr.bf16.gmra.mrb[24].mxu1 %v15764_v31  ;;  %v13353_v31 = vld [vmem:[%s18018_s12 + $0xb14] ss:$36 sps:$4 sm:$0xff]  }
 0x64d   : > { %v17292_v25 = vpack.c.bf16 %v8877_v49, %v8874_v60  ;;  %8609 = vmatprep.mubr.bf16.mxu1 %v15873_v48  ;;  %8629 = vmatpush1.bf16.msra.mxu1 %v13342_v50  ;;  %v13351_v48 = vld [vmem:[%s18018_s12 + $0xb10] ss:$36 sps:$4 sm:$0xff]  }
 0x64e   : > { %8630 = vmatprep.subr.bf16.mxu1 %v13347_v42 }
 0x651   : > { %8631 = vmatpush1.bf16.msra.mxu1 %v13345_v10 }
 0x652   : > { %8632 = vmatprep.subr.bf16.mxu1 %v13350_v3 }
 0x654   : > { %8610 = vmatmul.mubr.bf16.gmra.mrb[28].mxu1 %v15759_v45 }
 0x655   : > { %8633 = vmatpush1.bf16.msra.mxu1 %v13348_v1  ;;  %8652 = vmatprep.mubr.bf16.mxu1 %v18220_v24 }
 0x656   : > { %8634 = vmatprep.subr.bf16.mxu1 %v13353_v31 }
 0x659   : > { %8635 = vmatpush1.bf16.msra.mxu1 %v13351_v48 }
 0x65a   : > { %12382 = vmatprep.subr.bf16.mxu1 %v16506_v46 }
 0x65c   : > { %8653 = vmatmul.mubr.bf16.vlgmr.msra.gmra.mrb[16].mxu1 %v15981_v0 }
 0x65d   : > { %12383 = vmatpush3.bf16.msra.mxu1 %v16506_v46  ;;  %8662 = vmatprep.mubr.bf16.mxu1 %v18220_v24 }
 0x65e   : > { %12384 = vmatprep.subr.bf16.mxu1 %v16526_v56 }
 0x661   : > { %12385 = vmatpush3.bf16.msra.mxu1 %v16526_v56 }
 0x662   : > { %12386 = vmatprep.subr.bf16.mxu1 %v16554_v63 }
 0x663   : > { %v5497_v45 = vpop.xlane.xlu0 %5496 }
 0x664   : > { %8663 = vmatmul.mubr.bf16.gmra.mrb[20].mxu1 %v15975_v15  ;;  %13448 = vtanh.f32 %v5497_v45 }
 0x665   : > { %12387 = vmatpush3.bf16.msra.mxu1 %v16554_v63  ;;  %v5500_v22 = vpop.xlane.xlu1 %5499  ;;  %8672 = vmatprep.mubr.bf16.mxu1 %v18220_v24 }
 0x666   : > { %12388 = vmatprep.subr.bf16.mxu1 %v16578_v20  ;;  %13450 = vtanh.f32 %v5500_v22 }
 0x667   : > { %v5491_v0 = vpop.xlane.xlu0 %5490 }
 0x668   : > { %13452 = vtanh.f32 %v5491_v0 }
 0x669   : > { %12389 = vmatpush3.bf16.msra.mxu1 %v16578_v20  ;;  %v5494_v46 = vpop.xlane.xlu1 %5493 }
 0x66a   : > { %12398 = vmatprep.subr.bf16.mxu1 %v16500_v59  ;;  %13454 = vtanh.f32 %v5494_v46  ;;  %v13363_v46 = vld [vmem:[%s18019_s13 + $0x48] sm:$0xff]  }
 0x66b   : > { %v5509_v15 = vpop.xlane.xlu0 %5508 }
 0x66c   : > { %8673 = vmatmul.mubr.bf16.gmra.mrb[24].mxu1 %v16002_v37  ;;  %13456 = vtanh.f32 %v5509_v15  ;;  %v13364_v15 = vld [vmem:[%s18019_s13 + $0x50] sm:$0xff]  }
 0x66d   : > { %v5512_v56 = vpop.xlane.xlu1 %5511  ;;  %8682 = vmatprep.mubr.bf16.mxu1 %v18220_v24 }
 0x66e   : > { %v17327_v63 = vpop.eup %13448  ;;  %13458 = vtanh.f32 %v5512_v56 }
 0x66f   : > { %10376 = vst.msk [vmem:[%s16938_s2 + $0xd0] sm:$0xff] %vm10349_vm1, %v17327_v63  ;;  %v5503_v20 = vpop.xlane.xlu0 %5502 }
 0x670   : > { %v17332_v8 = vpop.eup %13450  ;;  %13460 = vtanh.f32 %v5503_v20  ;;  %v13365_v20 = vld [vmem:[%s18019_s13 + $0x58] sm:$0xff]  }
 0x671   : > { %10377 = vst.msk [vmem:[%s16938_s2 + $0xd8] sm:$0xff] %vm10349_vm1, %v17332_v8  ;;  %v5506_v37 = vpop.xlane.xlu1 %5505 }
 0x672   : > { %v17340_v55 = vpop.eup %13452  ;;  %13462 = vtanh.f32 %v5506_v37  ;;  %v13366_v37 = vld [vmem:[%s18019_s13 + $0x60] sm:$0xff]  }
 0x673   : > { %10374 = vst.msk [vmem:[%s16938_s2 + $0xc0] sm:$0xff] %vm10349_vm1, %v17340_v55 }
 0x674   : > { %v17345_v12 = vpop.eup %13454  ;;  %8683 = vmatmul.mubr.bf16.gmra.mrb[28].mxu1 %v15997_v17  ;;  %v13356_v17 = vld [vmem:[%s18019_s13 + $0x30] sm:$0xff]  }
 0x675   : > { %10375 = vst.msk [vmem:[%s16938_s2 + $0xc8] sm:$0xff] %vm10349_vm1, %v17345_v12  ;;  %12390 = vmatprep.mubr.msk.bf16.mxu1 %vm1687_vm0, %v13354_v62 }
 0x676   : > { %v17352_v40 = vpop.eup %13456 }
 0x677   : > { %10380 = vst.msk [vmem:[%s16938_s2 + $0xf0] sm:$0xff] %vm10349_vm1, %v17352_v40 }
 0x678   : > { %v17357_v29 = vpop.eup %13458 }
 0x679   : > { %10381 = vst.msk [vmem:[%s16938_s2 + $0xf8] sm:$0xff] %vm10349_vm1, %v17357_v29 }
 0x67a   : > { %v17368_v19 = vpop.eup %13460 }
 0x67b   : > { %10378 = vst.msk [vmem:[%s16938_s2 + $0xe0] sm:$0xff] %vm10349_vm1, %v17368_v19 }
 0x67c   : > { %v17373_v13 = vpop.eup %13462  ;;  %12391 = vmatmul.mubr.msk.bf16.vlgmr.msra.gmra.mrb[32].mxu1 %vm1687_vm0, %v13355_v34 }
 0x67d   : > { %10379 = vst.msk [vmem:[%s16938_s2 + $0xe8] sm:$0xff] %vm10349_vm1, %v17373_v13  ;;  %12399 = vmatpush3.bf16.msra.mxu1 %v16500_v59  ;;  %12394 = vmatprep.mubr.msk.bf16.mxu1 %vm1687_vm0, %v13356_v17  ;;  %v13359_v59 = vld [vmem:[%s18019_s13 + $0x8] sm:$0xff]  }
 0x67e   : > { %12400 = vmatprep.subr.bf16.mxu1 %v16519_v5 }
 0x681   : > { %12401 = vmatpush3.bf16.msra.mxu1 %v16519_v5  ;;  %v13360_v5 = vld [vmem:[%s18019_s13 + $0x10] sm:$0xff]  }
 0x682   : > { %12402 = vmatprep.subr.bf16.mxu1 %v16542_v35 }
 0x684   : > { %12395 = vmatmul.mubr.msk.bf16.gmra.mrb[36].mxu1 %vm1687_vm0, %v13357_v14 }
 0x685   : > { %12403 = vmatpush3.bf16.msra.mxu1 %v16542_v35  ;;  %12406 = vmatprep.mubr.msk.bf16.mxu1 %vm1687_vm0, %v13358_v26  ;;  %v13367_v26 = vld [vmem:[%s18019_s13 + $0x68] sm:$0xff]  }
 0x686   : > { %12404 = vmatprep.subr.bf16.mxu1 %v16573_v2 }
 0x689   : > { %12405 = vmatpush3.bf16.msra.mxu1 %v16573_v2 }
 0x68c   : > { %12407 = vmatmul.mubr.msk.bf16.vlgmr.msra.gmra.mrb[32].mxu1 %vm1687_vm0, %v13359_v59  ;;  %v13368_v59 = vld [vmem:[%s18019_s13 + $0x70] sm:$0xff]  }
 0x68d   : > { %12410 = vmatprep.mubr.msk.bf16.mxu1 %vm1687_vm0, %v13360_v5 }
 0x68f   : > { %v8216_v32 = vpop.f32.mrb[0].mxu1 }
 0x690   : > { %v8218_v35 = vpop.f32.mrb[1].mxu1 }
 0x691   : > { %v8220_v39 = vpop.f32.mrb[2].mxu1 }
 0x692   : > { %v9107_v2 = vpack.c.bf16 %v8220_v39, %v8216_v32  ;;  %v8222_v4 = vpop.f32.mrb[3].mxu1 }
 0x693   : > { %v9225_v27 = vpack.c.bf16 %v8222_v4, %v8218_v35  ;;  %v13370_v4 = vld [vmem:[%s18019_s13 + $0x80] sm:$0xff]  }
 0x694   : > { %12414 = vmatprep.subr.bf16.mxu1 %v9107_v2  ;;  %12411 = vmatmul.mubr.msk.bf16.gmra.mrb[36].mxu1 %vm1687_vm0, %v13361_v44 }
 0x695   : > { %12415 = vmatpush3.bf16.msra.mxu1 %v9107_v2  ;;  %12422 = vmatprep.mubr.msk.bf16.mxu1 %vm1687_vm0, %v13362_v47 }
 0x697   : > { %v8226_v7 = vpop.f32.mrb[4].mxu1 }
 0x698   : > { %v8228_v57 = vpop.f32.mrb[5].mxu1 }
 0x699   : > { %v8230_v60 = vpop.f32.mrb[6].mxu1 }
 0x69a   : > { %v9108_v52 = vpack.c.bf16 %v8230_v60, %v8226_v7  ;;  %v8232_v50 = vpop.f32.mrb[7].mxu1 }
 0x69b   : > { %v9226_v28 = vpack.c.bf16 %v8232_v50, %v8228_v57  ;;  %v13371_v57 = vld [vmem:[%s18019_s13 + $0x88] sm:$0xff]   ;;  %v13378_v50 = vld [vmem:[%s18019_s13 + $0xc0] sm:$0xff]  }
 0x69c   : > { %12416 = vmatprep.subr.bf16.mxu1 %v9108_v52 }
 0x69d   : > { %12417 = vmatpush3.bf16.msra.mxu1 %v9108_v52  ;;  %v13374_v52 = vld [vmem:[%s18019_s13 + $0xa0] sm:$0xff]  }
 0x69f   : > { %v8236_v54 = vpop.f32.mrb[8].mxu1 }
 0x6a0   : > { %v8238_v42 = vpop.f32.mrb[9].mxu1 }
 0x6a1   : > { %v8240_v49 = vpop.f32.mrb[10].mxu1 }
 0x6a2   : > { %v9109_v10 = vpack.c.bf16 %v8240_v49, %v8236_v54  ;;  %v8242_v3 = vpop.f32.mrb[11].mxu1 }
 0x6a3   : > { %v9227_v1 = vpack.c.bf16 %v8242_v3, %v8238_v42 }
 0x6a4   : > { %12418 = vmatprep.subr.bf16.mxu1 %v9109_v10 }
 0x6a5   : > { %12419 = vmatpush3.bf16.msra.mxu1 %v9109_v10 }
 0x6a7   : > { %v8246_v31 = vpop.f32.mrb[12].mxu1 }
 0x6a8   : > { %v8248_v48 = vpop.f32.mrb[13].mxu1 }
 0x6a9   : > { %v8250_v24 = vpop.f32.mrb[14].mxu1 }
 0x6aa   : > { %v9110_v45 = vpack.c.bf16 %v8250_v24, %v8246_v31  ;;  %v8252_v22 = vpop.f32.mrb[15].mxu1 }
 0x6ab   : > { %v9228_v0 = vpack.c.bf16 %v8252_v22, %v8248_v48 }
 0x6ac   : > { %12420 = vmatprep.subr.bf16.mxu1 %v9110_v45 }
 0x6ad   : > { %12421 = vmatpush3.bf16.msra.mxu1 %v9110_v45 }
 0x6ae   : > { %12430 = vmatprep.subr.bf16.mxu1 %v9225_v27 }
 0x6b0   : > { %12423 = vmatmul.mubr.msk.bf16.vlgmr.msra.gmra.mrb[32].mxu1 %vm1687_vm0, %v13363_v46 }
 0x6b1   : > { %12431 = vmatpush3.bf16.msra.mxu1 %v9225_v27  ;;  %12426 = vmatprep.mubr.msk.bf16.mxu1 %vm1687_vm0, %v13364_v15 }
 0x6b2   : > { %12432 = vmatprep.subr.bf16.mxu1 %v9226_v28 }
 0x6b3   : > { %v5521_v56 = vpop.xlane.xlu0 %5520 }
 0x6b4   : > { %13464 = vtanh.f32 %v5521_v56 }
 0x6b5   : > { %12433 = vmatpush3.bf16.msra.mxu1 %v9226_v28 }
 0x6b6   : > { %12434 = vmatprep.subr.bf16.mxu1 %v9227_v1  ;;  %v5524_v62 = vpop.xlane.xlu1 %5523 }
 0x6b7   : > { %13466 = vtanh.f32 %v5524_v62  ;;  %v5515_v34 = vpop.xlane.xlu0 %5514 }
 0x6b8   : > { %12427 = vmatmul.mubr.msk.bf16.gmra.mrb[36].mxu1 %vm1687_vm0, %v13365_v20  ;;  %13468 = vtanh.f32 %v5515_v34 }
 0x6b9   : > { %12435 = vmatpush3.bf16.msra.mxu1 %v9227_v1  ;;  %12438 = vmatprep.mubr.msk.bf16.mxu1 %vm1687_vm0, %v13366_v37 }
 0x6ba   : > { %12436 = vmatprep.subr.bf16.mxu1 %v9228_v0  ;;  %v5518_v17 = vpop.xlane.xlu1 %5517 }
 0x6bb   : > { %13470 = vtanh.f32 %v5518_v17 }
 0x6bc   : > { %v5527_v14 = vpop.xlane.xlu0 %5526 }
 0x6bd   : > { %12437 = vmatpush3.bf16.msra.mxu1 %v9228_v0  ;;  %13472 = vtanh.f32 %v5527_v14 }
 0x6be   : > { %12446 = vmatprep.subr.bf16.mxu1 %v16906_v43  ;;  %v17434_v32 = vpop.eup %13464 }
 0x6bf   : > { %v5530_v5 = vpop.xlane.xlu1 %5529  ;;  %10384 = vst.msk [vmem:[%s16938_s2 + $0x110] sm:$0xff] %vm10349_vm1, %v17434_v32 }
 0x6c0   : > { %13474 = vtanh.f32 %v5530_v5  ;;  %12439 = vmatmul.mubr.msk.bf16.vlgmr.msra.gmra.mrb[32].mxu1 %vm1687_vm0, %v13367_v26  ;;  %v5533_v35 = vpop.xlane.xlu0 %5532  ;;  %v13380_v5 = vld [vmem:[%s18019_s13 + $0xd0] sm:$0xff]  }
 0x6c1   : > { %v17440_v44 = vpop.eup %13466  ;;  %12447 = vmatpush3.bf16.msra.mxu1 %v16906_v43  ;;  %13476 = vtanh.f32 %v5533_v35  ;;  %12442 = vmatprep.mubr.msk.bf16.mxu1 %vm1687_vm0, %v13368_v59  ;;  %v13369_v43 = vld [vmem:[%s18019_s13 + $0x78] sm:$0xff]   ;;  %v13379_v59 = vld [vmem:[%s18019_s13 + $0xc8] sm:$0xff]  }
 0x6c2   : > { %10385 = vst.msk [vmem:[%s16938_s2 + $0x118] sm:$0xff] %vm10349_vm1, %v17440_v44  ;;  %12448 = vmatprep.subr.bf16.mxu1 %v16923_v23  ;;  %v17448_v47 = vpop.eup %13468  ;;  %v13381_v35 = vld [vmem:[%s18019_s13 + $0xd8] sm:$0xff]  }
 0x6c3   : > { %v5536_v39 = vpop.xlane.xlu1 %5535  ;;  %10382 = vst.msk [vmem:[%s16938_s2 + $0x100] sm:$0xff] %vm10349_vm1, %v17448_v47 }
 0x6c4   : > { %13478 = vtanh.f32 %v5536_v39  ;;  %v13382_v39 = vld [vmem:[%s18019_s13 + $0xe0] sm:$0xff]  }
 0x6c5   : > { %v17456_v2 = vpop.eup %13470  ;;  %12449 = vmatpush3.bf16.msra.mxu1 %v16923_v23 }
 0x6c6   : > { %10383 = vst.msk [vmem:[%s16938_s2 + $0x108] sm:$0xff] %vm10349_vm1, %v17456_v2  ;;  %12450 = vmatprep.subr.bf16.mxu1 %v16956_v38 }
 0x6c7   : > { %v17466_v27 = vpop.eup %13472 }
 0x6c8   : > { %10386 = vst.msk [vmem:[%s16938_s2 + $0x120] sm:$0xff] %vm10349_vm1, %v17466_v27  ;;  %12443 = vmatmul.mubr.msk.bf16.gmra.mrb[36].mxu1 %vm1687_vm0, %v13369_v43  ;;  %v13383_v43 = vld [vmem:[%s18019_s13 + $0xe8] sm:$0xff]  }
 0x6c9   : > { %12451 = vmatpush3.bf16.msra.mxu1 %v16956_v38  ;;  %12454 = vmatprep.mubr.msk.bf16.mxu1 %vm1687_vm0, %v13370_v4  ;;  %v13372_v38 = vld [vmem:[%s18019_s13 + $0x90] sm:$0xff]  }
 0x6ca   : > { %v17472_v7 = vpop.eup %13474  ;;  %12452 = vmatprep.subr.bf16.mxu1 %v16984_v33  ;;  %v13384_v4 = vld [vmem:[%s18019_s13 + $0xf0] sm:$0xff]  }
 0x6cb   : > { %10387 = vst.msk [vmem:[%s16938_s2 + $0x128] sm:$0xff] %vm10349_vm1, %v17472_v7  ;;  %v17480_v23 = vpop.eup %13476 }
 0x6cc   : > { %10388 = vst.msk [vmem:[%s16938_s2 + $0x130] sm:$0xff] %vm10349_vm1, %v17480_v23 }
 0x6cd   : > { %12453 = vmatpush3.bf16.msra.mxu1 %v16984_v33  ;;  %v13373_v33 = vld [vmem:[%s18019_s13 + $0x98] sm:$0xff]  }
 0x6ce   : > { %v17488_v60 = vpop.eup %13478  ;;  %12462 = vmatprep.subr.bf16.mxu1 %v16911_v11 }
 0x6cf   : > { %10389 = vst.msk [vmem:[%s16938_s2 + $0x138] sm:$0xff] %vm10349_vm1, %v17488_v60  ;;  %s10433_s2 = sshll.u32 %s612_s20, 4  ;;  %s17761_s2 = int_to_ptr.vmem [resolvable:$true] %s10433_s2 }
 0x6d0   : > { %12455 = vmatmul.mubr.msk.bf16.vlgmr.msra.gmra.mrb[32].mxu1 %vm1687_vm0, %v13371_v57  ;;  %v13385_v57 = vld [vmem:[%s18019_s13 + $0xf8] sm:$0xff]   ;;  %s13532_s23 = scalar_lea.vmem %s17761_s2, 16 }
 0x6d1   : > { %12463 = vmatpush3.bf16.msra.mxu1 %v16911_v11  ;;  %12458 = vmatprep.mubr.msk.bf16.mxu1 %vm1687_vm0, %v13372_v38  ;;  %v13375_v11 = vld [vmem:[%s18019_s13 + $0xa8] sm:$0xff]   ;;  %v13386_v38 = vld [vmem:[%s18019_s13 + $0x100] sm:$0xff]   ;;  %p13533_p11 = scmp.ne.s32.totalorder %s17761_s2, %s13532_s23 }
 0x6d2   : > { %12464 = vmatprep.subr.bf16.mxu1 %v16928_v41 }
 0x6d3   : > { %p13534_p12 = pnand %p13533_p11, %p13773_p5 }
 0x6d5   : > { %12465 = vmatpush3.bf16.msra.mxu1 %v16928_v41  ;;  %v13376_v41 = vld [vmem:[%s18019_s13 + $0xb0] sm:$0xff]   ;;  %p13535_p13 = pneg %p13534_p12 }
 0x6d6   : > { %12466 = vmatprep.subr.bf16.mxu1 %v16961_v9 }
 0x6d8   : > { %12459 = vmatmul.mubr.msk.bf16.gmra.mrb[36].mxu1 %vm1687_vm0, %v13373_v33  ;;  %v13390_v33 = vld [vmem:[%s18021_s15] sm:$0xff]  }
 0x6d9   : > { %12467 = vmatpush3.bf16.msra.mxu1 %v16961_v9  ;;  %12470 = vmatprep.mubr.msk.bf16.mxu1 %vm1687_vm0, %v13374_v52  ;;  %v13377_v9 = vld [vmem:[%s18019_s13 + $0xb8] sm:$0xff]   ;;  %v13629_v52 = vmov 0.0  }
 0x6da   : > { %12468 = vmatprep.subr.bf16.mxu1 %v16994_v61  ;;  %12526 = vmatprep.subr.bf16.mxu0 %v13629_v52 }
 0x6db   : > { %12527 = vmatpush3.bf16.msra.mxu0 %v13390_v33  ;;  %12542 = vmatprep.mubr.msk.bf16.mxu0 %vm13630_vm2, %v13629_v52 }
 0x6dc   : > { %12528 = vmatprep.subr.bf16.mxu0 %v13629_v52 }
 0x6dd   : > { %12469 = vmatpush3.bf16.msra.mxu1 %v16994_v61 }
 0x6e0   : > { %12471 = vmatmul.mubr.msk.bf16.vlgmr.msra.gmra.mrb[32].mxu1 %vm1687_vm0, %v13375_v11  ;;  %v13392_v11 = vld [vmem:[%s18021_s15 + $0x10] sm:$0xff]  }
 0x6e1   : > { %12474 = vmatprep.mubr.msk.bf16.mxu1 %vm1687_vm0, %v13376_v41  ;;  %v13393_v41 = vld [vmem:[%s18021_s15 + $0x18] sm:$0xff]  }
 0x6e8   : > { %12475 = vmatmul.mubr.msk.bf16.gmra.mrb[36].mxu1 %vm1687_vm0, %v13377_v9  ;;  %v13394_v9 = vld [vmem:[%s18021_s15 + $0x20] sm:$0xff]  }
 0x6e9   : > { %12486 = vmatprep.mubr.msk.bf16.mxu1 %vm1687_vm0, %v13378_v50  ;;  %v13395_v50 = vld [vmem:[%s18021_s15 + $0x28] sm:$0xff]  }
 0x72f   : > { %v8654_v61 = vpop.f32.mrb[16].mxu1 }
 0x730   : > { %v8656_v28 = vpop.f32.mrb[17].mxu1 }
 0x731   : > { %v8658_v54 = vpop.f32.mrb[18].mxu1 }
 0x732   : > { %v9579_v42 = vpack.c.bf16 %v8658_v54, %v8654_v61  ;;  %v8660_v49 = vpop.f32.mrb[19].mxu1  ;;  %v13396_v61 = vld [vmem:[%s18021_s15 + $0x30] sm:$0xff]   ;;  %v11301_v54 = vld [vmem:[%s18020_s14] ss:$0 sm:$0xff] }
 0x733   : > { %v9697_v10 = vpack.c.bf16 %v8660_v49, %v8656_v28  ;;  %v13397_v28 = vld [vmem:[%s18021_s15 + $0x38] sm:$0xff]  }
 0x734   : > { %12478 = vmatprep.subr.bf16.mxu1 %v9579_v42 }
 0x735   : > { %12479 = vmatpush3.bf16.msra.mxu1 %v9579_v42 }
 0x737   : > { %v8664_v3 = vpop.f32.mrb[20].mxu1 }
 0x738   : > { %v8666_v1 = vpop.f32.mrb[21].mxu1 }
 0x739   : > { %v8668_v31 = vpop.f32.mrb[22].mxu1 }
 0x73a   : > { %v9580_v48 = vpack.c.bf16 %v8668_v31, %v8664_v3  ;;  %v8670_v24 = vpop.f32.mrb[23].mxu1 }
 0x73b   : > { %v9698_v45 = vpack.c.bf16 %v8670_v24, %v8666_v1 }
 0x73c   : > { %12480 = vmatprep.subr.bf16.mxu1 %v9580_v48 }
 0x73d   : > { %12481 = vmatpush3.bf16.msra.mxu1 %v9580_v48 }
 0x73f   : > { %v8674_v22 = vpop.f32.mrb[24].mxu1 }
 0x740   : > { %v8676_v0 = vpop.f32.mrb[25].mxu1 }
 0x741   : > { %v8678_v46 = vpop.f32.mrb[26].mxu1 }
 0x742   : > { %v9581_v15 = vpack.c.bf16 %v8678_v46, %v8674_v22  ;;  %v8680_v56 = vpop.f32.mrb[27].mxu1 }
 0x743   : > { %v9699_v20 = vpack.c.bf16 %v8680_v56, %v8676_v0 }
 0x744   : > { %12482 = vmatprep.subr.bf16.mxu1 %v9581_v15 }
 0x745   : > { %12483 = vmatpush3.bf16.msra.mxu1 %v9581_v15 }
 0x747   : > { %v8684_v37 = vpop.f32.mrb[28].mxu1 }
 0x748   : > { %v8686_v62 = vpop.f32.mrb[29].mxu1 }
 0x749   : > { %v8688_v34 = vpop.f32.mrb[30].mxu1 }
 0x74a   : > { %v9582_v17 = vpack.c.bf16 %v8688_v34, %v8684_v37  ;;  %v8690_v14 = vpop.f32.mrb[31].mxu1 }
 0x74b   : > { %v9700_v26 = vpack.c.bf16 %v8690_v14, %v8686_v62 }
 0x74c   : > { %12484 = vmatprep.subr.bf16.mxu1 %v9582_v17 }
 0x74d   : > { %12485 = vmatpush3.bf16.msra.mxu1 %v9582_v17 }
 0x74e   : > { %12494 = vmatprep.subr.bf16.mxu1 %v9697_v10 }
 0x750   : > { %12487 = vmatmul.mubr.msk.bf16.vlgmr.msra.gmra.mrb[32].mxu1 %vm1687_vm0, %v13379_v59 }
 0x751   : > { %12495 = vmatpush3.bf16.msra.mxu1 %v9697_v10  ;;  %12490 = vmatprep.mubr.msk.bf16.mxu1 %vm1687_vm0, %v13380_v5 }
 0x752   : > { %12496 = vmatprep.subr.bf16.mxu1 %v9698_v45 }
 0x755   : > { %12497 = vmatpush3.bf16.msra.mxu1 %v9698_v45 }
 0x756   : > { %12498 = vmatprep.subr.bf16.mxu1 %v9699_v20 }
 0x758   : > { %12491 = vmatmul.mubr.msk.bf16.gmra.mrb[36].mxu1 %vm1687_vm0, %v13381_v35 }
 0x759   : > { %12499 = vmatpush3.bf16.msra.mxu1 %v9699_v20  ;;  %12502 = vmatprep.mubr.msk.bf16.mxu1 %vm1687_vm0, %v13382_v39 }
 0x75a   : > { %12500 = vmatprep.subr.bf16.mxu1 %v9700_v26 }
 0x75d   : > { %12501 = vmatpush3.bf16.msra.mxu1 %v9700_v26 }
 0x75e   : > { %12510 = vmatprep.subr.bf16.mxu1 %v17274_v51 }
 0x760   : > { %12503 = vmatmul.mubr.msk.bf16.vlgmr.msra.gmra.mrb[32].mxu1 %vm1687_vm0, %v13383_v43 }
 0x761   : > { %12511 = vmatpush3.bf16.msra.mxu1 %v17274_v51  ;;  %12506 = vmatprep.mubr.msk.bf16.mxu1 %vm1687_vm0, %v13384_v4  ;;  %v13387_v51 = vld [vmem:[%s18019_s13 + $0x108] sm:$0xff]  }
 0x762   : > { %12512 = vmatprep.subr.bf16.mxu1 %v17271_v16 }
 0x765   : > { %12513 = vmatpush3.bf16.msra.mxu1 %v17271_v16  ;;  %v13388_v16 = vld [vmem:[%s18019_s13 + $0x110] sm:$0xff]  }
 0x766   : > { %12514 = vmatprep.subr.bf16.mxu1 %v17292_v25 }
 0x768   : > { %12507 = vmatmul.mubr.msk.bf16.gmra.mrb[36].mxu1 %vm1687_vm0, %v13385_v57 }
 0x769   : > { %12515 = vmatpush3.bf16.msra.mxu1 %v17292_v25  ;;  %12518 = vmatprep.mubr.msk.bf16.mxu1 %vm1687_vm0, %v13386_v38  ;;  %v13389_v25 = vld [vmem:[%s18019_s13 + $0x118] sm:$0xff]  }
 0x76a   : > { %12516 = vmatprep.subr.bf16.mxu1 %v17289_v30 }
 0x76d   : > { %12517 = vmatpush3.bf16.msra.mxu1 %v17289_v30  ;;  %v13391_v30 = vld [vmem:[%s18021_s15 + $0x8] sm:$0xff]  }
 0x76e   : > { %12529 = vmatpush3.bf16.msra.mxu0 %v13391_v30 }
 0x76f   : > { %12530 = vmatprep.subr.bf16.mxu0 %v13629_v52 }
 0x770   : > { %12519 = vmatmul.mubr.msk.bf16.vlgmr.msra.gmra.mrb[32].mxu1 %vm1687_vm0, %v13387_v51 }
 0x771   : > { %12522 = vmatprep.mubr.msk.bf16.mxu1 %vm1687_vm0, %v13388_v16 }
 0x772   : > { %12531 = vmatpush3.bf16.msra.mxu0 %v13392_v11 }
 0x773   : > { %12532 = vmatprep.subr.bf16.mxu0 %v13629_v52 }
 0x776   : > { %12533 = vmatpush3.bf16.msra.mxu0 %v13393_v41 }
 0x777   : > { %12534 = vmatprep.subr.bf16.mxu0 %v13629_v52 }
 0x778   : > { %12523 = vmatmul.mubr.msk.bf16.gmra.mrb[36].mxu1 %vm1687_vm0, %v13389_v25 }
 0x77a   : > { %12535 = vmatpush3.bf16.msra.mxu0 %v13394_v9 }
 0x77b   : > { %12536 = vmatprep.subr.bf16.mxu0 %v13629_v52 }
 0x77e   : > { %12537 = vmatpush3.bf16.msra.mxu0 %v13395_v50 }
 0x77f   : > { %12538 = vmatprep.subr.bf16.mxu0 %v13629_v52 }
 0x782   : > { %12539 = vmatpush3.bf16.msra.mxu0 %v13396_v61  ;;  %v13398_v61 = vld [vmem:[%s18022_s16] sm:$0xff]  }
 0x783   : > { %12540 = vmatprep.subr.bf16.mxu0 %v13629_v52 }
 0x786   : > { %12541 = vmatpush3.bf16.msra.mxu0 %v13397_v28 }
 0x787   : > { %12546 = vmatprep.subr.bf16.mxu0 %v13629_v52 }
 0x843   : > { %v12520_v42 = vpop.f32.mrb[32].mxu1 }
 0x844   : > { %v9894_v49 = vpop.f32.mrb[33].mxu1  ;;  %v9942_v31 = vadd.f32 %v12520_v42, %v11301_v54 }
 0x845   : > { %v9940_v10 = vadd.f32 %v11301_v54, %v9894_v49  ;;  %v12521_v3 = vpop.f32.mrb[34].mxu1 }
 0x846   : > { %v9897_v1 = vpop.f32.mrb[35].mxu1  ;;  %v9943_v45 = vadd.f32 %v12521_v3, %v11301_v54  ;;  %v9950_v0 = vmax.f32 %v9942_v31, 0.0 }
 0x847   : > { %v9941_v48 = vadd.f32 %v11301_v54, %v9897_v1  ;;  %v9948_v24 = vmax.f32 %v9940_v10, 0.0 }
 0x848   : > { %v9951_v20 = vmax.f32 %v9943_v45, 0.0  ;;  %v10147_v45 = vmul.f32 0.5, %v16966_v53 }
 0x849   : > { %v9949_v22 = vmax.f32 %v9941_v48, 0.0  ;;  %v10146_v48 = vmul.f32 0.5, %v16943_v58 }
 0x84a   : > { %v10187_v58 = vadd.f32 1.5, %v10147_v45  ;;  %v13499_v45 = vld [vmem:[%s13802_s0 + $0x28] sm:$0xff] }
 0x84b   : > { %v9956_v46 = vadd.f32 %v9949_v22, %v9948_v24  ;;  %v12524_v15 = vpop.f32.mrb[36].mxu1  ;;  %v10144_v24 = vmul.f32 0.5, %v16945_v21  ;;  %v18221_v22 = vld [vmem:[#allocation26_spill] sm:$0xff] }
 0x84c   : > { %v9910_v56 = vpop.f32.mrb[37].mxu1  ;;  %v9946_v14 = vadd.f32 %v12524_v15, %v11301_v54 }
 0x84d   : > { %v9957_v37 = vadd.f32 %v9956_v46, %v9950_v0  ;;  %v9944_v62 = vadd.f32 %v11301_v54, %v9910_v56  ;;  %v12525_v34 = vpop.f32.mrb[38].mxu1  ;;  %v10150_v0 = vmul.f32 0.5, %v18221_v22  ;;  %v18222_v46 = vld [vmem:[#allocation25_spill] sm:$0xff]  ;;  %v18223_v56 = vld [vmem:[#allocation30_spill] sm:$0xff] }
 0x84e   : > { %v9913_v17 = vpop.f32.mrb[39].mxu1  ;;  %v9947_v39 = vadd.f32 %v12525_v34, %v11301_v54  ;;  %v9954_v4 = vmax.f32 %v9946_v14, 0.0  ;;  %v10151_v15 = vmul.f32 0.5, %v18222_v46  ;;  %v18225_v34 = vld [vmem:[#allocation33_spill] sm:$0xff]  ;;  %v10186_v14 = vadd.f32 1.5, %v10146_v48  ;;  %v13498_v48 = vld [vmem:[%s13802_s0 + $0x20] sm:$0xff] }
 0x84f   : > { %v9952_v26 = vmax.f32 %v9944_v62, 0.0  ;;  %v9958_v59 = vadd.f32 %v9957_v37, %v9951_v20  ;;  %v9945_v5 = vadd.f32 %v11301_v54, %v9913_v17  ;;  %v13399_v54 = vld [vmem:[%s18022_s16 + $0x8] sm:$0xff]   ;;  %v10148_v20 = vmul.f32 0.5, %v18223_v56  ;;  %v13500_v22 = vld [vmem:[%s13802_s0 + $0x50] sm:$0xff] }
 0x850   : > { %v9955_v38 = vmax.f32 %v9947_v39, 0.0  ;;  %v18224_v37 = vld [vmem:[#allocation32_spill] sm:$0xff]  ;;  %v10154_v17 = vmul.f32 0.5, %v18225_v34  ;;  %v10190_v53 = vadd.f32 1.5, %v10150_v0  ;;  %v18229_v56 = vld [vmem:[#allocation37_spill] sm:$0xff]  ;;  %v18231_v34 = vld [vmem:[#allocation39_spill] sm:$0xff] }
 0x851   : > { %v9959_v35 = vadd.f32 %v9958_v59, %v9952_v26  ;;  %v9953_v43 = vmax.f32 %v9945_v5, 0.0  ;;  %v10149_v62 = vmul.f32 0.5, %v18224_v37  ;;  %v10184_v26 = vadd.f32 1.5, %v10144_v24  ;;  %v18230_v37 = vld [vmem:[#allocation38_spill] sm:$0xff] }
 0x852   : > { %v10191_v5 = vadd.f32 1.5, %v10151_v15  ;;  %v10188_v39 = vadd.f32 1.5, %v10148_v20  ;;  %v10158_v20 = vmul.f32 0.5, %v18229_v56 }
 0x853   : > { %v9960_v57 = vadd.f32 %v9959_v35, %v9953_v43  ;;  %v10189_v43 = vadd.f32 1.5, %v10149_v62  ;;  %v10159_v62 = vmul.f32 0.5, %v18230_v37 }
 0x854   : > { %v17661_v24 = vmul.f32 %v13498_v48, %v10188_v39  ;;  %v18236_v39 = vld [vmem:[#allocation44_spill] sm:$0xff] }
 0x855   : > { %v9961_v51 = vadd.f32 %v9960_v57, %v9954_v4  ;;  %v10194_v4 = vadd.f32 1.5, %v10154_v17  ;;  %v18226_v57 = vld [vmem:[#allocation34_spill] sm:$0xff]  ;;  %v10156_v17 = vmul.f32 0.5, %v18231_v34 }
 0x857   : > { %v9962_v16 = vadd.f32 %v9961_v51, %v9955_v38  ;;  %v10155_v38 = vmul.f32 0.5, %v18226_v57  ;;  %v17667_v0 = vmul.f32 %v13500_v22, %v10194_v4  ;;  %v18237_v4 = vld [vmem:[#allocation45_spill] sm:$0xff] }
 0x858   : > { %v10166_v57 = vmul.f32 0.5, %v18237_v4 }
 0x859   : > { %v9963_v25 = vrot.slane %v9962_v16, 4  ;;  %v10195_v46 = vadd.f32 1.5, %v10155_v38  ;;  %v18238_v38 = vld [vmem:[#allocation46_spill] sm:$0xff] }
 0x85b   : > { %v9964_v33 = vadd.f32 %v9963_v25, %v9962_v16  ;;  %v18227_v16 = vld [vmem:[#allocation35_spill] sm:$0xff] }
 0x85c   : > { %v10152_v25 = vmul.f32 0.5, %v18227_v16  ;;  %v13501_v16 = vld [vmem:[%s13802_s0 + $0x58] sm:$0xff] }
 0x85d   : > { %v9965_v30 = vrot.slane %v9964_v33, 2 }
 0x85e   : > { %v10192_v15 = vadd.f32 1.5, %v10152_v25  ;;  %v17680_v25 = vmul.f32 %v13501_v16, %v10195_v46 }
 0x85f   : > { %v9966_v11 = vadd.f32 %v9965_v30, %v9964_v33  ;;  %v13492_v30 = vld [vmem:[%s13802_s0 + $0x10] sm:$0xff] }
 0x861   : > { %v9967_v41 = vrot.slane %v9966_v11, 1 }
 0x863   : > { %v9968_v9 = vadd.f32 %v9967_v41, %v9966_v11  ;;  %v17642_v11 = vmul.f32 %v13492_v30, %v10186_v14  ;;  %v13493_v41 = vld [vmem:[%s13802_s0] sm:$0xff]  ;;  %v10165_v30 = vmul.f32 0.5, %v17217_v6 }
 0x865   : > { %v9970_v50 = vmul.f32 0.015625, %v9968_v9  ;;  %v17645_v9 = vmul.f32 %v13493_v41, %v10184_v26  ;;  %v18232_v26 = vld [vmem:[#allocation40_spill] sm:$0xff]  ;;  %v10170_v41 = vmul.f32 0.5, %v17327_v63  ;;  %v10206_v63 = vadd.f32 1.5, %v10166_v57  ;;  %v13510_v57 = vld [vmem:[%s13802_s0 + $0x80] sm:$0xff] }
 0x866   : > { %v10205_v37 = vadd.f32 1.5, %v10165_v30  ;;  %v10265_v30 = vlaneseq }
 0x867   : > { %v9971_v28 = vpack.c.bf16 %v9970_v50, %v9970_v50  ;;  %v18228_v50 = vld [vmem:[#allocation36_spill] sm:$0xff] }
 0x869   : > { %12543 = vmatmul.mubr.bf16.vlgmr.msra.gmra.mrb[80].mxu0 %v9971_v28  ;;  %v13494_v28 = vld [vmem:[%s13802_s0 + $0x18] sm:$0xff] }
 0x86a   : > { %12547 = vmatpush3.bf16.msra.mxu0 %v13398_v61  ;;  %12550 = vmatprep.mubr.msk.bf16.mxu0 %vm13630_vm2, %v13629_v52  ;;  %v10153_v61 = vmul.f32 0.5, %v18228_v50  ;;  %v13502_v50 = vld [vmem:[%s13802_s0 + $0x40] sm:$0xff] }
 0x86b   : > { %12548 = vmatprep.subr.bf16.mxu0 %v13629_v52  ;;  %v10145_v52 = vmul.f32 0.5, %v16971_v36 }
 0x86c   : > { %v10193_v14 = vadd.f32 1.5, %v10153_v61  ;;  %v17686_v61 = vmul.f32 %v13502_v50, %v10192_v15 }
 0x86d   : > { %v10185_v21 = vadd.f32 1.5, %v10145_v52  ;;  %v17664_v52 = vmul.f32 %v13499_v45, %v10189_v43  ;;  %v10161_v43 = vmul.f32 0.5, %v18236_v39 }
 0x86e   : > { %12549 = vmatpush3.bf16.msra.mxu0 %v13399_v54  ;;  %v17649_v54 = vmul.f32 %v13494_v28, %v10187_v58  ;;  %v10157_v58 = vmul.f32 0.5, %v18232_v26  ;;  %v10198_v28 = vadd.f32 1.5, %v10158_v20  ;;  %v13505_v26 = vld [vmem:[%s13802_s0 + $0x78] sm:$0xff] }
 0x86f   : > { %v10201_v56 = vadd.f32 1.5, %v10161_v43  ;;  %v13509_v43 = vld [vmem:[%s13802_s0 + $0x98] sm:$0xff] }
 0x870   : > { %v10197_v45 = vadd.f32 1.5, %v10157_v58 }
 0x93c   : > { %v10070_v42 = vpop.f32.mrb[80].mxu0 }
 0x93d   : > { %v10076_v49 = vmax.f32 %v10070_v42, 0.0  ;;  %v12544_v10 = vpop.f32.mrb[81].mxu0  ;;  %v13495_v42 = vld [vmem:[%s13802_s0 + $0x8] sm:$0xff] }
 0x93e   : > { %v10073_v3 = vpop.f32.mrb[82].mxu0  ;;  %v13496_v10 = vld [vmem:[%s13802_s0 + $0x30] sm:$0xff] }
 0x93f   : > { %v10077_v1 = vpack.c.bf16 %v10076_v49, %v10076_v49  ;;  %v12545_v31 = vpop.f32.mrb[83].mxu0  ;;  %v17652_v49 = vmul.f32 %v13495_v42, %v10185_v21  ;;  %v17655_v3 = vmul.f32 %v13496_v10, %v10190_v53  ;;  %v18234_v53 = vld [vmem:[#allocation42_spill] sm:$0xff]  ;;  %v10199_v42 = vadd.f32 1.5, %v10159_v62 }
 0x940   : > { %v10196_v10 = vadd.f32 1.5, %v10156_v17  ;;  %v10210_v62 = vadd.f32 1.5, %v10170_v41  ;;  %v13504_v17 = vld [vmem:[%s13802_s0 + $0x70] sm:$0xff]  ;;  %v13513_v41 = vld [vmem:[%s13802_s0 + $0xb8] sm:$0xff] }
 0x941   : > { %12551 = vmatmul.mubr.msk.bf16.vlgmr.msra.gmra.mrb[84].mxu0 %vm10094_vm3, %v10077_v1  ;;  %v13497_v1 = vld [vmem:[%s13802_s0 + $0x38] sm:$0xff]  ;;  %v17695_v58 = vmul.f32 %v13505_v26, %v10199_v42 }
 0x942   : > { %v17658_v31 = vmul.f32 %v13497_v1, %v10191_v5  ;;  %v10163_v5 = vmul.f32 0.5, %v18234_v53  ;;  %v13503_v1 = vld [vmem:[%s13802_s0 + $0x48] sm:$0xff]  ;;  %v10171_v53 = vmul.f32 0.5, %v17332_v8  ;;  %v13512_v8 = vld [vmem:[%s13802_s0 + $0xb0] sm:$0xff] }
 0x943   : > { %v17689_v48 = vmul.f32 %v13503_v1, %v10193_v14  ;;  %v17692_v14 = vmul.f32 %v13504_v17, %v10198_v28  ;;  %v13514_v28 = vld [vmem:[%s13802_s0 + $0xa0] sm:$0xff]  ;;  %v17744_v17 = vshrl.u32 %v10265_v30, 7 }
 0x944   : > { %v10203_v46 = vadd.f32 1.5, %v10163_v5  ;;  %v13507_v5 = vld [vmem:[%s13802_s0 + $0x68] sm:$0xff]  ;;  %v13518_v30 = vld [vmem:[%s13802_s0 + $0xc0] sm:$0xff] }
 0x946   : > { %v17708_v4 = vmul.f32 %v13509_v43, %v10203_v46  ;;  %v10211_v46 = vadd.f32 1.5, %v10171_v53 }
 0xa14   : > { %v10132_v59 = vpop.f32.mrb[84].mxu0 }
 0xa15   : > { %v11313_v36 = vmul.f32 -1.442695, %v10132_v59  ;;  %v12552_v35 = vpop.f32.mrb[85].mxu0  ;;  %v18233_v59 = vld [vmem:[#allocation41_spill] sm:$0xff] }
 0xa16   : > { %v10135_v51 = vpop.f32.mrb[86].mxu0  ;;  %v10162_v21 = vmul.f32 0.5, %v18233_v59  ;;  %v13506_v59 = vld [vmem:[%s13802_s0 + $0x60] sm:$0xff] }
 0xa17   : > { %13480 = vpow2.f32 %v11313_v36  ;;  %v12553_v33 = vpop.f32.mrb[87].mxu0  ;;  %v18235_v36 = vld [vmem:[#allocation43_spill] sm:$0xff]  ;;  %v10167_v51 = vmul.f32 0.5, %v18238_v38 }
 0xa18   : > { %v10160_v35 = vmul.f32 0.5, %v18235_v36  ;;  %v10164_v33 = vmul.f32 0.5, %v17205_v18  ;;  %v10202_v22 = vadd.f32 1.5, %v10162_v21  ;;  %v17698_v21 = vmul.f32 %v13506_v59, %v10196_v10  ;;  %v13515_v10 = vld [vmem:[%s13802_s0 + $0xa8] sm:$0xff] }
 0xa19   : > { %v10207_v15 = vadd.f32 1.5, %v10167_v51  ;;  %v17702_v36 = vmul.f32 %v13507_v5, %v10197_v45  ;;  %v13511_v51 = vld [vmem:[%s13802_s0 + $0x88] sm:$0xff]  ;;  %v17729_v1 = vmul.f32 %v13515_v10, %v10205_v37  ;;  %v13516_v45 = vld [vmem:[%s13802_s0 + $0xd0] sm:$0xff]  ;;  %v10178_v37 = vmul.f32 0.5, %v17434_v32 }
 0xa1a   : > { %v10200_v6 = vadd.f32 1.5, %v10160_v35  ;;  %v10204_v20 = vadd.f32 1.5, %v10164_v33  ;;  %v13508_v35 = vld [vmem:[%s13802_s0 + $0x90] sm:$0xff]  ;;  %v17714_v16 = vmul.f32 %v13511_v51, %v10201_v56  ;;  %v17717_v33 = vmul.f32 %v13512_v8, %v10206_v63 }
 0xa1b   : > { %v17705_v39 = vmul.f32 %v13508_v35, %v10202_v22  ;;  %v17723_v50 = vmul.f32 %v13513_v41, %v10207_v15  ;;  %v17732_v22 = vmul.f32 %v13516_v45, %v10210_v62  ;;  %v10174_v56 = vmul.f32 0.5, %v17352_v40  ;;  %v13520_v45 = vld [vmem:[%s13802_s0 + $0xf0] sm:$0xff] }
 0xa1c   : > { %v17711_v38 = vmul.f32 %v13510_v57, %v10200_v6  ;;  %v17726_v42 = vmul.f32 %v13514_v28, %v10204_v20  ;;  %v10169_v6 = vmul.f32 0.5, %v17345_v12  ;;  %v10175_v63 = vmul.f32 0.5, %v17357_v29  ;;  %v13519_v28 = vld [vmem:[%s13802_s0 + $0xc8] sm:$0xff] }
 0xa1d   : > { %v10172_v15 = vmul.f32 0.5, %v17368_v19  ;;  %v10173_v20 = vmul.f32 0.5, %v17373_v13  ;;  %v10179_v62 = vmul.f32 0.5, %v17440_v44  ;;  %v10180_v12 = vmul.f32 0.5, %v17466_v27  ;;  %v13517_v13 = vld [vmem:[%s13802_s0 + $0xd8] sm:$0xff] }
 0xa1e   : > { %v10181_v40 = vmul.f32 0.5, %v17472_v7  ;;  %v10182_v29 = vmul.f32 0.5, %v17480_v23  ;;  %v10183_v19 = vmul.f32 0.5, %v17488_v60  ;;  %v17753_v32 = vmul.f32 %v13517_v13, %v10211_v46 }
 0xa1f   : > { %v10215_v26 = vadd.f32 1.5, %v10175_v63  ;;  %v10212_v59 = vadd.f32 1.5, %v10172_v15  ;;  %v10213_v27 = vadd.f32 1.5, %v10173_v20  ;;  %v10218_v7 = vadd.f32 1.5, %v10178_v37  ;;  %v13522_v63 = vld [vmem:[%s13802_s0 + $0xe0] sm:$0xff]  ;;  %v13523_v20 = vld [vmem:[%s13802_s0 + $0xe8] sm:$0xff] }
 0xa20   : > { %v10219_v53 = vadd.f32 1.5, %v10179_v62  ;;  %v10267_v5 = vsub.s32 0, %v17744_v17  ;;  %v10220_v43 = vadd.f32 1.5, %v10180_v12  ;;  %v10221_v57 = vadd.f32 1.5, %v10181_v40  ;;  %v13524_v62 = vld [vmem:[%s13802_s0 + $0x110] sm:$0xff] }
 0xa21   : > { %v13481_v18 = vpop.eup %13480  ;;  %v10222_v51 = vadd.f32 1.5, %v10182_v29  ;;  %v10223_v8 = vadd.f32 1.5, %v10183_v19  ;;  %v17777_v15 = vmul.f32 %v13522_v63, %v10212_v59  ;;  %v17780_v37 = vmul.f32 %v13523_v20, %v10213_v27 }
 0xa22   : > { %v10141_v34 = vadd.f32 1.0, %v13481_v18  ;;  %v10168_v18 = vmul.f32 0.5, %v17340_v55  ;;  %v10177_v55 = vmul.f32 0.5, %v17456_v2  ;;  %v10214_v2 = vadd.f32 1.5, %v10174_v56 }
 0xa24   : > { %13482 = vrcp.f32 %v10141_v34  ;;  %v10176_v34 = vmul.f32 0.5, %v17448_v47  ;;  %v10208_v44 = vadd.f32 1.5, %v10168_v18  ;;  %v10209_v47 = vadd.f32 1.5, %v10169_v6  ;;  %v13521_v6 = vld [vmem:[%s13802_s0 + $0xf8] sm:$0xff] }
 0xa25   : > { %v10217_v60 = vadd.f32 1.5, %v10177_v55  ;;  %v17771_v46 = vmul.f32 %v13520_v45, %v10214_v2  ;;  %v17774_v56 = vmul.f32 %v13521_v6, %v10215_v26 }
 0xa26   : > { %v10216_v23 = vadd.f32 1.5, %v10176_v34  ;;  %v17765_v41 = vmul.f32 %v13518_v30, %v10208_v44  ;;  %v17768_v10 = vmul.f32 %v13519_v28, %v10209_v47  ;;  %v17783_v34 = vmul.f32 %v13524_v62, %v10218_v7 }
 0xa2e   : > { %v13483_v35 = vpop.eup %13482 }
 0xa2f   : > { %v10264_v18 = vadd.f32 1.0, %v13483_v35  ;;  %10390 = vst [vmem:[%s612_s20] sm:$0x1] %v13483_v35  ;;  %s13631_s20 = smov [#allocation4]  }
 0xa30   : > { %s13536_s27 = sshll.u32 %s13631_s20, 4  ;;  %s13537_s27 = int_to_ptr.vmem [resolvable:$false] %s13536_s27 }
 0xa31   : > { %s13538_s21 = scalar_lea.vmem %s13537_s27, 32  ;;  %p13539_p0 = scmp.lt.s32.totalorder %s17761_s2, %s13537_s27 }
 0xa32   : > { %p13540_p1 = scmp.lt.s32.totalorder %s13538_s21, %s13532_s23 }
 0xa34   : > { %p13541_p2 = por %p13540_p1, %p13539_p0 }
 0xa36   : > { %p13542_p3 = pnand %p13541_p2, %p13535_p13 }
 0xa38   : > { %13545 = shalt.err (!%p13542_p3)
}
 0xa39   : > { %s13546_s3 = scalar_lea.hbm %s17759_s19, 16  ;;  %s13550_s20 = scalar_lea.hbm %s18239_s24, 32 }
 0xa3a   : > { %p13547_p4 = scmp.ne.s32.totalorder %s17759_s19, %s13546_s3  ;;  %p13551_p9 = scmp.lt.u32.totalorder %s17759_s19, %s18239_s24 }
 0xa3b   : > { %p13552_p10 = scmp.lt.u32.totalorder %s13550_s20, %s13546_s3  ;;  %p13554_p12 = scmp.lt.u32.totalorder %s13546_s3, %s17759_s19 }
 0xa3c   : > { %p13548_p7 = pnand %p13547_p4, %p13773_p5 }
 0xa3d   : > { %p13553_p11 = por %p13552_p10, %p13551_p9 }
 0xa3e   : > { %p13549_p8 = pneg %p13548_p7 }
 0xa3f   : > { %p13555_p13 = por %p13554_p12, %p13553_p11 }
 0xa41   : > { %p13556_p0 = pnand %p13555_p13, %p13549_p8 }
 0xa43   : > { %13559 = shalt.err (!%p13556_p0)
}
 0xa44   : > { %12758 = dma.vmem_to_hbm [thread:$0]  (%p13773_p5), %s17761_s2, 16, %s17759_s19, %s10402_s26   ;;  %v13525_v55 = vld [vmem:[%s13802_s0 + $0x118] sm:$0xff]  ;;  %v13526_v12 = vld [vmem:[%s13802_s0 + $0x100] sm:$0xff]  ;;  %v13527_v29 = vld [vmem:[%s13802_s0 + $0x108] sm:$0xff]  ;;  %v17816_v13 = vrot.slane %v10264_v18, %v10267_v5 }
 0xa45   : > { %v17808_v17 = vmul.f32 %v13525_v55, %v10219_v53  ;;  %v17811_v40 = vmul.f32 %v13526_v12, %v10216_v23  ;;  %v17814_v19 = vmul.f32 %v13527_v29, %v10217_v60  ;;  %v13528_v44 = vld [vmem:[%s13802_s0 + $0x120] sm:$0xff]  ;;  %v13529_v2 = vld [vmem:[%s13802_s0 + $0x128] sm:$0xff]  ;;  %v13530_v59 = vld [vmem:[%s13802_s0 + $0x130] sm:$0xff]  ;;  %s18241_s4 = smul.u32 320, %s17720_s22  ;;  %s18242_s3 = sld [smem:[#allocation59_spill]] }
 0xa46   : > { %v17819_v47 = vmul.f32 %v13528_v44, %v10220_v43  ;;  %v17822_v26 = vmul.f32 %v13529_v2, %v10221_v57  ;;  %v17825_v27 = vmul.f32 %v13530_v59, %v10222_v51  ;;  %v13531_v7 = vld [vmem:[%s13802_s0 + $0x138] sm:$0xff]  ;;  %v10269_v23 = vmul.f32 %v17816_v13, %v17645_v9  ;;  %s12756_s6 = smul.u32 5120, %s13756_s1  ;;  %s10392_s1 = scalar_lea.sflag [#allocation3], %s17720_s22 }
 0xa47   : > { %v17828_v53 = vmul.f32 %v13531_v7, %v10223_v8  ;;  %v10270_v60 = vmul.f32 %v17816_v13, %v17652_v49  ;;  %v10271_v5 = vmul.f32 %v17816_v13, %v17642_v11  ;;  %v10272_v35 = vmul.f32 %v17816_v13, %v17649_v54  ;;  %s17856_s5 = scalar_lea.vmem [#allocation2], %s18241_s4  ;;  %s13632_s21 = smov [#allocation2]  }
 0xa48   : > { %v10273_v43 = vmul.f32 %v17816_v13, %v17661_v24  ;;  %v10274_v57 = vmul.f32 %v17816_v13, %v17664_v52  ;;  %v10275_v51 = vmul.f32 %v17816_v13, %v17655_v3  ;;  %v10276_v9 = vmul.f32 %v17816_v13, %v17658_v31  ;;  %10309 = vst [vmem:[%s17856_s5] sm:$0xff] %v10269_v23  ;;  %s10414_s0 = sshll.u32 %s17856_s5, 4  ;;  %s13564_s20 = sshll.u32 %s13632_s21, 4  ;;  %s17955_s0 = int_to_ptr.vmem [resolvable:$true] %s10414_s0  ;;  %s13565_s20 = int_to_ptr.vmem [resolvable:$false] %s13564_s20 }
 0xa49   : > { %v10277_v49 = vmul.f32 %v17816_v13, %v17686_v61  ;;  %v10278_v11 = vmul.f32 %v17816_v13, %v17689_v48  ;;  %v10279_v54 = vmul.f32 %v17816_v13, %v17667_v0  ;;  %v10280_v24 = vmul.f32 %v17816_v13, %v17680_v25  ;;  %10310 = vst [vmem:[%s17856_s5 + $0x8] sm:$0xff] %v10270_v60  ;;  %s13560_s23 = scalar_lea.vmem %s17955_s0, 5120  ;;  %s13566_s27 = scalar_lea.vmem %s13565_s20, 10240 }
 0xa4a   : > { %10311 = vst [vmem:[%s17856_s5 + $0x10] sm:$0xff] %v10271_v5  ;;  %10312 = vst [vmem:[%s17856_s5 + $0x18] sm:$0xff] %v10272_v35  ;;  %v10281_v3 = vmul.f32 %v17816_v13, %v17698_v21  ;;  %v10282_v31 = vmul.f32 %v17816_v13, %v17702_v36  ;;  %v10283_v52 = vmul.f32 %v17816_v13, %v17692_v14  ;;  %p13561_p1 = scmp.ne.s32.totalorder %s17955_s0, %s13560_s23  ;;  %p13567_p4 = scmp.lt.s32.totalorder %s17955_s0, %s13565_s20 }
 0xa4b   : > { %v10284_v0 = vmul.f32 %v17816_v13, %v17695_v58  ;;  %10313 = vst [vmem:[%s17856_s5 + $0x20] sm:$0xff] %v10273_v43  ;;  %10314 = vst [vmem:[%s17856_s5 + $0x28] sm:$0xff] %v10274_v57  ;;  %v10285_v25 = vmul.f32 %v17816_v13, %v17711_v38  ;;  %v10286_v61 = vmul.f32 %v17816_v13, %v17714_v16  ;;  %s17941_s26 = scalar_lea.hbm %s18242_s3, %s12756_s6  ;;  %p13568_p7 = scmp.lt.s32.totalorder %s13566_s27, %s13560_s23 }
 0xa4c   : > { %10315 = vst [vmem:[%s17856_s5 + $0x30] sm:$0xff] %v10275_v51  ;;  %10316 = vst [vmem:[%s17856_s5 + $0x38] sm:$0xff] %v10276_v9  ;;  %v10287_v48 = vmul.f32 %v17816_v13, %v17705_v39  ;;  %v10288_v14 = vmul.f32 %v17816_v13, %v17708_v4  ;;  %v10289_v58 = vmul.f32 %v17816_v13, %v17726_v42  ;;  %p13562_p2 = pnand %p13561_p1, %p13773_p5 }
 0xa4d   : > { %10317 = vst [vmem:[%s17856_s5 + $0x40] sm:$0xff] %v10277_v49  ;;  %10318 = vst [vmem:[%s17856_s5 + $0x48] sm:$0xff] %v10278_v11  ;;  %v10290_v21 = vmul.f32 %v17816_v13, %v17729_v1  ;;  %v10291_v36 = vmul.f32 %v17816_v13, %v17717_v33  ;;  %v10292_v39 = vmul.f32 %v17816_v13, %v17723_v50  ;;  %p13569_p8 = por %p13568_p7, %p13567_p4 }
 0xa4e   : > { %10319 = vst [vmem:[%s17856_s5 + $0x50] sm:$0xff] %v10279_v54  ;;  %10320 = vst [vmem:[%s17856_s5 + $0x58] sm:$0xff] %v10280_v24  ;;  %v10293_v4 = vmul.f32 %v17816_v13, %v17765_v41  ;;  %v10294_v38 = vmul.f32 %v17816_v13, %v17768_v10  ;;  %v10295_v16 = vmul.f32 %v17816_v13, %v17732_v22  ;;  %p13563_p3 = pneg %p13562_p2 }
 0xa4f   : > { %10321 = vst [vmem:[%s17856_s5 + $0x60] sm:$0xff] %v10281_v3  ;;  %10322 = vst [vmem:[%s17856_s5 + $0x68] sm:$0xff] %v10282_v31  ;;  %v10296_v33 = vmul.f32 %v17816_v13, %v17753_v32  ;;  %v10297_v50 = vmul.f32 %v17816_v13, %v17777_v15  ;;  %v10298_v42 = vmul.f32 %v17816_v13, %v17780_v37 }
 0xa50   : > { %10323 = vst [vmem:[%s17856_s5 + $0x70] sm:$0xff] %v10283_v52  ;;  %10324 = vst [vmem:[%s17856_s5 + $0x78] sm:$0xff] %v10284_v0  ;;  %v10299_v1 = vmul.f32 %v17816_v13, %v17771_v46  ;;  %v10300_v22 = vmul.f32 %v17816_v13, %v17774_v56  ;;  %v10301_v32 = vmul.f32 %v17816_v13, %v17811_v40  ;;  %p13570_p9 = pnand %p13569_p8, %p13563_p3 }
 0xa51   : > { %10325 = vst [vmem:[%s17856_s5 + $0x80] sm:$0xff] %v10285_v25  ;;  %10326 = vst [vmem:[%s17856_s5 + $0x88] sm:$0xff] %v10286_v61  ;;  %v10302_v8 = vmul.f32 %v17816_v13, %v17814_v19  ;;  %v10303_v30 = vmul.f32 %v17816_v13, %v17783_v34  ;;  %v10304_v41 = vmul.f32 %v17816_v13, %v17808_v17 }
 0xa52   : > { %10327 = vst [vmem:[%s17856_s5 + $0x90] sm:$0xff] %v10287_v48  ;;  %10328 = vst [vmem:[%s17856_s5 + $0x98] sm:$0xff] %v10288_v14  ;;  %v10305_v28 = vmul.f32 %v17816_v13, %v17819_v47  ;;  %v10306_v10 = vmul.f32 %v17816_v13, %v17822_v26  ;;  %v10307_v45 = vmul.f32 %v17816_v13, %v17825_v27 }
 0xa53   : > { %10329 = vst [vmem:[%s17856_s5 + $0xa0] sm:$0xff] %v10289_v58  ;;  %10330 = vst [vmem:[%s17856_s5 + $0xa8] sm:$0xff] %v10290_v21  ;;  %v10308_v46 = vmul.f32 %v17816_v13, %v17828_v53 }
 0xa54   : > { %10331 = vst [vmem:[%s17856_s5 + $0xb0] sm:$0xff] %v10291_v36  ;;  %10332 = vst [vmem:[%s17856_s5 + $0xb8] sm:$0xff] %v10292_v39 }
 0xa55   : > { %10333 = vst [vmem:[%s17856_s5 + $0xc0] sm:$0xff] %v10293_v4  ;;  %10334 = vst [vmem:[%s17856_s5 + $0xc8] sm:$0xff] %v10294_v38 }
 0xa56   : > { %10335 = vst [vmem:[%s17856_s5 + $0xd0] sm:$0xff] %v10295_v16  ;;  %10336 = vst [vmem:[%s17856_s5 + $0xd8] sm:$0xff] %v10296_v33 }
 0xa57   : > { %10337 = vst [vmem:[%s17856_s5 + $0xe0] sm:$0xff] %v10297_v50  ;;  %10338 = vst [vmem:[%s17856_s5 + $0xe8] sm:$0xff] %v10298_v42 }
 0xa58   : > { %10339 = vst [vmem:[%s17856_s5 + $0xf0] sm:$0xff] %v10299_v1  ;;  %10340 = vst [vmem:[%s17856_s5 + $0xf8] sm:$0xff] %v10300_v22 }
 0xa59   : > { %10341 = vst [vmem:[%s17856_s5 + $0x100] sm:$0xff] %v10301_v32  ;;  %10342 = vst [vmem:[%s17856_s5 + $0x108] sm:$0xff] %v10302_v8 }
 0xa5a   : > { %10343 = vst [vmem:[%s17856_s5 + $0x110] sm:$0xff] %v10303_v30  ;;  %10344 = vst [vmem:[%s17856_s5 + $0x118] sm:$0xff] %v10304_v41 }
 0xa5b   : > { %10345 = vst [vmem:[%s17856_s5 + $0x120] sm:$0xff] %v10305_v28  ;;  %10346 = vst [vmem:[%s17856_s5 + $0x128] sm:$0xff] %v10306_v10 }
 0xa5c   : > { %10347 = vst [vmem:[%s17856_s5 + $0x130] sm:$0xff] %v10307_v45  ;;  %10348 = vst [vmem:[%s17856_s5 + $0x138] sm:$0xff] %v10308_v46 }
 0xa5d   : > { %13573 = shalt.err (!%p13570_p9)
}
 0xa5e   : > { %s13574_s4 = scalar_lea.hbm %s17941_s26, 5120  ;;  %s13578_s2 = scalar_lea.hbm %s18242_s3, 10240 }
 0xa5f   : > { %p13575_p10 = scmp.ne.s32.totalorder %s17941_s26, %s13574_s4  ;;  %p13579_p13 = scmp.lt.u32.totalorder %s17941_s26, %s18242_s3 }
 0xa60   : > { %p13580_p0 = scmp.lt.u32.totalorder %s13578_s2, %s13574_s4  ;;  %p13582_p2 = scmp.lt.u32.totalorder %s13574_s4, %s17941_s26 }
 0xa61   : > { %p13576_p11 = pnand %p13575_p10, %p13773_p5 }
 0xa62   : > { %p13581_p1 = por %p13580_p0, %p13579_p13 }
 0xa63   : > { %p13577_p12 = pneg %p13576_p11 }
 0xa64   : > { %p13583_p3 = por %p13582_p2, %p13581_p1 }
 0xa66   : > { %p13584_p4 = pnand %p13583_p3, %p13577_p12 }
 0xa68   : > { %13587 = shalt.err (!%p13584_p4)
}
 0xa69   : > { %s13633_s23 = smov 128   ;;  %s13634_s20 = smov 8  }
 0xa6a   : > { %12757 = dma.vmem_to_hbm [thread:$0]  (%p13773_p5), %s17955_s0, 5120, %s17941_s26, %s10392_s1, %s13633_s23, %s13633_s23, %s13634_s20  }
 0xa6b PF: > { %s18243_s27 = sld [smem:[#allocation10_spill]]  ;;  %s18244_s5 = sld [smem:[#allocation8_spill]] }
 0xa71   : > { %p12768_p7 = scmp.ge.s32.totalorder %s18243_s27, 2  ;;  %s10445_s2 = sand.u32 1, %s18244_s5  }
 0xa72   : > { %s10446_s4 = scalar_lea.sflag [#allocation3], %s10445_s2 }
 0xa73   : > { %p12762_p8 = pnand %p12768_p7, %p13777_p6 }
 0xa75   : > { %13605 = dma.done.wait (!%p12762_p8), %s10446_s4, 5120  }
 0xa76   : > { %13607 = vsyncadd (!%p12762_p8), %s10446_s4, 4294962176  ;;  %s10463_s19 = scalar_lea.sflag [#allocation5], %s10445_s2 }
 0xa77   : > { %13609 = dma.done.wait (!%p12762_p8), %s10463_s19, 16  }
 0xa78   : > { %13611 = vsyncadd (!%p12762_p8), %s10463_s19, 4294967280  ;;  %s18246_s21 = sld [smem:[#allocation11_spill]]  ;;  %s18247_s3 = sld [smem:[#allocation9_spill]] }
 0xa79   : > { %s18248_s20 = sld [smem:[#allocation12_spill]]  ;;  %s18249_s0 = smov %s13618_s30 }
 0xa7e   : > { %p33_p5 = scmp.ge.s32.totalorder %s18246_s21, 4   ;;  %s18250_s30 = smov %s18247_s3 }
 0xa80   :  { %35 = sbr.rel (!%p33_p5) target bundleno = 15 (0xf), region = 160 }
 0xa87   :  { %10467 = vsyncpa [#allocation3], 1 }
 0xa88   :  { %10469 = vsyncpa [#allocation3 + $0x1], 1 }
 0xa89   :  { %10470 = vsyncpa [#allocation5], 1 }
 0xa8a   :  { %10472 = vsyncpa [#allocation5 + $0x1], 1 }

</bundles_post_ra>
